<compile_context>
chip_gen: v7x
topology: tpu7x:2x2x1
jax: 0.10.0
libtpu: 0.0.40
codegen_flags: <defaults>
</compile_context>

<pallas_src>
import functools

import jax
import jax.numpy as jnp
from jax.experimental import pallas as pl
from jax.experimental.pallas import tpu as pltpu


# ----------------------------------------------------------------------------
# Trunk kernel: (M,K)@(K,C)  then  [+bias]  or  [BatchNorm(batch stats)]
# followed by LeakyReLU.  p_ref packs the per-channel vectors:
#   do_bn=False -> p = [bias]          shape (1, C)
#   do_bn=True  -> p = [gamma; beta]   shape (2, C)   (conv bias elided: it is
#                                       cancelled by the BN mean subtraction)
# ----------------------------------------------------------------------------
def _trunk_kernel(a_ref, w_ref, p_ref, o_ref, *, do_bn, slope, eps):
    # bf16 x bf16 -> f32 accumulate on the MXU.
    y = jnp.dot(a_ref[...], w_ref[...], preferred_element_type=jnp.float32)
    if do_bn:
        # PyTorch training-mode BN: batch statistics over batch*spatial rows,
        # biased variance, mean-subtracted (two-pass) formulation.
        inv_m = 1.0 / y.shape[0]
        mean = jnp.sum(y, axis=0, keepdims=True) * inv_m
        xc = y - mean
        var = jnp.sum(xc * xc, axis=0, keepdims=True) * inv_m
        y = xc * jax.lax.rsqrt(var + eps) * p_ref[0:1, :] + p_ref[1:2, :]
    else:
        y = y + p_ref[0:1, :]
    if slope is not None:
        y = jnp.where(y >= 0.0, y, slope * y)
    o_ref[...] = y.astype(o_ref.dtype)


def trunk_conv_call(patches, w, p, *, do_bn, slope,
                    out_dtype=jnp.bfloat16, eps=1e-5):
    """One fused matmul(+BN)(+LeakyReLU) call; whole arrays as one block.

    Largest call (conv0): patches 2048x48 bf16 + output 2048x8 bf16, far
    below the scoped VMEM limit on v5e/v6e/v7x, so no vmem_limit override.
    """
    M, K = patches.shape
    C = w.shape[1]
    kernel = functools.partial(_trunk_kernel, do_bn=do_bn, slope=slope, eps=eps)
    return pl.pallas_call(
        kernel,
        out_shape=jax.ShapeDtypeStruct((M, C), out_dtype),
        grid=(1,),
        in_specs=[pl.BlockSpec((M, K), lambda i: (0, 0)),
                  pl.BlockSpec((K, C), lambda i: (0, 0)),
                  pl.BlockSpec(p.shape, lambda i: (0, 0))],
        out_specs=pl.BlockSpec((M, C), lambda i: (0, 0)),
        compiler_params=pltpu.CompilerParams(
            dimension_semantics=("arbitrary",)),
    )(patches, w, p)


# ----------------------------------------------------------------------------
# Fused tail kernel: last_conv.conv (as a Linear on the flattened 4x4x64 map)
# -> merged fc heads (Linear + BN1d + LeakyReLU(0.01) -> block-diag Linear).
# p_ref rows: [b4; gamma1; beta1; b2 (zero-padded to width C)].
# ----------------------------------------------------------------------------
def _tail_kernel(feat_ref, w4_ref, w1_ref, w2_ref, p_ref, o_ref, *,
                 eps, slope_fc):
    # conv4 == Linear(1024 -> 64): flattened (h, w, c) order matches the
    # (kh, kw, in) row order of the flattened conv weight.
    h0 = jnp.dot(feat_ref[...], w4_ref[...], preferred_element_type=jnp.float32)
    h0 = h0 + p_ref[0:1, :]

    # Merged first Linears of fc_mean/fc_logvar (bias elided: cancelled by
    # BN1d) + BatchNorm1d(batch stats over the batch rows) + LeakyReLU(0.01).
    h1 = jnp.dot(h0.astype(jnp.bfloat16), w1_ref[...],
                 preferred_element_type=jnp.float32)
    inv_m = 1.0 / h1.shape[0]
    mean = jnp.sum(h1, axis=0, keepdims=True) * inv_m
    xc = h1 - mean
    var = jnp.sum(xc * xc, axis=0, keepdims=True) * inv_m
    h1 = xc * jax.lax.rsqrt(var + eps) * p_ref[1:2, :] + p_ref[2:3, :]
    h1 = jnp.where(h1 >= 0.0, h1, slope_fc * h1)

    # Merged second Linears as one block-diagonal weight (zero-padded to a
    # full-width output so no in-kernel lane slicing is needed).
    z = jnp.dot(h1.astype(jnp.bfloat16), w2_ref[...],
                preferred_element_type=jnp.float32)
    o_ref[...] = (z + p_ref[3:4, :]).astype(o_ref.dtype)


def tail_call(feat, w4, w1, w2, p, *, eps=1e-5, slope_fc=0.01):
    M = feat.shape[0]
    C = w4.shape[1]   # width of every tail tensor (w2/b2 zero-padded to C)
    kernel = functools.partial(_tail_kernel, eps=eps, slope_fc=slope_fc)
    return pl.pallas_call(
        kernel,
        out_shape=jax.ShapeDtypeStruct((M, C), jnp.float32),
        grid=(1,),
        in_specs=[pl.BlockSpec(feat.shape, lambda i: (0, 0)),
                  pl.BlockSpec(w4.shape, lambda i: (0, 0)),
                  pl.BlockSpec(w1.shape, lambda i: (0, 0)),
                  pl.BlockSpec(w2.shape, lambda i: (0, 0)),
                  pl.BlockSpec(p.shape, lambda i: (0, 0))],
        out_specs=pl.BlockSpec((M, C), lambda i: (0, 0)),
        compiler_params=pltpu.CompilerParams(
            dimension_semantics=("arbitrary",)),
    )(feat, w4, w1, w2, p)


# ----------------------------------------------------------------------------
# Glue: im2col patch extraction (pure XLA indexing/reshape, bf16 throughout)
# ----------------------------------------------------------------------------
def im2col(x, kh, kw, stride, pad):
    # x: (N, H, W, C) -> patches (N*oh*ow, kh*kw*C), feature order (i, j, c)
    if pad:
        x = jnp.pad(x, ((0, 0), (pad, pad), (pad, pad), (0, 0)))
    N, H, W, C = x.shape
    oh = (H - kh) // stride + 1
    ow = (W - kw) // stride + 1
    cols = []
    for i in range(kh):
        for j in range(kw):
            cols.append(x[:, i:i + stride * oh:stride, j:j + stride * ow:stride, :])
    patches = jnp.concatenate(cols, axis=-1)
    return patches.reshape(N * oh * ow, kh * kw * C), (N, oh, ow)


def conv_block(x, layer):
    """Conv(4x4) as im2col + fused matmul, with the NEXT block's BN/act fused
    as the epilogue (producer-side fusion)."""
    patches, (N, oh, ow) = im2col(x, 4, 4, layer["stride"], layer["pad"])
    y = trunk_conv_call(patches, layer["w"], layer["p"],
                        do_bn=layer["do_bn"], slope=layer["slope"])
    return y.reshape(N, oh, ow, -1)


# ----------------------------------------------------------------------------
# Deterministic parameter construction (shapes from Encoder.__init__)
# TODO(synk): the repo's `init_weights(init_type)` helper is external; we use
#             N(0, 0.02) conv/linear weights, zero biases, BN gamma=1 beta=0.
# ----------------------------------------------------------------------------
def conv_weight(key, in_c, out_c, kh=4, kw=4, std=0.02):
    w = jax.random.normal(key, (out_c, in_c, kh, kw), jnp.float32) * std  # torch layout
    # (out,in,kh,kw) -> (kh,kw,in,out) -> (kh*kw*in, out): matches im2col order
    w_flat = jnp.transpose(w, (2, 3, 1, 0)).reshape(kh * kw * in_c, out_c)
    return w_flat.astype(jnp.bfloat16), jnp.zeros((out_c,), jnp.float32)


def linear_weight(key, in_f, out_f, std=0.02):
    w = jax.random.normal(key, (out_f, in_f), jnp.float32) * std  # torch (out, in)
    return jnp.transpose(w).astype(jnp.bfloat16), jnp.zeros((out_f,), jnp.float32)


def make_encoder_params(key, z_dim=16, in_dim=3, dim=8, dim_mults=(1, 2, 4, 8)):
    chans = [dim * m for m in dim_mults]
    keys = jax.random.split(key, 9)
    convs = []

    # conv0 = first_conv; fused epilogue = layers[0]'s (Identity BN, LeakyReLU 0.2)
    w, b = conv_weight(keys[0], in_dim, chans[0])
    convs.append(dict(w=w, p=b.reshape(1, -1), stride=2, pad=1,
                      do_bn=False, slope=0.2))

    # conv[1..3] = layers[i].conv; epilogue = NEXT block's BN(chans[i+1]) +
    # LeakyReLU(0.2).  Conv bias is elided (cancelled by BN mean subtraction).
    for i in range(len(dim_mults) - 1):
        w, _ = conv_weight(keys[1 + i], chans[i], chans[i + 1])
        p = jnp.stack([jnp.ones((chans[i + 1],), jnp.float32),     # gamma
                       jnp.zeros((chans[i + 1],), jnp.float32)])   # beta
        convs.append(dict(w=w, p=p, stride=2, pad=1, do_bn=True, slope=0.2))

    # Tail: conv4 (last_conv.conv, 4x4/s1/p0 on a 4x4 map == Linear) + merged
    # fc heads.  fc1 biases elided (cancelled by BN1d).
    cur = chans[-1]
    half = cur // 2
    w4, b4 = conv_weight(keys[4], cur, cur)                 # (16*cur, cur)
    w1m, _ = linear_weight(keys[5], cur, half)
    w2m, b2m = linear_weight(keys[6], half, z_dim)
    w1v, _ = linear_weight(keys[7], cur, half)
    w2v, b2v = linear_weight(keys[8], half, z_dim)

    w1 = jnp.concatenate([w1m, w1v], axis=1)                # (cur, 2*half)
    zblk = jnp.zeros((half, z_dim), jnp.bfloat16)
    w2 = jnp.concatenate([jnp.concatenate([w2m, zblk], axis=1),
                          jnp.concatenate([zblk, w2v], axis=1)], axis=0)  # (cur, 2*z_dim)
    w2 = jnp.pad(w2, ((0, 0), (0, cur - 2 * z_dim)))        # zero-pad to (cur, cur)

    b2 = jnp.concatenate([b2m, b2v])                        # (2*z_dim,)
    b2_pad = jnp.zeros((cur,), jnp.float32).at[:2 * z_dim].set(b2)
    gamma1 = jnp.ones((2 * half,), jnp.float32)
    beta1 = jnp.zeros((2 * half,), jnp.float32)
    tail_p = jnp.stack([b4, gamma1, beta1, b2_pad])         # (4, cur)

    return dict(convs=convs,
                tail=dict(w4=w4, w1=w1, w2=w2, p=tail_p, z_dim=z_dim))


# ----------------------------------------------------------------------------
# Forward pass (matches Encoder.forward; 5 pallas_calls total)
# ----------------------------------------------------------------------------
def encoder_forward(params, x_nchw):
    x = jnp.transpose(x_nchw, (0, 2, 3, 1)).astype(jnp.bfloat16)  # NCHW -> NHWC

    # Trunk: 4 fused conv calls (activation of the following block fused in).
    for conv in params["convs"]:
        x = conv_block(x, conv)

    # conv4's "im2col" is a plain reshape: the 4x4 kernel covers the whole
    # 4x4 map, and (i, j, c) patch order == flattened HWC order.
    N = x.shape[0]
    feat = x.reshape(N, -1)

    t = params["tail"]
    z = tail_call(feat, t["w4"], t["w1"], t["w2"], t["p"])
    zd = t["z_dim"]
    return z[:, :zd], z[:, zd:2 * zd]


if __name__ == "__main__":
    key = jax.random.PRNGKey(0)
    k_param, k_x = jax.random.split(key)

    params = make_encoder_params(k_param, z_dim=16, in_dim=3, dim=8,
                                 dim_mults=(1, 2, 4, 8))
    # Input: PyTorch NCHW; 64x64 so the trunk reduces spatial 64->32->16->8->4->1.
    x = jax.random.normal(k_x, (2, 3, 64, 64), jnp.float32)

    fwd = jax.jit(lambda xx: encoder_forward(params, xx))
    mean, logvar = fwd(x)
    jax.block_until_ready((mean, logvar))

    assert mean.shape == (2, 16) and logvar.shape == (2, 16)
    assert bool(jnp.all(jnp.isfinite(mean))) and bool(jnp.all(jnp.isfinite(logvar)))
    print("KERNEL_OK")
</pallas_src>

<mosaic_0001>
module attributes {stable_mosaic.version = 11 : i64} {
  func.func @_trunk_kernel(%arg0: i32, %arg1: memref<2048x48xbf16, #tpu.memory_space<vmem>>, %arg2: memref<48x8xbf16, #tpu.memory_space<vmem>>, %arg3: memref<1x8xf32, #tpu.memory_space<vmem>>, %arg4: memref<2048x8xbf16, #tpu.memory_space<vmem>>) attributes {dimension_semantics = [#tpu.dimension_semantics<arbitrary>], iteration_bounds = array<i64: 1>, scalar_prefetch = 0 : i64, scratch_operands = 0 : i64, tpu.core_type = #tpu.core_type<tc>, window_params = [{pipeline_mode = #tpu.pipeline_mode<synchronous>, transform_indices = @transform_0, window_bounds = array<i64: 2048, 48>}, {pipeline_mode = #tpu.pipeline_mode<synchronous>, transform_indices = @transform_1, window_bounds = array<i64: 48, 8>}, {pipeline_mode = #tpu.pipeline_mode<synchronous>, transform_indices = @transform_2, window_bounds = array<i64: 1, 8>}, {pipeline_mode = #tpu.pipeline_mode<synchronous>, transform_indices = @transform_3, window_bounds = array<i64: 2048, 8>}]} {
    %c0 = arith.constant 0 : index
    %c0_0 = arith.constant 0 : index
    %0 = vector.load %arg1[%c0, %c0_0] : memref<2048x48xbf16, #tpu.memory_space<vmem>>, vector<2048x48xbf16>
    %c0_1 = arith.constant 0 : index
    %c0_2 = arith.constant 0 : index
    %1 = vector.load %arg2[%c0_1, %c0_2] : memref<48x8xbf16, #tpu.memory_space<vmem>>, vector<48x8xbf16>
    %cst = arith.constant dense<0.000000e+00> : vector<2048x8xf32>
    %2 = tpu.matmul %0, %1, %cst {dimension_numbers = #tpu.dot_dimension_numbers<[1], [0], [0], [1], [0, 0, 1, 1], [], []>} : vector<2048x48xbf16>, vector<48x8xbf16>, vector<2048x8xf32> -> vector<2048x8xf32>
    %c0_3 = arith.constant 0 : index
    %c0_4 = arith.constant 0 : index
    %3 = vector.load %arg3[%c0_3, %c0_4] : memref<1x8xf32, #tpu.memory_space<vmem>>, vector<1x8xf32>
    %4 = vector.broadcast %3 : vector<1x8xf32> to vector<2048x8xf32>
    %5 = arith.addf %2, %4 : vector<2048x8xf32>
    %cst_5 = arith.constant 0.000000e+00 : f32
    %6 = vector.broadcast %cst_5 : f32 to vector<2048x8xf32>
    %7 = arith.cmpf oge, %5, %6 : vector<2048x8xf32>
    %cst_6 = arith.constant 2.000000e-01 : f32
    %8 = vector.broadcast %cst_6 : f32 to vector<2048x8xf32>
    %9 = arith.mulf %8, %5 : vector<2048x8xf32>
    %10 = arith.select %7, %5, %9 : vector<2048x8xi1>, vector<2048x8xf32>
    %11 = arith.truncf %10 : vector<2048x8xf32> to vector<2048x8xbf16>
    %c0_7 = arith.constant 0 : index
    %c0_8 = arith.constant 0 : index
    %12 = vector.load %arg4[%c0_7, %c0_8] : memref<2048x8xbf16, #tpu.memory_space<vmem>>, vector<2048x8xbf16>
    tpu.vector_store %arg4[%c0_7, %c0_8], %11 {strides = array<i32>} : memref<2048x8xbf16, #tpu.memory_space<vmem>>, vector<2048x8xbf16>,
    return
  }
  func.func @transform_0(%arg0: i32) -> (i32, i32) {
    %c0_i32 = arith.constant 0 : i32
    %c0_i32_0 = arith.constant 0 : i32
    %c0_i32_1 = arith.constant 0 : i32
    return %c0_i32, %c0_i32_0 : i32, i32
  }
  func.func @transform_1(%arg0: i32) -> (i32, i32) {
    %c0_i32 = arith.constant 0 : i32
    %c0_i32_0 = arith.constant 0 : i32
    %c0_i32_1 = arith.constant 0 : i32
    return %c0_i32, %c0_i32_0 : i32, i32
  }
  func.func @transform_2(%arg0: i32) -> (i32, i32) {
    %c0_i32 = arith.constant 0 : i32
    %c0_i32_0 = arith.constant 0 : i32
    %c0_i32_1 = arith.constant 0 : i32
    return %c0_i32, %c0_i32_0 : i32, i32
  }
  func.func @transform_3(%arg0: i32) -> (i32, i32) {
    %c0_i32 = arith.constant 0 : i32
    %c0_i32_0 = arith.constant 0 : i32
    %c0_i32_1 = arith.constant 0 : i32
    return %c0_i32, %c0_i32_0 : i32, i32
  }
}

module attributes {stable_mosaic.version = 11 : i64} {
  func.func @_trunk_kernel(%arg0: i32, %arg1: memref<512x128xbf16, #tpu.memory_space<vmem>>, %arg2: memref<128x16xbf16, #tpu.memory_space<vmem>>, %arg3: memref<2x16xf32, #tpu.memory_space<vmem>>, %arg4: memref<512x16xbf16, #tpu.memory_space<vmem>>) attributes {dimension_semantics = [#tpu.dimension_semantics<arbitrary>], iteration_bounds = array<i64: 1>, scalar_prefetch = 0 : i64, scratch_operands = 0 : i64, tpu.core_type = #tpu.core_type<tc>, window_params = [{pipeline_mode = #tpu.pipeline_mode<synchronous>, transform_indices = @transform_0, window_bounds = array<i64: 512, 128>}, {pipeline_mode = #tpu.pipeline_mode<synchronous>, transform_indices = @transform_1, window_bounds = array<i64: 128, 16>}, {pipeline_mode = #tpu.pipeline_mode<synchronous>, transform_indices = @transform_2, window_bounds = array<i64: 2, 16>}, {pipeline_mode = #tpu.pipeline_mode<synchronous>, transform_indices = @transform_3, window_bounds = array<i64: 512, 16>}]} {
    %c0 = arith.constant 0 : index
    %c0_0 = arith.constant 0 : index
    %0 = vector.load %arg1[%c0, %c0_0] : memref<512x128xbf16, #tpu.memory_space<vmem>>, vector<512x128xbf16>
    %c0_1 = arith.constant 0 : index
    %c0_2 = arith.constant 0 : index
    %1 = vector.load %arg2[%c0_1, %c0_2] : memref<128x16xbf16, #tpu.memory_space<vmem>>, vector<128x16xbf16>
    %cst = arith.constant dense<0.000000e+00> : vector<512x16xf32>
    %2 = tpu.matmul %0, %1, %cst {dimension_numbers = #tpu.dot_dimension_numbers<[1], [0], [0], [1], [0, 0, 1, 1], [], []>} : vector<512x128xbf16>, vector<128x16xbf16>, vector<512x16xf32> -> vector<512x16xf32>
    %cst_3 = arith.constant dense<0.000000e+00> : vector<16xf32>
    %3 = vector.multi_reduction <add>, %2, %cst_3 [0] : vector<512x16xf32> to vector<16xf32>
    %4 = vector.shape_cast %3 : vector<16xf32> to vector<1x16xf32>
    %cst_4 = arith.constant 0.001953125 : f32
    %5 = vector.broadcast %cst_4 : f32 to vector<1x16xf32>
    %6 = arith.mulf %4, %5 : vector<1x16xf32>
    %7 = vector.broadcast %6 : vector<1x16xf32> to vector<512x16xf32>
    %8 = arith.subf %2, %7 : vector<512x16xf32>
    %9 = arith.mulf %8, %8 : vector<512x16xf32>
    %cst_5 = arith.constant dense<0.000000e+00> : vector<16xf32>
    %10 = vector.multi_reduction <add>, %9, %cst_5 [0] : vector<512x16xf32> to vector<16xf32>
    %11 = vector.shape_cast %10 : vector<16xf32> to vector<1x16xf32>
    %cst_6 = arith.constant 0.001953125 : f32
    %12 = vector.broadcast %cst_6 : f32 to vector<1x16xf32>
    %13 = arith.mulf %11, %12 : vector<1x16xf32>
    %cst_7 = arith.constant 9.99999974E-6 : f32
    %14 = vector.broadcast %cst_7 : f32 to vector<1x16xf32>
    %15 = arith.addf %13, %14 : vector<1x16xf32>
    %16 = math.rsqrt %15 : vector<1x16xf32>
    %17 = vector.broadcast %16 : vector<1x16xf32> to vector<512x16xf32>
    %18 = arith.mulf %8, %17 : vector<512x16xf32>
    %c0_8 = arith.constant 0 : index
    %c0_9 = arith.constant 0 : index
    %19 = vector.load %arg3[%c0_8, %c0_9] : memref<2x16xf32, #tpu.memory_space<vmem>>, vector<1x16xf32>
    %20 = vector.broadcast %19 : vector<1x16xf32> to vector<512x16xf32>
    %21 = arith.mulf %18, %20 : vector<512x16xf32>
    %c1 = arith.constant 1 : index
    %c0_10 = arith.constant 0 : index
    %22 = vector.load %arg3[%c1, %c0_10] : memref<2x16xf32, #tpu.memory_space<vmem>>, vector<1x16xf32>
    %23 = vector.broadcast %22 : vector<1x16xf32> to vector<512x16xf32>
    %24 = arith.addf %21, %23 : vector<512x16xf32>
    %cst_11 = arith.constant 0.000000e+00 : f32
    %25 = vector.broadcast %cst_11 : f32 to vector<512x16xf32>
    %26 = arith.cmpf oge, %24, %25 : vector<512x16xf32>
    %cst_12 = arith.constant 2.000000e-01 : f32
    %27 = vector.broadcast %cst_12 : f32 to vector<512x16xf32>
    %28 = arith.mulf %27, %24 : vector<512x16xf32>
    %29 = arith.select %26, %24, %28 : vector<512x16xi1>, vector<512x16xf32>
    %30 = arith.truncf %29 : vector<512x16xf32> to vector<512x16xbf16>
    %c0_13 = arith.constant 0 : index
    %c0_14 = arith.constant 0 : index
    %31 = vector.load %arg4[%c0_13, %c0_14] : memref<512x16xbf16, #tpu.memory_space<vmem>>, vector<512x16xbf16>
    tpu.vector_store %arg4[%c0_13, %c0_14], %30 {strides = array<i32>} : memref<512x16xbf16, #tpu.memory_space<vmem>>, vector<512x16xbf16>,
    return
  }
  func.func @transform_0(%arg0: i32) -> (i32, i32) {
    %c0_i32 = arith.constant 0 : i32
    %c0_i32_0 = arith.constant 0 : i32
    %c0_i32_1 = arith.constant 0 : i32
    return %c0_i32, %c0_i32_0 : i32, i32
  }
  func.func @transform_1(%arg0: i32) -> (i32, i32) {
    %c0_i32 = arith.constant 0 : i32
    %c0_i32_0 = arith.constant 0 : i32
    %c0_i32_1 = arith.constant 0 : i32
    return %c0_i32, %c0_i32_0 : i32, i32
  }
  func.func @transform_2(%arg0: i32) -> (i32, i32) {
    %c0_i32 = arith.constant 0 : i32
    %c0_i32_0 = arith.constant 0 : i32
    %c0_i32_1 = arith.constant 0 : i32
    return %c0_i32, %c0_i32_0 : i32, i32
  }
  func.func @transform_3(%arg0: i32) -> (i32, i32) {
    %c0_i32 = arith.constant 0 : i32
    %c0_i32_0 = arith.constant 0 : i32
    %c0_i32_1 = arith.constant 0 : i32
    return %c0_i32, %c0_i32_0 : i32, i32
  }
}

module attributes {stable_mosaic.version = 11 : i64} {
  func.func @_trunk_kernel(%arg0: i32, %arg1: memref<128x256xbf16, #tpu.memory_space<vmem>>, %arg2: memref<256x32xbf16, #tpu.memory_space<vmem>>, %arg3: memref<2x32xf32, #tpu.memory_space<vmem>>, %arg4: memref<128x32xbf16, #tpu.memory_space<vmem>>) attributes {dimension_semantics = [#tpu.dimension_semantics<arbitrary>], iteration_bounds = array<i64: 1>, scalar_prefetch = 0 : i64, scratch_operands = 0 : i64, tpu.core_type = #tpu.core_type<tc>, window_params = [{pipeline_mode = #tpu.pipeline_mode<synchronous>, transform_indices = @transform_0, window_bounds = array<i64: 128, 256>}, {pipeline_mode = #tpu.pipeline_mode<synchronous>, transform_indices = @transform_1, window_bounds = array<i64: 256, 32>}, {pipeline_mode = #tpu.pipeline_mode<synchronous>, transform_indices = @transform_2, window_bounds = array<i64: 2, 32>}, {pipeline_mode = #tpu.pipeline_mode<synchronous>, transform_indices = @transform_3, window_bounds = array<i64: 128, 32>}]} {
    %c0 = arith.constant 0 : index
    %c0_0 = arith.constant 0 : index
    %0 = vector.load %arg1[%c0, %c0_0] : memref<128x256xbf16, #tpu.memory_space<vmem>>, vector<128x256xbf16>
    %c0_1 = arith.constant 0 : index
    %c0_2 = arith.constant 0 : index
    %1 = vector.load %arg2[%c0_1, %c0_2] : memref<256x32xbf16, #tpu.memory_space<vmem>>, vector<256x32xbf16>
    %cst = arith.constant dense<0.000000e+00> : vector<128x32xf32>
    %2 = tpu.matmul %0, %1, %cst {dimension_numbers = #tpu.dot_dimension_numbers<[1], [0], [0], [1], [0, 0, 1, 1], [], []>} : vector<128x256xbf16>, vector<256x32xbf16>, vector<128x32xf32> -> vector<128x32xf32>
    %cst_3 = arith.constant dense<0.000000e+00> : vector<32xf32>
    %3 = vector.multi_reduction <add>, %2, %cst_3 [0] : vector<128x32xf32> to vector<32xf32>
    %4 = vector.shape_cast %3 : vector<32xf32> to vector<1x32xf32>
    %cst_4 = arith.constant 7.812500e-03 : f32
    %5 = vector.broadcast %cst_4 : f32 to vector<1x32xf32>
    %6 = arith.mulf %4, %5 : vector<1x32xf32>
    %7 = vector.broadcast %6 : vector<1x32xf32> to vector<128x32xf32>
    %8 = arith.subf %2, %7 : vector<128x32xf32>
    %9 = arith.mulf %8, %8 : vector<128x32xf32>
    %cst_5 = arith.constant dense<0.000000e+00> : vector<32xf32>
    %10 = vector.multi_reduction <add>, %9, %cst_5 [0] : vector<128x32xf32> to vector<32xf32>
    %11 = vector.shape_cast %10 : vector<32xf32> to vector<1x32xf32>
    %cst_6 = arith.constant 7.812500e-03 : f32
    %12 = vector.broadcast %cst_6 : f32 to vector<1x32xf32>
    %13 = arith.mulf %11, %12 : vector<1x32xf32>
    %cst_7 = arith.constant 9.99999974E-6 : f32
    %14 = vector.broadcast %cst_7 : f32 to vector<1x32xf32>
    %15 = arith.addf %13, %14 : vector<1x32xf32>
    %16 = math.rsqrt %15 : vector<1x32xf32>
    %17 = vector.broadcast %16 : vector<1x32xf32> to vector<128x32xf32>
    %18 = arith.mulf %8, %17 : vector<128x32xf32>
    %c0_8 = arith.constant 0 : index
    %c0_9 = arith.constant 0 : index
    %19 = vector.load %arg3[%c0_8, %c0_9] : memref<2x32xf32, #tpu.memory_space<vmem>>, vector<1x32xf32>
    %20 = vector.broadcast %19 : vector<1x32xf32> to vector<128x32xf32>
    %21 = arith.mulf %18, %20 : vector<128x32xf32>
    %c1 = arith.constant 1 : index
    %c0_10 = arith.constant 0 : index
    %22 = vector.load %arg3[%c1, %c0_10] : memref<2x32xf32, #tpu.memory_space<vmem>>, vector<1x32xf32>
    %23 = vector.broadcast %22 : vector<1x32xf32> to vector<128x32xf32>
    %24 = arith.addf %21, %23 : vector<128x32xf32>
    %cst_11 = arith.constant 0.000000e+00 : f32
    %25 = vector.broadcast %cst_11 : f32 to vector<128x32xf32>
    %26 = arith.cmpf oge, %24, %25 : vector<128x32xf32>
    %cst_12 = arith.constant 2.000000e-01 : f32
    %27 = vector.broadcast %cst_12 : f32 to vector<128x32xf32>
    %28 = arith.mulf %27, %24 : vector<128x32xf32>
    %29 = arith.select %26, %24, %28 : vector<128x32xi1>, vector<128x32xf32>
    %30 = arith.truncf %29 : vector<128x32xf32> to vector<128x32xbf16>
    %c0_13 = arith.constant 0 : index
    %c0_14 = arith.constant 0 : index
    %31 = vector.load %arg4[%c0_13, %c0_14] : memref<128x32xbf16, #tpu.memory_space<vmem>>, vector<128x32xbf16>
    tpu.vector_store %arg4[%c0_13, %c0_14], %30 {strides = array<i32>} : memref<128x32xbf16, #tpu.memory_space<vmem>>, vector<128x32xbf16>,
    return
  }
  func.func @transform_0(%arg0: i32) -> (i32, i32) {
    %c0_i32 = arith.constant 0 : i32
    %c0_i32_0 = arith.constant 0 : i32
    %c0_i32_1 = arith.constant 0 : i32
    return %c0_i32, %c0_i32_0 : i32, i32
  }
  func.func @transform_1(%arg0: i32) -> (i32, i32) {
    %c0_i32 = arith.constant 0 : i32
    %c0_i32_0 = arith.constant 0 : i32
    %c0_i32_1 = arith.constant 0 : i32
    return %c0_i32, %c0_i32_0 : i32, i32
  }
  func.func @transform_2(%arg0: i32) -> (i32, i32) {
    %c0_i32 = arith.constant 0 : i32
    %c0_i32_0 = arith.constant 0 : i32
    %c0_i32_1 = arith.constant 0 : i32
    return %c0_i32, %c0_i32_0 : i32, i32
  }
  func.func @transform_3(%arg0: i32) -> (i32, i32) {
    %c0_i32 = arith.constant 0 : i32
    %c0_i32_0 = arith.constant 0 : i32
    %c0_i32_1 = arith.constant 0 : i32
    return %c0_i32, %c0_i32_0 : i32, i32
  }
}

module attributes {stable_mosaic.version = 11 : i64} {
  func.func @_trunk_kernel(%arg0: i32, %arg1: memref<32x512xbf16, #tpu.memory_space<vmem>>, %arg2: memref<512x64xbf16, #tpu.memory_space<vmem>>, %arg3: memref<2x64xf32, #tpu.memory_space<vmem>>, %arg4: memref<32x64xbf16, #tpu.memory_space<vmem>>) attributes {dimension_semantics = [#tpu.dimension_semantics<arbitrary>], iteration_bounds = array<i64: 1>, scalar_prefetch = 0 : i64, scratch_operands = 0 : i64, tpu.core_type = #tpu.core_type<tc>, window_params = [{pipeline_mode = #tpu.pipeline_mode<synchronous>, transform_indices = @transform_0, window_bounds = array<i64: 32, 512>}, {pipeline_mode = #tpu.pipeline_mode<synchronous>, transform_indices = @transform_1, window_bounds = array<i64: 512, 64>}, {pipeline_mode = #tpu.pipeline_mode<synchronous>, transform_indices = @transform_2, window_bounds = array<i64: 2, 64>}, {pipeline_mode = #tpu.pipeline_mode<synchronous>, transform_indices = @transform_3, window_bounds = array<i64: 32, 64>}]} {
    %c0 = arith.constant 0 : index
    %c0_0 = arith.constant 0 : index
    %0 = vector.load %arg1[%c0, %c0_0] : memref<32x512xbf16, #tpu.memory_space<vmem>>, vector<32x512xbf16>
    %c0_1 = arith.constant 0 : index
    %c0_2 = arith.constant 0 : index
    %1 = vector.load %arg2[%c0_1, %c0_2] : memref<512x64xbf16, #tpu.memory_space<vmem>>, vector<512x64xbf16>
    %cst = arith.constant dense<0.000000e+00> : vector<32x64xf32>
    %2 = tpu.matmul %0, %1, %cst {dimension_numbers = #tpu.dot_dimension_numbers<[1], [0], [0], [1], [0, 0, 1, 1], [], []>} : vector<32x512xbf16>, vector<512x64xbf16>, vector<32x64xf32> -> vector<32x64xf32>
    %cst_3 = arith.constant dense<0.000000e+00> : vector<64xf32>
    %3 = vector.multi_reduction <add>, %2, %cst_3 [0] : vector<32x64xf32> to vector<64xf32>
    %4 = vector.shape_cast %3 : vector<64xf32> to vector<1x64xf32>
    %cst_4 = arith.constant 3.125000e-02 : f32
    %5 = vector.broadcast %cst_4 : f32 to vector<1x64xf32>
    %6 = arith.mulf %4, %5 : vector<1x64xf32>
    %7 = vector.broadcast %6 : vector<1x64xf32> to vector<32x64xf32>
    %8 = arith.subf %2, %7 : vector<32x64xf32>
    %9 = arith.mulf %8, %8 : vector<32x64xf32>
    %cst_5 = arith.constant dense<0.000000e+00> : vector<64xf32>
    %10 = vector.multi_reduction <add>, %9, %cst_5 [0] : vector<32x64xf32> to vector<64xf32>
    %11 = vector.shape_cast %10 : vector<64xf32> to vector<1x64xf32>
    %cst_6 = arith.constant 3.125000e-02 : f32
    %12 = vector.broadcast %cst_6 : f32 to vector<1x64xf32>
    %13 = arith.mulf %11, %12 : vector<1x64xf32>
    %cst_7 = arith.constant 9.99999974E-6 : f32
    %14 = vector.broadcast %cst_7 : f32 to vector<1x64xf32>
    %15 = arith.addf %13, %14 : vector<1x64xf32>
    %16 = math.rsqrt %15 : vector<1x64xf32>
    %17 = vector.broadcast %16 : vector<1x64xf32> to vector<32x64xf32>
    %18 = arith.mulf %8, %17 : vector<32x64xf32>
    %c0_8 = arith.constant 0 : index
    %c0_9 = arith.constant 0 : index
    %19 = vector.load %arg3[%c0_8, %c0_9] : memref<2x64xf32, #tpu.memory_space<vmem>>, vector<1x64xf32>
    %20 = vector.broadcast %19 : vector<1x64xf32> to vector<32x64xf32>
    %21 = arith.mulf %18, %20 : vector<32x64xf32>
    %c1 = arith.constant 1 : index
    %c0_10 = arith.constant 0 : index
    %22 = vector.load %arg3[%c1, %c0_10] : memref<2x64xf32, #tpu.memory_space<vmem>>, vector<1x64xf32>
    %23 = vector.broadcast %22 : vector<1x64xf32> to vector<32x64xf32>
    %24 = arith.addf %21, %23 : vector<32x64xf32>
    %cst_11 = arith.constant 0.000000e+00 : f32
    %25 = vector.broadcast %cst_11 : f32 to vector<32x64xf32>
    %26 = arith.cmpf oge, %24, %25 : vector<32x64xf32>
    %cst_12 = arith.constant 2.000000e-01 : f32
    %27 = vector.broadcast %cst_12 : f32 to vector<32x64xf32>
    %28 = arith.mulf %27, %24 : vector<32x64xf32>
    %29 = arith.select %26, %24, %28 : vector<32x64xi1>, vector<32x64xf32>
    %30 = arith.truncf %29 : vector<32x64xf32> to vector<32x64xbf16>
    %c0_13 = arith.constant 0 : index
    %c0_14 = arith.constant 0 : index
    %31 = vector.load %arg4[%c0_13, %c0_14] : memref<32x64xbf16, #tpu.memory_space<vmem>>, vector<32x64xbf16>
    tpu.vector_store %arg4[%c0_13, %c0_14], %30 {strides = array<i32>} : memref<32x64xbf16, #tpu.memory_space<vmem>>, vector<32x64xbf16>,
    return
  }
  func.func @transform_0(%arg0: i32) -> (i32, i32) {
    %c0_i32 = arith.constant 0 : i32
    %c0_i32_0 = arith.constant 0 : i32
    %c0_i32_1 = arith.constant 0 : i32
    return %c0_i32, %c0_i32_0 : i32, i32
  }
  func.func @transform_1(%arg0: i32) -> (i32, i32) {
    %c0_i32 = arith.constant 0 : i32
    %c0_i32_0 = arith.constant 0 : i32
    %c0_i32_1 = arith.constant 0 : i32
    return %c0_i32, %c0_i32_0 : i32, i32
  }
  func.func @transform_2(%arg0: i32) -> (i32, i32) {
    %c0_i32 = arith.constant 0 : i32
    %c0_i32_0 = arith.constant 0 : i32
    %c0_i32_1 = arith.constant 0 : i32
    return %c0_i32, %c0_i32_0 : i32, i32
  }
  func.func @transform_3(%arg0: i32) -> (i32, i32) {
    %c0_i32 = arith.constant 0 : i32
    %c0_i32_0 = arith.constant 0 : i32
    %c0_i32_1 = arith.constant 0 : i32
    return %c0_i32, %c0_i32_0 : i32, i32
  }
}

module attributes {stable_mosaic.version = 11 : i64} {
  func.func @_tail_kernel(%arg0: i32, %arg1: memref<2x1024xbf16, #tpu.memory_space<vmem>>, %arg2: memref<1024x64xbf16, #tpu.memory_space<vmem>>, %arg3: memref<64x64xbf16, #tpu.memory_space<vmem>>, %arg4: memref<64x64xbf16, #tpu.memory_space<vmem>>, %arg5: memref<4x64xf32, #tpu.memory_space<vmem>>, %arg6: memref<2x64xf32, #tpu.memory_space<vmem>>) attributes {dimension_semantics = [#tpu.dimension_semantics<arbitrary>], iteration_bounds = array<i64: 1>, scalar_prefetch = 0 : i64, scratch_operands = 0 : i64, tpu.core_type = #tpu.core_type<tc>, window_params = [{pipeline_mode = #tpu.pipeline_mode<synchronous>, transform_indices = @transform_0, window_bounds = array<i64: 2, 1024>}, {pipeline_mode = #tpu.pipeline_mode<synchronous>, transform_indices = @transform_1, window_bounds = array<i64: 1024, 64>}, {pipeline_mode = #tpu.pipeline_mode<synchronous>, transform_indices = @transform_2, window_bounds = array<i64: 64, 64>}, {pipeline_mode = #tpu.pipeline_mode<synchronous>, transform_indices = @transform_3, window_bounds = array<i64: 64, 64>}, {pipeline_mode = #tpu.pipeline_mode<synchronous>, transform_indices = @transform_4, window_bounds = array<i64: 4, 64>}, {pipeline_mode = #tpu.pipeline_mode<synchronous>, transform_indices = @transform_5, window_bounds = array<i64: 2, 64>}]} {
    %c0 = arith.constant 0 : index
    %c0_0 = arith.constant 0 : index
    %0 = vector.load %arg1[%c0, %c0_0] : memref<2x1024xbf16, #tpu.memory_space<vmem>>, vector<2x1024xbf16>
    %c0_1 = arith.constant 0 : index
    %c0_2 = arith.constant 0 : index
    %1 = vector.load %arg2[%c0_1, %c0_2] : memref<1024x64xbf16, #tpu.memory_space<vmem>>, vector<1024x64xbf16>
    %cst = arith.constant dense<0.000000e+00> : vector<2x64xf32>
    %2 = tpu.matmul %0, %1, %cst {dimension_numbers = #tpu.dot_dimension_numbers<[1], [0], [0], [1], [0, 0, 1, 1], [], []>} : vector<2x1024xbf16>, vector<1024x64xbf16>, vector<2x64xf32> -> vector<2x64xf32>
    %c0_3 = arith.constant 0 : index
    %c0_4 = arith.constant 0 : index
    %3 = vector.load %arg5[%c0_3, %c0_4] : memref<4x64xf32, #tpu.memory_space<vmem>>, vector<1x64xf32>
    %4 = vector.broadcast %3 : vector<1x64xf32> to vector<2x64xf32>
    %5 = arith.addf %2, %4 : vector<2x64xf32>
    %6 = arith.truncf %5 : vector<2x64xf32> to vector<2x64xbf16>
    %c0_5 = arith.constant 0 : index
    %c0_6 = arith.constant 0 : index
    %7 = vector.load %arg3[%c0_5, %c0_6] : memref<64x64xbf16, #tpu.memory_space<vmem>>, vector<64x64xbf16>
    %cst_7 = arith.constant dense<0.000000e+00> : vector<2x64xf32>
    %8 = tpu.matmul %6, %7, %cst_7 {dimension_numbers = #tpu.dot_dimension_numbers<[1], [0], [0], [1], [0, 0, 1, 1], [], []>} : vector<2x64xbf16>, vector<64x64xbf16>, vector<2x64xf32> -> vector<2x64xf32>
    %cst_8 = arith.constant dense<0.000000e+00> : vector<64xf32>
    %9 = vector.multi_reduction <add>, %8, %cst_8 [0] : vector<2x64xf32> to vector<64xf32>
    %10 = vector.shape_cast %9 : vector<64xf32> to vector<1x64xf32>
    %cst_9 = arith.constant 5.000000e-01 : f32
    %11 = vector.broadcast %cst_9 : f32 to vector<1x64xf32>
    %12 = arith.mulf %10, %11 : vector<1x64xf32>
    %13 = vector.broadcast %12 : vector<1x64xf32> to vector<2x64xf32>
    %14 = arith.subf %8, %13 : vector<2x64xf32>
    %15 = arith.mulf %14, %14 : vector<2x64xf32>
    %cst_10 = arith.constant dense<0.000000e+00> : vector<64xf32>
    %16 = vector.multi_reduction <add>, %15, %cst_10 [0] : vector<2x64xf32> to vector<64xf32>
    %17 = vector.shape_cast %16 : vector<64xf32> to vector<1x64xf32>
    %cst_11 = arith.constant 5.000000e-01 : f32
    %18 = vector.broadcast %cst_11 : f32 to vector<1x64xf32>
    %19 = arith.mulf %17, %18 : vector<1x64xf32>
    %cst_12 = arith.constant 9.99999974E-6 : f32
    %20 = vector.broadcast %cst_12 : f32 to vector<1x64xf32>
    %21 = arith.addf %19, %20 : vector<1x64xf32>
    %22 = math.rsqrt %21 : vector<1x64xf32>
    %23 = vector.broadcast %22 : vector<1x64xf32> to vector<2x64xf32>
    %24 = arith.mulf %14, %23 : vector<2x64xf32>
    %c1 = arith.constant 1 : index
    %c0_13 = arith.constant 0 : index
    %25 = vector.load %arg5[%c1, %c0_13] : memref<4x64xf32, #tpu.memory_space<vmem>>, vector<1x64xf32>
    %26 = vector.broadcast %25 : vector<1x64xf32> to vector<2x64xf32>
    %27 = arith.mulf %24, %26 : vector<2x64xf32>
    %c2 = arith.constant 2 : index
    %c0_14 = arith.constant 0 : index
    %28 = vector.load %arg5[%c2, %c0_14] : memref<4x64xf32, #tpu.memory_space<vmem>>, vector<1x64xf32>
    %29 = vector.broadcast %28 : vector<1x64xf32> to vector<2x64xf32>
    %30 = arith.addf %27, %29 : vector<2x64xf32>
    %cst_15 = arith.constant 0.000000e+00 : f32
    %31 = vector.broadcast %cst_15 : f32 to vector<2x64xf32>
    %32 = arith.cmpf oge, %30, %31 : vector<2x64xf32>
    %cst_16 = arith.constant 0.00999999977 : f32
    %33 = vector.broadcast %cst_16 : f32 to vector<2x64xf32>
    %34 = arith.mulf %33, %30 : vector<2x64xf32>
    %35 = arith.select %32, %30, %34 : vector<2x64xi1>, vector<2x64xf32>
    %36 = arith.truncf %35 : vector<2x64xf32> to vector<2x64xbf16>
    %c0_17 = arith.constant 0 : index
    %c0_18 = arith.constant 0 : index
    %37 = vector.load %arg4[%c0_17, %c0_18] : memref<64x64xbf16, #tpu.memory_space<vmem>>, vector<64x64xbf16>
    %cst_19 = arith.constant dense<0.000000e+00> : vector<2x64xf32>
    %38 = tpu.matmul %36, %37, %cst_19 {dimension_numbers = #tpu.dot_dimension_numbers<[1], [0], [0], [1], [0, 0, 1, 1], [], []>} : vector<2x64xbf16>, vector<64x64xbf16>, vector<2x64xf32> -> vector<2x64xf32>
    %c3 = arith.constant 3 : index
    %c0_20 = arith.constant 0 : index
    %39 = vector.load %arg5[%c3, %c0_20] : memref<4x64xf32, #tpu.memory_space<vmem>>, vector<1x64xf32>
    %40 = vector.broadcast %39 : vector<1x64xf32> to vector<2x64xf32>
    %41 = arith.addf %38, %40 : vector<2x64xf32>
    %c0_21 = arith.constant 0 : index
    %c0_22 = arith.constant 0 : index
    %42 = vector.load %arg6[%c0_21, %c0_22] : memref<2x64xf32, #tpu.memory_space<vmem>>, vector<2x64xf32>
    tpu.vector_store %arg6[%c0_21, %c0_22], %41 {strides = array<i32>} : memref<2x64xf32, #tpu.memory_space<vmem>>, vector<2x64xf32>,
    return
  }
  func.func @transform_0(%arg0: i32) -> (i32, i32) {
    %c0_i32 = arith.constant 0 : i32
    %c0_i32_0 = arith.constant 0 : i32
    %c0_i32_1 = arith.constant 0 : i32
    return %c0_i32, %c0_i32_0 : i32, i32
  }
  func.func @transform_1(%arg0: i32) -> (i32, i32) {
    %c0_i32 = arith.constant 0 : i32
    %c0_i32_0 = arith.constant 0 : i32
    %c0_i32_1 = arith.constant 0 : i32
    return %c0_i32, %c0_i32_0 : i32, i32
  }
  func.func @transform_2(%arg0: i32) -> (i32, i32) {
    %c0_i32 = arith.constant 0 : i32
    %c0_i32_0 = arith.constant 0 : i32
    %c0_i32_1 = arith.constant 0 : i32
    return %c0_i32, %c0_i32_0 : i32, i32
  }
  func.func @transform_3(%arg0: i32) -> (i32, i32) {
    %c0_i32 = arith.constant 0 : i32
    %c0_i32_0 = arith.constant 0 : i32
    %c0_i32_1 = arith.constant 0 : i32
    return %c0_i32, %c0_i32_0 : i32, i32
  }
  func.func @transform_4(%arg0: i32) -> (i32, i32) {
    %c0_i32 = arith.constant 0 : i32
    %c0_i32_0 = arith.constant 0 : i32
    %c0_i32_1 = arith.constant 0 : i32
    return %c0_i32, %c0_i32_0 : i32, i32
  }
  func.func @transform_5(%arg0: i32) -> (i32, i32) {
    %c0_i32 = arith.constant 0 : i32
    %c0_i32_0 = arith.constant 0 : i32
    %c0_i32_1 = arith.constant 0 : i32
    return %c0_i32, %c0_i32_0 : i32, i32
  }
}

</mosaic_0001>

<bundles_post_ra>
// kernel: _lambda_.5
= control target key start
LH: loop header
LB: loop body
LE: loop exit
PB: predicated region body
PF: predicated region fallthrough
CT: control target
= control target key end

     0   :  { %vm942_vm0 = vcmask 392192   ;;  %vm4176_vm1 = vcmask 60416   ;;  %s8258_s1 = inlined_call_operand.vmem [shape: bf16[48,8], index: 1, kind: input, shape index: {}]   ;;  %s8259_s0 = inlined_call_operand.vmem [shape: bf16[2048,48], index: 0, kind: input, shape index: {}]   ;;  %s8260_s2 = inlined_call_operand.vmem [shape: f32[1,8], index: 2, kind: input, shape index: {}]   ;;  %s8261_s3 = inlined_call_operand.vmem [shape: bf16[2048,8], index: 3, kind: output, shape index: {}]  }
   0x1   :  { %v5608_v0 = vld [vmem:[%s8258_s1] sm:$0xff]   ;;  %v5609_v1 = vld [vmem:[%s8258_s1 + $0x8] sm:$0xff]   ;;  %v5610_v2 = vld [vmem:[%s8258_s1 + $0x10] sm:$0xff]  }
   0x2   :  { %5340 = vmatprep.subr.bf16.mxu0 %v5608_v0  ;;  %5602 = vmatprep.subr.bf16.mxu1 %v5608_v0  ;;  %v5611_v3 = vld [vmem:[%s8259_s0] sm:$0xff]   ;;  %v5613_v5 = vld [vmem:[%s8259_s0 + $0x8] sm:$0xff]   ;;  %v5615_v7 = vld [vmem:[%s8259_s0 + $0x10] sm:$0xff]  }
   0x3   :  { %5341 = vmatpush3.bf16.msra.mxu0 %v5608_v0  ;;  %5605 = vmatpush3.bf16.msra.mxu1 %v5608_v0  ;;  %v5612_v4 = vld [vmem:[%s8259_s0 + $0x200] sm:$0xff]   ;;  %v5614_v6 = vld [vmem:[%s8259_s0 + $0x208] sm:$0xff]   ;;  %v5616_v8 = vld [vmem:[%s8259_s0 + $0x210] sm:$0xff]  }
   0x4   :  { %5342 = vmatprep.subr.bf16.mxu0 %v5609_v1  ;;  %5603 = vmatprep.subr.bf16.mxu1 %v5609_v1  ;;  %v5617_v9 = vld [vmem:[%s8259_s0 + $0x18] sm:$0xff]   ;;  %v5619_v11 = vld [vmem:[%s8259_s0 + $0x20] sm:$0xff]   ;;  %v5621_v13 = vld [vmem:[%s8259_s0 + $0x28] sm:$0xff]  }
   0x5   :  { %5346 = vmatprep.mubr.msk.bf16.mxu0 %vm942_vm0, %v5611_v3  ;;  %5474 = vmatprep.mubr.msk.bf16.mxu1 %vm942_vm0, %v5612_v4  ;;  %v5618_v10 = vld [vmem:[%s8259_s0 + $0x218] sm:$0xff]   ;;  %v5620_v12 = vld [vmem:[%s8259_s0 + $0x220] sm:$0xff]   ;;  %v5622_v14 = vld [vmem:[%s8259_s0 + $0x228] sm:$0xff]  }
   0x6   :  { %v5623_v15 = vld [vmem:[%s8259_s0 + $0x30] sm:$0xff]   ;;  %v5625_v17 = vld [vmem:[%s8259_s0 + $0x38] sm:$0xff]   ;;  %v5627_v19 = vld [vmem:[%s8259_s0 + $0x40] sm:$0xff]  }
   0x7   :  { %5343 = vmatpush3.bf16.msra.mxu0 %v5609_v1  ;;  %5606 = vmatpush3.bf16.msra.mxu1 %v5609_v1  ;;  %v5624_v16 = vld [vmem:[%s8259_s0 + $0x230] sm:$0xff]   ;;  %v5626_v18 = vld [vmem:[%s8259_s0 + $0x238] sm:$0xff]   ;;  %v5628_v20 = vld [vmem:[%s8259_s0 + $0x240] sm:$0xff]  }
   0x8   :  { %5344 = vmatprep.subr.bf16.mxu0 %v5610_v2  ;;  %5604 = vmatprep.subr.bf16.mxu1 %v5610_v2  ;;  %v5629_v21 = vld [vmem:[%s8259_s0 + $0x48] sm:$0xff]   ;;  %v5631_v23 = vld [vmem:[%s8259_s0 + $0x50] sm:$0xff]   ;;  %v5633_v25 = vld [vmem:[%s8259_s0 + $0x58] sm:$0xff]  }
   0x9   :  { %v5630_v22 = vld [vmem:[%s8259_s0 + $0x248] sm:$0xff]   ;;  %v5632_v24 = vld [vmem:[%s8259_s0 + $0x250] sm:$0xff]   ;;  %v5634_v26 = vld [vmem:[%s8259_s0 + $0x258] sm:$0xff]  }
   0xa   :  { %v5635_v27 = vld [vmem:[%s8259_s0 + $0x60] sm:$0xff]   ;;  %v5637_v29 = vld [vmem:[%s8259_s0 + $0x68] sm:$0xff]   ;;  %v5639_v31 = vld [vmem:[%s8259_s0 + $0x70] sm:$0xff]  }
   0xb   :  { %5345 = vmatpush3.bf16.msra.mxu0 %v5610_v2  ;;  %5607 = vmatpush3.bf16.msra.mxu1 %v5610_v2  ;;  %v5636_v28 = vld [vmem:[%s8259_s0 + $0x260] sm:$0xff]   ;;  %v5638_v30 = vld [vmem:[%s8259_s0 + $0x268] sm:$0xff]   ;;  %v5640_v32 = vld [vmem:[%s8259_s0 + $0x270] sm:$0xff]  }
   0xc   :  { %v5641_v33 = vld [vmem:[%s8259_s0 + $0x78] sm:$0xff]   ;;  %v5643_v35 = vld [vmem:[%s8259_s0 + $0x80] sm:$0xff]   ;;  %v5645_v37 = vld [vmem:[%s8259_s0 + $0x88] sm:$0xff]  }
   0xd   :  { %v5642_v34 = vld [vmem:[%s8259_s0 + $0x278] sm:$0xff]   ;;  %v5644_v36 = vld [vmem:[%s8259_s0 + $0x280] sm:$0xff]   ;;  %v5646_v38 = vld [vmem:[%s8259_s0 + $0x288] sm:$0xff]  }
   0xe   :  { %5347 = vmatmul.mubr.msk.bf16.vlgmr.msra.gmra.mrb[0].mxu0 %vm942_vm0, %v5613_v5  ;;  %5475 = vmatmul.mubr.msk.bf16.vlgmr.msra.gmra.mrb[0].mxu1 %vm942_vm0, %v5614_v6  ;;  %v5647_v39 = vld [vmem:[%s8259_s0 + $0x90] sm:$0xff]   ;;  %v5649_v41 = vld [vmem:[%s8259_s0 + $0x98] sm:$0xff]   ;;  %v5651_v43 = vld [vmem:[%s8259_s0 + $0xa0] sm:$0xff]  }
   0xf   :  { %5350 = vmatprep.mubr.msk.bf16.mxu0 %vm942_vm0, %v5615_v7  ;;  %5478 = vmatprep.mubr.msk.bf16.mxu1 %vm942_vm0, %v5616_v8  ;;  %v5648_v40 = vld [vmem:[%s8259_s0 + $0x290] sm:$0xff]   ;;  %v5650_v42 = vld [vmem:[%s8259_s0 + $0x298] sm:$0xff]   ;;  %v5652_v44 = vld [vmem:[%s8259_s0 + $0x2a0] sm:$0xff]  }
  0x10   :  { %v5653_v45 = vld [vmem:[%s8259_s0 + $0xa8] sm:$0xff]   ;;  %v5655_v47 = vld [vmem:[%s8259_s0 + $0xb0] sm:$0xff]   ;;  %v5657_v49 = vld [vmem:[%s8259_s0 + $0xb8] sm:$0xff]  }
  0x11   :  { %v5654_v46 = vld [vmem:[%s8259_s0 + $0x2a8] sm:$0xff]   ;;  %v5656_v48 = vld [vmem:[%s8259_s0 + $0x2b0] sm:$0xff]   ;;  %v5658_v50 = vld [vmem:[%s8259_s0 + $0x2b8] sm:$0xff]  }
  0x12   :  { %v5659_v51 = vld [vmem:[%s8259_s0 + $0xc0] sm:$0xff]   ;;  %v5661_v53 = vld [vmem:[%s8259_s0 + $0xc8] sm:$0xff]   ;;  %v5663_v55 = vld [vmem:[%s8259_s0 + $0xd0] sm:$0xff]  }
  0x13   :  { %v5660_v52 = vld [vmem:[%s8259_s0 + $0x2c0] sm:$0xff]   ;;  %v5662_v54 = vld [vmem:[%s8259_s0 + $0x2c8] sm:$0xff]   ;;  %v5664_v56 = vld [vmem:[%s8259_s0 + $0x2d0] sm:$0xff]  }
  0x14   :  { %v5665_v57 = vld [vmem:[%s8259_s0 + $0xd8] sm:$0xff]   ;;  %v5667_v59 = vld [vmem:[%s8259_s0 + $0xe0] sm:$0xff]   ;;  %v5669_v61 = vld [vmem:[%s8259_s0 + $0xe8] sm:$0xff]  }
  0x15   :  { %v5666_v58 = vld [vmem:[%s8259_s0 + $0x2d8] sm:$0xff]   ;;  %v5668_v60 = vld [vmem:[%s8259_s0 + $0x2e0] sm:$0xff]   ;;  %v5670_v62 = vld [vmem:[%s8259_s0 + $0x2e8] sm:$0xff]  }
  0x16   :  { %5351 = vmatmul.mubr.msk.bf16.gmra.mrb[4].mxu0 %vm942_vm0, %v5617_v9  ;;  %5479 = vmatmul.mubr.msk.bf16.gmra.mrb[4].mxu1 %vm942_vm0, %v5618_v10  ;;  %v5671_v63 = vld [vmem:[%s8259_s0 + $0xf0] sm:$0xff]   ;;  %v5673_v1 = vld [vmem:[%s8259_s0 + $0xf8] sm:$0xff]   ;;  %v5675_v3 = vld [vmem:[%s8259_s0 + $0x100] sm:$0xff]  }
  0x17   :  { %5354 = vmatprep.mubr.msk.bf16.mxu0 %vm942_vm0, %v5619_v11  ;;  %5482 = vmatprep.mubr.msk.bf16.mxu1 %vm942_vm0, %v5620_v12  ;;  %v5672_v0 = vld [vmem:[%s8259_s0 + $0x2f0] sm:$0xff]   ;;  %v5674_v2 = vld [vmem:[%s8259_s0 + $0x2f8] sm:$0xff]   ;;  %v5676_v4 = vld [vmem:[%s8259_s0 + $0x300] sm:$0xff]  }
  0x18   :  { %v5677_v5 = vld [vmem:[%s8259_s0 + $0x108] sm:$0xff]   ;;  %v5679_v7 = vld [vmem:[%s8259_s0 + $0x110] sm:$0xff]   ;;  %v5681_v9 = vld [vmem:[%s8259_s0 + $0x118] sm:$0xff]  }
  0x19   :  { %v5678_v6 = vld [vmem:[%s8259_s0 + $0x308] sm:$0xff]   ;;  %v5680_v8 = vld [vmem:[%s8259_s0 + $0x310] sm:$0xff]   ;;  %v5682_v10 = vld [vmem:[%s8259_s0 + $0x318] sm:$0xff]  }
  0x1a   :  { %v5683_v11 = vld [vmem:[%s8259_s0 + $0x120] sm:$0xff]  }
  0x1b   :  { %v5684_v12 = vld [vmem:[%s8259_s0 + $0x320] sm:$0xff]  }
  0x1e   :  { %5355 = vmatmul.mubr.msk.bf16.gmra.mrb[8].mxu0 %vm942_vm0, %v5621_v13  ;;  %5483 = vmatmul.mubr.msk.bf16.gmra.mrb[8].mxu1 %vm942_vm0, %v5622_v14  ;;  %v5685_v13 = vld [vmem:[%s8259_s0 + $0x128] sm:$0xff]  }
  0x1f   :  { %5358 = vmatprep.mubr.msk.bf16.mxu0 %vm942_vm0, %v5623_v15  ;;  %5486 = vmatprep.mubr.msk.bf16.mxu1 %vm942_vm0, %v5624_v16  ;;  %v5686_v14 = vld [vmem:[%s8259_s0 + $0x328] sm:$0xff]   ;;  %v5687_v15 = vld [vmem:[%s8259_s0 + $0x130] sm:$0xff]  }
  0x20   :  { %v5688_v16 = vld [vmem:[%s8259_s0 + $0x330] sm:$0xff]  }
  0x26   :  { %5359 = vmatmul.mubr.msk.bf16.gmra.mrb[12].mxu0 %vm942_vm0, %v5625_v17  ;;  %5487 = vmatmul.mubr.msk.bf16.gmra.mrb[12].mxu1 %vm942_vm0, %v5626_v18  ;;  %v5689_v17 = vld [vmem:[%s8259_s0 + $0x138] sm:$0xff]  }
  0x27   :  { %5362 = vmatprep.mubr.msk.bf16.mxu0 %vm942_vm0, %v5627_v19  ;;  %5490 = vmatprep.mubr.msk.bf16.mxu1 %vm942_vm0, %v5628_v20  ;;  %v5690_v18 = vld [vmem:[%s8259_s0 + $0x338] sm:$0xff]   ;;  %v5691_v19 = vld [vmem:[%s8259_s0 + $0x140] sm:$0xff]  }
  0x28   :  { %v5692_v20 = vld [vmem:[%s8259_s0 + $0x340] sm:$0xff]  }
  0x2e   :  { %5363 = vmatmul.mubr.msk.bf16.gmra.mrb[16].mxu0 %vm942_vm0, %v5629_v21  ;;  %5491 = vmatmul.mubr.msk.bf16.gmra.mrb[16].mxu1 %vm942_vm0, %v5630_v22  ;;  %v5693_v21 = vld [vmem:[%s8259_s0 + $0x148] sm:$0xff]  }
  0x2f   :  { %5366 = vmatprep.mubr.msk.bf16.mxu0 %vm942_vm0, %v5631_v23  ;;  %5494 = vmatprep.mubr.msk.bf16.mxu1 %vm942_vm0, %v5632_v24  ;;  %v5694_v22 = vld [vmem:[%s8259_s0 + $0x348] sm:$0xff]   ;;  %v5695_v23 = vld [vmem:[%s8259_s0 + $0x150] sm:$0xff]  }
  0x30   :  { %v5696_v24 = vld [vmem:[%s8259_s0 + $0x350] sm:$0xff]  }
  0x36   :  { %5367 = vmatmul.mubr.msk.bf16.gmra.mrb[20].mxu0 %vm942_vm0, %v5633_v25  ;;  %5495 = vmatmul.mubr.msk.bf16.gmra.mrb[20].mxu1 %vm942_vm0, %v5634_v26  ;;  %v5697_v25 = vld [vmem:[%s8259_s0 + $0x158] sm:$0xff]  }
  0x37   :  { %5370 = vmatprep.mubr.msk.bf16.mxu0 %vm942_vm0, %v5635_v27  ;;  %5498 = vmatprep.mubr.msk.bf16.mxu1 %vm942_vm0, %v5636_v28  ;;  %v5698_v26 = vld [vmem:[%s8259_s0 + $0x358] sm:$0xff]   ;;  %v5699_v27 = vld [vmem:[%s8259_s0 + $0x160] sm:$0xff]  }
  0x38   :  { %v5700_v28 = vld [vmem:[%s8259_s0 + $0x360] sm:$0xff]  }
  0x3e   :  { %5371 = vmatmul.mubr.msk.bf16.gmra.mrb[24].mxu0 %vm942_vm0, %v5637_v29  ;;  %5499 = vmatmul.mubr.msk.bf16.gmra.mrb[24].mxu1 %vm942_vm0, %v5638_v30  ;;  %v5701_v29 = vld [vmem:[%s8259_s0 + $0x168] sm:$0xff]  }
  0x3f   :  { %5374 = vmatprep.mubr.msk.bf16.mxu0 %vm942_vm0, %v5639_v31  ;;  %5502 = vmatprep.mubr.msk.bf16.mxu1 %vm942_vm0, %v5640_v32  ;;  %v5702_v30 = vld [vmem:[%s8259_s0 + $0x368] sm:$0xff]   ;;  %v5703_v31 = vld [vmem:[%s8259_s0 + $0x170] sm:$0xff]  }
  0x40   :  { %v5704_v32 = vld [vmem:[%s8259_s0 + $0x370] sm:$0xff]  }
  0x46   :  { %5375 = vmatmul.mubr.msk.bf16.gmra.mrb[28].mxu0 %vm942_vm0, %v5641_v33  ;;  %5503 = vmatmul.mubr.msk.bf16.gmra.mrb[28].mxu1 %vm942_vm0, %v5642_v34  ;;  %v5705_v33 = vld [vmem:[%s8259_s0 + $0x178] sm:$0xff]  }
  0x47   :  { %5378 = vmatprep.mubr.msk.bf16.mxu0 %vm942_vm0, %v5643_v35  ;;  %5506 = vmatprep.mubr.msk.bf16.mxu1 %vm942_vm0, %v5644_v36  ;;  %v5706_v34 = vld [vmem:[%s8259_s0 + $0x378] sm:$0xff]   ;;  %v5707_v35 = vld [vmem:[%s8259_s0 + $0x180] sm:$0xff]  }
  0x48   :  { %v5708_v36 = vld [vmem:[%s8259_s0 + $0x380] sm:$0xff]  }
  0x4e   :  { %5379 = vmatmul.mubr.msk.bf16.gmra.mrb[32].mxu0 %vm942_vm0, %v5645_v37  ;;  %5507 = vmatmul.mubr.msk.bf16.gmra.mrb[32].mxu1 %vm942_vm0, %v5646_v38  ;;  %v5709_v37 = vld [vmem:[%s8259_s0 + $0x188] sm:$0xff]  }
  0x4f   :  { %5382 = vmatprep.mubr.msk.bf16.mxu0 %vm942_vm0, %v5647_v39  ;;  %5510 = vmatprep.mubr.msk.bf16.mxu1 %vm942_vm0, %v5648_v40  ;;  %v5710_v38 = vld [vmem:[%s8259_s0 + $0x388] sm:$0xff]   ;;  %v5711_v39 = vld [vmem:[%s8259_s0 + $0x190] sm:$0xff]  }
  0x50   :  { %v5712_v40 = vld [vmem:[%s8259_s0 + $0x390] sm:$0xff]  }
  0x56   :  { %5383 = vmatmul.mubr.msk.bf16.gmra.mrb[36].mxu0 %vm942_vm0, %v5649_v41  ;;  %5511 = vmatmul.mubr.msk.bf16.gmra.mrb[36].mxu1 %vm942_vm0, %v5650_v42  ;;  %v5713_v41 = vld [vmem:[%s8259_s0 + $0x198] sm:$0xff]  }
  0x57   :  { %5386 = vmatprep.mubr.msk.bf16.mxu0 %vm942_vm0, %v5651_v43  ;;  %5514 = vmatprep.mubr.msk.bf16.mxu1 %vm942_vm0, %v5652_v44  ;;  %v5714_v42 = vld [vmem:[%s8259_s0 + $0x398] sm:$0xff]   ;;  %v5715_v43 = vld [vmem:[%s8259_s0 + $0x1a0] sm:$0xff]  }
  0x58   :  { %v5716_v44 = vld [vmem:[%s8259_s0 + $0x3a0] sm:$0xff]  }
  0x5e   :  { %5387 = vmatmul.mubr.msk.bf16.gmra.mrb[40].mxu0 %vm942_vm0, %v5653_v45  ;;  %5515 = vmatmul.mubr.msk.bf16.gmra.mrb[40].mxu1 %vm942_vm0, %v5654_v46  ;;  %v5717_v45 = vld [vmem:[%s8259_s0 + $0x1a8] sm:$0xff]  }
  0x5f   :  { %5390 = vmatprep.mubr.msk.bf16.mxu0 %vm942_vm0, %v5655_v47  ;;  %5518 = vmatprep.mubr.msk.bf16.mxu1 %vm942_vm0, %v5656_v48  ;;  %v5718_v46 = vld [vmem:[%s8259_s0 + $0x3a8] sm:$0xff]   ;;  %v5719_v47 = vld [vmem:[%s8259_s0 + $0x1b0] sm:$0xff]  }
  0x60   :  { %v5720_v48 = vld [vmem:[%s8259_s0 + $0x3b0] sm:$0xff]  }
  0x66   :  { %5391 = vmatmul.mubr.msk.bf16.gmra.mrb[44].mxu0 %vm942_vm0, %v5657_v49  ;;  %5519 = vmatmul.mubr.msk.bf16.gmra.mrb[44].mxu1 %vm942_vm0, %v5658_v50  ;;  %v6212_v49 = vld [vmem:[%s8260_s2] ss:$0 sm:$0xff] }
  0x67   :  { %5394 = vmatprep.mubr.msk.bf16.mxu0 %vm942_vm0, %v5659_v51  ;;  %5522 = vmatprep.mubr.msk.bf16.mxu1 %vm942_vm0, %v5660_v52 }
  0x6e   :  { %5395 = vmatmul.mubr.msk.bf16.gmra.mrb[48].mxu0 %vm942_vm0, %v5661_v53  ;;  %5523 = vmatmul.mubr.msk.bf16.gmra.mrb[48].mxu1 %vm942_vm0, %v5662_v54 }
  0x6f   :  { %5398 = vmatprep.mubr.msk.bf16.mxu0 %vm942_vm0, %v5663_v55  ;;  %5526 = vmatprep.mubr.msk.bf16.mxu1 %vm942_vm0, %v5664_v56  ;;  %v5721_v56 = vld [vmem:[%s8259_s0 + $0x1b8] sm:$0xff]  }
  0x76   :  { %5399 = vmatmul.mubr.msk.bf16.gmra.mrb[52].mxu0 %vm942_vm0, %v5665_v57  ;;  %5527 = vmatmul.mubr.msk.bf16.gmra.mrb[52].mxu1 %vm942_vm0, %v5666_v58 }
  0x77   :  { %5402 = vmatprep.mubr.msk.bf16.mxu0 %vm942_vm0, %v5667_v59  ;;  %5530 = vmatprep.mubr.msk.bf16.mxu1 %vm942_vm0, %v5668_v60 }
  0x7e   :  { %5403 = vmatmul.mubr.msk.bf16.gmra.mrb[56].mxu0 %vm942_vm0, %v5669_v61  ;;  %5531 = vmatmul.mubr.msk.bf16.gmra.mrb[56].mxu1 %vm942_vm0, %v5670_v62  ;;  %v5722_v61 = vld [vmem:[%s8259_s0 + $0x3b8] sm:$0xff]   ;;  %v5723_v62 = vld [vmem:[%s8259_s0 + $0x1c0] sm:$0xff]  }
  0x7f   :  { %5406 = vmatprep.mubr.msk.bf16.mxu0 %vm942_vm0, %v5671_v63  ;;  %5534 = vmatprep.mubr.msk.bf16.mxu1 %vm942_vm0, %v5672_v0  ;;  %v5724_v63 = vld [vmem:[%s8259_s0 + $0x3c0] sm:$0xff]  }
  0x86   :  { %5407 = vmatmul.mubr.msk.bf16.gmra.mrb[60].mxu0 %vm942_vm0, %v5673_v1  ;;  %5535 = vmatmul.mubr.msk.bf16.gmra.mrb[60].mxu1 %vm942_vm0, %v5674_v2 }
  0x87   :  { %5410 = vmatprep.mubr.msk.bf16.mxu0 %vm942_vm0, %v5675_v3  ;;  %5538 = vmatprep.mubr.msk.bf16.mxu1 %vm942_vm0, %v5676_v4 }
  0x8e   :  { %5411 = vmatmul.mubr.msk.bf16.gmra.mrb[64].mxu0 %vm942_vm0, %v5677_v5  ;;  %5539 = vmatmul.mubr.msk.bf16.gmra.mrb[64].mxu1 %vm942_vm0, %v5678_v6 }
  0x8f   :  { %5414 = vmatprep.mubr.msk.bf16.mxu0 %vm942_vm0, %v5679_v7  ;;  %5542 = vmatprep.mubr.msk.bf16.mxu1 %vm942_vm0, %v5680_v8 }
  0x96   :  { %5415 = vmatmul.mubr.msk.bf16.gmra.mrb[68].mxu0 %vm942_vm0, %v5681_v9  ;;  %5543 = vmatmul.mubr.msk.bf16.gmra.mrb[68].mxu1 %vm942_vm0, %v5682_v10 }
  0x97   :  { %5418 = vmatprep.mubr.msk.bf16.mxu0 %vm942_vm0, %v5683_v11  ;;  %5546 = vmatprep.mubr.msk.bf16.mxu1 %vm942_vm0, %v5684_v12 }
  0x9e   :  { %5419 = vmatmul.mubr.msk.bf16.gmra.mrb[72].mxu0 %vm942_vm0, %v5685_v13  ;;  %5547 = vmatmul.mubr.msk.bf16.gmra.mrb[72].mxu1 %vm942_vm0, %v5686_v14 }
  0x9f   :  { %5422 = vmatprep.mubr.msk.bf16.mxu0 %vm942_vm0, %v5687_v15  ;;  %5550 = vmatprep.mubr.msk.bf16.mxu1 %vm942_vm0, %v5688_v16 }
  0xa6   :  { %5423 = vmatmul.mubr.msk.bf16.gmra.mrb[76].mxu0 %vm942_vm0, %v5689_v17  ;;  %5551 = vmatmul.mubr.msk.bf16.gmra.mrb[76].mxu1 %vm942_vm0, %v5690_v18 }
  0xa7   :  { %5426 = vmatprep.mubr.msk.bf16.mxu0 %vm942_vm0, %v5691_v19  ;;  %5554 = vmatprep.mubr.msk.bf16.mxu1 %vm942_vm0, %v5692_v20 }
  0xae   :  { %5427 = vmatmul.mubr.msk.bf16.gmra.mrb[80].mxu0 %vm942_vm0, %v5693_v21  ;;  %5555 = vmatmul.mubr.msk.bf16.gmra.mrb[80].mxu1 %vm942_vm0, %v5694_v22 }
  0xaf   :  { %5430 = vmatprep.mubr.msk.bf16.mxu0 %vm942_vm0, %v5695_v23  ;;  %5558 = vmatprep.mubr.msk.bf16.mxu1 %vm942_vm0, %v5696_v24 }
  0xb6   :  { %5431 = vmatmul.mubr.msk.bf16.gmra.mrb[84].mxu0 %vm942_vm0, %v5697_v25  ;;  %5559 = vmatmul.mubr.msk.bf16.gmra.mrb[84].mxu1 %vm942_vm0, %v5698_v26 }
  0xb7   :  { %5434 = vmatprep.mubr.msk.bf16.mxu0 %vm942_vm0, %v5699_v27  ;;  %5562 = vmatprep.mubr.msk.bf16.mxu1 %vm942_vm0, %v5700_v28  ;;  %v5725_v27 = vld [vmem:[%s8259_s0 + $0x1c8] sm:$0xff]  }
  0xb8   :  { %v5726_v28 = vld [vmem:[%s8259_s0 + $0x3c8] sm:$0xff]  }
  0xbe   :  { %5435 = vmatmul.mubr.msk.bf16.gmra.mrb[88].mxu0 %vm942_vm0, %v5701_v29  ;;  %5563 = vmatmul.mubr.msk.bf16.gmra.mrb[88].mxu1 %vm942_vm0, %v5702_v30  ;;  %v5727_v29 = vld [vmem:[%s8259_s0 + $0x1d0] sm:$0xff]  }
  0xbf   :  { %5438 = vmatprep.mubr.msk.bf16.mxu0 %vm942_vm0, %v5703_v31  ;;  %5566 = vmatprep.mubr.msk.bf16.mxu1 %vm942_vm0, %v5704_v32 }
  0xc6   :  { %5439 = vmatmul.mubr.msk.bf16.gmra.mrb[92].mxu0 %vm942_vm0, %v5705_v33  ;;  %5567 = vmatmul.mubr.msk.bf16.gmra.mrb[92].mxu1 %vm942_vm0, %v5706_v34 }
  0xc7   :  { %5442 = vmatprep.mubr.msk.bf16.mxu0 %vm942_vm0, %v5707_v35  ;;  %5570 = vmatprep.mubr.msk.bf16.mxu1 %vm942_vm0, %v5708_v36  ;;  %v5728_v35 = vld [vmem:[%s8259_s0 + $0x3d0] sm:$0xff]  }
  0xce   :  { %5443 = vmatmul.mubr.msk.bf16.gmra.mrb[96].mxu0 %vm942_vm0, %v5709_v37  ;;  %5571 = vmatmul.mubr.msk.bf16.gmra.mrb[96].mxu1 %vm942_vm0, %v5710_v38 }
  0xcf   :  { %5446 = vmatprep.mubr.msk.bf16.mxu0 %vm942_vm0, %v5711_v39  ;;  %5574 = vmatprep.mubr.msk.bf16.mxu1 %vm942_vm0, %v5712_v40 }
  0xd6   :  { %5447 = vmatmul.mubr.msk.bf16.gmra.mrb[100].mxu0 %vm942_vm0, %v5713_v41  ;;  %5575 = vmatmul.mubr.msk.bf16.gmra.mrb[100].mxu1 %vm942_vm0, %v5714_v42 }
  0xd7   :  { %5450 = vmatprep.mubr.msk.bf16.mxu0 %vm942_vm0, %v5715_v43  ;;  %5578 = vmatprep.mubr.msk.bf16.mxu1 %vm942_vm0, %v5716_v44 }
  0xde   :  { %5451 = vmatmul.mubr.msk.bf16.gmra.mrb[104].mxu0 %vm942_vm0, %v5717_v45  ;;  %5579 = vmatmul.mubr.msk.bf16.gmra.mrb[104].mxu1 %vm942_vm0, %v5718_v46 }
  0xdf   :  { %5454 = vmatprep.mubr.msk.bf16.mxu0 %vm942_vm0, %v5719_v47  ;;  %5582 = vmatprep.mubr.msk.bf16.mxu1 %vm942_vm0, %v5720_v48 }
  0xe1   :  { %v5348_v50 = vpop.f32.mrb[0].mxu0  ;;  %v5476_v51 = vpop.f32.mrb[0].mxu1 }
  0xe2   :  { %v1370_v52 = vadd.f32 %v5348_v50, %v6212_v49  ;;  %v1882_v53 = vadd.f32 %v5476_v51, %v6212_v49  ;;  %v1361_v54 = vpop.f32.mrb[1].mxu0  ;;  %v1873_v55 = vpop.f32.mrb[1].mxu1 }
  0xe3   :  { %v1362_v57 = vadd.f32 %v6212_v49, %v1361_v54  ;;  %v1874_v58 = vadd.f32 %v6212_v49, %v1873_v55  ;;  %v5349_v59 = vpop.f32.mrb[2].mxu0  ;;  %v5477_v60 = vpop.f32.mrb[2].mxu1 }
  0xe4   :  { %vm2386_vm2 = vcmp.ge.f32.partialorder %v1370_v52, 0.0  ;;  %v2642_v0 = vmul.f32 0.2, %v1370_v52  ;;  %vm2514_vm3 = vcmp.ge.f32.partialorder %v1882_v53, 0.0  ;;  %v2770_v1 = vmul.f32 0.2, %v1882_v53 }
  0xe5   :  { %vm2384_vm4 = vcmp.ge.f32.partialorder %v1362_v57, 0.0  ;;  %v2640_v2 = vmul.f32 0.2, %v1362_v57  ;;  %vm2512_vm5 = vcmp.ge.f32.partialorder %v1874_v58, 0.0  ;;  %v2768_v3 = vmul.f32 0.2, %v1874_v58 }
  0xe6   :  { %v2898_v4 = vsel %vm2386_vm2, %v1370_v52, %v2642_v0  ;;  %v3026_v5 = vsel %vm2514_vm3, %v1882_v53, %v2770_v1  ;;  %v1373_v6 = vadd.f32 %v5349_v59, %v6212_v49  ;;  %v1885_v7 = vadd.f32 %v5477_v60, %v6212_v49  ;;  %v1364_v8 = vpop.f32.mrb[3].mxu0  ;;  %v1876_v9 = vpop.f32.mrb[3].mxu1  ;;  %5455 = vmatmul.mubr.msk.bf16.gmra.mrb[108].mxu0 %vm942_vm0, %v5721_v56 }
  0xe7   :  { %v4955_v10 = vpack.c.bf16 %v2898_v4, %v2898_v4  ;;  %v5083_v11 = vpack.c.bf16 %v3026_v5, %v3026_v5  ;;  %v2896_v12 = vsel %vm2384_vm4, %v1362_v57, %v2640_v2  ;;  %v3024_v13 = vsel %vm2512_vm5, %v1874_v58, %v2768_v3  ;;  %5583 = vmatmul.mubr.msk.bf16.gmra.mrb[108].mxu1 %vm942_vm0, %v5722_v61 }
  0xe8   :  { %v4953_v14 = vpack.c.bf16 %v2896_v12, %v2896_v12  ;;  %v5081_v15 = vpack.c.bf16 %v3024_v13, %v3024_v13  ;;  %vm2387_vm6 = vcmp.ge.f32.partialorder %v1373_v6, 0.0  ;;  %v2643_v16 = vmul.f32 0.2, %v1373_v6  ;;  %5458 = vmatprep.mubr.msk.bf16.mxu0 %vm942_vm0, %v5723_v62  ;;  %5586 = vmatprep.mubr.msk.bf16.mxu1 %vm942_vm0, %v5724_v63  ;;  %v5729_v63 = vld [vmem:[%s8259_s0 + $0x1d8] sm:$0xff]   ;;  %v5732_v13 = vld [vmem:[%s8259_s0 + $0x3e0] sm:$0xff]  }
  0xe9   :  { %4179 = vst.msk [vmem:[%s8261_s3 + $0x8] sm:$0xf] %vm4176_vm1, %v4955_v10  ;;  %4307 = vst.msk [vmem:[%s8261_s3 + $0x208] sm:$0xf] %vm4176_vm1, %v5083_v11  ;;  %vm2515_vm7 = vcmp.ge.f32.partialorder %v1885_v7, 0.0  ;;  %v1365_v18 = vadd.f32 %v6212_v49, %v1364_v8  ;;  %v1877_v19 = vadd.f32 %v6212_v49, %v1876_v9  ;;  %v5352_v20 = vpop.f32.mrb[4].mxu0 }
  0xea   :  { %v2771_v17 = vmul.f32 0.2, %v1885_v7  ;;  %v5480_v21 = vpop.f32.mrb[4].mxu1  ;;  %4177 = vst.msk [vmem:[%s8261_s3] sm:$0xf] %vm4176_vm1, %v4953_v14  ;;  %v2899_v22 = vsel %vm2387_vm6, %v1373_v6, %v2643_v16  ;;  %v1386_v23 = vadd.f32 %v5352_v20, %v6212_v49  ;;  %v1377_v25 = vpop.f32.mrb[5].mxu0 }
  0xeb   :  { %4305 = vst.msk [vmem:[%s8261_s3 + $0x200] sm:$0xf] %vm4176_vm1, %v5081_v15  ;;  %v1898_v24 = vadd.f32 %v5480_v21, %v6212_v49  ;;  %v1889_v26 = vpop.f32.mrb[5].mxu1  ;;  %v4956_v30 = vpack.c.bf16 %v2899_v22, %v2899_v22  ;;  %vm2385_vm8 = vcmp.ge.f32.partialorder %v1365_v18, 0.0  ;;  %v2641_v32 = vmul.f32 0.2, %v1365_v18 }
  0xec   :  { %v3027_v31 = vsel %vm2515_vm7, %v1885_v7, %v2771_v17  ;;  %v5353_v33 = vpop.f32.mrb[6].mxu0  ;;  %v5481_v34 = vpop.f32.mrb[6].mxu1  ;;  %vm2513_vm9 = vcmp.ge.f32.partialorder %v1877_v19, 0.0  ;;  %v2769_v37 = vmul.f32 0.2, %v1877_v19  ;;  %vm2390_vm10 = vcmp.ge.f32.partialorder %v1386_v23, 0.0 }
  0xed   :  { %v5084_v36 = vpack.c.bf16 %v3027_v31, %v3027_v31  ;;  %v1380_v38 = vpop.f32.mrb[7].mxu0  ;;  %v1892_v39 = vpop.f32.mrb[7].mxu1  ;;  %4180 = vst.msk [vmem:[%s8261_s3 + $0xc] sm:$0xf] %vm4176_vm1, %v4956_v30  ;;  %v2897_v40 = vsel %vm2385_vm8, %v1365_v18, %v2641_v32  ;;  %v2646_v41 = vmul.f32 0.2, %v1386_v23  ;;  %v1378_v45 = vadd.f32 %v6212_v49, %v1377_v25 }
  0xee   :  { %vm2518_vm11 = vcmp.ge.f32.partialorder %v1898_v24, 0.0  ;;  %v2774_v42 = vmul.f32 0.2, %v1898_v24  ;;  %v4954_v43 = vpack.c.bf16 %v2897_v40, %v2897_v40  ;;  %v3025_v44 = vsel %vm2513_vm9, %v1877_v19, %v2769_v37  ;;  %5459 = vmatmul.mubr.msk.bf16.gmra.mrb[112].mxu0 %vm942_vm0, %v5725_v27  ;;  %v5730_v6 = vld [vmem:[%s8259_s0 + $0x3d8] sm:$0xff]   ;;  %v5731_v7 = vld [vmem:[%s8259_s0 + $0x1e0] sm:$0xff]  }
  0xef   :  { %4308 = vst.msk [vmem:[%s8261_s3 + $0x20c] sm:$0xf] %vm4176_vm1, %v5084_v36  ;;  %v1890_v46 = vadd.f32 %v6212_v49, %v1889_v26  ;;  %v5082_v47 = vpack.c.bf16 %v3025_v44, %v3025_v44  ;;  %v2902_v48 = vsel %vm2390_vm10, %v1386_v23, %v2646_v41  ;;  %v1389_v51 = vadd.f32 %v5353_v33, %v6212_v49 }
  0xf0   :  { %v3030_v50 = vsel %vm2518_vm11, %v1898_v24, %v2774_v42  ;;  %5587 = vmatmul.mubr.msk.bf16.gmra.mrb[112].mxu1 %vm942_vm0, %v5726_v28  ;;  %4178 = vst.msk [vmem:[%s8261_s3 + $0x4] sm:$0xf] %vm4176_vm1, %v4954_v43  ;;  %v4959_v52 = vpack.c.bf16 %v2902_v48, %v2902_v48  ;;  %vm2388_vm12 = vcmp.ge.f32.partialorder %v1378_v45, 0.0  ;;  %v2644_v54 = vmul.f32 0.2, %v1378_v45  ;;  %5462 = vmatprep.mubr.msk.bf16.mxu0 %vm942_vm0, %v5727_v29 }
  0xf1   :  { %v5087_v53 = vpack.c.bf16 %v3030_v50, %v3030_v50  ;;  %5590 = vmatprep.mubr.msk.bf16.mxu1 %vm942_vm0, %v5728_v35  ;;  %4306 = vst.msk [vmem:[%s8261_s3 + $0x204] sm:$0xf] %vm4176_vm1, %v5082_v47  ;;  %vm2516_vm13 = vcmp.ge.f32.partialorder %v1890_v46, 0.0  ;;  %v2772_v55 = vmul.f32 0.2, %v1890_v46  ;;  %vm2391_vm14 = vcmp.ge.f32.partialorder %v1389_v51, 0.0 }
  0xf2   :  { %v2647_v56 = vmul.f32 0.2, %v1389_v51  ;;  %4183 = vst.msk [vmem:[%s8261_s3 + $0x18] sm:$0xf] %vm4176_vm1, %v4959_v52  ;;  %v2900_v57 = vsel %vm2388_vm12, %v1378_v45, %v2644_v54  ;;  %v1901_v58 = vadd.f32 %v5481_v34, %v6212_v49  ;;  %v1381_v59 = vadd.f32 %v6212_v49, %v1380_v38  ;;  %v5356_v61 = vpop.f32.mrb[8].mxu0  ;;  %v5484_v62 = vpop.f32.mrb[8].mxu1 }
  0xf3   :  { %4311 = vst.msk [vmem:[%s8261_s3 + $0x218] sm:$0xf] %vm4176_vm1, %v5087_v53  ;;  %v1893_v60 = vadd.f32 %v6212_v49, %v1892_v39  ;;  %v4957_v0 = vpack.c.bf16 %v2900_v57, %v2900_v57  ;;  %v3028_v1 = vsel %vm2516_vm13, %v1890_v46, %v2772_v55  ;;  %v1402_v3 = vadd.f32 %v5356_v61, %v6212_v49  ;;  %v1393_v4 = vpop.f32.mrb[9].mxu0  ;;  %v1905_v5 = vpop.f32.mrb[9].mxu1  ;;  %v5733_v38 = vld [vmem:[%s8259_s0 + $0x1e8] sm:$0xff]   ;;  %v5735_v46 = vld [vmem:[%s8259_s0 + $0x1f0] sm:$0xff]  }
  0xf4   :  { %v2903_v2 = vsel %vm2391_vm14, %v1389_v51, %v2647_v56  ;;  %v5085_v8 = vpack.c.bf16 %v3028_v1, %v3028_v1  ;;  %vm2519_vm15 = vcmp.ge.f32.partialorder %v1901_v58, 0.0  ;;  %v2775_v10 = vmul.f32 0.2, %v1901_v58  ;;  %v5357_v11 = vpop.f32.mrb[10].mxu0  ;;  %v5485_v12 = vpop.f32.mrb[10].mxu1  ;;  %v5734_v45 = vld [vmem:[%s8259_s0 + $0x3e8] sm:$0xff]  }
  0xf5   :  { %v4960_v9 = vpack.c.bf16 %v2903_v2, %v2903_v2  ;;  %4181 = vst.msk [vmem:[%s8261_s3 + $0x10] sm:$0xf] %vm4176_vm1, %v4957_v0  ;;  %vm2389_vm2 = vcmp.ge.f32.partialorder %v1381_v59, 0.0  ;;  %v2645_v14 = vmul.f32 0.2, %v1381_v59  ;;  %vm2517_vm3 = vcmp.ge.f32.partialorder %v1893_v60, 0.0 }
  0xf6   :  { %v2773_v15 = vmul.f32 0.2, %v1893_v60  ;;  %4309 = vst.msk [vmem:[%s8261_s3 + $0x210] sm:$0xf] %vm4176_vm1, %v5085_v8  ;;  %v3031_v16 = vsel %vm2519_vm15, %v1901_v58, %v2775_v10  ;;  %vm2394_vm4 = vcmp.ge.f32.partialorder %v1402_v3, 0.0  ;;  %v1914_v18 = vadd.f32 %v5484_v62, %v6212_v49  ;;  %v1396_v19 = vpop.f32.mrb[11].mxu0  ;;  %5463 = vmatmul.mubr.msk.bf16.gmra.mrb[116].mxu0 %vm942_vm0, %v5729_v63 }
  0xf7   :  { %4184 = vst.msk [vmem:[%s8261_s3 + $0x1c] sm:$0xf] %vm4176_vm1, %v4960_v9  ;;  %v2650_v17 = vmul.f32 0.2, %v1402_v3  ;;  %v1908_v20 = vpop.f32.mrb[11].mxu1  ;;  %v5088_v21 = vpack.c.bf16 %v3031_v16, %v3031_v16  ;;  %v2901_v22 = vsel %vm2389_vm2, %v1381_v59, %v2645_v14  ;;  %v1394_v24 = vadd.f32 %v6212_v49, %v1393_v4  ;;  %5466 = vmatprep.mubr.msk.bf16.mxu0 %vm942_vm0, %v5731_v7  ;;  %v5736_v53 = vld [vmem:[%s8259_s0 + $0x3f0] sm:$0xff]  }
  0xf8   :  { %v3029_v23 = vsel %vm2517_vm3, %v1893_v60, %v2773_v15  ;;  %5591 = vmatmul.mubr.msk.bf16.gmra.mrb[116].mxu1 %vm942_vm0, %v5730_v6  ;;  %v4958_v25 = vpack.c.bf16 %v2901_v22, %v2901_v22  ;;  %vm2522_vm5 = vcmp.ge.f32.partialorder %v1914_v18, 0.0  ;;  %v2778_v29 = vmul.f32 0.2, %v1914_v18  ;;  %v5737_v14 = vld [vmem:[%s8259_s0 + $0x1f8] sm:$0xff]  }
  0xf9   :  { %v5086_v26 = vpack.c.bf16 %v3029_v23, %v3029_v23  ;;  %v2906_v27 = vsel %vm2394_vm4, %v1402_v3, %v2650_v17  ;;  %5594 = vmatprep.mubr.msk.bf16.mxu1 %vm942_vm0, %v5732_v13  ;;  %4312 = vst.msk [vmem:[%s8261_s3 + $0x21c] sm:$0xf] %vm4176_vm1, %v5088_v21  ;;  %vm2392_vm6 = vcmp.ge.f32.partialorder %v1394_v24, 0.0  ;;  %v2648_v30 = vmul.f32 0.2, %v1394_v24  ;;  %v5360_v31 = vpop.f32.mrb[12].mxu0 }
  0xfa   :  { %v4963_v28 = vpack.c.bf16 %v2906_v27, %v2906_v27  ;;  %4182 = vst.msk [vmem:[%s8261_s3 + $0x14] sm:$0xf] %vm4176_vm1, %v4958_v25  ;;  %v1906_v32 = vadd.f32 %v6212_v49, %v1905_v5  ;;  %v1405_v33 = vadd.f32 %v5357_v11, %v6212_v49  ;;  %v1917_v34 = vadd.f32 %v5485_v12, %v6212_v49  ;;  %v5488_v36 = vpop.f32.mrb[12].mxu1  ;;  %v1409_v37 = vpop.f32.mrb[13].mxu0 }
  0xfb   :  { %4310 = vst.msk [vmem:[%s8261_s3 + $0x214] sm:$0xf] %vm4176_vm1, %v5086_v26  ;;  %v1397_v35 = vadd.f32 %v6212_v49, %v1396_v19  ;;  %v3034_v39 = vsel %vm2522_vm5, %v1914_v18, %v2778_v29  ;;  %v2904_v40 = vsel %vm2392_vm6, %v1394_v24, %v2648_v30  ;;  %v1909_v41 = vadd.f32 %v6212_v49, %v1908_v20  ;;  %v1921_v43 = vpop.f32.mrb[13].mxu1  ;;  %v5361_v44 = vpop.f32.mrb[14].mxu0  ;;  %v5738_v20 = vld [vmem:[%s8259_s0 + $0x3f8] sm:$0xff]  }
  0xfc   :  { %4187 = vst.msk [vmem:[%s8261_s3 + $0x28] sm:$0xf] %vm4176_vm1, %v4963_v28  ;;  %v1418_v42 = vadd.f32 %v5360_v31, %v6212_v49  ;;  %v5091_v47 = vpack.c.bf16 %v3034_v39, %v3034_v39  ;;  %v4961_v48 = vpack.c.bf16 %v2904_v40, %v2904_v40  ;;  %vm2520_vm7 = vcmp.ge.f32.partialorder %v1906_v32, 0.0  ;;  %v5489_v51 = vpop.f32.mrb[14].mxu1  ;;  %v6368_v52 = vpop.f32.mrb[15].mxu0 }
  0xfd   :  { %v2776_v50 = vmul.f32 0.2, %v1906_v32  ;;  %vm2395_vm8 = vcmp.ge.f32.partialorder %v1405_v33, 0.0  ;;  %v2651_v54 = vmul.f32 0.2, %v1405_v33  ;;  %vm2523_vm9 = vcmp.ge.f32.partialorder %v1917_v34, 0.0 }
  0xfe   :  { %v2779_v55 = vmul.f32 0.2, %v1917_v34  ;;  %4315 = vst.msk [vmem:[%s8261_s3 + $0x228] sm:$0xf] %vm4176_vm1, %v5091_v47  ;;  %4185 = vst.msk [vmem:[%s8261_s3 + $0x20] sm:$0xf] %vm4176_vm1, %v4961_v48  ;;  %5467 = vmatmul.mubr.msk.bf16.gmra.mrb[120].mxu0 %vm942_vm0, %v5733_v38  ;;  %v1930_v5 = vadd.f32 %v5488_v36, %v6212_v49  ;;  %v1410_v9 = vadd.f32 %v6212_v49, %v1409_v37 }
  0xff   :  { %v3032_v56 = vsel %vm2520_vm7, %v1906_v32, %v2776_v50  ;;  %vm2393_vm10 = vcmp.ge.f32.partialorder %v1397_v35, 0.0  ;;  %v2649_v57 = vmul.f32 0.2, %v1397_v35  ;;  %vm2521_vm11 = vcmp.ge.f32.partialorder %v1909_v41, 0.0  ;;  %v6381_v58 = vpop.f32.mrb[15].mxu1  ;;  %5470 = vmatprep.mubr.msk.bf16.mxu0 %vm942_vm0, %v5735_v46 }
 0x100   :  { %v5089_v59 = vpack.c.bf16 %v3032_v56, %v3032_v56  ;;  %v2907_v60 = vsel %vm2395_vm8, %v1405_v33, %v2651_v54  ;;  %v3035_v61 = vsel %vm2523_vm9, %v1917_v34, %v2779_v55  ;;  %v2777_v62 = vmul.f32 0.2, %v1909_v41  ;;  %5595 = vmatmul.mubr.msk.bf16.gmra.mrb[120].mxu1 %vm942_vm0, %v5734_v45 }
 0x101   :  { %v4964_v63 = vpack.c.bf16 %v2907_v60, %v2907_v60  ;;  %v5092_v0 = vpack.c.bf16 %v3035_v61, %v3035_v61  ;;  %v2905_v1 = vsel %vm2393_vm10, %v1397_v35, %v2649_v57  ;;  %vm2398_vm12 = vcmp.ge.f32.partialorder %v1418_v42, 0.0  ;;  %5598 = vmatprep.mubr.msk.bf16.mxu1 %vm942_vm0, %v5736_v53  ;;  %v5364_v6 = vpop.f32.mrb[16].mxu0  ;;  %v5492_v7 = vpop.f32.mrb[16].mxu1 }
 0x102   :  { %4313 = vst.msk [vmem:[%s8261_s3 + $0x220] sm:$0xf] %vm4176_vm1, %v5089_v59  ;;  %v4962_v2 = vpack.c.bf16 %v2905_v1, %v2905_v1  ;;  %v3033_v3 = vsel %vm2521_vm11, %v1909_v41, %v2777_v62  ;;  %v2654_v4 = vmul.f32 0.2, %v1418_v42  ;;  %v1922_v10 = vadd.f32 %v6212_v49, %v1921_v43  ;;  %v1425_v12 = vpop.f32.mrb[17].mxu0  ;;  %v1937_v13 = vpop.f32.mrb[17].mxu1 }
 0x103   :  { %4188 = vst.msk [vmem:[%s8261_s3 + $0x2c] sm:$0xf] %vm4176_vm1, %v4964_v63  ;;  %4316 = vst.msk [vmem:[%s8261_s3 + $0x22c] sm:$0xf] %vm4176_vm1, %v5092_v0  ;;  %v5090_v8 = vpack.c.bf16 %v3033_v3, %v3033_v3  ;;  %v1421_v11 = vadd.f32 %v5361_v44, %v6212_v49  ;;  %vm2526_vm13 = vcmp.ge.f32.partialorder %v1930_v5, 0.0  ;;  %v1933_v17 = vadd.f32 %v5489_v51, %v6212_v49  ;;  %v6413_v18 = vpop.f32.mrb[18].mxu0 }
 0x104   :  { %4186 = vst.msk [vmem:[%s8261_s3 + $0x24] sm:$0xf] %vm4176_vm1, %v4962_v2  ;;  %v2910_v15 = vsel %vm2398_vm12, %v1418_v42, %v2654_v4  ;;  %v2782_v16 = vmul.f32 0.2, %v1930_v5  ;;  %v6415_v19 = vpop.f32.mrb[18].mxu1  ;;  %vm2396_vm14 = vcmp.ge.f32.partialorder %v1410_v9, 0.0  ;;  %v1413_v34 = vadd.f32 %v6212_v49, %v6368_v52 }
 0x105   :  { %4314 = vst.msk [vmem:[%s8261_s3 + $0x224] sm:$0xf] %vm4176_vm1, %v5090_v8  ;;  %v4967_v21 = vpack.c.bf16 %v2910_v15, %v2910_v15  ;;  %v2652_v22 = vmul.f32 0.2, %v1410_v9  ;;  %vm2524_vm15 = vcmp.ge.f32.partialorder %v1922_v10, 0.0  ;;  %v6424_v23 = vpop.f32.mrb[19].mxu0  ;;  %v1925_v38 = vadd.f32 %v6212_v49, %v6381_v58 }
 0x106   :  { %v6426_v24 = vpop.f32.mrb[19].mxu1  ;;  %v3038_v25 = vsel %vm2526_vm13, %v1930_v5, %v2782_v16  ;;  %v2780_v26 = vmul.f32 0.2, %v1922_v10  ;;  %vm2399_vm2 = vcmp.ge.f32.partialorder %v1421_v11, 0.0  ;;  %v2655_v27 = vmul.f32 0.2, %v1421_v11  ;;  %5471 = vmatmul.mubr.msk.bf16.gmra.mrb[124].mxu0 %vm942_vm0, %v5737_v14 }
 0x107   :  { %4191 = vst.msk [vmem:[%s8261_s3 + $0x38] sm:$0xf] %vm4176_vm1, %v4967_v21  ;;  %v5095_v28 = vpack.c.bf16 %v3038_v25, %v3038_v25  ;;  %v2908_v29 = vsel %vm2396_vm14, %v1410_v9, %v2652_v22  ;;  %vm2527_vm3 = vcmp.ge.f32.partialorder %v1933_v17, 0.0  ;;  %v2783_v30 = vmul.f32 0.2, %v1933_v17 }
 0x108   :  { %v4965_v31 = vpack.c.bf16 %v2908_v29, %v2908_v29  ;;  %v3036_v32 = vsel %vm2524_vm15, %v1922_v10, %v2780_v26  ;;  %v2911_v33 = vsel %vm2399_vm2, %v1421_v11, %v2655_v27  ;;  %5599 = vmatmul.mubr.msk.bf16.gmra.mrb[124].mxu1 %vm942_vm0, %v5738_v20  ;;  %vm2397_vm4 = vcmp.ge.f32.partialorder %v1413_v34, 0.0 }
 0x109   :  { %4319 = vst.msk [vmem:[%s8261_s3 + $0x238] sm:$0xf] %vm4176_vm1, %v5095_v28  ;;  %v5093_v35 = vpack.c.bf16 %v3036_v32, %v3036_v32  ;;  %v4968_v36 = vpack.c.bf16 %v2911_v33, %v2911_v33  ;;  %v3039_v37 = vsel %vm2527_vm3, %v1933_v17, %v2783_v30  ;;  %v2653_v40 = vmul.f32 0.2, %v1413_v34  ;;  %v5368_v42 = vpop.f32.mrb[20].mxu0  ;;  %v5496_v43 = vpop.f32.mrb[20].mxu1 }
 0x10a   :  { %4189 = vst.msk [vmem:[%s8261_s3 + $0x30] sm:$0xf] %vm4176_vm1, %v4965_v31  ;;  %v5096_v39 = vpack.c.bf16 %v3039_v37, %v3039_v37  ;;  %v1434_v41 = vadd.f32 %v5364_v6, %v6212_v49  ;;  %vm2525_vm0 = vcmp.ge.f32.partialorder %v1925_v38, 0.0  ;;  %v2781_v44 = vmul.f32 0.2, %v1925_v38  ;;  %v1441_v47 = vpop.f32.mrb[21].mxu0 }
 0x10b   :  { %4317 = vst.msk [vmem:[%s8261_s3 + $0x230] sm:$0xf] %vm4176_vm1, %v5093_v35  ;;  %4192 = vst.msk [vmem:[%s8261_s3 + $0x3c] sm:$0xf] %vm4176_vm1, %v4968_v36  ;;  %v1946_v45 = vadd.f32 %v5492_v7, %v6212_v49  ;;  %v1426_v46 = vadd.f32 %v6212_v49, %v1425_v12  ;;  %v6457_v48 = vpop.f32.mrb[21].mxu1  ;;  %v2909_v50 = vsel %vm2397_vm4, %v1413_v34, %v2653_v40  ;;  %v6464_v53 = vpop.f32.mrb[22].mxu0 }
 0x10c   :  { %4320 = vst.msk [vmem:[%s8261_s3 + $0x23c] sm:$0xf] %vm4176_vm1, %v5096_v39  ;;  %vm2402_vm5 = vcmp.ge.f32.partialorder %v1434_v41, 0.0  ;;  %v2658_v51 = vmul.f32 0.2, %v1434_v41  ;;  %v1938_v52 = vadd.f32 %v6212_v49, %v1937_v13  ;;  %v6466_v54 = vpop.f32.mrb[22].mxu1  ;;  %v4966_v55 = vpack.c.bf16 %v2909_v50, %v2909_v50 }
 0x10d   :  { %v3037_v56 = vsel %vm2525_vm0, %v1925_v38, %v2781_v44  ;;  %vm2530_vm6 = vcmp.ge.f32.partialorder %v1946_v45, 0.0  ;;  %v2786_v57 = vmul.f32 0.2, %v1946_v45  ;;  %v6468_v58 = vpop.f32.mrb[23].mxu0  ;;  %v6470_v59 = vpop.f32.mrb[23].mxu1  ;;  %vm2400_vm7 = vcmp.ge.f32.partialorder %v1426_v46, 0.0 }
 0x10e   :  { %v5094_v60 = vpack.c.bf16 %v3037_v56, %v3037_v56  ;;  %v2914_v61 = vsel %vm2402_vm5, %v1434_v41, %v2658_v51  ;;  %v2656_v62 = vmul.f32 0.2, %v1426_v46  ;;  %4190 = vst.msk [vmem:[%s8261_s3 + $0x34] sm:$0xf] %vm4176_vm1, %v4966_v55  ;;  %vm2528_vm8 = vcmp.ge.f32.partialorder %v1938_v52, 0.0 }
 0x10f   :  { %v4971_v63 = vpack.c.bf16 %v2914_v61, %v2914_v61  ;;  %v3042_v0 = vsel %vm2530_vm6, %v1946_v45, %v2786_v57  ;;  %v2784_v1 = vmul.f32 0.2, %v1938_v52  ;;  %v1437_v4 = vadd.f32 %v6413_v18, %v6212_v49 }
 0x110   :  { %4318 = vst.msk [vmem:[%s8261_s3 + $0x234] sm:$0xf] %vm4176_vm1, %v5094_v60  ;;  %v5099_v2 = vpack.c.bf16 %v3042_v0, %v3042_v0  ;;  %v2912_v3 = vsel %vm2400_vm7, %v1426_v46, %v2656_v62  ;;  %v1949_v5 = vadd.f32 %v6415_v19, %v6212_v49  ;;  %v1429_v8 = vadd.f32 %v6212_v49, %v6424_v23 }
 0x111   :  { %4195 = vst.msk [vmem:[%s8261_s3 + $0x48] sm:$0xf] %vm4176_vm1, %v4971_v63  ;;  %v4969_v6 = vpack.c.bf16 %v2912_v3, %v2912_v3  ;;  %v3040_v7 = vsel %vm2528_vm8, %v1938_v52, %v2784_v1  ;;  %v1941_v9 = vadd.f32 %v6212_v49, %v6426_v24  ;;  %vm2403_vm9 = vcmp.ge.f32.partialorder %v1437_v4, 0.0  ;;  %v6496_v12 = vpop.f32.mrb[24].mxu0  ;;  %v6498_v13 = vpop.f32.mrb[24].mxu1 }
 0x112   :  { %4323 = vst.msk [vmem:[%s8261_s3 + $0x248] sm:$0xf] %vm4176_vm1, %v5099_v2  ;;  %v5097_v10 = vpack.c.bf16 %v3040_v7, %v3040_v7  ;;  %v2659_v11 = vmul.f32 0.2, %v1437_v4  ;;  %vm2531_vm10 = vcmp.ge.f32.partialorder %v1949_v5, 0.0  ;;  %vm2401_vm11 = vcmp.ge.f32.partialorder %v1429_v8, 0.0 }
 0x113   :  { %4193 = vst.msk [vmem:[%s8261_s3 + $0x40] sm:$0xf] %vm4176_vm1, %v4969_v6  ;;  %v2787_v14 = vmul.f32 0.2, %v1949_v5  ;;  %v2657_v15 = vmul.f32 0.2, %v1429_v8  ;;  %v1450_v18 = vadd.f32 %v5368_v42, %v6212_v49  ;;  %v1962_v19 = vadd.f32 %v5496_v43, %v6212_v49 }
 0x114   :  { %vm2529_vm12 = vcmp.ge.f32.partialorder %v1941_v9, 0.0  ;;  %4321 = vst.msk [vmem:[%s8261_s3 + $0x240] sm:$0xf] %vm4176_vm1, %v5097_v10  ;;  %v2915_v16 = vsel %vm2403_vm9, %v1437_v4, %v2659_v11  ;;  %v2785_v17 = vmul.f32 0.2, %v1941_v9  ;;  %v6510_v20 = vpop.f32.mrb[25].mxu0  ;;  %v1442_v25 = vadd.f32 %v6212_v49, %v1441_v47 }
 0x115   :  { %v6512_v21 = vpop.f32.mrb[25].mxu1  ;;  %v4972_v22 = vpack.c.bf16 %v2915_v16, %v2915_v16  ;;  %v3043_v23 = vsel %vm2531_vm10, %v1949_v5, %v2787_v14  ;;  %v2913_v24 = vsel %vm2401_vm11, %v1429_v8, %v2657_v15  ;;  %v6516_v26 = vpop.f32.mrb[26].mxu0  ;;  %vm2406_vm13 = vcmp.ge.f32.partialorder %v1450_v18, 0.0 }
 0x116   :  { %v6518_v27 = vpop.f32.mrb[26].mxu1  ;;  %v5100_v28 = vpack.c.bf16 %v3043_v23, %v3043_v23  ;;  %v4970_v29 = vpack.c.bf16 %v2913_v24, %v2913_v24  ;;  %v3041_v30 = vsel %vm2529_vm12, %v1941_v9, %v2785_v17  ;;  %v6521_v31 = vpop.f32.mrb[27].mxu0  ;;  %v2662_v34 = vmul.f32 0.2, %v1450_v18 }
 0x117   :  { %v6523_v32 = vpop.f32.mrb[27].mxu1  ;;  %4196 = vst.msk [vmem:[%s8261_s3 + $0x4c] sm:$0xf] %vm4176_vm1, %v4972_v22  ;;  %v5098_v33 = vpack.c.bf16 %v3041_v30, %v3041_v30  ;;  %vm2534_vm14 = vcmp.ge.f32.partialorder %v1962_v19, 0.0  ;;  %v2790_v35 = vmul.f32 0.2, %v1962_v19  ;;  %v1954_v37 = vadd.f32 %v6212_v49, %v6457_v48 }
 0x118   :  { %4324 = vst.msk [vmem:[%s8261_s3 + $0x24c] sm:$0xf] %vm4176_vm1, %v5100_v28  ;;  %4194 = vst.msk [vmem:[%s8261_s3 + $0x44] sm:$0xf] %vm4176_vm1, %v4970_v29  ;;  %vm2404_vm15 = vcmp.ge.f32.partialorder %v1442_v25, 0.0  ;;  %v1453_v38 = vadd.f32 %v6464_v53, %v6212_v49  ;;  %v2918_v39 = vsel %vm2406_vm13, %v1450_v18, %v2662_v34  ;;  %v1965_v41 = vadd.f32 %v6466_v54, %v6212_v49 }
 0x119   :  { %v2660_v36 = vmul.f32 0.2, %v1442_v25  ;;  %4322 = vst.msk [vmem:[%s8261_s3 + $0x244] sm:$0xf] %vm4176_vm1, %v5098_v33  ;;  %v3046_v40 = vsel %vm2534_vm14, %v1962_v19, %v2790_v35  ;;  %v1445_v42 = vadd.f32 %v6212_v49, %v6468_v58  ;;  %v4975_v43 = vpack.c.bf16 %v2918_v39, %v2918_v39  ;;  %v6549_v46 = vpop.f32.mrb[28].mxu0  ;;  %v6551_v47 = vpop.f32.mrb[28].mxu1 }
 0x11a   :  { %v5103_v44 = vpack.c.bf16 %v3046_v40, %v3046_v40  ;;  %vm2532_vm2 = vcmp.ge.f32.partialorder %v1954_v37, 0.0  ;;  %v2788_v50 = vmul.f32 0.2, %v1954_v37  ;;  %vm2407_vm3 = vcmp.ge.f32.partialorder %v1453_v38, 0.0  ;;  %v6553_v52 = vpop.f32.mrb[29].mxu0  ;;  %v6571_v60 = vpop.f32.mrb[29].mxu1 }
 0x11b   :  { %v2916_v45 = vsel %vm2404_vm15, %v1442_v25, %v2660_v36  ;;  %v2663_v51 = vmul.f32 0.2, %v1453_v38  ;;  %4199 = vst.msk [vmem:[%s8261_s3 + $0x58] sm:$0xf] %vm4176_vm1, %v4975_v43  ;;  %vm2535_vm4 = vcmp.ge.f32.partialorder %v1965_v41, 0.0  ;;  %vm2405_vm0 = vcmp.ge.f32.partialorder %v1445_v42, 0.0 }
 0x11c   :  { %v4973_v48 = vpack.c.bf16 %v2916_v45, %v2916_v45  ;;  %4327 = vst.msk [vmem:[%s8261_s3 + $0x258] sm:$0xf] %vm4176_vm1, %v5103_v44  ;;  %v2791_v53 = vmul.f32 0.2, %v1965_v41  ;;  %v2661_v54 = vmul.f32 0.2, %v1445_v42  ;;  %v3044_v55 = vsel %vm2532_vm2, %v1954_v37, %v2788_v50 }
 0x11d   :  { %v2919_v56 = vsel %vm2407_vm3, %v1453_v38, %v2663_v51  ;;  %v1957_v57 = vadd.f32 %v6212_v49, %v6470_v59  ;;  %v1466_v58 = vadd.f32 %v6496_v12, %v6212_v49  ;;  %v6573_v61 = vpop.f32.mrb[30].mxu0  ;;  %v5101_v62 = vpack.c.bf16 %v3044_v55, %v3044_v55  ;;  %v6575_v2 = vpop.f32.mrb[30].mxu1 }
 0x11e   :  { %4197 = vst.msk [vmem:[%s8261_s3 + $0x50] sm:$0xf] %vm4176_vm1, %v4973_v48  ;;  %v4976_v63 = vpack.c.bf16 %v2919_v56, %v2919_v56  ;;  %v3047_v0 = vsel %vm2535_vm4, %v1965_v41, %v2791_v53  ;;  %v2917_v1 = vsel %vm2405_vm0, %v1445_v42, %v2661_v54  ;;  %v6577_v3 = vpop.f32.mrb[31].mxu0  ;;  %v6579_v59 = vpop.f32.mrb[31].mxu1  ;;  %v1978_v8 = vadd.f32 %v6498_v13, %v6212_v49 }
 0x11f   :  { %v5104_v4 = vpack.c.bf16 %v3047_v0, %v3047_v0  ;;  %v4974_v5 = vpack.c.bf16 %v2917_v1, %v2917_v1  ;;  %vm2533_vm5 = vcmp.ge.f32.partialorder %v1957_v57, 0.0  ;;  %v2789_v6 = vmul.f32 0.2, %v1957_v57  ;;  %4325 = vst.msk [vmem:[%s8261_s3 + $0x250] sm:$0xf] %vm4176_vm1, %v5101_v62 }
 0x120   :  { %4200 = vst.msk [vmem:[%s8261_s3 + $0x5c] sm:$0xf] %vm4176_vm1, %v4976_v63  ;;  %vm2410_vm6 = vcmp.ge.f32.partialorder %v1466_v58, 0.0  ;;  %v2666_v7 = vmul.f32 0.2, %v1466_v58  ;;  %v1458_v9 = vadd.f32 %v6212_v49, %v6510_v20  ;;  %v1970_v11 = vadd.f32 %v6212_v49, %v6512_v21 }
 0x121   :  { %4328 = vst.msk [vmem:[%s8261_s3 + $0x25c] sm:$0xf] %vm4176_vm1, %v5104_v4  ;;  %4198 = vst.msk [vmem:[%s8261_s3 + $0x54] sm:$0xf] %vm4176_vm1, %v4974_v5  ;;  %v3045_v10 = vsel %vm2533_vm5, %v1957_v57, %v2789_v6  ;;  %v1469_v12 = vadd.f32 %v6516_v26, %v6212_v49  ;;  %v1981_v13 = vadd.f32 %v6518_v27, %v6212_v49  ;;  %vm2538_vm7 = vcmp.ge.f32.partialorder %v1978_v8, 0.0  ;;  %v6607_v17 = vpop.f32.mrb[32].mxu0 }
 0x122   :  { %v5102_v14 = vpack.c.bf16 %v3045_v10, %v3045_v10  ;;  %v2922_v15 = vsel %vm2410_vm6, %v1466_v58, %v2666_v7  ;;  %v2794_v16 = vmul.f32 0.2, %v1978_v8  ;;  %v6609_v18 = vpop.f32.mrb[32].mxu1  ;;  %vm2408_vm8 = vcmp.ge.f32.partialorder %v1458_v9, 0.0  ;;  %v6611_v22 = vpop.f32.mrb[33].mxu0 }
 0x123   :  { %v4979_v19 = vpack.c.bf16 %v2922_v15, %v2922_v15  ;;  %v2664_v20 = vmul.f32 0.2, %v1458_v9  ;;  %vm2536_vm9 = vcmp.ge.f32.partialorder %v1970_v11, 0.0  ;;  %v6613_v21 = vpop.f32.mrb[33].mxu1  ;;  %v2792_v24 = vmul.f32 0.2, %v1970_v11 }
 0x124   :  { %4326 = vst.msk [vmem:[%s8261_s3 + $0x254] sm:$0xf] %vm4176_vm1, %v5102_v14  ;;  %v3050_v23 = vsel %vm2538_vm7, %v1978_v8, %v2794_v16  ;;  %vm2411_vm10 = vcmp.ge.f32.partialorder %v1469_v12, 0.0  ;;  %v2667_v25 = vmul.f32 0.2, %v1469_v12  ;;  %v6619_v26 = vpop.f32.mrb[34].mxu0  ;;  %v1461_v37 = vadd.f32 %v6212_v49, %v6521_v31 }
 0x125   :  { %4203 = vst.msk [vmem:[%s8261_s3 + $0x68] sm:$0xf] %vm4176_vm1, %v4979_v19  ;;  %v5107_v27 = vpack.c.bf16 %v3050_v23, %v3050_v23  ;;  %v2920_v28 = vsel %vm2408_vm8, %v1458_v9, %v2664_v20  ;;  %vm2539_vm11 = vcmp.ge.f32.partialorder %v1981_v13, 0.0  ;;  %v2795_v29 = vmul.f32 0.2, %v1981_v13  ;;  %v6625_v30 = vpop.f32.mrb[34].mxu1 }
 0x126   :  { %v6627_v33 = vpop.f32.mrb[35].mxu0  ;;  %v4977_v34 = vpack.c.bf16 %v2920_v28, %v2920_v28  ;;  %v3048_v35 = vsel %vm2536_vm9, %v1970_v11, %v2792_v24  ;;  %v2923_v36 = vsel %vm2411_vm10, %v1469_v12, %v2667_v25  ;;  %v6632_v38 = vpop.f32.mrb[35].mxu1  ;;  %v1973_v42 = vadd.f32 %v6212_v49, %v6523_v32 }
 0x127   :  { %4331 = vst.msk [vmem:[%s8261_s3 + $0x268] sm:$0xf] %vm4176_vm1, %v5107_v27  ;;  %v5105_v39 = vpack.c.bf16 %v3048_v35, %v3048_v35  ;;  %v4980_v40 = vpack.c.bf16 %v2923_v36, %v2923_v36  ;;  %v3051_v41 = vsel %vm2539_vm11, %v1981_v13, %v2795_v29  ;;  %vm2409_vm12 = vcmp.ge.f32.partialorder %v1461_v37, 0.0 }
 0x128   :  { %4201 = vst.msk [vmem:[%s8261_s3 + $0x60] sm:$0xf] %vm4176_vm1, %v4977_v34  ;;  %v5108_v43 = vpack.c.bf16 %v3051_v41, %v3051_v41  ;;  %v2665_v31 = vmul.f32 0.2, %v1461_v37  ;;  %v1482_v44 = vadd.f32 %v6549_v46, %v6212_v49  ;;  %vm2537_vm13 = vcmp.ge.f32.partialorder %v1973_v42, 0.0 }
 0x129   :  { %4329 = vst.msk [vmem:[%s8261_s3 + $0x260] sm:$0xf] %vm4176_vm1, %v5105_v39  ;;  %4204 = vst.msk [vmem:[%s8261_s3 + $0x6c] sm:$0xf] %vm4176_vm1, %v4980_v40  ;;  %v2793_v32 = vmul.f32 0.2, %v1973_v42  ;;  %v1994_v45 = vadd.f32 %v6551_v47, %v6212_v49  ;;  %v1474_v48 = vadd.f32 %v6212_v49, %v6553_v52  ;;  %v1986_v51 = vadd.f32 %v6212_v49, %v6571_v60 }
 0x12a   :  { %4332 = vst.msk [vmem:[%s8261_s3 + $0x26c] sm:$0xf] %vm4176_vm1, %v5108_v43  ;;  %v2921_v46 = vsel %vm2409_vm12, %v1461_v37, %v2665_v31  ;;  %vm2414_vm14 = vcmp.ge.f32.partialorder %v1482_v44, 0.0  ;;  %v2670_v50 = vmul.f32 0.2, %v1482_v44  ;;  %v6664_v53 = vpop.f32.mrb[36].mxu0  ;;  %v1485_v10 = vadd.f32 %v6573_v61, %v6212_v49 }
 0x12b   :  { %v6666_v54 = vpop.f32.mrb[36].mxu1  ;;  %v4978_v55 = vpack.c.bf16 %v2921_v46, %v2921_v46  ;;  %v3049_v47 = vsel %vm2537_vm13, %v1973_v42, %v2793_v32  ;;  %vm2542_vm15 = vcmp.ge.f32.partialorder %v1994_v45, 0.0  ;;  %v2798_v56 = vmul.f32 0.2, %v1994_v45  ;;  %v6668_v52 = vpop.f32.mrb[37].mxu0 }
 0x12c   :  { %v6670_v57 = vpop.f32.mrb[37].mxu1  ;;  %v5106_v58 = vpack.c.bf16 %v3049_v47, %v3049_v47  ;;  %v2926_v62 = vsel %vm2414_vm14, %v1482_v44, %v2670_v50  ;;  %vm2412_vm2 = vcmp.ge.f32.partialorder %v1474_v48, 0.0  ;;  %v2668_v63 = vmul.f32 0.2, %v1474_v48  ;;  %v6672_v0 = vpop.f32.mrb[38].mxu0 }
 0x12d   :  { %v6674_v1 = vpop.f32.mrb[38].mxu1  ;;  %4202 = vst.msk [vmem:[%s8261_s3 + $0x64] sm:$0xf] %vm4176_vm1, %v4978_v55  ;;  %v4983_v60 = vpack.c.bf16 %v2926_v62, %v2926_v62  ;;  %v3054_v4 = vsel %vm2542_vm15, %v1994_v45, %v2798_v56  ;;  %vm2540_vm3 = vcmp.ge.f32.partialorder %v1986_v51, 0.0  ;;  %v2796_v5 = vmul.f32 0.2, %v1986_v51 }
 0x12e   :  { %v6680_v6 = vpop.f32.mrb[39].mxu0  ;;  %v6682_v7 = vpop.f32.mrb[39].mxu1  ;;  %4330 = vst.msk [vmem:[%s8261_s3 + $0x264] sm:$0xf] %vm4176_vm1, %v5106_v58  ;;  %v5111_v8 = vpack.c.bf16 %v3054_v4, %v3054_v4  ;;  %v2924_v9 = vsel %vm2412_vm2, %v1474_v48, %v2668_v63  ;;  %v1997_v11 = vadd.f32 %v6575_v2, %v6212_v49  ;;  %v1477_v14 = vadd.f32 %v6212_v49, %v6577_v3  ;;  %v6748_v31 = vld [vmem:[%s8260_s2] ss:$0 sm:$0xff] }
 0x12f   :  { %4207 = vst.msk [vmem:[%s8261_s3 + $0x78] sm:$0xf] %vm4176_vm1, %v4983_v60  ;;  %v4981_v12 = vpack.c.bf16 %v2924_v9, %v2924_v9  ;;  %v3052_v13 = vsel %vm2540_vm3, %v1986_v51, %v2796_v5  ;;  %v1989_v15 = vadd.f32 %v6212_v49, %v6579_v59  ;;  %vm2415_vm4 = vcmp.ge.f32.partialorder %v1485_v10, 0.0 }
 0x130   :  { %4335 = vst.msk [vmem:[%s8261_s3 + $0x278] sm:$0xf] %vm4176_vm1, %v5111_v8  ;;  %v5109_v61 = vpack.c.bf16 %v3052_v13, %v3052_v13  ;;  %v2671_v2 = vmul.f32 0.2, %v1485_v10  ;;  %vm2543_vm0 = vcmp.ge.f32.partialorder %v1997_v11, 0.0  ;;  %vm2413_vm5 = vcmp.ge.f32.partialorder %v1477_v14, 0.0 }
 0x131   :  { %4205 = vst.msk [vmem:[%s8261_s3 + $0x70] sm:$0xf] %vm4176_vm1, %v4981_v12  ;;  %v2799_v16 = vmul.f32 0.2, %v1997_v11  ;;  %v2669_v3 = vmul.f32 0.2, %v1477_v14  ;;  %v1498_v20 = vadd.f32 %v6607_v17, %v6212_v49  ;;  %v2010_v23 = vadd.f32 %v6609_v18, %v6212_v49 }
 0x132   :  { %vm2541_vm6 = vcmp.ge.f32.partialorder %v1989_v15, 0.0  ;;  %4333 = vst.msk [vmem:[%s8261_s3 + $0x270] sm:$0xf] %vm4176_vm1, %v5109_v61  ;;  %v2927_v59 = vsel %vm2415_vm4, %v1485_v10, %v2671_v2  ;;  %v2797_v19 = vmul.f32 0.2, %v1989_v15  ;;  %v6716_v24 = vpop.f32.mrb[40].mxu0  ;;  %v1490_v34 = vadd.f32 %v6212_v49, %v6611_v22 }
 0x133   :  { %v6718_v25 = vpop.f32.mrb[40].mxu1  ;;  %v4984_v27 = vpack.c.bf16 %v2927_v59, %v2927_v59  ;;  %v3055_v28 = vsel %vm2543_vm0, %v1997_v11, %v2799_v16  ;;  %v2925_v29 = vsel %vm2413_vm5, %v1477_v14, %v2669_v3  ;;  %v6722_v35 = vpop.f32.mrb[41].mxu0  ;;  %vm2418_vm7 = vcmp.ge.f32.partialorder %v1498_v20, 0.0 }
 0x134   :  { %v6724_v36 = vpop.f32.mrb[41].mxu1  ;;  %v5112_v37 = vpack.c.bf16 %v3055_v28, %v3055_v28  ;;  %v4982_v39 = vpack.c.bf16 %v2925_v29, %v2925_v29  ;;  %v3053_v17 = vsel %vm2541_vm6, %v1989_v15, %v2797_v19  ;;  %v6727_v18 = vpop.f32.mrb[42].mxu0  ;;  %v2674_v49 = vmul.f32 0.2, %v1498_v20 }
 0x135   :  { %v6729_v40 = vpop.f32.mrb[42].mxu1  ;;  %4208 = vst.msk [vmem:[%s8261_s3 + $0x7c] sm:$0xf] %vm4176_vm1, %v4984_v27  ;;  %v5110_v41 = vpack.c.bf16 %v3053_v17, %v3053_v17  ;;  %vm2546_vm8 = vcmp.ge.f32.partialorder %v2010_v23, 0.0  ;;  %v2802_v22 = vmul.f32 0.2, %v2010_v23  ;;  %v2002_v44 = vadd.f32 %v6748_v31, %v6613_v21 }
 0x136   :  { %v6735_v42 = vpop.f32.mrb[43].mxu0  ;;  %4336 = vst.msk [vmem:[%s8261_s3 + $0x27c] sm:$0xf] %vm4176_vm1, %v5112_v37  ;;  %4206 = vst.msk [vmem:[%s8261_s3 + $0x74] sm:$0xf] %vm4176_vm1, %v4982_v39  ;;  %vm2416_vm9 = vcmp.ge.f32.partialorder %v1490_v34, 0.0  ;;  %v1501_v32 = vadd.f32 %v6748_v31, %v6619_v26  ;;  %v2930_v48 = vsel %vm2418_vm7, %v1498_v20, %v2674_v49  ;;  %v2013_v50 = vadd.f32 %v6748_v31, %v6625_v30 }
 0x137   :  { %v2672_v43 = vmul.f32 0.2, %v1490_v34  ;;  %v6754_v45 = vpop.f32.mrb[43].mxu1  ;;  %4334 = vst.msk [vmem:[%s8261_s3 + $0x274] sm:$0xf] %vm4176_vm1, %v5110_v41  ;;  %v3058_v46 = vsel %vm2546_vm8, %v2010_v23, %v2802_v22  ;;  %v1493_v51 = vadd.f32 %v6748_v31, %v6627_v33  ;;  %v4987_v21 = vpack.c.bf16 %v2930_v48, %v2930_v48 }
 0x138   :  { %v5115_v55 = vpack.c.bf16 %v3058_v46, %v3058_v46  ;;  %vm2544_vm10 = vcmp.ge.f32.partialorder %v2002_v44, 0.0  ;;  %v2800_v56 = vmul.f32 0.2, %v2002_v44  ;;  %vm2419_vm11 = vcmp.ge.f32.partialorder %v1501_v32, 0.0 }
 0x139   :  { %v2928_v47 = vsel %vm2416_vm9, %v1490_v34, %v2672_v43  ;;  %v2675_v58 = vmul.f32 0.2, %v1501_v32  ;;  %4211 = vst.msk [vmem:[%s8261_s3 + $0x88] sm:$0xf] %vm4176_vm1, %v4987_v21  ;;  %vm2547_vm12 = vcmp.ge.f32.partialorder %v2013_v50, 0.0  ;;  %vm2417_vm13 = vcmp.ge.f32.partialorder %v1493_v51, 0.0 }
 0x13a   :  { %v4985_v26 = vpack.c.bf16 %v2928_v47, %v2928_v47  ;;  %4339 = vst.msk [vmem:[%s8261_s3 + $0x288] sm:$0xf] %vm4176_vm1, %v5115_v55  ;;  %v2803_v30 = vmul.f32 0.2, %v2013_v50  ;;  %v2673_v33 = vmul.f32 0.2, %v1493_v51  ;;  %v3056_v62 = vsel %vm2544_vm10, %v2002_v44, %v2800_v56 }
 0x13b   :  { %v2931_v63 = vsel %vm2419_vm11, %v1501_v32, %v2675_v58  ;;  %v2005_v60 = vadd.f32 %v6748_v31, %v6632_v38  ;;  %v1514_v4 = vadd.f32 %v6748_v31, %v6664_v53  ;;  %v6781_v5 = vpop.f32.mrb[44].mxu0  ;;  %v6783_v8 = vpop.f32.mrb[44].mxu1  ;;  %v5113_v9 = vpack.c.bf16 %v3056_v62, %v3056_v62 }
 0x13c   :  { %4209 = vst.msk [vmem:[%s8261_s3 + $0x80] sm:$0xf] %vm4176_vm1, %v4985_v26  ;;  %v4988_v10 = vpack.c.bf16 %v2931_v63, %v2931_v63  ;;  %v3059_v11 = vsel %vm2547_vm12, %v2013_v50, %v2803_v30  ;;  %v2929_v12 = vsel %vm2417_vm13, %v1493_v51, %v2673_v33  ;;  %v6785_v13 = vpop.f32.mrb[45].mxu0  ;;  %v6787_v14 = vpop.f32.mrb[45].mxu1  ;;  %v2026_v3 = vadd.f32 %v6748_v31, %v6666_v54 }
 0x13d   :  { %v5116_v15 = vpack.c.bf16 %v3059_v11, %v3059_v11  ;;  %v4986_v61 = vpack.c.bf16 %v2929_v12, %v2929_v12  ;;  %vm2545_vm14 = vcmp.ge.f32.partialorder %v2005_v60, 0.0  ;;  %v2801_v2 = vmul.f32 0.2, %v2005_v60  ;;  %v6789_v38 = vpop.f32.mrb[46].mxu0  ;;  %v6791_v16 = vpop.f32.mrb[46].mxu1 }
 0x13e   :  { %4337 = vst.msk [vmem:[%s8261_s3 + $0x280] sm:$0xf] %vm4176_vm1, %v5113_v9  ;;  %4212 = vst.msk [vmem:[%s8261_s3 + $0x8c] sm:$0xf] %vm4176_vm1, %v4988_v10  ;;  %vm2422_vm15 = vcmp.ge.f32.partialorder %v1514_v4, 0.0  ;;  %v1506_v59 = vadd.f32 %v6748_v31, %v6668_v52  ;;  %v6805_v19 = vpop.f32.mrb[47].mxu0  ;;  %v2018_v54 = vadd.f32 %v6748_v31, %v6670_v57  ;;  %v1517_v52 = vadd.f32 %v6748_v31, %v6672_v0 }
 0x13f   :  { %v2678_v53 = vmul.f32 0.2, %v1514_v4  ;;  %v6807_v20 = vpop.f32.mrb[47].mxu1  ;;  %4340 = vst.msk [vmem:[%s8261_s3 + $0x28c] sm:$0xf] %vm4176_vm1, %v5116_v15  ;;  %v3057_v23 = vsel %vm2545_vm14, %v2005_v60, %v2801_v2  ;;  %v2029_v27 = vadd.f32 %v6748_v31, %v6674_v1  ;;  %vm2550_vm2 = vcmp.ge.f32.partialorder %v2026_v3, 0.0 }
 0x140   :  { %4210 = vst.msk [vmem:[%s8261_s3 + $0x84] sm:$0xf] %vm4176_vm1, %v4986_v61  ;;  %v5114_v28 = vpack.c.bf16 %v3057_v23, %v3057_v23  ;;  %v2806_v34 = vmul.f32 0.2, %v2026_v3  ;;  %vm2420_vm3 = vcmp.ge.f32.partialorder %v1506_v59, 0.0  ;;  %vm2548_vm4 = vcmp.ge.f32.partialorder %v2018_v54, 0.0 }
 0x141   :  { %v2934_v29 = vsel %vm2422_vm15, %v1514_v4, %v2678_v53  ;;  %v2676_v39 = vmul.f32 0.2, %v1506_v59  ;;  %v2804_v17 = vmul.f32 0.2, %v2018_v54  ;;  %vm2423_vm0 = vcmp.ge.f32.partialorder %v1517_v52, 0.0  ;;  %v6827_v41 = vpop.f32.mrb[48].mxu0 }
 0x142   :  { %v4991_v37 = vpack.c.bf16 %v2934_v29, %v2934_v29  ;;  %4338 = vst.msk [vmem:[%s8261_s3 + $0x284] sm:$0xf] %vm4176_vm1, %v5114_v28  ;;  %v3062_v57 = vsel %vm2550_vm2, %v2026_v3, %v2806_v34  ;;  %v2679_v0 = vmul.f32 0.2, %v1517_v52  ;;  %vm2551_vm5 = vcmp.ge.f32.partialorder %v2029_v27, 0.0  ;;  %v6833_v43 = vpop.f32.mrb[48].mxu1 }
 0x143   :  { %v5119_v1 = vpack.c.bf16 %v3062_v57, %v3062_v57  ;;  %v2932_v49 = vsel %vm2420_vm3, %v1506_v59, %v2676_v39  ;;  %v2807_v22 = vmul.f32 0.2, %v2029_v27  ;;  %v6835_v44 = vpop.f32.mrb[49].mxu0  ;;  %v3060_v48 = vsel %vm2548_vm4, %v2018_v54, %v2804_v17  ;;  %v6839_v51 = vpop.f32.mrb[49].mxu1 }
 0x144   :  { %4215 = vst.msk [vmem:[%s8261_s3 + $0x98] sm:$0xf] %vm4176_vm1, %v4991_v37  ;;  %v4989_v32 = vpack.c.bf16 %v2932_v49, %v2932_v49  ;;  %v2935_v46 = vsel %vm2423_vm0, %v1517_v52, %v2679_v0  ;;  %v1509_v50 = vadd.f32 %v6748_v31, %v6680_v6  ;;  %v6841_v21 = vpop.f32.mrb[50].mxu0  ;;  %v5117_v55 = vpack.c.bf16 %v3060_v48, %v3060_v48  ;;  %v6849_v58 = vpop.f32.mrb[50].mxu1 }
 0x145   :  { %4343 = vst.msk [vmem:[%s8261_s3 + $0x298] sm:$0xf] %vm4176_vm1, %v5119_v1  ;;  %v4992_v47 = vpack.c.bf16 %v2935_v46, %v2935_v46  ;;  %v3063_v26 = vsel %vm2551_vm5, %v2029_v27, %v2807_v22  ;;  %v2021_v56 = vadd.f32 %v6748_v31, %v6682_v7  ;;  %v6851_v30 = vpop.f32.mrb[51].mxu0  ;;  %v1530_v62 = vadd.f32 %v6748_v31, %v6716_v24  ;;  %v6859_v63 = vpop.f32.mrb[51].mxu1 }
 0x146   :  { %4213 = vst.msk [vmem:[%s8261_s3 + $0x90] sm:$0xf] %vm4176_vm1, %v4989_v32  ;;  %v5120_v6 = vpack.c.bf16 %v3063_v26, %v3063_v26  ;;  %vm2421_vm6 = vcmp.ge.f32.partialorder %v1509_v50, 0.0  ;;  %v2677_v33 = vmul.f32 0.2, %v1509_v50  ;;  %v2042_v60 = vadd.f32 %v6748_v31, %v6718_v25 }
 0x147   :  { %4341 = vst.msk [vmem:[%s8261_s3 + $0x290] sm:$0xf] %vm4176_vm1, %v5117_v55  ;;  %4216 = vst.msk [vmem:[%s8261_s3 + $0x9c] sm:$0xf] %vm4176_vm1, %v4992_v47  ;;  %vm2549_vm7 = vcmp.ge.f32.partialorder %v2021_v56, 0.0  ;;  %v1522_v24 = vadd.f32 %v6748_v31, %v6722_v35  ;;  %vm2426_vm8 = vcmp.ge.f32.partialorder %v1530_v62, 0.0  ;;  %v2034_v10 = vadd.f32 %v6748_v31, %v6724_v36 }
 0x148   :  { %v2805_v7 = vmul.f32 0.2, %v2021_v56  ;;  %4344 = vst.msk [vmem:[%s8261_s3 + $0x29c] sm:$0xf] %vm4176_vm1, %v5120_v6  ;;  %v2933_v4 = vsel %vm2421_vm6, %v1509_v50, %v2677_v33  ;;  %v2682_v9 = vmul.f32 0.2, %v1530_v62  ;;  %v1533_v28 = vadd.f32 %v6748_v31, %v6727_v18 }
 0x149   :  { %v4990_v11 = vpack.c.bf16 %v2933_v4, %v2933_v4  ;;  %vm2554_vm9 = vcmp.ge.f32.partialorder %v2042_v60, 0.0  ;;  %v2810_v15 = vmul.f32 0.2, %v2042_v60  ;;  %vm2424_vm10 = vcmp.ge.f32.partialorder %v1522_v24, 0.0  ;;  %v6879_v35 = vpop.f32.mrb[52].mxu0  ;;  %v6881_v53 = vpop.f32.mrb[52].mxu1 }
 0x14a   :  { %v3061_v12 = vsel %vm2549_vm7, %v2021_v56, %v2805_v7  ;;  %v2938_v25 = vsel %vm2426_vm8, %v1530_v62, %v2682_v9  ;;  %v2680_v2 = vmul.f32 0.2, %v1522_v24  ;;  %vm2552_vm11 = vcmp.ge.f32.partialorder %v2034_v10, 0.0  ;;  %v6887_v23 = vpop.f32.mrb[53].mxu0  ;;  %v6889_v54 = vpop.f32.mrb[53].mxu1 }
 0x14b   :  { %v5118_v61 = vpack.c.bf16 %v3061_v12, %v3061_v12  ;;  %4214 = vst.msk [vmem:[%s8261_s3 + $0x94] sm:$0xf] %vm4176_vm1, %v4990_v11  ;;  %v4995_v3 = vpack.c.bf16 %v2938_v25, %v2938_v25  ;;  %v3066_v59 = vsel %vm2554_vm9, %v2042_v60, %v2810_v15  ;;  %v2808_v36 = vmul.f32 0.2, %v2034_v10  ;;  %v6899_v34 = vpop.f32.mrb[54].mxu0  ;;  %v6901_v37 = vpop.f32.mrb[54].mxu1 }
 0x14c   :  { %v5123_v52 = vpack.c.bf16 %v3066_v59, %v3066_v59  ;;  %v2936_v27 = vsel %vm2424_vm10, %v1522_v24, %v2680_v2  ;;  %v2045_v29 = vadd.f32 %v6748_v31, %v6729_v40  ;;  %v1525_v17 = vadd.f32 %v6748_v31, %v6735_v42  ;;  %v6911_v0 = vpop.f32.mrb[55].mxu0  ;;  %v6913_v40 = vpop.f32.mrb[55].mxu1 }
 0x14d   :  { %4342 = vst.msk [vmem:[%s8261_s3 + $0x294] sm:$0xf] %vm4176_vm1, %v5118_v61  ;;  %4219 = vst.msk [vmem:[%s8261_s3 + $0xa8] sm:$0xf] %vm4176_vm1, %v4995_v3  ;;  %v4993_v39 = vpack.c.bf16 %v2936_v27, %v2936_v27  ;;  %v3064_v57 = vsel %vm2552_vm11, %v2034_v10, %v2808_v36  ;;  %v2037_v18 = vadd.f32 %v6748_v31, %v6754_v45  ;;  %vm2427_vm12 = vcmp.ge.f32.partialorder %v1533_v28, 0.0 }
 0x14e   :  { %4347 = vst.msk [vmem:[%s8261_s3 + $0x2a8] sm:$0xf] %vm4176_vm1, %v5123_v52  ;;  %v5121_v1 = vpack.c.bf16 %v3064_v57, %v3064_v57  ;;  %v2683_v49 = vmul.f32 0.2, %v1533_v28  ;;  %vm2555_vm13 = vcmp.ge.f32.partialorder %v2045_v29, 0.0  ;;  %vm2425_vm14 = vcmp.ge.f32.partialorder %v1525_v17, 0.0 }
 0x14f   :  { %4217 = vst.msk [vmem:[%s8261_s3 + $0xa0] sm:$0xf] %vm4176_vm1, %v4993_v39  ;;  %v2811_v42 = vmul.f32 0.2, %v2045_v29  ;;  %v2681_v45 = vmul.f32 0.2, %v1525_v17  ;;  %v1546_v48 = vadd.f32 %v6748_v31, %v6781_v5  ;;  %v2058_v46 = vadd.f32 %v6748_v31, %v6783_v8 }
 0x150   :  { %vm2553_vm15 = vcmp.ge.f32.partialorder %v2037_v18, 0.0  ;;  %4345 = vst.msk [vmem:[%s8261_s3 + $0x2a0] sm:$0xf] %vm4176_vm1, %v5121_v1  ;;  %v2939_v22 = vsel %vm2427_vm12, %v1533_v28, %v2683_v49  ;;  %v2809_v32 = vmul.f32 0.2, %v2037_v18  ;;  %v1538_v26 = vadd.f32 %v6748_v31, %v6785_v13 }
 0x151   :  { %v4996_v50 = vpack.c.bf16 %v2939_v22, %v2939_v22  ;;  %v3067_v55 = vsel %vm2555_vm13, %v2045_v29, %v2811_v42  ;;  %v2937_v47 = vsel %vm2425_vm14, %v1525_v17, %v2681_v45  ;;  %vm2430_vm2 = vcmp.ge.f32.partialorder %v1546_v48, 0.0  ;;  %v6933_v62 = vpop.f32.mrb[56].mxu0  ;;  %v6935_v7 = vpop.f32.mrb[56].mxu1 }
 0x152   :  { %v5124_v56 = vpack.c.bf16 %v3067_v55, %v3067_v55  ;;  %v4994_v6 = vpack.c.bf16 %v2937_v47, %v2937_v47  ;;  %v3065_v33 = vsel %vm2553_vm15, %v2037_v18, %v2809_v32  ;;  %v2686_v8 = vmul.f32 0.2, %v1546_v48  ;;  %v6941_v24 = vpop.f32.mrb[57].mxu0  ;;  %v6955_v10 = vpop.f32.mrb[57].mxu1 }
 0x153   :  { %4220 = vst.msk [vmem:[%s8261_s3 + $0xac] sm:$0xf] %vm4176_vm1, %v4996_v50  ;;  %v5122_v5 = vpack.c.bf16 %v3065_v33, %v3065_v33  ;;  %vm2558_vm3 = vcmp.ge.f32.partialorder %v2058_v46, 0.0  ;;  %v2814_v60 = vmul.f32 0.2, %v2058_v46  ;;  %vm2428_vm4 = vcmp.ge.f32.partialorder %v1538_v26, 0.0 }
 0x154   :  { %4348 = vst.msk [vmem:[%s8261_s3 + $0x2ac] sm:$0xf] %vm4176_vm1, %v5124_v56  ;;  %4218 = vst.msk [vmem:[%s8261_s3 + $0xa4] sm:$0xf] %vm4176_vm1, %v4994_v6  ;;  %v2684_v13 = vmul.f32 0.2, %v1538_v26  ;;  %v2050_v4 = vadd.f32 %v6748_v31, %v6787_v14  ;;  %v1549_v9 = vadd.f32 %v6748_v31, %v6789_v38  ;;  %v2942_v12 = vsel %vm2430_vm2, %v1546_v48, %v2686_v8 }
 0x155   :  { %v6957_v11 = vpop.f32.mrb[58].mxu0  ;;  %4346 = vst.msk [vmem:[%s8261_s3 + $0x2a4] sm:$0xf] %vm4176_vm1, %v5122_v5  ;;  %v3070_v15 = vsel %vm2558_vm3, %v2058_v46, %v2814_v60  ;;  %v2061_v61 = vadd.f32 %v6748_v31, %v6791_v16  ;;  %v1541_v14 = vadd.f32 %v6748_v31, %v6805_v19  ;;  %v6968_v25 = vpop.f32.mrb[58].mxu1  ;;  %v4999_v2 = vpack.c.bf16 %v2942_v12, %v2942_v12 }
 0x156   :  { %v6970_v38 = vpop.f32.mrb[59].mxu0  ;;  %v5127_v3 = vpack.c.bf16 %v3070_v15, %v3070_v15  ;;  %v2940_v59 = vsel %vm2428_vm4, %v1538_v26, %v2684_v13  ;;  %vm2556_vm0 = vcmp.ge.f32.partialorder %v2050_v4, 0.0  ;;  %v6972_v36 = vpop.f32.mrb[59].mxu1  ;;  %v2812_v27 = vmul.f32 0.2, %v2050_v4 }
 0x157   :  { %v4997_v52 = vpack.c.bf16 %v2940_v59, %v2940_v59  ;;  %vm2431_vm5 = vcmp.ge.f32.partialorder %v1549_v9, 0.0  ;;  %v2687_v28 = vmul.f32 0.2, %v1549_v9  ;;  %4223 = vst.msk [vmem:[%s8261_s3 + $0xb8] sm:$0xf] %vm4176_vm1, %v4999_v2  ;;  %vm2559_vm6 = vcmp.ge.f32.partialorder %v2061_v61, 0.0 }
 0x158   :  { %4351 = vst.msk [vmem:[%s8261_s3 + $0x2b8] sm:$0xf] %vm4176_vm1, %v5127_v3  ;;  %v2815_v16 = vmul.f32 0.2, %v2061_v61  ;;  %vm2429_vm7 = vcmp.ge.f32.partialorder %v1541_v14, 0.0  ;;  %v3068_v29 = vsel %vm2556_vm0, %v2050_v4, %v2812_v27  ;;  %v2053_v57 = vadd.f32 %v6748_v31, %v6807_v20 }
 0x159   :  { %v2685_v19 = vmul.f32 0.2, %v1541_v14  ;;  %4221 = vst.msk [vmem:[%s8261_s3 + $0xb0] sm:$0xf] %vm4176_vm1, %v4997_v52  ;;  %v2943_v39 = vsel %vm2431_vm5, %v1549_v9, %v2687_v28  ;;  %v1562_v17 = vadd.f32 %v6748_v31, %v6827_v41  ;;  %v5125_v18 = vpack.c.bf16 %v3068_v29, %v3068_v29  ;;  %v6990_v45 = vpop.f32.mrb[60].mxu0  ;;  %v6992_v22 = vpop.f32.mrb[60].mxu1 }
 0x15a   :  { %v5000_v1 = vpack.c.bf16 %v2943_v39, %v2943_v39  ;;  %v3071_v49 = vsel %vm2559_vm6, %v2061_v61, %v2815_v16  ;;  %vm2557_vm8 = vcmp.ge.f32.partialorder %v2053_v57, 0.0  ;;  %v2813_v46 = vmul.f32 0.2, %v2053_v57  ;;  %v6994_v50 = vpop.f32.mrb[61].mxu0  ;;  %v6996_v55 = vpop.f32.mrb[61].mxu1 }
 0x15b   :  { %v2941_v42 = vsel %vm2429_vm7, %v1541_v14, %v2685_v19  ;;  %v5128_v32 = vpack.c.bf16 %v3071_v49, %v3071_v49  ;;  %4349 = vst.msk [vmem:[%s8261_s3 + $0x2b0] sm:$0xf] %vm4176_vm1, %v5125_v18  ;;  %vm2434_vm9 = vcmp.ge.f32.partialorder %v1562_v17, 0.0  ;;  %v2690_v20 = vmul.f32 0.2, %v1562_v17  ;;  %v7010_v26 = vpop.f32.mrb[62].mxu0 }
 0x15c   :  { %v4998_v48 = vpack.c.bf16 %v2941_v42, %v2941_v42  ;;  %4224 = vst.msk [vmem:[%s8261_s3 + $0xbc] sm:$0xf] %vm4176_vm1, %v5000_v1  ;;  %v2074_v41 = vadd.f32 %v6748_v31, %v6833_v43  ;;  %v1554_v47 = vadd.f32 %v6748_v31, %v6835_v44  ;;  %v7012_v56 = vpop.f32.mrb[62].mxu1  ;;  %v3069_v6 = vsel %vm2557_vm8, %v2053_v57, %v2813_v46  ;;  %v7028_v5 = vpop.f32.mrb[63].mxu0 }
 0x15d   :  { %4352 = vst.msk [vmem:[%s8261_s3 + $0x2bc] sm:$0xf] %vm4176_vm1, %v5128_v32  ;;  %v2066_v43 = vadd.f32 %v6748_v31, %v6839_v51  ;;  %v1565_v44 = vadd.f32 %v6748_v31, %v6841_v21  ;;  %v2077_v33 = vadd.f32 %v6748_v31, %v6849_v58  ;;  %v7030_v8 = vpop.f32.mrb[63].mxu1  ;;  %v5126_v60 = vpack.c.bf16 %v3069_v6, %v3069_v6 }
 0x15e   :  { %4222 = vst.msk [vmem:[%s8261_s3 + $0xb4] sm:$0xf] %vm4176_vm1, %v4998_v48  ;;  %v2946_v13 = vsel %vm2434_vm9, %v1562_v17, %v2690_v20  ;;  %vm2562_vm10 = vcmp.ge.f32.partialorder %v2074_v41, 0.0  ;;  %v2818_v4 = vmul.f32 0.2, %v2074_v41  ;;  %vm2432_vm11 = vcmp.ge.f32.partialorder %v1554_v47, 0.0 }
 0x15f   :  { %v5003_v9 = vpack.c.bf16 %v2946_v13, %v2946_v13  ;;  %v2688_v12 = vmul.f32 0.2, %v1554_v47  ;;  %vm2560_vm12 = vcmp.ge.f32.partialorder %v2066_v43, 0.0  ;;  %4350 = vst.msk [vmem:[%s8261_s3 + $0x2b4] sm:$0xf] %vm4176_vm1, %v5126_v60  ;;  %vm2435_vm13 = vcmp.ge.f32.partialorder %v1565_v44, 0.0 }
 0x160   :  { %v3074_v51 = vsel %vm2562_vm10, %v2074_v41, %v2818_v4  ;;  %v2816_v21 = vmul.f32 0.2, %v2066_v43  ;;  %v2691_v58 = vmul.f32 0.2, %v1565_v44  ;;  %vm2563_vm14 = vcmp.ge.f32.partialorder %v2077_v33, 0.0 }
 0x161   :  { %4227 = vst.msk [vmem:[%s8261_s3 + $0xc8] sm:$0xf] %vm4176_vm1, %v5003_v9  ;;  %v5131_v15 = vpack.c.bf16 %v3074_v51, %v3074_v51  ;;  %v2944_v61 = vsel %vm2432_vm11, %v1554_v47, %v2688_v12  ;;  %v2819_v14 = vmul.f32 0.2, %v2077_v33  ;;  %v1557_v52 = vadd.f32 %v6748_v31, %v6851_v30  ;;  %v7042_v27 = vpop.f32.mrb[64].mxu0  ;;  %v7044_v28 = vpop.f32.mrb[64].mxu1 }
 0x162   :  { %v5001_v2 = vpack.c.bf16 %v2944_v61, %v2944_v61  ;;  %v3072_v3 = vsel %vm2560_vm12, %v2066_v43, %v2816_v21  ;;  %v2947_v59 = vsel %vm2435_vm13, %v1565_v44, %v2691_v58  ;;  %v2069_v39 = vadd.f32 %v6748_v31, %v6859_v63  ;;  %v7052_v57 = vpop.f32.mrb[65].mxu0  ;;  %v7054_v17 = vpop.f32.mrb[65].mxu1 }
 0x163   :  { %4355 = vst.msk [vmem:[%s8261_s3 + $0x2c8] sm:$0xf] %vm4176_vm1, %v5131_v15  ;;  %v5129_v16 = vpack.c.bf16 %v3072_v3, %v3072_v3  ;;  %v5004_v19 = vpack.c.bf16 %v2947_v59, %v2947_v59  ;;  %v3075_v29 = vsel %vm2563_vm14, %v2077_v33, %v2819_v14  ;;  %vm2433_vm15 = vcmp.ge.f32.partialorder %v1557_v52, 0.0  ;;  %v7062_v49 = vpop.f32.mrb[66].mxu0  ;;  %v7064_v42 = vpop.f32.mrb[66].mxu1 }
 0x164   :  { %4225 = vst.msk [vmem:[%s8261_s3 + $0xc0] sm:$0xf] %vm4176_vm1, %v5001_v2  ;;  %v5132_v30 = vpack.c.bf16 %v3075_v29, %v3075_v29  ;;  %v2689_v18 = vmul.f32 0.2, %v1557_v52  ;;  %v1578_v1 = vadd.f32 %v6748_v31, %v6879_v35  ;;  %vm2561_vm2 = vcmp.ge.f32.partialorder %v2069_v39, 0.0  ;;  %v7078_v48 = vpop.f32.mrb[67].mxu0 }
 0x165   :  { %4353 = vst.msk [vmem:[%s8261_s3 + $0x2c0] sm:$0xf] %vm4176_vm1, %v5129_v16  ;;  %4228 = vst.msk [vmem:[%s8261_s3 + $0xcc] sm:$0xf] %vm4176_vm1, %v5004_v19  ;;  %v2817_v63 = vmul.f32 0.2, %v2069_v39  ;;  %v2090_v32 = vadd.f32 %v6748_v31, %v6881_v53  ;;  %v1570_v35 = vadd.f32 %v6748_v31, %v6887_v23  ;;  %v2082_v47 = vadd.f32 %v6748_v31, %v6889_v54 }
 0x166   :  { %v7080_v46 = vpop.f32.mrb[67].mxu1  ;;  %4356 = vst.msk [vmem:[%s8261_s3 + $0x2cc] sm:$0xf] %vm4176_vm1, %v5132_v30  ;;  %v2945_v20 = vsel %vm2433_vm15, %v1557_v52, %v2689_v18  ;;  %vm2438_vm3 = vcmp.ge.f32.partialorder %v1578_v1, 0.0  ;;  %v2694_v41 = vmul.f32 0.2, %v1578_v1  ;;  %v1581_v12 = vadd.f32 %v6748_v31, %v6899_v34 }
 0x167   :  { %v5002_v6 = vpack.c.bf16 %v2945_v20, %v2945_v20  ;;  %v3073_v53 = vsel %vm2561_vm2, %v2069_v39, %v2817_v63  ;;  %vm2566_vm4 = vcmp.ge.f32.partialorder %v2090_v32, 0.0  ;;  %v2822_v43 = vmul.f32 0.2, %v2090_v32 }
 0x168   :  { %v5130_v23 = vpack.c.bf16 %v3073_v53, %v3073_v53  ;;  %v2950_v44 = vsel %vm2438_vm3, %v1578_v1, %v2694_v41  ;;  %vm2436_vm0 = vcmp.ge.f32.partialorder %v1570_v35, 0.0  ;;  %v2692_v33 = vmul.f32 0.2, %v1570_v35 }
 0x169   :  { %4226 = vst.msk [vmem:[%s8261_s3 + $0xc4] sm:$0xf] %vm4176_vm1, %v5002_v6  ;;  %v5007_v60 = vpack.c.bf16 %v2950_v44, %v2950_v44  ;;  %v3078_v13 = vsel %vm2566_vm4, %v2090_v32, %v2822_v43  ;;  %vm2564_vm5 = vcmp.ge.f32.partialorder %v2082_v47, 0.0  ;;  %v2820_v4 = vmul.f32 0.2, %v2082_v47  ;;  %v7100_v21 = vpop.f32.mrb[68].mxu0 }
 0x16a   :  { %4354 = vst.msk [vmem:[%s8261_s3 + $0x2c4] sm:$0xf] %vm4176_vm1, %v5130_v23  ;;  %v5135_v54 = vpack.c.bf16 %v3078_v13, %v3078_v13  ;;  %v2948_v9 = vsel %vm2436_vm0, %v1570_v35, %v2692_v33  ;;  %v2093_v51 = vadd.f32 %v6748_v31, %v6901_v37  ;;  %v7102_v58 = vpop.f32.mrb[68].mxu1  ;;  %v1573_v14 = vadd.f32 %v6748_v31, %v6911_v0  ;;  %v7112_v2 = vpop.f32.mrb[69].mxu0 }
 0x16b   :  { %4231 = vst.msk [vmem:[%s8261_s3 + $0xd8] sm:$0xf] %vm4176_vm1, %v5007_v60  ;;  %v5005_v15 = vpack.c.bf16 %v2948_v9, %v2948_v9  ;;  %v3076_v61 = vsel %vm2564_vm5, %v2082_v47, %v2820_v4  ;;  %v2085_v34 = vadd.f32 %v6748_v31, %v6913_v40  ;;  %v7114_v37 = vpop.f32.mrb[69].mxu1  ;;  %vm2439_vm6 = vcmp.ge.f32.partialorder %v1581_v12, 0.0  ;;  %v7120_v52 = vpop.f32.mrb[70].mxu0 }
 0x16c   :  { %4359 = vst.msk [vmem:[%s8261_s3 + $0x2d8] sm:$0xf] %vm4176_vm1, %v5135_v54  ;;  %v5133_v3 = vpack.c.bf16 %v3076_v61, %v3076_v61  ;;  %v2695_v59 = vmul.f32 0.2, %v1581_v12  ;;  %vm2567_vm7 = vcmp.ge.f32.partialorder %v2093_v51, 0.0  ;;  %v7122_v16 = vpop.f32.mrb[70].mxu1  ;;  %v1594_v39 = vadd.f32 %v6748_v31, %v6933_v62 }
 0x16d   :  { %4229 = vst.msk [vmem:[%s8261_s3 + $0xd0] sm:$0xf] %vm4176_vm1, %v5005_v15  ;;  %v2823_v0 = vmul.f32 0.2, %v2093_v51  ;;  %vm2437_vm8 = vcmp.ge.f32.partialorder %v1573_v14, 0.0  ;;  %vm2565_vm9 = vcmp.ge.f32.partialorder %v2085_v34, 0.0  ;;  %v2106_v30 = vadd.f32 %v6748_v31, %v6935_v7 }
 0x16e   :  { %v2693_v40 = vmul.f32 0.2, %v1573_v14  ;;  %4357 = vst.msk [vmem:[%s8261_s3 + $0x2d0] sm:$0xf] %vm4176_vm1, %v5133_v3  ;;  %v2951_v19 = vsel %vm2439_vm6, %v1581_v12, %v2695_v59  ;;  %v2821_v29 = vmul.f32 0.2, %v2085_v34  ;;  %v1586_v20 = vadd.f32 %v6748_v31, %v6941_v24 }
 0x16f   :  { %v7136_v18 = vpop.f32.mrb[71].mxu0  ;;  %v7138_v1 = vpop.f32.mrb[71].mxu1  ;;  %v5008_v63 = vpack.c.bf16 %v2951_v19, %v2951_v19  ;;  %v3079_v32 = vsel %vm2567_vm7, %v2093_v51, %v2823_v0  ;;  %vm2442_vm10 = vcmp.ge.f32.partialorder %v1594_v39, 0.0  ;;  %v2698_v7 = vmul.f32 0.2, %v1594_v39 }
 0x170   :  { %v2949_v35 = vsel %vm2437_vm8, %v1573_v14, %v2693_v40  ;;  %v5136_v41 = vpack.c.bf16 %v3079_v32, %v3079_v32  ;;  %v3077_v6 = vsel %vm2565_vm9, %v2085_v34, %v2821_v29  ;;  %vm2570_vm11 = vcmp.ge.f32.partialorder %v2106_v30, 0.0 }
 0x171   :  { %v5006_v47 = vpack.c.bf16 %v2949_v35, %v2949_v35  ;;  %4232 = vst.msk [vmem:[%s8261_s3 + $0xdc] sm:$0xf] %vm4176_vm1, %v5008_v63  ;;  %v5134_v62 = vpack.c.bf16 %v3077_v6, %v3077_v6  ;;  %v2826_v53 = vmul.f32 0.2, %v2106_v30  ;;  %vm2440_vm12 = vcmp.ge.f32.partialorder %v1586_v20, 0.0  ;;  %v7159_v44 = vpop.f32.mrb[72].mxu0 }
 0x172   :  { %4360 = vst.msk [vmem:[%s8261_s3 + $0x2dc] sm:$0xf] %vm4176_vm1, %v5136_v41  ;;  %v2696_v24 = vmul.f32 0.2, %v1586_v20  ;;  %v2098_v43 = vadd.f32 %v6748_v31, %v6955_v10  ;;  %v1597_v23 = vadd.f32 %v6748_v31, %v6957_v11  ;;  %v7161_v33 = vpop.f32.mrb[72].mxu1  ;;  %v2954_v60 = vsel %vm2442_vm10, %v1594_v39, %v2698_v7  ;;  %v7171_v54 = vpop.f32.mrb[73].mxu0 }
 0x173   :  { %4230 = vst.msk [vmem:[%s8261_s3 + $0xd4] sm:$0xf] %vm4176_vm1, %v5006_v47  ;;  %4358 = vst.msk [vmem:[%s8261_s3 + $0x2d4] sm:$0xf] %vm4176_vm1, %v5134_v62  ;;  %v3082_v13 = vsel %vm2570_vm11, %v2106_v30, %v2826_v53  ;;  %v2109_v4 = vadd.f32 %v6748_v31, %v6968_v25  ;;  %v1589_v10 = vadd.f32 %v6748_v31, %v6970_v38  ;;  %v7173_v11 = vpop.f32.mrb[73].mxu1  ;;  %v7175_v15 = vpop.f32.mrb[74].mxu0 }
 0x174   :  { %v5011_v9 = vpack.c.bf16 %v2954_v60, %v2954_v60  ;;  %v5139_v12 = vpack.c.bf16 %v3082_v13, %v3082_v13  ;;  %v2952_v51 = vsel %vm2440_vm12, %v1586_v20, %v2696_v24  ;;  %vm2568_vm13 = vcmp.ge.f32.partialorder %v2098_v43, 0.0  ;;  %v7177_v61 = vpop.f32.mrb[74].mxu1  ;;  %v7179_v25 = vpop.f32.mrb[75].mxu0 }
 0x175   :  { %v5009_v14 = vpack.c.bf16 %v2952_v51, %v2952_v51  ;;  %v2824_v34 = vmul.f32 0.2, %v2098_v43  ;;  %vm2443_vm14 = vcmp.ge.f32.partialorder %v1597_v23, 0.0  ;;  %v2699_v3 = vmul.f32 0.2, %v1597_v23  ;;  %v7197_v39 = vpop.f32.mrb[75].mxu1 }
 0x176   :  { %4235 = vst.msk [vmem:[%s8261_s3 + $0xe8] sm:$0xf] %vm4176_vm1, %v5011_v9  ;;  %4363 = vst.msk [vmem:[%s8261_s3 + $0x2e8] sm:$0xf] %vm4176_vm1, %v5139_v12  ;;  %vm2571_vm15 = vcmp.ge.f32.partialorder %v2109_v4, 0.0  ;;  %vm2441_vm2 = vcmp.ge.f32.partialorder %v1589_v10, 0.0  ;;  %v2101_v19 = vadd.f32 %v6748_v31, %v6972_v36  ;;  %v1610_v29 = vadd.f32 %v6748_v31, %v6990_v45 }
 0x177   :  { %v2827_v38 = vmul.f32 0.2, %v2109_v4  ;;  %v2697_v59 = vmul.f32 0.2, %v1589_v10  ;;  %4233 = vst.msk [vmem:[%s8261_s3 + $0xe0] sm:$0xf] %vm4176_vm1, %v5009_v14  ;;  %v3080_v0 = vsel %vm2568_vm13, %v2098_v43, %v2824_v34  ;;  %v2955_v40 = vsel %vm2443_vm14, %v1597_v23, %v2699_v3 }
 0x178   :  { %v5137_v30 = vpack.c.bf16 %v3080_v0, %v3080_v0  ;;  %v5012_v63 = vpack.c.bf16 %v2955_v40, %v2955_v40  ;;  %vm2569_vm3 = vcmp.ge.f32.partialorder %v2101_v19, 0.0  ;;  %v2825_v47 = vmul.f32 0.2, %v2101_v19 }
 0x179   :  { %v3083_v32 = vsel %vm2571_vm15, %v2109_v4, %v2827_v38  ;;  %v2953_v35 = vsel %vm2441_vm2, %v1589_v10, %v2697_v59  ;;  %vm2446_vm4 = vcmp.ge.f32.partialorder %v1610_v29, 0.0  ;;  %v2702_v36 = vmul.f32 0.2, %v1610_v29  ;;  %v7211_v62 = vpop.f32.mrb[76].mxu0  ;;  %v7213_v7 = vpop.f32.mrb[76].mxu1 }
 0x17a   :  { %v5140_v20 = vpack.c.bf16 %v3083_v32, %v3083_v32  ;;  %v5010_v41 = vpack.c.bf16 %v2953_v35, %v2953_v35  ;;  %4361 = vst.msk [vmem:[%s8261_s3 + $0x2e0] sm:$0xf] %vm4176_vm1, %v5137_v30  ;;  %4236 = vst.msk [vmem:[%s8261_s3 + $0xec] sm:$0xf] %vm4176_vm1, %v5012_v63  ;;  %v2122_v45 = vadd.f32 %v6748_v31, %v6992_v22  ;;  %v7229_v43 = vpop.f32.mrb[77].mxu0  ;;  %v7231_v23 = vpop.f32.mrb[77].mxu1 }
 0x17b   :  { %v1602_v6 = vadd.f32 %v6748_v31, %v6994_v50  ;;  %v3081_v53 = vsel %vm2569_vm3, %v2101_v19, %v2825_v47  ;;  %v2114_v22 = vadd.f32 %v6748_v31, %v6996_v55  ;;  %v1613_v50 = vadd.f32 %v6748_v31, %v7010_v26  ;;  %v7233_v10 = vpop.f32.mrb[78].mxu0  ;;  %v7235_v9 = vpop.f32.mrb[78].mxu1 }
 0x17c   :  { %4364 = vst.msk [vmem:[%s8261_s3 + $0x2ec] sm:$0xf] %vm4176_vm1, %v5140_v20  ;;  %4234 = vst.msk [vmem:[%s8261_s3 + $0xe4] sm:$0xf] %vm4176_vm1, %v5010_v41  ;;  %v2125_v24 = vadd.f32 %v6748_v31, %v7012_v56  ;;  %v5138_v60 = vpack.c.bf16 %v3081_v53, %v3081_v53  ;;  %v2958_v13 = vsel %vm2446_vm4, %v1610_v29, %v2702_v36  ;;  %vm2574_vm0 = vcmp.ge.f32.partialorder %v2122_v45, 0.0  ;;  %v7237_v26 = vpop.f32.mrb[79].mxu0 }
 0x17d   :  { %v2830_v4 = vmul.f32 0.2, %v2122_v45  ;;  %v5015_v12 = vpack.c.bf16 %v2958_v13, %v2958_v13  ;;  %vm2444_vm5 = vcmp.ge.f32.partialorder %v1602_v6, 0.0  ;;  %v2700_v55 = vmul.f32 0.2, %v1602_v6  ;;  %v7239_v51 = vpop.f32.mrb[79].mxu1 }
 0x17e   :  { %vm2572_vm6 = vcmp.ge.f32.partialorder %v2114_v22, 0.0  ;;  %4362 = vst.msk [vmem:[%s8261_s3 + $0x2e4] sm:$0xf] %vm4176_vm1, %v5138_v60  ;;  %v2828_v14 = vmul.f32 0.2, %v2114_v22  ;;  %vm2447_vm7 = vcmp.ge.f32.partialorder %v1613_v50, 0.0  ;;  %v1605_v29 = vadd.f32 %v6748_v31, %v7028_v5 }
 0x17f   :  { %v3086_v56 = vsel %vm2574_vm0, %v2122_v45, %v2830_v4  ;;  %v2703_v34 = vmul.f32 0.2, %v1613_v50  ;;  %4239 = vst.msk [vmem:[%s8261_s3 + $0xf8] sm:$0xf] %vm4176_vm1, %v5015_v12  ;;  %v2956_v38 = vsel %vm2444_vm5, %v1602_v6, %v2700_v55  ;;  %vm2575_vm8 = vcmp.ge.f32.partialorder %v2125_v24, 0.0 }
 0x180   :  { %v5143_v3 = vpack.c.bf16 %v3086_v56, %v3086_v56  ;;  %v2831_v59 = vmul.f32 0.2, %v2125_v24  ;;  %v5013_v0 = vpack.c.bf16 %v2956_v38, %v2956_v38  ;;  %v3084_v40 = vsel %vm2572_vm6, %v2114_v22, %v2828_v14 }
 0x181   :  { %v2959_v19 = vsel %vm2447_vm7, %v1613_v50, %v2703_v34  ;;  %v5141_v30 = vpack.c.bf16 %v3084_v40, %v3084_v40  ;;  %v2117_v35 = vadd.f32 %v6748_v31, %v7030_v8  ;;  %vm2445_vm9 = vcmp.ge.f32.partialorder %v1605_v29, 0.0  ;;  %v7263_v47 = vpop.f32.mrb[80].mxu0  ;;  %v7265_v36 = vpop.f32.mrb[80].mxu1 }
 0x182   :  { %4367 = vst.msk [vmem:[%s8261_s3 + $0x2f8] sm:$0xf] %vm4176_vm1, %v5143_v3  ;;  %v5016_v63 = vpack.c.bf16 %v2959_v19, %v2959_v19  ;;  %v3087_v32 = vsel %vm2575_vm8, %v2125_v24, %v2831_v59  ;;  %4237 = vst.msk [vmem:[%s8261_s3 + $0xf0] sm:$0xf] %vm4176_vm1, %v5013_v0  ;;  %v2701_v41 = vmul.f32 0.2, %v1605_v29  ;;  %v1626_v5 = vadd.f32 %v6748_v31, %v7042_v27 }
 0x183   :  { %v5144_v20 = vpack.c.bf16 %v3087_v32, %v3087_v32  ;;  %4365 = vst.msk [vmem:[%s8261_s3 + $0x2f0] sm:$0xf] %vm4176_vm1, %v5141_v30  ;;  %vm2573_vm10 = vcmp.ge.f32.partialorder %v2117_v35, 0.0  ;;  %v2829_v8 = vmul.f32 0.2, %v2117_v35  ;;  %v2138_v45 = vadd.f32 %v6748_v31, %v7044_v28  ;;  %v7279_v6 = vpop.f32.mrb[81].mxu0 }
 0x184   :  { %4240 = vst.msk [vmem:[%s8261_s3 + $0xfc] sm:$0xf] %vm4176_vm1, %v5016_v63  ;;  %v1618_v27 = vadd.f32 %v6748_v31, %v7052_v57  ;;  %v7281_v53 = vpop.f32.mrb[81].mxu1  ;;  %v2957_v22 = vsel %vm2445_vm9, %v1605_v29, %v2701_v41  ;;  %vm2450_vm11 = vcmp.ge.f32.partialorder %v1626_v5, 0.0  ;;  %v2706_v50 = vmul.f32 0.2, %v1626_v5 }
 0x185   :  { %4368 = vst.msk [vmem:[%s8261_s3 + $0x2fc] sm:$0xf] %vm4176_vm1, %v5144_v20  ;;  %v2130_v24 = vadd.f32 %v6748_v31, %v7054_v17  ;;  %v7289_v60 = vpop.f32.mrb[82].mxu0  ;;  %v7291_v28 = vpop.f32.mrb[82].mxu1  ;;  %v5014_v57 = vpack.c.bf16 %v2957_v22, %v2957_v22  ;;  %v3085_v13 = vsel %vm2573_vm10, %v2117_v35, %v2829_v8  ;;  %vm2578_vm12 = vcmp.ge.f32.partialorder %v2138_v45, 0.0 }
 0x186   :  { %v2834_v4 = vmul.f32 0.2, %v2138_v45  ;;  %v7293_v12 = vpop.f32.mrb[83].mxu0  ;;  %v7295_v55 = vpop.f32.mrb[83].mxu1  ;;  %v5142_v56 = vpack.c.bf16 %v3085_v13, %v3085_v13  ;;  %v2962_v14 = vsel %vm2450_vm11, %v1626_v5, %v2706_v50  ;;  %vm2448_vm13 = vcmp.ge.f32.partialorder %v1618_v27, 0.0 }
 0x187   :  { %v2704_v34 = vmul.f32 0.2, %v1618_v27  ;;  %4238 = vst.msk [vmem:[%s8261_s3 + $0xf4] sm:$0xf] %vm4176_vm1, %v5014_v57  ;;  %v5019_v17 = vpack.c.bf16 %v2962_v14, %v2962_v14  ;;  %vm2576_vm14 = vcmp.ge.f32.partialorder %v2130_v24, 0.0  ;;  %v1629_v40 = vadd.f32 %v6748_v31, %v7062_v49 }
 0x188   :  { %v3090_v3 = vsel %vm2578_vm12, %v2138_v45, %v2834_v4  ;;  %v2832_v38 = vmul.f32 0.2, %v2130_v24  ;;  %4366 = vst.msk [vmem:[%s8261_s3 + $0x2f4] sm:$0xf] %vm4176_vm1, %v5142_v56  ;;  %v2141_v19 = vadd.f32 %v6748_v31, %v7064_v42  ;;  %v1621_v63 = vadd.f32 %v6748_v31, %v7078_v48 }
 0x189   :  { %v5147_v59 = vpack.c.bf16 %v3090_v3, %v3090_v3  ;;  %v2960_v0 = vsel %vm2448_vm13, %v1618_v27, %v2704_v34  ;;  %4243 = vst.msk [vmem:[%s8261_s3 + $0x108] sm:$0xf] %vm4176_vm1, %v5019_v17  ;;  %v2133_v32 = vadd.f32 %v6748_v31, %v7080_v46  ;;  %vm2451_vm15 = vcmp.ge.f32.partialorder %v1629_v40, 0.0  ;;  %v7321_v35 = vpop.f32.mrb[84].mxu0  ;;  %v7323_v20 = vpop.f32.mrb[84].mxu1 }
 0x18a   :  { %v5017_v29 = vpack.c.bf16 %v2960_v0, %v2960_v0  ;;  %v3088_v30 = vsel %vm2576_vm14, %v2130_v24, %v2832_v38  ;;  %v2707_v42 = vmul.f32 0.2, %v1629_v40  ;;  %vm2579_vm2 = vcmp.ge.f32.partialorder %v2141_v19, 0.0  ;;  %v7337_v27 = vpop.f32.mrb[85].mxu0  ;;  %v7339_v22 = vpop.f32.mrb[85].mxu1 }
 0x18b   :  { %4371 = vst.msk [vmem:[%s8261_s3 + $0x308] sm:$0xf] %vm4176_vm1, %v5147_v59  ;;  %v5145_v49 = vpack.c.bf16 %v3088_v30, %v3088_v30  ;;  %v2835_v48 = vmul.f32 0.2, %v2141_v19  ;;  %vm2449_vm3 = vcmp.ge.f32.partialorder %v1621_v63, 0.0  ;;  %vm2577_vm4 = vcmp.ge.f32.partialorder %v2133_v32, 0.0 }
 0x18c   :  { %4241 = vst.msk [vmem:[%s8261_s3 + $0x100] sm:$0xf] %vm4176_vm1, %v5017_v29  ;;  %v2705_v46 = vmul.f32 0.2, %v1621_v63  ;;  %v2963_v41 = vsel %vm2451_vm15, %v1629_v40, %v2707_v42  ;;  %v2833_v5 = vmul.f32 0.2, %v2133_v32  ;;  %v1642_v8 = vadd.f32 %v6748_v31, %v7100_v21 }
 0x18d   :  { %4369 = vst.msk [vmem:[%s8261_s3 + $0x300] sm:$0xf] %vm4176_vm1, %v5145_v49  ;;  %v2154_v45 = vadd.f32 %v6748_v31, %v7102_v58  ;;  %v5020_v50 = vpack.c.bf16 %v2963_v41, %v2963_v41  ;;  %v3091_v24 = vsel %vm2579_vm2, %v2141_v19, %v2835_v48  ;;  %v1634_v13 = vadd.f32 %v6748_v31, %v7112_v2  ;;  %v7344_v4 = vpop.f32.mrb[86].mxu0  ;;  %v7346_v56 = vpop.f32.mrb[86].mxu1  ;;  %v7368_v59 = vld [vmem:[%s8260_s2] ss:$0 sm:$0xff] }
 0x18e   :  { %v2961_v57 = vsel %vm2449_vm3, %v1621_v63, %v2705_v46  ;;  %v5148_v14 = vpack.c.bf16 %v3091_v24, %v3091_v24  ;;  %v3089_v34 = vsel %vm2577_vm4, %v2133_v32, %v2833_v5  ;;  %vm2454_vm0 = vcmp.ge.f32.partialorder %v1642_v8, 0.0  ;;  %v7349_v58 = vpop.f32.mrb[87].mxu0  ;;  %v7351_v17 = vpop.f32.mrb[87].mxu1 }
 0x18f   :  { %v5018_v21 = vpack.c.bf16 %v2961_v57, %v2961_v57  ;;  %4244 = vst.msk [vmem:[%s8261_s3 + $0x10c] sm:$0xf] %vm4176_vm1, %v5020_v50  ;;  %v5146_v3 = vpack.c.bf16 %v3089_v34, %v3089_v34  ;;  %v2710_v31 = vmul.f32 0.2, %v1642_v8  ;;  %vm2582_vm5 = vcmp.ge.f32.partialorder %v2154_v45, 0.0 }
 0x190   :  { %v2838_v2 = vmul.f32 0.2, %v2154_v45  ;;  %4372 = vst.msk [vmem:[%s8261_s3 + $0x30c] sm:$0xf] %vm4176_vm1, %v5148_v14  ;;  %vm2452_vm6 = vcmp.ge.f32.partialorder %v1634_v13, 0.0  ;;  %v2146_v0 = vadd.f32 %v7368_v59, %v7114_v37  ;;  %v1645_v40 = vadd.f32 %v7368_v59, %v7120_v52 }
 0x191   :  { %4242 = vst.msk [vmem:[%s8261_s3 + $0x104] sm:$0xf] %vm4176_vm1, %v5018_v21  ;;  %v2708_v38 = vmul.f32 0.2, %v1634_v13  ;;  %4370 = vst.msk [vmem:[%s8261_s3 + $0x304] sm:$0xf] %vm4176_vm1, %v5146_v3  ;;  %v2966_v19 = vsel %vm2454_vm0, %v1642_v8, %v2710_v31  ;;  %v2157_v30 = vadd.f32 %v7368_v59, %v7122_v16  ;;  %v1637_v63 = vadd.f32 %v7368_v59, %v7136_v18 }
 0x192   :  { %v3094_v29 = vsel %vm2582_vm5, %v2154_v45, %v2838_v2  ;;  %v5023_v32 = vpack.c.bf16 %v2966_v19, %v2966_v19  ;;  %vm2580_vm7 = vcmp.ge.f32.partialorder %v2146_v0, 0.0  ;;  %v7383_v42 = vpop.f32.mrb[88].mxu0  ;;  %v7385_v52 = vpop.f32.mrb[88].mxu1  ;;  %v2836_v46 = vmul.f32 0.2, %v2146_v0 }
 0x193   :  { %v5151_v49 = vpack.c.bf16 %v3094_v29, %v3094_v29  ;;  %v2964_v37 = vsel %vm2452_vm6, %v1634_v13, %v2708_v38  ;;  %vm2455_vm8 = vcmp.ge.f32.partialorder %v1645_v40, 0.0  ;;  %v2711_v41 = vmul.f32 0.2, %v1645_v40  ;;  %v7387_v5 = vpop.f32.mrb[89].mxu0  ;;  %v7405_v57 = vpop.f32.mrb[89].mxu1 }
 0x194   :  { %v5021_v48 = vpack.c.bf16 %v2964_v37, %v2964_v37  ;;  %4247 = vst.msk [vmem:[%s8261_s3 + $0x118] sm:$0xf] %vm4176_vm1, %v5023_v32  ;;  %vm2583_vm9 = vcmp.ge.f32.partialorder %v2157_v30, 0.0  ;;  %v2839_v16 = vmul.f32 0.2, %v2157_v30  ;;  %vm2453_vm10 = vcmp.ge.f32.partialorder %v1637_v63, 0.0 }
 0x195   :  { %4375 = vst.msk [vmem:[%s8261_s3 + $0x318] sm:$0xf] %vm4176_vm1, %v5151_v49  ;;  %v2709_v18 = vmul.f32 0.2, %v1637_v63  ;;  %v3092_v8 = vsel %vm2580_vm7, %v2146_v0, %v2836_v46  ;;  %v2967_v45 = vsel %vm2455_vm8, %v1645_v40, %v2711_v41  ;;  %v2149_v50 = vadd.f32 %v7368_v59, %v7138_v1  ;;  %v7407_v13 = vpop.f32.mrb[90].mxu0  ;;  %v7409_v31 = vpop.f32.mrb[90].mxu1 }
 0x196   :  { %4245 = vst.msk [vmem:[%s8261_s3 + $0x110] sm:$0xf] %vm4176_vm1, %v5021_v48  ;;  %v1658_v24 = vadd.f32 %v7368_v59, %v7159_v44  ;;  %v5149_v14 = vpack.c.bf16 %v3092_v8, %v3092_v8  ;;  %v5024_v21 = vpack.c.bf16 %v2967_v45, %v2967_v45  ;;  %v3095_v34 = vsel %vm2583_vm9, %v2157_v30, %v2839_v16  ;;  %v7411_v2 = vpop.f32.mrb[91].mxu0  ;;  %v7413_v1 = vpop.f32.mrb[91].mxu1 }
 0x197   :  { %v2965_v3 = vsel %vm2453_vm10, %v1637_v63, %v2709_v18  ;;  %v5152_v38 = vpack.c.bf16 %v3095_v34, %v3095_v34  ;;  %vm2581_vm11 = vcmp.ge.f32.partialorder %v2149_v50, 0.0  ;;  %v2837_v40 = vmul.f32 0.2, %v2149_v50 }
 0x198   :  { %v5022_v0 = vpack.c.bf16 %v2965_v3, %v2965_v3  ;;  %4373 = vst.msk [vmem:[%s8261_s3 + $0x310] sm:$0xf] %vm4176_vm1, %v5149_v14  ;;  %4248 = vst.msk [vmem:[%s8261_s3 + $0x11c] sm:$0xf] %vm4176_vm1, %v5024_v21  ;;  %vm2458_vm12 = vcmp.ge.f32.partialorder %v1658_v24, 0.0  ;;  %v2170_v19 = vadd.f32 %v7368_v59, %v7161_v33  ;;  %v1650_v29 = vadd.f32 %v7368_v59, %v7171_v54 }
 0x199   :  { %v2714_v44 = vmul.f32 0.2, %v1658_v24  ;;  %4376 = vst.msk [vmem:[%s8261_s3 + $0x31c] sm:$0xf] %vm4176_vm1, %v5152_v38  ;;  %v3093_v30 = vsel %vm2581_vm11, %v2149_v50, %v2837_v40  ;;  %v2162_v63 = vadd.f32 %v7368_v59, %v7173_v11  ;;  %v1661_v33 = vadd.f32 %v7368_v59, %v7175_v15  ;;  %v7441_v48 = vpop.f32.mrb[92].mxu0  ;;  %v7443_v46 = vpop.f32.mrb[92].mxu1 }
 0x19a   :  { %4246 = vst.msk [vmem:[%s8261_s3 + $0x114] sm:$0xf] %vm4176_vm1, %v5022_v0  ;;  %v2173_v54 = vadd.f32 %v7368_v59, %v7177_v61  ;;  %v5150_v32 = vpack.c.bf16 %v3093_v30, %v3093_v30  ;;  %vm2586_vm13 = vcmp.ge.f32.partialorder %v2170_v19, 0.0  ;;  %v2842_v37 = vmul.f32 0.2, %v2170_v19  ;;  %v7445_v18 = vpop.f32.mrb[93].mxu0 }
 0x19b   :  { %v2970_v49 = vsel %vm2458_vm12, %v1658_v24, %v2714_v44  ;;  %vm2456_vm14 = vcmp.ge.f32.partialorder %v1650_v29, 0.0  ;;  %v2712_v16 = vmul.f32 0.2, %v1650_v29  ;;  %vm2584_vm15 = vcmp.ge.f32.partialorder %v2162_v63, 0.0  ;;  %v7447_v11 = vpop.f32.mrb[93].mxu1  ;;  %v7453_v45 = vpop.f32.mrb[94].mxu0 }
 0x19c   :  { %v5027_v41 = vpack.c.bf16 %v2970_v49, %v2970_v49  ;;  %4374 = vst.msk [vmem:[%s8261_s3 + $0x314] sm:$0xf] %vm4176_vm1, %v5150_v32  ;;  %v3098_v15 = vsel %vm2586_vm13, %v2170_v19, %v2842_v37  ;;  %v2840_v61 = vmul.f32 0.2, %v2162_v63  ;;  %vm2459_vm2 = vcmp.ge.f32.partialorder %v1661_v33, 0.0  ;;  %v7459_v21 = vpop.f32.mrb[94].mxu1 }
 0x19d   :  { %v2715_v8 = vmul.f32 0.2, %v1661_v33  ;;  %v5155_v50 = vpack.c.bf16 %v3098_v15, %v3098_v15  ;;  %v2968_v24 = vsel %vm2456_vm14, %v1650_v29, %v2712_v16  ;;  %vm2587_vm3 = vcmp.ge.f32.partialorder %v2173_v54, 0.0  ;;  %v7461_v34 = vpop.f32.mrb[95].mxu0  ;;  %v7466_v44 = vpop.f32.mrb[95].mxu1 }
 0x19e   :  { %4251 = vst.msk [vmem:[%s8261_s3 + $0x128] sm:$0xf] %vm4176_vm1, %v5027_v41  ;;  %v2843_v14 = vmul.f32 0.2, %v2173_v54  ;;  %v5025_v3 = vpack.c.bf16 %v2968_v24, %v2968_v24  ;;  %v3096_v38 = vsel %vm2584_vm15, %v2162_v63, %v2840_v61  ;;  %v1653_v40 = vadd.f32 %v7368_v59, %v7179_v25 }
 0x19f   :  { %v2971_v0 = vsel %vm2459_vm2, %v1661_v33, %v2715_v8  ;;  %4379 = vst.msk [vmem:[%s8261_s3 + $0x328] sm:$0xf] %vm4176_vm1, %v5155_v50  ;;  %v5153_v19 = vpack.c.bf16 %v3096_v38, %v3096_v38  ;;  %v2165_v32 = vadd.f32 %v7368_v59, %v7197_v39  ;;  %v1674_v33 = vadd.f32 %v7368_v59, %v7211_v62 }
 0x1a0   :  { %v5028_v29 = vpack.c.bf16 %v2971_v0, %v2971_v0  ;;  %v3099_v30 = vsel %vm2587_vm3, %v2173_v54, %v2843_v14  ;;  %4249 = vst.msk [vmem:[%s8261_s3 + $0x120] sm:$0xf] %vm4176_vm1, %v5025_v3  ;;  %vm2457_vm4 = vcmp.ge.f32.partialorder %v1653_v40, 0.0  ;;  %v2713_v25 = vmul.f32 0.2, %v1653_v40 }
 0x1a1   :  { %v5156_v63 = vpack.c.bf16 %v3099_v30, %v3099_v30  ;;  %4377 = vst.msk [vmem:[%s8261_s3 + $0x320] sm:$0xf] %vm4176_vm1, %v5153_v19  ;;  %vm2585_vm0 = vcmp.ge.f32.partialorder %v2165_v32, 0.0  ;;  %v2841_v39 = vmul.f32 0.2, %v2165_v32  ;;  %v2186_v54 = vadd.f32 %v7368_v59, %v7213_v7  ;;  %v7498_v16 = vpop.f32.mrb[96].mxu0 }
 0x1a2   :  { %4252 = vst.msk [vmem:[%s8261_s3 + $0x12c] sm:$0xf] %vm4176_vm1, %v5028_v29  ;;  %v1666_v49 = vadd.f32 %v7368_v59, %v7229_v43  ;;  %v2969_v62 = vsel %vm2457_vm4, %v1653_v40, %v2713_v25  ;;  %vm2462_vm5 = vcmp.ge.f32.partialorder %v1674_v33, 0.0  ;;  %v2718_v37 = vmul.f32 0.2, %v1674_v33  ;;  %v7500_v15 = vpop.f32.mrb[96].mxu1 }
 0x1a3   :  { %4380 = vst.msk [vmem:[%s8261_s3 + $0x32c] sm:$0xf] %vm4176_vm1, %v5156_v63  ;;  %v2178_v41 = vadd.f32 %v7368_v59, %v7231_v23  ;;  %v5026_v61 = vpack.c.bf16 %v2969_v62, %v2969_v62  ;;  %v3097_v7 = vsel %vm2585_vm0, %v2165_v32, %v2841_v39  ;;  %vm2590_vm6 = vcmp.ge.f32.partialorder %v2186_v54, 0.0  ;;  %v7502_v43 = vpop.f32.mrb[97].mxu0  ;;  %v7504_v50 = vpop.f32.mrb[97].mxu1 }
 0x1a4   :  { %v2846_v8 = vmul.f32 0.2, %v2186_v54  ;;  %v5154_v24 = vpack.c.bf16 %v3097_v7, %v3097_v7  ;;  %v2974_v14 = vsel %vm2462_vm5, %v1674_v33, %v2718_v37  ;;  %vm2460_vm7 = vcmp.ge.f32.partialorder %v1666_v49, 0.0  ;;  %v7506_v38 = vpop.f32.mrb[98].mxu0  ;;  %v7508_v0 = vpop.f32.mrb[98].mxu1 }
 0x1a5   :  { %v2716_v3 = vmul.f32 0.2, %v1666_v49  ;;  %4250 = vst.msk [vmem:[%s8261_s3 + $0x124] sm:$0xf] %vm4176_vm1, %v5026_v61  ;;  %v5031_v23 = vpack.c.bf16 %v2974_v14, %v2974_v14  ;;  %vm2588_vm8 = vcmp.ge.f32.partialorder %v2178_v41, 0.0  ;;  %v7514_v29 = vpop.f32.mrb[99].mxu0  ;;  %v1677_v25 = vadd.f32 %v7368_v59, %v7233_v10 }
 0x1a6   :  { %v3102_v40 = vsel %vm2590_vm6, %v2186_v54, %v2846_v8  ;;  %v2844_v19 = vmul.f32 0.2, %v2178_v41  ;;  %v7516_v30 = vpop.f32.mrb[99].mxu1  ;;  %4378 = vst.msk [vmem:[%s8261_s3 + $0x324] sm:$0xf] %vm4176_vm1, %v5154_v24  ;;  %v2189_v33 = vadd.f32 %v7368_v59, %v7235_v9  ;;  %v1669_v62 = vadd.f32 %v7368_v59, %v7237_v26 }
 0x1a7   :  { %v5159_v32 = vpack.c.bf16 %v3102_v40, %v3102_v40  ;;  %v2972_v63 = vsel %vm2460_vm7, %v1666_v49, %v2716_v3  ;;  %4255 = vst.msk [vmem:[%s8261_s3 + $0x138] sm:$0xf] %vm4176_vm1, %v5031_v23  ;;  %v2181_v37 = vadd.f32 %v7368_v59, %v7239_v51  ;;  %vm2463_vm9 = vcmp.ge.f32.partialorder %v1677_v25, 0.0 }
 0x1a8   :  { %v5029_v39 = vpack.c.bf16 %v2972_v63, %v2972_v63  ;;  %v3100_v54 = vsel %vm2588_vm8, %v2178_v41, %v2844_v19  ;;  %v2719_v9 = vmul.f32 0.2, %v1677_v25  ;;  %vm2591_vm10 = vcmp.ge.f32.partialorder %v2189_v33, 0.0 }
 0x1a9   :  { %4383 = vst.msk [vmem:[%s8261_s3 + $0x338] sm:$0xf] %vm4176_vm1, %v5159_v32  ;;  %v5157_v10 = vpack.c.bf16 %v3100_v54, %v3100_v54  ;;  %v2847_v49 = vmul.f32 0.2, %v2189_v33  ;;  %vm2461_vm11 = vcmp.ge.f32.partialorder %v1669_v62, 0.0  ;;  %vm2589_vm12 = vcmp.ge.f32.partialorder %v2181_v37, 0.0 }
 0x1aa   :  { %4253 = vst.msk [vmem:[%s8261_s3 + $0x130] sm:$0xf] %vm4176_vm1, %v5029_v39  ;;  %v2717_v26 = vmul.f32 0.2, %v1669_v62  ;;  %v2975_v51 = vsel %vm2463_vm9, %v1677_v25, %v2719_v9  ;;  %v2845_v41 = vmul.f32 0.2, %v2181_v37  ;;  %v1690_v61 = vadd.f32 %v7368_v59, %v7263_v47 }
 0x1ab   :  { %4381 = vst.msk [vmem:[%s8261_s3 + $0x330] sm:$0xf] %vm4176_vm1, %v5157_v10  ;;  %v2202_v7 = vadd.f32 %v7368_v59, %v7265_v36  ;;  %v7550_v8 = vpop.f32.mrb[100].mxu0  ;;  %v7552_v24 = vpop.f32.mrb[100].mxu1  ;;  %v5032_v14 = vpack.c.bf16 %v2975_v51, %v2975_v51  ;;  %v3103_v3 = vsel %vm2591_vm10, %v2189_v33, %v2847_v49  ;;  %v1682_v40 = vadd.f32 %v7368_v59, %v7279_v6 }
 0x1ac   :  { %v2973_v23 = vsel %vm2461_vm11, %v1669_v62, %v2717_v26  ;;  %v7556_v19 = vpop.f32.mrb[101].mxu0  ;;  %v7558_v32 = vpop.f32.mrb[101].mxu1  ;;  %v5160_v63 = vpack.c.bf16 %v3103_v3, %v3103_v3  ;;  %v3101_v47 = vsel %vm2589_vm12, %v2181_v37, %v2845_v41  ;;  %vm2466_vm13 = vcmp.ge.f32.partialorder %v1690_v61, 0.0 }
 0x1ad   :  { %v5030_v25 = vpack.c.bf16 %v2973_v23, %v2973_v23  ;;  %v7561_v36 = vpop.f32.mrb[102].mxu0  ;;  %v7563_v39 = vpop.f32.mrb[102].mxu1  ;;  %4256 = vst.msk [vmem:[%s8261_s3 + $0x13c] sm:$0xf] %vm4176_vm1, %v5032_v14  ;;  %v5158_v33 = vpack.c.bf16 %v3101_v47, %v3101_v47  ;;  %v2722_v6 = vmul.f32 0.2, %v1690_v61  ;;  %v2194_v10 = vadd.f32 %v7368_v59, %v7281_v53 }
 0x1ae   :  { %vm2594_vm14 = vcmp.ge.f32.partialorder %v2202_v7, 0.0  ;;  %v2850_v54 = vmul.f32 0.2, %v2202_v7  ;;  %v7569_v62 = vpop.f32.mrb[103].mxu0  ;;  %4384 = vst.msk [vmem:[%s8261_s3 + $0x33c] sm:$0xf] %vm4176_vm1, %v5160_v63  ;;  %v1693_v9 = vadd.f32 %v7368_v59, %v7289_v60  ;;  %v2205_v41 = vadd.f32 %v7368_v59, %v7291_v28 }
 0x1af   :  { %4254 = vst.msk [vmem:[%s8261_s3 + $0x134] sm:$0xf] %vm4176_vm1, %v5030_v25  ;;  %vm2464_vm15 = vcmp.ge.f32.partialorder %v1682_v40, 0.0  ;;  %v2720_v37 = vmul.f32 0.2, %v1682_v40  ;;  %v7583_v49 = vpop.f32.mrb[103].mxu1  ;;  %v2978_v26 = vsel %vm2466_vm13, %v1690_v61, %v2722_v6  ;;  %v1685_v14 = vadd.f32 %v7368_v59, %v7293_v12 }
 0x1b0   :  { %4382 = vst.msk [vmem:[%s8261_s3 + $0x334] sm:$0xf] %vm4176_vm1, %v5158_v33  ;;  %v3106_v51 = vsel %vm2594_vm14, %v2202_v7, %v2850_v54  ;;  %v5035_v53 = vpack.c.bf16 %v2978_v26, %v2978_v26  ;;  %vm2592_vm2 = vcmp.ge.f32.partialorder %v2194_v10, 0.0  ;;  %v2848_v63 = vmul.f32 0.2, %v2194_v10 }
 0x1b1   :  { %v5163_v3 = vpack.c.bf16 %v3106_v51, %v3106_v51  ;;  %v2976_v23 = vsel %vm2464_vm15, %v1682_v40, %v2720_v37  ;;  %vm2467_vm3 = vcmp.ge.f32.partialorder %v1693_v9, 0.0  ;;  %v2723_v25 = vmul.f32 0.2, %v1693_v9  ;;  %v7610_v33 = vpop.f32.mrb[104].mxu0  ;;  %v7612_v6 = vpop.f32.mrb[104].mxu1 }
 0x1b2   :  { %v5033_v60 = vpack.c.bf16 %v2976_v23, %v2976_v23  ;;  %4259 = vst.msk [vmem:[%s8261_s3 + $0x148] sm:$0xf] %vm4176_vm1, %v5035_v53  ;;  %vm2595_vm4 = vcmp.ge.f32.partialorder %v2205_v41, 0.0  ;;  %v2851_v28 = vmul.f32 0.2, %v2205_v41  ;;  %vm2465_vm0 = vcmp.ge.f32.partialorder %v1685_v14, 0.0 }
 0x1b3   :  { %4387 = vst.msk [vmem:[%s8261_s3 + $0x348] sm:$0xf] %vm4176_vm1, %v5163_v3  ;;  %v2721_v12 = vmul.f32 0.2, %v1685_v14  ;;  %v3104_v61 = vsel %vm2592_vm2, %v2194_v10, %v2848_v63  ;;  %v2979_v7 = vsel %vm2467_vm3, %v1693_v9, %v2723_v25  ;;  %v2197_v40 = vadd.f32 %v7368_v59, %v7295_v55  ;;  %v7614_v53 = vpop.f32.mrb[105].mxu0  ;;  %v7616_v3 = vpop.f32.mrb[105].mxu1 }
 0x1b4   :  { %4257 = vst.msk [vmem:[%s8261_s3 + $0x140] sm:$0xf] %vm4176_vm1, %v5033_v60  ;;  %v1706_v47 = vadd.f32 %v7368_v59, %v7321_v35  ;;  %v5161_v54 = vpack.c.bf16 %v3104_v61, %v3104_v61  ;;  %v5036_v37 = vpack.c.bf16 %v2979_v7, %v2979_v7  ;;  %v3107_v26 = vsel %vm2595_vm4, %v2205_v41, %v2851_v28  ;;  %v7618_v55 = vpop.f32.mrb[106].mxu0  ;;  %v7620_v60 = vpop.f32.mrb[106].mxu1 }
 0x1b5   :  { %v2977_v51 = vsel %vm2465_vm0, %v1685_v14, %v2721_v12  ;;  %v5164_v10 = vpack.c.bf16 %v3107_v26, %v3107_v26  ;;  %vm2593_vm5 = vcmp.ge.f32.partialorder %v2197_v40, 0.0  ;;  %v2849_v23 = vmul.f32 0.2, %v2197_v40  ;;  %v7634_v63 = vpop.f32.mrb[107].mxu0  ;;  %v7636_v25 = vpop.f32.mrb[107].mxu1 }
 0x1b6   :  { %v5034_v9 = vpack.c.bf16 %v2977_v51, %v2977_v51  ;;  %4385 = vst.msk [vmem:[%s8261_s3 + $0x340] sm:$0xf] %vm4176_vm1, %v5161_v54  ;;  %4260 = vst.msk [vmem:[%s8261_s3 + $0x14c] sm:$0xf] %vm4176_vm1, %v5036_v37  ;;  %vm2470_vm6 = vcmp.ge.f32.partialorder %v1706_v47, 0.0  ;;  %v2218_v41 = vadd.f32 %v7368_v59, %v7323_v20  ;;  %v1698_v14 = vadd.f32 %v7368_v59, %v7337_v27 }
 0x1b7   :  { %v2726_v35 = vmul.f32 0.2, %v1706_v47  ;;  %4388 = vst.msk [vmem:[%s8261_s3 + $0x34c] sm:$0xf] %vm4176_vm1, %v5164_v10  ;;  %v3105_v28 = vsel %vm2593_vm5, %v2197_v40, %v2849_v23  ;;  %v2210_v20 = vadd.f32 %v7368_v59, %v7339_v22  ;;  %v1709_v27 = vadd.f32 %v7368_v59, %v7344_v4 }
 0x1b8   :  { %4258 = vst.msk [vmem:[%s8261_s3 + $0x144] sm:$0xf] %vm4176_vm1, %v5034_v9  ;;  %v2221_v12 = vadd.f32 %v7368_v59, %v7346_v56  ;;  %v5162_v61 = vpack.c.bf16 %v3105_v28, %v3105_v28  ;;  %vm2598_vm7 = vcmp.ge.f32.partialorder %v2218_v41, 0.0  ;;  %v2854_v54 = vmul.f32 0.2, %v2218_v41 }
 0x1b9   :  { %v2982_v7 = vsel %vm2470_vm6, %v1706_v47, %v2726_v35  ;;  %vm2468_vm8 = vcmp.ge.f32.partialorder %v1698_v14, 0.0  ;;  %v2724_v26 = vmul.f32 0.2, %v1698_v14  ;;  %vm2596_vm9 = vcmp.ge.f32.partialorder %v2210_v20, 0.0  ;;  %v7656_v51 = vpop.f32.mrb[108].mxu0 }
 0x1ba   :  { %v5039_v37 = vpack.c.bf16 %v2982_v7, %v2982_v7  ;;  %4386 = vst.msk [vmem:[%s8261_s3 + $0x344] sm:$0xf] %vm4176_vm1, %v5162_v61  ;;  %v3110_v22 = vsel %vm2598_vm7, %v2218_v41, %v2854_v54  ;;  %v2852_v40 = vmul.f32 0.2, %v2210_v20  ;;  %vm2471_vm10 = vcmp.ge.f32.partialorder %v1709_v27, 0.0  ;;  %v7662_v9 = vpop.f32.mrb[108].mxu1 }
 0x1bb   :  { %v2727_v4 = vmul.f32 0.2, %v1709_v27  ;;  %v5167_v56 = vpack.c.bf16 %v3110_v22, %v3110_v22  ;;  %v2980_v47 = vsel %vm2468_vm8, %v1698_v14, %v2724_v26  ;;  %vm2599_vm11 = vcmp.ge.f32.partialorder %v2221_v12, 0.0  ;;  %v7664_v23 = vpop.f32.mrb[109].mxu0  ;;  %v7668_v7 = vpop.f32.mrb[109].mxu1 }
 0x1bc   :  { %4263 = vst.msk [vmem:[%s8261_s3 + $0x158] sm:$0xf] %vm4176_vm1, %v5039_v37  ;;  %v2855_v10 = vmul.f32 0.2, %v2221_v12  ;;  %v5037_v35 = vpack.c.bf16 %v2980_v47, %v2980_v47  ;;  %v3108_v41 = vsel %vm2596_vm9, %v2210_v20, %v2852_v40  ;;  %v1701_v61 = vadd.f32 %v7368_v59, %v7349_v58  ;;  %v7670_v54 = vpop.f32.mrb[110].mxu0  ;;  %v7678_v20 = vpop.f32.mrb[110].mxu1 }
 0x1bd   :  { %v2983_v28 = vsel %vm2471_vm10, %v1709_v27, %v2727_v4  ;;  %4391 = vst.msk [vmem:[%s8261_s3 + $0x358] sm:$0xf] %vm4176_vm1, %v5167_v56  ;;  %v5165_v14 = vpack.c.bf16 %v3108_v41, %v3108_v41  ;;  %v2213_v22 = vadd.f32 %v7368_v59, %v7351_v17  ;;  %v7680_v27 = vpop.f32.mrb[111].mxu0  ;;  %v1722_v4 = vadd.f32 %v7368_v59, %v7383_v42  ;;  %v7688_v56 = vpop.f32.mrb[111].mxu1 }
 0x1be   :  { %v5040_v37 = vpack.c.bf16 %v2983_v28, %v2983_v28  ;;  %v3111_v26 = vsel %vm2599_vm11, %v2221_v12, %v2855_v10  ;;  %4261 = vst.msk [vmem:[%s8261_s3 + $0x150] sm:$0xf] %vm4176_vm1, %v5037_v35  ;;  %vm2469_vm12 = vcmp.ge.f32.partialorder %v1701_v61, 0.0  ;;  %v2725_v40 = vmul.f32 0.2, %v1701_v61 }
 0x1bf   :  { %v5168_v58 = vpack.c.bf16 %v3111_v26, %v3111_v26  ;;  %4389 = vst.msk [vmem:[%s8261_s3 + $0x350] sm:$0xf] %vm4176_vm1, %v5165_v14  ;;  %vm2597_vm13 = vcmp.ge.f32.partialorder %v2213_v22, 0.0  ;;  %v2853_v17 = vmul.f32 0.2, %v2213_v22  ;;  %v2234_v12 = vadd.f32 %v7368_v59, %v7385_v52 }
 0x1c0   :  { %4264 = vst.msk [vmem:[%s8261_s3 + $0x15c] sm:$0xf] %vm4176_vm1, %v5040_v37  ;;  %v1714_v42 = vadd.f32 %v7368_v59, %v7387_v5  ;;  %v2981_v47 = vsel %vm2469_vm12, %v1701_v61, %v2725_v40  ;;  %vm2474_vm14 = vcmp.ge.f32.partialorder %v1722_v4, 0.0  ;;  %v2730_v10 = vmul.f32 0.2, %v1722_v4 }
 0x1c1   :  { %4392 = vst.msk [vmem:[%s8261_s3 + $0x35c] sm:$0xf] %vm4176_vm1, %v5168_v58  ;;  %v2226_v35 = vadd.f32 %v7368_v59, %v7405_v57  ;;  %v5038_v41 = vpack.c.bf16 %v2981_v47, %v2981_v47  ;;  %v3109_v28 = vsel %vm2597_vm13, %v2213_v22, %v2853_v17  ;;  %vm2602_vm15 = vcmp.ge.f32.partialorder %v2234_v12, 0.0  ;;  %v7708_v5 = vpop.f32.mrb[112].mxu0 }
 0x1c2   :  { %v2858_v14 = vmul.f32 0.2, %v2234_v12  ;;  %v5166_v37 = vpack.c.bf16 %v3109_v28, %v3109_v28  ;;  %v2986_v52 = vsel %vm2474_vm14, %v1722_v4, %v2730_v10  ;;  %vm2472_vm2 = vcmp.ge.f32.partialorder %v1714_v42, 0.0  ;;  %v7716_v22 = vpop.f32.mrb[113].mxu0 }
 0x1c3   :  { %v2728_v26 = vmul.f32 0.2, %v1714_v42  ;;  %4262 = vst.msk [vmem:[%s8261_s3 + $0x154] sm:$0xf] %vm4176_vm1, %v5038_v41  ;;  %v5043_v61 = vpack.c.bf16 %v2986_v52, %v2986_v52  ;;  %vm2600_vm3 = vcmp.ge.f32.partialorder %v2226_v35, 0.0  ;;  %v7714_v57 = vpop.f32.mrb[112].mxu1  ;;  %v1725_v47 = vadd.f32 %v7368_v59, %v7407_v13 }
 0x1c4   :  { %v3114_v58 = vsel %vm2602_vm15, %v2234_v12, %v2858_v14  ;;  %v2856_v40 = vmul.f32 0.2, %v2226_v35  ;;  %4390 = vst.msk [vmem:[%s8261_s3 + $0x354] sm:$0xf] %vm4176_vm1, %v5166_v37  ;;  %v2237_v10 = vadd.f32 %v7368_v59, %v7409_v31  ;;  %v7726_v12 = vpop.f32.mrb[113].mxu1  ;;  %v7728_v41 = vpop.f32.mrb[114].mxu0  ;;  %v2229_v13 = vadd.f32 %v7368_v59, %v7413_v1 }
 0x1c5   :  { %v5171_v4 = vpack.c.bf16 %v3114_v58, %v3114_v58  ;;  %v2984_v17 = vsel %vm2472_vm2, %v1714_v42, %v2728_v26  ;;  %8262 = vst [vmem:[#allocation2_spill] sm:$0xff] %v7726_v12  ;;  %8263 = vst [vmem:[#allocation3_spill] sm:$0xff] %v7728_v41  ;;  %v1717_v42 = vadd.f32 %v7368_v59, %v7411_v2  ;;  %v7738_v37 = vpop.f32.mrb[114].mxu1  ;;  %v7740_v31 = vpop.f32.mrb[115].mxu0  ;;  %vm2475_vm4 = vcmp.ge.f32.partialorder %v1725_v47, 0.0 }
 0x1c6   :  { %4267 = vst.msk [vmem:[%s8261_s3 + $0x168] sm:$0xf] %vm4176_vm1, %v5043_v61  ;;  %v5041_v28 = vpack.c.bf16 %v2984_v17, %v2984_v17  ;;  %v3112_v14 = vsel %vm2600_vm3, %v2226_v35, %v2856_v40  ;;  %8264 = vst [vmem:[#allocation4_spill] sm:$0xff] %v7738_v37  ;;  %v2731_v26 = vmul.f32 0.2, %v1725_v47  ;;  %vm2603_vm0 = vcmp.ge.f32.partialorder %v2237_v10, 0.0 }
 0x1c7   :  { %8265 = vst [vmem:[#allocation5_spill] sm:$0xff] %v7740_v31  ;;  %4395 = vst.msk [vmem:[%s8261_s3 + $0x368] sm:$0xf] %vm4176_vm1, %v5171_v4  ;;  %v5169_v52 = vpack.c.bf16 %v3112_v14, %v3112_v14  ;;  %v7746_v35 = vpop.f32.mrb[115].mxu1  ;;  %v2859_v2 = vmul.f32 0.2, %v2237_v10  ;;  %v1738_v40 = vadd.f32 %v7368_v59, %v7441_v48  ;;  %v2250_v4 = vadd.f32 %v7368_v59, %v7443_v46 }
 0x1c8   :  { %8266 = vst [vmem:[#allocation6_spill] sm:$0xff] %v7746_v35  ;;  %4265 = vst.msk [vmem:[%s8261_s3 + $0x160] sm:$0xf] %vm4176_vm1, %v5041_v28  ;;  %vm2473_vm5 = vcmp.ge.f32.partialorder %v1717_v42, 0.0  ;;  %v2729_v1 = vmul.f32 0.2, %v1717_v42  ;;  %v2987_v61 = vsel %vm2475_vm4, %v1725_v47, %v2731_v26  ;;  %v1730_v35 = vadd.f32 %v7368_v59, %v7445_v18 }
 0x1c9   :  { %vm2601_vm6 = vcmp.ge.f32.partialorder %v2229_v13, 0.0  ;;  %4393 = vst.msk [vmem:[%s8261_s3 + $0x360] sm:$0xf] %vm4176_vm1, %v5169_v52  ;;  %v2857_v58 = vmul.f32 0.2, %v2229_v13  ;;  %v5044_v17 = vpack.c.bf16 %v2987_v61, %v2987_v61  ;;  %v3115_v14 = vsel %vm2603_vm0, %v2237_v10, %v2859_v2  ;;  %v7762_v12 = vpop.f32.mrb[116].mxu0 }
 0x1ca   :  { %v2985_v28 = vsel %vm2473_vm5, %v1717_v42, %v2729_v1  ;;  %v5172_v31 = vpack.c.bf16 %v3115_v14, %v3115_v14  ;;  %vm2478_vm7 = vcmp.ge.f32.partialorder %v1738_v40, 0.0  ;;  %v2734_v47 = vmul.f32 0.2, %v1738_v40 }
 0x1cb   :  { %v5042_v37 = vpack.c.bf16 %v2985_v28, %v2985_v28  ;;  %v3113_v41 = vsel %vm2601_vm6, %v2229_v13, %v2857_v58  ;;  %4268 = vst.msk [vmem:[%s8261_s3 + $0x16c] sm:$0xf] %vm4176_vm1, %v5044_v17  ;;  %vm2606_vm8 = vcmp.ge.f32.partialorder %v2250_v4, 0.0  ;;  %v2862_v46 = vmul.f32 0.2, %v2250_v4  ;;  %v7768_v10 = vpop.f32.mrb[116].mxu1 }
 0x1cc   :  { %v5170_v48 = vpack.c.bf16 %v3113_v41, %v3113_v41  ;;  %4396 = vst.msk [vmem:[%s8261_s3 + $0x36c] sm:$0xf] %vm4176_vm1, %v5172_v31  ;;  %vm2476_vm9 = vcmp.ge.f32.partialorder %v1730_v35, 0.0  ;;  %v2732_v18 = vmul.f32 0.2, %v1730_v35  ;;  %v2242_v41 = vadd.f32 %v7368_v59, %v7447_v11  ;;  %v7782_v13 = vpop.f32.mrb[117].mxu0 }
 0x1cd   :  { %4266 = vst.msk [vmem:[%s8261_s3 + $0x164] sm:$0xf] %vm4176_vm1, %v5042_v37  ;;  %v1741_v42 = vadd.f32 %v7368_v59, %v7453_v45  ;;  %v7784_v52 = vpop.f32.mrb[117].mxu1  ;;  %v2990_v31 = vsel %vm2478_vm7, %v1738_v40, %v2734_v47  ;;  %v3118_v37 = vsel %vm2606_vm8, %v2250_v4, %v2862_v46  ;;  %v2253_v26 = vadd.f32 %v7368_v59, %v7459_v21  ;;  %v7795_v2 = vpop.f32.mrb[118].mxu0 }
 0x1ce   :  { %4394 = vst.msk [vmem:[%s8261_s3 + $0x364] sm:$0xf] %vm4176_vm1, %v5170_v48  ;;  %v1733_v11 = vadd.f32 %v7368_v59, %v7461_v34  ;;  %v7797_v45 = vpop.f32.mrb[118].mxu1  ;;  %v5047_v1 = vpack.c.bf16 %v2990_v31, %v2990_v31  ;;  %v5175_v61 = vpack.c.bf16 %v3118_v37, %v3118_v37  ;;  %v2988_v58 = vsel %vm2476_vm9, %v1730_v35, %v2732_v18  ;;  %v7799_v17 = vpop.f32.mrb[119].mxu0 }
 0x1cf   :  { %8267 = vst [vmem:[#allocation7_spill] sm:$0xff] %v7797_v45  ;;  %vm2604_vm10 = vcmp.ge.f32.partialorder %v2242_v41, 0.0  ;;  %8268 = vst [vmem:[#allocation8_spill] sm:$0xff] %v7799_v17  ;;  %v7801_v14 = vpop.f32.mrb[119].mxu1  ;;  %v5045_v40 = vpack.c.bf16 %v2988_v58, %v2988_v58  ;;  %v2860_v4 = vmul.f32 0.2, %v2242_v41  ;;  %v2245_v47 = vadd.f32 %v7368_v59, %v7466_v44 }
 0x1d0   :  { %8269 = vst [vmem:[#allocation9_spill] sm:$0xff] %v7801_v14  ;;  %vm2479_vm11 = vcmp.ge.f32.partialorder %v1741_v42, 0.0  ;;  %v2735_v28 = vmul.f32 0.2, %v1741_v42  ;;  %4271 = vst.msk [vmem:[%s8261_s3 + $0x178] sm:$0xf] %vm4176_vm1, %v5047_v1  ;;  %v1754_v46 = vadd.f32 %v7368_v59, %v7498_v16  ;;  %v2266_v16 = vadd.f32 %v7368_v59, %v7500_v15 }
 0x1d1   :  { %4399 = vst.msk [vmem:[%s8261_s3 + $0x378] sm:$0xf] %vm4176_vm1, %v5175_v61  ;;  %vm2607_vm12 = vcmp.ge.f32.partialorder %v2253_v26, 0.0  ;;  %v2863_v21 = vmul.f32 0.2, %v2253_v26  ;;  %vm2477_vm13 = vcmp.ge.f32.partialorder %v1733_v11, 0.0  ;;  %v3116_v35 = vsel %vm2604_vm10, %v2242_v41, %v2860_v4 }
 0x1d2   :  { %v2733_v34 = vmul.f32 0.2, %v1733_v11  ;;  %4269 = vst.msk [vmem:[%s8261_s3 + $0x170] sm:$0xf] %vm4176_vm1, %v5045_v40  ;;  %v2991_v48 = vsel %vm2479_vm11, %v1741_v42, %v2735_v28  ;;  %v5173_v18 = vpack.c.bf16 %v3116_v35, %v3116_v35  ;;  %v7819_v61 = vpop.f32.mrb[120].mxu0  ;;  %vm2605_vm14 = vcmp.ge.f32.partialorder %v2245_v47, 0.0 }
 0x1d3   :  { %v5048_v31 = vpack.c.bf16 %v2991_v48, %v2991_v48  ;;  %v3119_v37 = vsel %vm2607_vm12, %v2253_v26, %v2863_v21  ;;  %v2861_v17 = vmul.f32 0.2, %v2245_v47  ;;  %v7821_v45 = vpop.f32.mrb[120].mxu1  ;;  %v7823_v41 = vpop.f32.mrb[121].mxu0  ;;  %vm2482_vm15 = vcmp.ge.f32.partialorder %v1754_v46, 0.0 }
 0x1d4   :  { %v2989_v1 = vsel %vm2477_vm13, %v1733_v11, %v2733_v34  ;;  %v5176_v58 = vpack.c.bf16 %v3119_v37, %v3119_v37  ;;  %4397 = vst.msk [vmem:[%s8261_s3 + $0x370] sm:$0xf] %vm4176_vm1, %v5173_v18  ;;  %v2738_v44 = vmul.f32 0.2, %v1754_v46  ;;  %v1746_v42 = vadd.f32 %v7368_v59, %v7502_v43  ;;  %v7837_v26 = vpop.f32.mrb[121].mxu1  ;;  %v7839_v11 = vpop.f32.mrb[122].mxu0 }
 0x1d5   :  { %v5046_v14 = vpack.c.bf16 %v2989_v1, %v2989_v1  ;;  %4272 = vst.msk [vmem:[%s8261_s3 + $0x17c] sm:$0xf] %vm4176_vm1, %v5048_v31  ;;  %v3117_v40 = vsel %vm2605_vm14, %v2245_v47, %v2861_v17  ;;  %v2258_v15 = vadd.f32 %v7368_v59, %v7504_v50  ;;  %v1757_v43 = vadd.f32 %v7368_v59, %v7506_v38  ;;  %v7855_v28 = vpop.f32.mrb[122].mxu1  ;;  %v7857_v21 = vpop.f32.mrb[123].mxu0 }
 0x1d6   :  { %4400 = vst.msk [vmem:[%s8261_s3 + $0x37c] sm:$0xf] %vm4176_vm1, %v5176_v58  ;;  %v2269_v4 = vadd.f32 %v7368_v59, %v7508_v0  ;;  %v5174_v34 = vpack.c.bf16 %v3117_v40, %v3117_v40  ;;  %v2994_v35 = vsel %vm2482_vm15, %v1754_v46, %v2738_v44  ;;  %vm2610_vm2 = vcmp.ge.f32.partialorder %v2266_v16, 0.0  ;;  %v7859_v18 = vpop.f32.mrb[123].mxu1 }
 0x1d7   :  { %4270 = vst.msk [vmem:[%s8261_s3 + $0x174] sm:$0xf] %vm4176_vm1, %v5046_v14  ;;  %v2866_v48 = vmul.f32 0.2, %v2266_v16  ;;  %v5051_v17 = vpack.c.bf16 %v2994_v35, %v2994_v35  ;;  %vm2480_vm3 = vcmp.ge.f32.partialorder %v1746_v42, 0.0  ;;  %vm2608_vm4 = vcmp.ge.f32.partialorder %v2258_v15, 0.0 }
 0x1d8   :  { %v2736_v14 = vmul.f32 0.2, %v1746_v42  ;;  %4398 = vst.msk [vmem:[%s8261_s3 + $0x374] sm:$0xf] %vm4176_vm1, %v5174_v34  ;;  %v2864_v38 = vmul.f32 0.2, %v2258_v15  ;;  %v1749_v44 = vadd.f32 %v7368_v59, %v7514_v29 }
 0x1d9   :  { %v3122_v50 = vsel %vm2610_vm2, %v2266_v16, %v2866_v48  ;;  %vm2483_vm0 = vcmp.ge.f32.partialorder %v1757_v43, 0.0  ;;  %v2739_v0 = vmul.f32 0.2, %v1757_v43  ;;  %4275 = vst.msk [vmem:[%s8261_s3 + $0x188] sm:$0xf] %vm4176_vm1, %v5051_v17  ;;  %vm2611_vm5 = vcmp.ge.f32.partialorder %v2269_v4, 0.0 }
 0x1da   :  { %v5179_v47 = vpack.c.bf16 %v3122_v50, %v3122_v50  ;;  %v2992_v46 = vsel %vm2480_vm3, %v1746_v42, %v2736_v14  ;;  %v2867_v31 = vmul.f32 0.2, %v2269_v4  ;;  %v3120_v1 = vsel %vm2608_vm4, %v2258_v15, %v2864_v38  ;;  %v7871_v40 = vpop.f32.mrb[124].mxu0 }
 0x1db   :  { %v5049_v37 = vpack.c.bf16 %v2992_v46, %v2992_v46  ;;  %v2995_v58 = vsel %vm2483_vm0, %v1757_v43, %v2739_v0  ;;  %v5177_v16 = vpack.c.bf16 %v3120_v1, %v3120_v1  ;;  %v2261_v42 = vadd.f32 %v7368_v59, %v7516_v30  ;;  %v7879_v48 = vpop.f32.mrb[124].mxu1  ;;  %v7881_v15 = vpop.f32.mrb[125].mxu0 }
 0x1dc   :  { %4403 = vst.msk [vmem:[%s8261_s3 + $0x388] sm:$0xf] %vm4176_vm1, %v5179_v47  ;;  %v5052_v34 = vpack.c.bf16 %v2995_v58, %v2995_v58  ;;  %v3123_v35 = vsel %vm2611_vm5, %v2269_v4, %v2867_v31  ;;  %vm2481_vm6 = vcmp.ge.f32.partialorder %v1749_v44, 0.0  ;;  %v2737_v43 = vmul.f32 0.2, %v1749_v44  ;;  %v7889_v14 = vpop.f32.mrb[125].mxu1 }
 0x1dd   :  { %4273 = vst.msk [vmem:[%s8261_s3 + $0x180] sm:$0xf] %vm4176_vm1, %v5049_v37  ;;  %v5180_v29 = vpack.c.bf16 %v3123_v35, %v3123_v35  ;;  %v1770_v17 = vadd.f32 %v7368_v59, %v7550_v8  ;;  %v7891_v4 = vpop.f32.mrb[126].mxu0  ;;  %4401 = vst.msk [vmem:[%s8261_s3 + $0x380] sm:$0xf] %vm4176_vm1, %v5177_v16  ;;  %vm2609_vm7 = vcmp.ge.f32.partialorder %v2261_v42, 0.0  ;;  %v2282_v50 = vadd.f32 %v7368_v59, %v7552_v24 }
 0x1de   :  { %4276 = vst.msk [vmem:[%s8261_s3 + $0x18c] sm:$0xf] %vm4176_vm1, %v5052_v34  ;;  %v2865_v30 = vmul.f32 0.2, %v2261_v42  ;;  %v1762_v8 = vadd.f32 %v7368_v59, %v7556_v19  ;;  %v7905_v38 = vpop.f32.mrb[126].mxu1  ;;  %v7907_v0 = vpop.f32.mrb[127].mxu0  ;;  %v2993_v47 = vsel %vm2481_vm6, %v1749_v44, %v2737_v43  ;;  %v2274_v31 = vadd.f32 %v7368_v59, %v7558_v32 }
 0x1df   :  { %4404 = vst.msk [vmem:[%s8261_s3 + $0x38c] sm:$0xf] %vm4176_vm1, %v5180_v29  ;;  %vm2486_vm8 = vcmp.ge.f32.partialorder %v1770_v17, 0.0  ;;  %v2742_v46 = vmul.f32 0.2, %v1770_v17  ;;  %v7915_v37 = vpop.f32.mrb[127].mxu1  ;;  %v5050_v24 = vpack.c.bf16 %v2993_v47, %v2993_v47  ;;  %v1773_v43 = vadd.f32 %v7368_v59, %v7561_v36 }
 0x1e0   :  { %v3121_v1 = vsel %vm2609_vm7, %v2261_v42, %v2865_v30  ;;  %vm2614_vm9 = vcmp.ge.f32.partialorder %v2282_v50, 0.0  ;;  %v2870_v19 = vmul.f32 0.2, %v2282_v50  ;;  %vm2484_vm10 = vcmp.ge.f32.partialorder %v1762_v8, 0.0 }
 0x1e1   :  { %v5178_v58 = vpack.c.bf16 %v3121_v1, %v3121_v1  ;;  %v2998_v16 = vsel %vm2486_vm8, %v1770_v17, %v2742_v46  ;;  %v2740_v34 = vmul.f32 0.2, %v1762_v8  ;;  %4274 = vst.msk [vmem:[%s8261_s3 + $0x184] sm:$0xf] %vm4176_vm1, %v5050_v24  ;;  %vm2612_vm11 = vcmp.ge.f32.partialorder %v2274_v31, 0.0 }
 0x1e2   :  { %v5055_v44 = vpack.c.bf16 %v2998_v16, %v2998_v16  ;;  %v3126_v35 = vsel %vm2614_vm9, %v2282_v50, %v2870_v19  ;;  %v2868_v29 = vmul.f32 0.2, %v2274_v31  ;;  %v2285_v17 = vadd.f32 %v7368_v59, %v7563_v39 }
 0x1e3   :  { %4402 = vst.msk [vmem:[%s8261_s3 + $0x384] sm:$0xf] %vm4176_vm1, %v5178_v58  ;;  %v5183_v32 = vpack.c.bf16 %v3126_v35, %v3126_v35  ;;  %v2996_v42 = vsel %vm2484_vm10, %v1762_v8, %v2740_v34  ;;  %v1765_v47 = vadd.f32 %v7368_v59, %v7569_v62  ;;  %v2277_v46 = vadd.f32 %v7368_v59, %v7583_v49 }
 0x1e4   :  { %4279 = vst.msk [vmem:[%s8261_s3 + $0x198] sm:$0xf] %vm4176_vm1, %v5055_v44  ;;  %v5053_v30 = vpack.c.bf16 %v2996_v42, %v2996_v42  ;;  %v3124_v50 = vsel %vm2612_vm11, %v2274_v31, %v2868_v29  ;;  %vm2487_vm12 = vcmp.ge.f32.partialorder %v1773_v43, 0.0  ;;  %v2743_v39 = vmul.f32 0.2, %v1773_v43 }
 0x1e5   :  { %4407 = vst.msk [vmem:[%s8261_s3 + $0x398] sm:$0xf] %vm4176_vm1, %v5183_v32  ;;  %v5181_v36 = vpack.c.bf16 %v3124_v50, %v3124_v50  ;;  %vm2615_vm13 = vcmp.ge.f32.partialorder %v2285_v17, 0.0  ;;  %v2871_v8 = vmul.f32 0.2, %v2285_v17  ;;  %vm2485_vm14 = vcmp.ge.f32.partialorder %v1765_v47, 0.0 }
 0x1e6   :  { %4277 = vst.msk [vmem:[%s8261_s3 + $0x190] sm:$0xf] %vm4176_vm1, %v5053_v30  ;;  %v2741_v62 = vmul.f32 0.2, %v1765_v47  ;;  %vm2613_vm15 = vcmp.ge.f32.partialorder %v2277_v46, 0.0  ;;  %v2999_v49 = vsel %vm2487_vm12, %v1773_v43, %v2743_v39  ;;  %v1786_v24 = vadd.f32 %v7368_v59, %v7610_v33 }
 0x1e7   :  { %4405 = vst.msk [vmem:[%s8261_s3 + $0x390] sm:$0xf] %vm4176_vm1, %v5181_v36  ;;  %v2869_v31 = vmul.f32 0.2, %v2277_v46  ;;  %v2298_v1 = vadd.f32 %v7368_v59, %v7612_v6  ;;  %v5056_v19 = vpack.c.bf16 %v2999_v49, %v2999_v49  ;;  %v3127_v58 = vsel %vm2615_vm13, %v2285_v17, %v2871_v8  ;;  %v7970_v6 = vld [vmem:[%s8260_s2] ss:$0 sm:$0xff] }
 0x1e8   :  { %v2997_v16 = vsel %vm2485_vm14, %v1765_v47, %v2741_v62  ;;  %v1778_v34 = vadd.f32 %v7368_v59, %v7614_v53  ;;  %v5184_v44 = vpack.c.bf16 %v3127_v58, %v3127_v58  ;;  %vm2490_vm2 = vcmp.ge.f32.partialorder %v1786_v24, 0.0 }
 0x1e9   :  { %v5054_v35 = vpack.c.bf16 %v2997_v16, %v2997_v16  ;;  %v3125_v29 = vsel %vm2613_vm15, %v2277_v46, %v2869_v31  ;;  %4280 = vst.msk [vmem:[%s8261_s3 + $0x19c] sm:$0xf] %vm4176_vm1, %v5056_v19  ;;  %v2746_v33 = vmul.f32 0.2, %v1786_v24  ;;  %vm2618_vm3 = vcmp.ge.f32.partialorder %v2298_v1, 0.0 }
 0x1ea   :  { %v5182_v32 = vpack.c.bf16 %v3125_v29, %v3125_v29  ;;  %v2874_v42 = vmul.f32 0.2, %v2298_v1  ;;  %4408 = vst.msk [vmem:[%s8261_s3 + $0x39c] sm:$0xf] %vm4176_vm1, %v5184_v44  ;;  %vm2488_vm4 = vcmp.ge.f32.partialorder %v1778_v34, 0.0  ;;  %v2290_v53 = vadd.f32 %v7970_v6, %v7616_v3 }
 0x1eb   :  { %4278 = vst.msk [vmem:[%s8261_s3 + $0x194] sm:$0xf] %vm4176_vm1, %v5054_v35  ;;  %v2744_v59 = vmul.f32 0.2, %v1778_v34  ;;  %v1789_v43 = vadd.f32 %v7970_v6, %v7618_v55  ;;  %v3002_v17 = vsel %vm2490_vm2, %v1786_v24, %v2746_v33  ;;  %v2301_v50 = vadd.f32 %v7970_v6, %v7620_v60 }
 0x1ec   :  { %4406 = vst.msk [vmem:[%s8261_s3 + $0x394] sm:$0xf] %vm4176_vm1, %v5182_v32  ;;  %v3130_v30 = vsel %vm2618_vm3, %v2298_v1, %v2874_v42  ;;  %v1781_v47 = vadd.f32 %v7970_v6, %v7634_v63  ;;  %v5059_v46 = vpack.c.bf16 %v3002_v17, %v3002_v17  ;;  %vm2616_vm0 = vcmp.ge.f32.partialorder %v2290_v53, 0.0 }
 0x1ed   :  { %v5187_v36 = vpack.c.bf16 %v3130_v30, %v3130_v30  ;;  %v3000_v39 = vsel %vm2488_vm4, %v1778_v34, %v2744_v59  ;;  %v2872_v8 = vmul.f32 0.2, %v2290_v53  ;;  %vm2491_vm5 = vcmp.ge.f32.partialorder %v1789_v43, 0.0 }
 0x1ee   :  { %v5057_v3 = vpack.c.bf16 %v3000_v39, %v3000_v39  ;;  %v2747_v55 = vmul.f32 0.2, %v1789_v43  ;;  %4283 = vst.msk [vmem:[%s8261_s3 + $0x1a8] sm:$0xf] %vm4176_vm1, %v5059_v46  ;;  %vm2619_vm6 = vcmp.ge.f32.partialorder %v2301_v50, 0.0  ;;  %vm2489_vm7 = vcmp.ge.f32.partialorder %v1781_v47, 0.0 }
 0x1ef   :  { %4411 = vst.msk [vmem:[%s8261_s3 + $0x3a8] sm:$0xf] %vm4176_vm1, %v5187_v36  ;;  %v2875_v60 = vmul.f32 0.2, %v2301_v50  ;;  %v2745_v63 = vmul.f32 0.2, %v1781_v47  ;;  %v3128_v62 = vsel %vm2616_vm0, %v2290_v53, %v2872_v8  ;;  %v2293_v31 = vadd.f32 %v7970_v6, %v7636_v25 }
 0x1f0   :  { %4281 = vst.msk [vmem:[%s8261_s3 + $0x1a0] sm:$0xf] %vm4176_vm1, %v5057_v3  ;;  %v3003_v49 = vsel %vm2491_vm5, %v1789_v43, %v2747_v55  ;;  %v1802_v24 = vadd.f32 %v7970_v6, %v7656_v51  ;;  %v5185_v1 = vpack.c.bf16 %v3128_v62, %v3128_v62  ;;  %v2314_v51 = vadd.f32 %v7970_v6, %v7662_v9 }
 0x1f1   :  { %v5060_v19 = vpack.c.bf16 %v3003_v49, %v3003_v49  ;;  %v3131_v58 = vsel %vm2619_vm6, %v2301_v50, %v2875_v60  ;;  %v3001_v16 = vsel %vm2489_vm7, %v1781_v47, %v2745_v63  ;;  %vm2617_vm8 = vcmp.ge.f32.partialorder %v2293_v31, 0.0 }
 0x1f2   :  { %v5188_v34 = vpack.c.bf16 %v3131_v58, %v3131_v58  ;;  %v5058_v44 = vpack.c.bf16 %v3001_v16, %v3001_v16  ;;  %v2873_v35 = vmul.f32 0.2, %v2293_v31  ;;  %4409 = vst.msk [vmem:[%s8261_s3 + $0x3a0] sm:$0xf] %vm4176_vm1, %v5185_v1  ;;  %vm2494_vm9 = vcmp.ge.f32.partialorder %v1802_v24, 0.0 }
 0x1f3   :  { %4284 = vst.msk [vmem:[%s8261_s3 + $0x1ac] sm:$0xf] %vm4176_vm1, %v5060_v19  ;;  %v2750_v25 = vmul.f32 0.2, %v1802_v24  ;;  %v1794_v29 = vadd.f32 %v7970_v6, %v7664_v23  ;;  %v2306_v33 = vadd.f32 %v7970_v6, %v7668_v7  ;;  %v1805_v9 = vadd.f32 %v7970_v6, %v7670_v54  ;;  %v8270_v19 = vld [vmem:[#allocation2_spill] sm:$0xff] }
 0x1f4   :  { %4412 = vst.msk [vmem:[%s8261_s3 + $0x3ac] sm:$0xf] %vm4176_vm1, %v5188_v34  ;;  %4282 = vst.msk [vmem:[%s8261_s3 + $0x1a4] sm:$0xf] %vm4176_vm1, %v5058_v44  ;;  %v3129_v32 = vsel %vm2617_vm8, %v2293_v31, %v2873_v35  ;;  %v2317_v23 = vadd.f32 %v7970_v6, %v7678_v20  ;;  %vm2622_vm10 = vcmp.ge.f32.partialorder %v2314_v51, 0.0  ;;  %v1797_v3 = vadd.f32 %v7970_v6, %v7680_v27 }
 0x1f5   :  { %v5186_v42 = vpack.c.bf16 %v3129_v32, %v3129_v32  ;;  %v3006_v59 = vsel %vm2494_vm9, %v1802_v24, %v2750_v25  ;;  %v2878_v53 = vmul.f32 0.2, %v2314_v51  ;;  %vm2492_vm11 = vcmp.ge.f32.partialorder %v1794_v29, 0.0 }
 0x1f6   :  { %v5063_v43 = vpack.c.bf16 %v3006_v59, %v3006_v59  ;;  %v2748_v17 = vmul.f32 0.2, %v1794_v29  ;;  %vm2620_vm12 = vcmp.ge.f32.partialorder %v2306_v33, 0.0  ;;  %v2876_v30 = vmul.f32 0.2, %v2306_v33 }
 0x1f7   :  { %4410 = vst.msk [vmem:[%s8261_s3 + $0x3a4] sm:$0xf] %vm4176_vm1, %v5186_v42  ;;  %v3134_v7 = vsel %vm2622_vm10, %v2314_v51, %v2878_v53  ;;  %vm2495_vm13 = vcmp.ge.f32.partialorder %v1805_v9, 0.0  ;;  %v2751_v54 = vmul.f32 0.2, %v1805_v9  ;;  %vm2623_vm14 = vcmp.ge.f32.partialorder %v2317_v23, 0.0 }
 0x1f8   :  { %4287 = vst.msk [vmem:[%s8261_s3 + $0x1b8] sm:$0xf] %vm4176_vm1, %v5063_v43  ;;  %v5191_v20 = vpack.c.bf16 %v3134_v7, %v3134_v7  ;;  %v3004_v50 = vsel %vm2492_vm11, %v1794_v29, %v2748_v17  ;;  %v2879_v47 = vmul.f32 0.2, %v2317_v23  ;;  %v3132_v36 = vsel %vm2620_vm12, %v2306_v33, %v2876_v30  ;;  %v8272_v42 = vld [vmem:[#allocation4_spill] sm:$0xff]  ;;  %v8273_v17 = vld [vmem:[#allocation5_spill] sm:$0xff] }
 0x1f9   :  { %v5061_v46 = vpack.c.bf16 %v3004_v50, %v3004_v50  ;;  %v3007_v39 = vsel %vm2495_vm13, %v1805_v9, %v2751_v54  ;;  %v5189_v8 = vpack.c.bf16 %v3132_v36, %v3132_v36  ;;  %v2309_v63 = vadd.f32 %v7970_v6, %v7688_v56  ;;  %v8271_v9 = vld [vmem:[#allocation3_spill] sm:$0xff]  ;;  %v8274_v30 = vld [vmem:[#allocation6_spill] sm:$0xff] }
 0x1fa   :  { %4415 = vst.msk [vmem:[%s8261_s3 + $0x3b8] sm:$0xf] %vm4176_vm1, %v5191_v20  ;;  %v5064_v55 = vpack.c.bf16 %v3007_v39, %v3007_v39  ;;  %v3135_v60 = vsel %vm2623_vm14, %v2317_v23, %v2879_v47  ;;  %vm2493_vm15 = vcmp.ge.f32.partialorder %v1797_v3, 0.0  ;;  %v2749_v49 = vmul.f32 0.2, %v1797_v3 }
 0x1fb   :  { %4285 = vst.msk [vmem:[%s8261_s3 + $0x1b0] sm:$0xf] %vm4176_vm1, %v5061_v46  ;;  %v5192_v62 = vpack.c.bf16 %v3135_v60, %v3135_v60  ;;  %v1818_v27 = vadd.f32 %v7970_v6, %v7708_v5  ;;  %4413 = vst.msk [vmem:[%s8261_s3 + $0x3b0] sm:$0xf] %vm4176_vm1, %v5189_v8  ;;  %vm2621_vm2 = vcmp.ge.f32.partialorder %v2309_v63, 0.0  ;;  %v2330_v31 = vadd.f32 %v7970_v6, %v7714_v57 }
 0x1fc   :  { %4288 = vst.msk [vmem:[%s8261_s3 + $0x1bc] sm:$0xf] %vm4176_vm1, %v5064_v55  ;;  %v2877_v56 = vmul.f32 0.2, %v2309_v63  ;;  %v1810_v24 = vadd.f32 %v7970_v6, %v7716_v22  ;;  %v3005_v5 = vsel %vm2493_vm15, %v1797_v3, %v2749_v49  ;;  %v2322_v58 = vadd.f32 %v7970_v6, %v8270_v19 }
 0x1fd   :  { %4416 = vst.msk [vmem:[%s8261_s3 + $0x3bc] sm:$0xf] %vm4176_vm1, %v5192_v62  ;;  %vm2498_vm3 = vcmp.ge.f32.partialorder %v1818_v27, 0.0  ;;  %v2754_v1 = vmul.f32 0.2, %v1818_v27  ;;  %v5062_v16 = vpack.c.bf16 %v3005_v5, %v3005_v5  ;;  %vm2626_vm4 = vcmp.ge.f32.partialorder %v2330_v31, 0.0 }
 0x1fe   :  { %v3133_v34 = vsel %vm2621_vm2, %v2309_v63, %v2877_v56  ;;  %v2882_v44 = vmul.f32 0.2, %v2330_v31  ;;  %vm2496_vm0 = vcmp.ge.f32.partialorder %v1810_v24, 0.0  ;;  %v2752_v25 = vmul.f32 0.2, %v1810_v24 }
 0x1ff   :  { %v5190_v35 = vpack.c.bf16 %v3133_v34, %v3133_v34  ;;  %v3010_v57 = vsel %vm2498_vm3, %v1818_v27, %v2754_v1  ;;  %4286 = vst.msk [vmem:[%s8261_s3 + $0x1b4] sm:$0xf] %vm4176_vm1, %v5062_v16  ;;  %vm2624_vm5 = vcmp.ge.f32.partialorder %v2322_v58, 0.0  ;;  %v2880_v29 = vmul.f32 0.2, %v2322_v58  ;;  %v8276_v34 = vld [vmem:[#allocation8_spill] sm:$0xff] }
 0x200   :  { %v5067_v22 = vpack.c.bf16 %v3010_v57, %v3010_v57  ;;  %v3138_v51 = vsel %vm2626_vm4, %v2330_v31, %v2882_v44  ;;  %v3008_v33 = vsel %vm2496_vm0, %v1810_v24, %v2752_v25  ;;  %v1821_v23 = vadd.f32 %v7970_v6, %v8271_v9  ;;  %v8277_v9 = vld [vmem:[#allocation9_spill] sm:$0xff] }
 0x201   :  { %4414 = vst.msk [vmem:[%s8261_s3 + $0x3b4] sm:$0xf] %vm4176_vm1, %v5190_v35  ;;  %v5195_v32 = vpack.c.bf16 %v3138_v51, %v3138_v51  ;;  %v2333_v59 = vadd.f32 %v7970_v6, %v8272_v42  ;;  %v5065_v53 = vpack.c.bf16 %v3008_v33, %v3008_v33  ;;  %v3136_v43 = vsel %vm2624_vm5, %v2322_v58, %v2880_v29  ;;  %v8275_v58 = vld [vmem:[#allocation7_spill] sm:$0xff] }
 0x202   :  { %4291 = vst.msk [vmem:[%s8261_s3 + $0x1c8] sm:$0xf] %vm4176_vm1, %v5067_v22  ;;  %v1813_v7 = vadd.f32 %v7970_v6, %v8273_v17  ;;  %v2325_v54 = vadd.f32 %v7970_v6, %v8274_v30  ;;  %v5193_v20 = vpack.c.bf16 %v3136_v43, %v3136_v43  ;;  %vm2499_vm6 = vcmp.ge.f32.partialorder %v1821_v23, 0.0 }
 0x203   :  { %4419 = vst.msk [vmem:[%s8261_s3 + $0x3c8] sm:$0xf] %vm4176_vm1, %v5195_v32  ;;  %v2755_v50 = vmul.f32 0.2, %v1821_v23  ;;  %vm2627_vm7 = vcmp.ge.f32.partialorder %v2333_v59, 0.0  ;;  %v1834_v3 = vadd.f32 %v7970_v6, %v7762_v12  ;;  %v2346_v8 = vadd.f32 %v7970_v6, %v7768_v10 }
 0x204   :  { %4289 = vst.msk [vmem:[%s8261_s3 + $0x1c0] sm:$0xf] %vm4176_vm1, %v5065_v53  ;;  %v2883_v47 = vmul.f32 0.2, %v2333_v59  ;;  %vm2497_vm8 = vcmp.ge.f32.partialorder %v1813_v7, 0.0  ;;  %vm2625_vm9 = vcmp.ge.f32.partialorder %v2325_v54, 0.0  ;;  %v1826_v62 = vadd.f32 %v7970_v6, %v7782_v13 }
 0x205   :  { %v2753_v46 = vmul.f32 0.2, %v1813_v7  ;;  %4417 = vst.msk [vmem:[%s8261_s3 + $0x3c0] sm:$0xf] %vm4176_vm1, %v5193_v20  ;;  %v3011_v36 = vsel %vm2499_vm6, %v1821_v23, %v2755_v50  ;;  %v2881_v39 = vmul.f32 0.2, %v2325_v54  ;;  %v2338_v13 = vadd.f32 %v7970_v6, %v7784_v52 }
 0x206   :  { %v5068_v55 = vpack.c.bf16 %v3011_v36, %v3011_v36  ;;  %v3139_v60 = vsel %vm2627_vm7, %v2333_v59, %v2883_v47  ;;  %vm2502_vm10 = vcmp.ge.f32.partialorder %v1834_v3, 0.0  ;;  %v2758_v12 = vmul.f32 0.2, %v1834_v3 }
 0x207   :  { %v3009_v63 = vsel %vm2497_vm8, %v1813_v7, %v2753_v46  ;;  %v5196_v49 = vpack.c.bf16 %v3139_v60, %v3139_v60  ;;  %v3137_v56 = vsel %vm2625_vm9, %v2325_v54, %v2881_v39  ;;  %vm2630_vm11 = vcmp.ge.f32.partialorder %v2346_v8, 0.0 }
 0x208   :  { %v5066_v27 = vpack.c.bf16 %v3009_v63, %v3009_v63  ;;  %4292 = vst.msk [vmem:[%s8261_s3 + $0x1cc] sm:$0xf] %vm4176_vm1, %v5068_v55  ;;  %v5194_v31 = vpack.c.bf16 %v3137_v56, %v3137_v56  ;;  %v2886_v24 = vmul.f32 0.2, %v2346_v8  ;;  %vm2500_vm12 = vcmp.ge.f32.partialorder %v1826_v62, 0.0 }
 0x209   :  { %4420 = vst.msk [vmem:[%s8261_s3 + $0x3cc] sm:$0xf] %vm4176_vm1, %v5196_v49  ;;  %v2756_v10 = vmul.f32 0.2, %v1826_v62  ;;  %v1837_v5 = vadd.f32 %v7970_v6, %v7795_v2  ;;  %v3014_v1 = vsel %vm2502_vm10, %v1834_v3, %v2758_v12  ;;  %v2349_v16 = vadd.f32 %v7970_v6, %v8275_v58 }
 0x20a   :  { %4290 = vst.msk [vmem:[%s8261_s3 + $0x1c4] sm:$0xf] %vm4176_vm1, %v5066_v27  ;;  %4418 = vst.msk [vmem:[%s8261_s3 + $0x3c4] sm:$0xf] %vm4176_vm1, %v5194_v31  ;;  %v3142_v19 = vsel %vm2630_vm11, %v2346_v8, %v2886_v24  ;;  %v1829_v44 = vadd.f32 %v7970_v6, %v8276_v34  ;;  %v5071_v35 = vpack.c.bf16 %v3014_v1, %v3014_v1  ;;  %vm2628_vm13 = vcmp.ge.f32.partialorder %v2338_v13, 0.0 }
 0x20b   :  { %v5199_v57 = vpack.c.bf16 %v3142_v19, %v3142_v19  ;;  %v3012_v25 = vsel %vm2500_vm12, %v1826_v62, %v2756_v10  ;;  %v2884_v22 = vmul.f32 0.2, %v2338_v13  ;;  %vm2503_vm14 = vcmp.ge.f32.partialorder %v1837_v5, 0.0 }
 0x20c   :  { %v5069_v52 = vpack.c.bf16 %v3012_v25, %v3012_v25  ;;  %v2759_v2 = vmul.f32 0.2, %v1837_v5  ;;  %4295 = vst.msk [vmem:[%s8261_s3 + $0x1d8] sm:$0xf] %vm4176_vm1, %v5071_v35  ;;  %vm2631_vm15 = vcmp.ge.f32.partialorder %v2349_v16, 0.0  ;;  %vm2501_vm2 = vcmp.ge.f32.partialorder %v1829_v44, 0.0 }
 0x20d   :  { %4423 = vst.msk [vmem:[%s8261_s3 + $0x3d8] sm:$0xf] %vm4176_vm1, %v5199_v57  ;;  %v2887_v51 = vmul.f32 0.2, %v2349_v16  ;;  %v2757_v29 = vmul.f32 0.2, %v1829_v44  ;;  %v3140_v32 = vsel %vm2628_vm13, %v2338_v13, %v2884_v22  ;;  %v2341_v23 = vadd.f32 %v7970_v6, %v8277_v9 }
 0x20e   :  { %4293 = vst.msk [vmem:[%s8261_s3 + $0x1d0] sm:$0xf] %vm4176_vm1, %v5069_v52  ;;  %v3015_v33 = vsel %vm2503_vm14, %v1837_v5, %v2759_v2  ;;  %v1850_v42 = vadd.f32 %v7970_v6, %v7819_v61  ;;  %v5197_v59 = vpack.c.bf16 %v3140_v32, %v3140_v32  ;;  %v2362_v20 = vadd.f32 %v7970_v6, %v7821_v45 }
 0x20f   :  { %v5072_v53 = vpack.c.bf16 %v3015_v33, %v3015_v33  ;;  %v3143_v43 = vsel %vm2631_vm15, %v2349_v16, %v2887_v51  ;;  %v3013_v17 = vsel %vm2501_vm2, %v1829_v44, %v2757_v29  ;;  %vm2629_vm3 = vcmp.ge.f32.partialorder %v2341_v23, 0.0 }
 0x210   :  { %v5200_v7 = vpack.c.bf16 %v3143_v43, %v3143_v43  ;;  %v5070_v30 = vpack.c.bf16 %v3013_v17, %v3013_v17  ;;  %v2885_v54 = vmul.f32 0.2, %v2341_v23  ;;  %4421 = vst.msk [vmem:[%s8261_s3 + $0x3d0] sm:$0xf] %vm4176_vm1, %v5197_v59  ;;  %vm2506_vm4 = vcmp.ge.f32.partialorder %v1850_v42, 0.0 }
 0x211   :  { %4296 = vst.msk [vmem:[%s8261_s3 + $0x1dc] sm:$0xf] %vm4176_vm1, %v5072_v53  ;;  %v2762_v61 = vmul.f32 0.2, %v1850_v42  ;;  %v1842_v50 = vadd.f32 %v7970_v6, %v7823_v41  ;;  %v2354_v46 = vadd.f32 %v7970_v6, %v7837_v26  ;;  %v1853_v45 = vadd.f32 %v7970_v6, %v7839_v11 }
 0x212   :  { %4424 = vst.msk [vmem:[%s8261_s3 + $0x3dc] sm:$0xf] %vm4176_vm1, %v5200_v7  ;;  %4294 = vst.msk [vmem:[%s8261_s3 + $0x1d4] sm:$0xf] %vm4176_vm1, %v5070_v30  ;;  %v3141_v47 = vsel %vm2629_vm3, %v2341_v23, %v2885_v54  ;;  %v2365_v41 = vadd.f32 %v7970_v6, %v7855_v28  ;;  %vm2634_vm0 = vcmp.ge.f32.partialorder %v2362_v20, 0.0  ;;  %v1845_v31 = vadd.f32 %v7970_v6, %v7857_v21 }
 0x213   :  { %v5198_v36 = vpack.c.bf16 %v3141_v47, %v3141_v47  ;;  %v3018_v39 = vsel %vm2506_vm4, %v1850_v42, %v2762_v61  ;;  %v2890_v3 = vmul.f32 0.2, %v2362_v20  ;;  %vm2504_vm5 = vcmp.ge.f32.partialorder %v1842_v50, 0.0 }
 0x214   :  { %v5075_v8 = vpack.c.bf16 %v3018_v39, %v3018_v39  ;;  %v2760_v55 = vmul.f32 0.2, %v1842_v50  ;;  %vm2632_vm6 = vcmp.ge.f32.partialorder %v2354_v46, 0.0  ;;  %v2888_v60 = vmul.f32 0.2, %v2354_v46 }
 0x215   :  { %4422 = vst.msk [vmem:[%s8261_s3 + $0x3d4] sm:$0xf] %vm4176_vm1, %v5198_v36  ;;  %v3146_v26 = vsel %vm2634_vm0, %v2362_v20, %v2890_v3  ;;  %vm2507_vm7 = vcmp.ge.f32.partialorder %v1853_v45, 0.0  ;;  %v2763_v11 = vmul.f32 0.2, %v1853_v45  ;;  %vm2635_vm8 = vcmp.ge.f32.partialorder %v2365_v41, 0.0 }
 0x216   :  { %4299 = vst.msk [vmem:[%s8261_s3 + $0x1e8] sm:$0xf] %vm4176_vm1, %v5075_v8  ;;  %v5203_v28 = vpack.c.bf16 %v3146_v26, %v3146_v26  ;;  %v3016_v63 = vsel %vm2504_vm5, %v1842_v50, %v2760_v55  ;;  %v2891_v62 = vmul.f32 0.2, %v2365_v41  ;;  %v3144_v27 = vsel %vm2632_vm6, %v2354_v46, %v2888_v60 }
 0x217   :  { %v5073_v49 = vpack.c.bf16 %v3016_v63, %v3016_v63  ;;  %v3019_v56 = vsel %vm2507_vm7, %v1853_v45, %v2763_v11  ;;  %v5201_v12 = vpack.c.bf16 %v3144_v27, %v3144_v27  ;;  %v2357_v13 = vadd.f32 %v7970_v6, %v7859_v18 }
 0x218   :  { %4427 = vst.msk [vmem:[%s8261_s3 + $0x3e8] sm:$0xf] %vm4176_vm1, %v5203_v28  ;;  %v5076_v24 = vpack.c.bf16 %v3019_v56, %v3019_v56  ;;  %v3147_v10 = vsel %vm2635_vm8, %v2365_v41, %v2891_v62  ;;  %vm2505_vm9 = vcmp.ge.f32.partialorder %v1845_v31, 0.0  ;;  %v2761_v1 = vmul.f32 0.2, %v1845_v31 }
 0x219   :  { %4297 = vst.msk [vmem:[%s8261_s3 + $0x1e0] sm:$0xf] %vm4176_vm1, %v5073_v49  ;;  %v5204_v5 = vpack.c.bf16 %v3147_v10, %v3147_v10  ;;  %v1866_v21 = vadd.f32 %v7970_v6, %v7871_v40  ;;  %4425 = vst.msk [vmem:[%s8261_s3 + $0x3e0] sm:$0xf] %vm4176_vm1, %v5201_v12  ;;  %vm2633_vm10 = vcmp.ge.f32.partialorder %v2357_v13, 0.0  ;;  %v2378_v19 = vadd.f32 %v7970_v6, %v7879_v48 }
 0x21a   :  { %4300 = vst.msk [vmem:[%s8261_s3 + $0x1ec] sm:$0xf] %vm4176_vm1, %v5076_v24  ;;  %v2889_v18 = vmul.f32 0.2, %v2357_v13  ;;  %v1858_v58 = vadd.f32 %v7970_v6, %v7881_v15  ;;  %v3017_v40 = vsel %vm2505_vm9, %v1845_v31, %v2761_v1  ;;  %v2370_v34 = vadd.f32 %v7970_v6, %v7889_v14 }
 0x21b   :  { %4428 = vst.msk [vmem:[%s8261_s3 + $0x3ec] sm:$0xf] %vm4176_vm1, %v5204_v5  ;;  %vm2510_vm11 = vcmp.ge.f32.partialorder %v1866_v21, 0.0  ;;  %v2766_v16 = vmul.f32 0.2, %v1866_v21  ;;  %v5074_v44 = vpack.c.bf16 %v3017_v40, %v3017_v40  ;;  %vm2638_vm12 = vcmp.ge.f32.partialorder %v2378_v19, 0.0 }
 0x21c   :  { %v3145_v35 = vsel %vm2633_vm10, %v2357_v13, %v2889_v18  ;;  %v2894_v57 = vmul.f32 0.2, %v2378_v19  ;;  %vm2508_vm13 = vcmp.ge.f32.partialorder %v1858_v58, 0.0  ;;  %v2764_v52 = vmul.f32 0.2, %v1858_v58 }
 0x21d   :  { %v5202_v25 = vpack.c.bf16 %v3145_v35, %v3145_v35  ;;  %v3022_v48 = vsel %vm2510_vm11, %v1866_v21, %v2766_v16  ;;  %4298 = vst.msk [vmem:[%s8261_s3 + $0x1e4] sm:$0xf] %vm4176_vm1, %v5074_v44  ;;  %vm2636_vm14 = vcmp.ge.f32.partialorder %v2370_v34, 0.0  ;;  %v2892_v2 = vmul.f32 0.2, %v2370_v34 }
 0x21e   :  { %v5079_v15 = vpack.c.bf16 %v3022_v48, %v3022_v48  ;;  %v3150_v22 = vsel %vm2638_vm12, %v2378_v19, %v2894_v57  ;;  %v3020_v51 = vsel %vm2508_vm13, %v1858_v58, %v2764_v52  ;;  %v1869_v29 = vadd.f32 %v7970_v6, %v7891_v4 }
 0x21f   :  { %4426 = vst.msk [vmem:[%s8261_s3 + $0x3e4] sm:$0xf] %vm4176_vm1, %v5202_v25  ;;  %v5207_v14 = vpack.c.bf16 %v3150_v22, %v3150_v22  ;;  %v2381_v32 = vadd.f32 %v7970_v6, %v7905_v38  ;;  %v5077_v33 = vpack.c.bf16 %v3020_v51, %v3020_v51  ;;  %v3148_v9 = vsel %vm2636_vm14, %v2370_v34, %v2892_v2 }
 0x220   :  { %4303 = vst.msk [vmem:[%s8261_s3 + $0x1f8] sm:$0xf] %vm4176_vm1, %v5079_v15  ;;  %v1861_v23 = vadd.f32 %v7970_v6, %v7907_v0  ;;  %v2373_v42 = vadd.f32 %v7970_v6, %v7915_v37  ;;  %v5205_v4 = vpack.c.bf16 %v3148_v9, %v3148_v9  ;;  %vm2511_vm15 = vcmp.ge.f32.partialorder %v1869_v29, 0.0 }
 0x221   :  { %4431 = vst.msk [vmem:[%s8261_s3 + $0x3f8] sm:$0xf] %vm4176_vm1, %v5207_v14  ;;  %v2767_v38 = vmul.f32 0.2, %v1869_v29  ;;  %vm2639_vm2 = vcmp.ge.f32.partialorder %v2381_v32, 0.0 }
 0x222   :  { %4301 = vst.msk [vmem:[%s8261_s3 + $0x1f0] sm:$0xf] %vm4176_vm1, %v5077_v33  ;;  %v2895_v59 = vmul.f32 0.2, %v2381_v32  ;;  %vm2509_vm3 = vcmp.ge.f32.partialorder %v1861_v23, 0.0  ;;  %vm2637_vm4 = vcmp.ge.f32.partialorder %v2373_v42, 0.0 }
 0x223   :  { %v2765_v0 = vmul.f32 0.2, %v1861_v23  ;;  %4429 = vst.msk [vmem:[%s8261_s3 + $0x3f0] sm:$0xf] %vm4176_vm1, %v5205_v4  ;;  %v3023_v37 = vsel %vm2511_vm15, %v1869_v29, %v2767_v38  ;;  %v2893_v6 = vmul.f32 0.2, %v2373_v42 }
 0x224   :  { %v5080_v53 = vpack.c.bf16 %v3023_v37, %v3023_v37  ;;  %v3151_v43 = vsel %vm2639_vm2, %v2381_v32, %v2895_v59 }
 0x225   :  { %v3021_v17 = vsel %vm2509_vm3, %v1861_v23, %v2765_v0  ;;  %v5208_v7 = vpack.c.bf16 %v3151_v43, %v3151_v43  ;;  %v3149_v54 = vsel %vm2637_vm4, %v2373_v42, %v2893_v6 }
 0x226   :  { %v5078_v30 = vpack.c.bf16 %v3021_v17, %v3021_v17  ;;  %4304 = vst.msk [vmem:[%s8261_s3 + $0x1fc] sm:$0xf] %vm4176_vm1, %v5080_v53  ;;  %v5206_v61 = vpack.c.bf16 %v3149_v54, %v3149_v54 }
 0x227   :  { %4432 = vst.msk [vmem:[%s8261_s3 + $0x3fc] sm:$0xf] %vm4176_vm1, %v5208_v7 }
 0x228   :  { %4302 = vst.msk [vmem:[%s8261_s3 + $0x1f4] sm:$0xf] %vm4176_vm1, %v5078_v30  ;;  %4430 = vst.msk [vmem:[%s8261_s3 + $0x3f4] sm:$0xf] %vm4176_vm1, %v5206_v61 }

// kernel: _lambda_.6
= control target key start
LH: loop header
LB: loop body
LE: loop exit
PB: predicated region body
PF: predicated region fallthrough
CT: control target
= control target key end

     0   :  { %vm624_vm0 = vcmask 130048   ;;  %s4515_s1 = inlined_call_operand.vmem [shape: bf16[128,16], index: 1, kind: input, shape index: {}]   ;;  %s4516_s0 = inlined_call_operand.vmem [shape: bf16[512,128], index: 0, kind: input, shape index: {}]   ;;  %s4517_s2 = inlined_call_operand.vmem [shape: f32[2,16], index: 2, kind: input, shape index: {}]   ;;  %s4518_s3 = inlined_call_operand.vmem [shape: bf16[512,16], index: 3, kind: output, shape index: {}]  }
   0x1   :  { %v2048_v0 = vld [vmem:[%s4515_s1] sm:$0xff]   ;;  %v2049_v1 = vld [vmem:[%s4515_s1 + $0x8] sm:$0xff]   ;;  %v2050_v2 = vld [vmem:[%s4515_s1 + $0x10] sm:$0xff]  }
   0x2   :  { %1952 = vmatprep.subr.bf16.mxu0 %v2048_v0  ;;  %2032 = vmatprep.subr.bf16.mxu1 %v2048_v0  ;;  %v2051_v3 = vld [vmem:[%s4515_s1 + $0x18] sm:$0xff]   ;;  %v2056_v4 = vld [vmem:[%s4516_s0] sm:$0xff]   ;;  %v2053_v6 = vld [vmem:[%s4515_s1 + $0x28] sm:$0xff]  }
   0x3   :  { %1953 = vmatpush3.bf16.msra.mxu0 %v2048_v0  ;;  %2040 = vmatpush3.bf16.msra.mxu1 %v2048_v0  ;;  %v2052_v5 = vld [vmem:[%s4515_s1 + $0x20] sm:$0xff]   ;;  %v2054_v7 = vld [vmem:[%s4515_s1 + $0x30] sm:$0xff]   ;;  %v2055_v8 = vld [vmem:[%s4515_s1 + $0x38] sm:$0xff]  }
   0x4   :  { %1954 = vmatprep.subr.bf16.mxu0 %v2049_v1  ;;  %2033 = vmatprep.subr.bf16.mxu1 %v2049_v1  ;;  %v2072_v9 = vld [vmem:[%s4516_s0 + $0x80] sm:$0xff]   ;;  %v2057_v10 = vld [vmem:[%s4516_s0 + $0x8] sm:$0xff]   ;;  %v2058_v11 = vld [vmem:[%s4516_s0 + $0x10] sm:$0xff]  }
   0x5   :  { %1968 = vmatprep.mubr.bf16.mxu0 %v2056_v4  ;;  %2000 = vmatprep.mubr.bf16.mxu1 %v2072_v9  ;;  %v2073_v12 = vld [vmem:[%s4516_s0 + $0x88] sm:$0xff]   ;;  %v2074_v13 = vld [vmem:[%s4516_s0 + $0x90] sm:$0xff]   ;;  %v2059_v14 = vld [vmem:[%s4516_s0 + $0x18] sm:$0xff]  }
   0x6   :  { %v2060_v15 = vld [vmem:[%s4516_s0 + $0x20] sm:$0xff]   ;;  %v2075_v16 = vld [vmem:[%s4516_s0 + $0x98] sm:$0xff]   ;;  %v2061_v18 = vld [vmem:[%s4516_s0 + $0x28] sm:$0xff]  }
   0x7   :  { %1955 = vmatpush3.bf16.msra.mxu0 %v2049_v1  ;;  %2041 = vmatpush3.bf16.msra.mxu1 %v2049_v1  ;;  %v2076_v17 = vld [vmem:[%s4516_s0 + $0xa0] sm:$0xff]   ;;  %v2077_v19 = vld [vmem:[%s4516_s0 + $0xa8] sm:$0xff]   ;;  %v2062_v20 = vld [vmem:[%s4516_s0 + $0x30] sm:$0xff]  }
   0x8   :  { %1956 = vmatprep.subr.bf16.mxu0 %v2050_v2  ;;  %2034 = vmatprep.subr.bf16.mxu1 %v2050_v2  ;;  %v2078_v21 = vld [vmem:[%s4516_s0 + $0xb0] sm:$0xff]   ;;  %v2063_v22 = vld [vmem:[%s4516_s0 + $0x38] sm:$0xff]   ;;  %v2064_v24 = vld [vmem:[%s4516_s0 + $0x40] sm:$0xff]  }
   0x9   :  { %v2079_v23 = vld [vmem:[%s4516_s0 + $0xb8] sm:$0xff]   ;;  %v2080_v25 = vld [vmem:[%s4516_s0 + $0xc0] sm:$0xff]   ;;  %v2065_v26 = vld [vmem:[%s4516_s0 + $0x48] sm:$0xff]  }
   0xa   :  { %v2081_v27 = vld [vmem:[%s4516_s0 + $0xc8] sm:$0xff]   ;;  %v2066_v28 = vld [vmem:[%s4516_s0 + $0x50] sm:$0xff]   ;;  %v2067_v30 = vld [vmem:[%s4516_s0 + $0x58] sm:$0xff]  }
   0xb   :  { %1957 = vmatpush3.bf16.msra.mxu0 %v2050_v2  ;;  %2042 = vmatpush3.bf16.msra.mxu1 %v2050_v2  ;;  %v2082_v29 = vld [vmem:[%s4516_s0 + $0xd0] sm:$0xff]   ;;  %v2083_v31 = vld [vmem:[%s4516_s0 + $0xd8] sm:$0xff]   ;;  %v2068_v32 = vld [vmem:[%s4516_s0 + $0x60] sm:$0xff]  }
   0xc   :  { %1958 = vmatprep.subr.bf16.mxu0 %v2051_v3  ;;  %2035 = vmatprep.subr.bf16.mxu1 %v2051_v3  ;;  %v2084_v33 = vld [vmem:[%s4516_s0 + $0xe0] sm:$0xff]   ;;  %v2069_v34 = vld [vmem:[%s4516_s0 + $0x68] sm:$0xff]   ;;  %v2070_v36 = vld [vmem:[%s4516_s0 + $0x70] sm:$0xff]  }
   0xd   :  { %v2085_v35 = vld [vmem:[%s4516_s0 + $0xe8] sm:$0xff]   ;;  %v2086_v37 = vld [vmem:[%s4516_s0 + $0xf0] sm:$0xff]   ;;  %v2071_v38 = vld [vmem:[%s4516_s0 + $0x78] sm:$0xff]  }
   0xe   :  { %v2087_v39 = vld [vmem:[%s4516_s0 + $0xf8] sm:$0xff]  }
   0xf   :  { %1959 = vmatpush3.bf16.msra.mxu0 %v2051_v3  ;;  %2043 = vmatpush3.bf16.msra.mxu1 %v2051_v3 }
  0x10   :  { %1960 = vmatprep.subr.bf16.mxu0 %v2052_v5  ;;  %2036 = vmatprep.subr.bf16.mxu1 %v2052_v5 }
  0x13   :  { %1961 = vmatpush3.bf16.msra.mxu0 %v2052_v5  ;;  %2044 = vmatpush3.bf16.msra.mxu1 %v2052_v5 }
  0x14   :  { %1962 = vmatprep.subr.bf16.mxu0 %v2053_v6  ;;  %2037 = vmatprep.subr.bf16.mxu1 %v2053_v6 }
  0x17   :  { %1963 = vmatpush3.bf16.msra.mxu0 %v2053_v6  ;;  %2045 = vmatpush3.bf16.msra.mxu1 %v2053_v6 }
  0x18   :  { %1964 = vmatprep.subr.bf16.mxu0 %v2054_v7  ;;  %2038 = vmatprep.subr.bf16.mxu1 %v2054_v7 }
  0x1b   :  { %1965 = vmatpush3.bf16.msra.mxu0 %v2054_v7  ;;  %2046 = vmatpush3.bf16.msra.mxu1 %v2054_v7 }
  0x1c   :  { %1966 = vmatprep.subr.bf16.mxu0 %v2055_v8  ;;  %2039 = vmatprep.subr.bf16.mxu1 %v2055_v8 }
  0x1f   :  { %1967 = vmatpush3.bf16.msra.mxu0 %v2055_v8  ;;  %2047 = vmatpush3.bf16.msra.mxu1 %v2055_v8 }
  0x22   :  { %1969 = vmatmul.mubr.bf16.vlgmr.msra.gmra.mrb[0].mxu0 %v2057_v10  ;;  %2001 = vmatmul.mubr.bf16.vlgmr.msra.gmra.mrb[0].mxu1 %v2073_v12 }
  0x23   :  { %1972 = vmatprep.mubr.bf16.mxu0 %v2058_v11  ;;  %2004 = vmatprep.mubr.bf16.mxu1 %v2074_v13 }
  0x2a   :  { %1973 = vmatmul.mubr.bf16.gmra.mrb[4].mxu0 %v2059_v14  ;;  %2005 = vmatmul.mubr.bf16.gmra.mrb[4].mxu1 %v2075_v16 }
  0x2b   :  { %1976 = vmatprep.mubr.bf16.mxu0 %v2060_v15  ;;  %2008 = vmatprep.mubr.bf16.mxu1 %v2076_v17 }
  0x32   :  { %1977 = vmatmul.mubr.bf16.gmra.mrb[8].mxu0 %v2061_v18  ;;  %2009 = vmatmul.mubr.bf16.gmra.mrb[8].mxu1 %v2077_v19 }
  0x33   :  { %1980 = vmatprep.mubr.bf16.mxu0 %v2062_v20  ;;  %2012 = vmatprep.mubr.bf16.mxu1 %v2078_v21 }
  0x3a   :  { %1981 = vmatmul.mubr.bf16.gmra.mrb[12].mxu0 %v2063_v22  ;;  %2013 = vmatmul.mubr.bf16.gmra.mrb[12].mxu1 %v2079_v23 }
  0x3b   :  { %1984 = vmatprep.mubr.bf16.mxu0 %v2064_v24  ;;  %2016 = vmatprep.mubr.bf16.mxu1 %v2080_v25 }
  0x42   :  { %1985 = vmatmul.mubr.bf16.gmra.mrb[16].mxu0 %v2065_v26  ;;  %2017 = vmatmul.mubr.bf16.gmra.mrb[16].mxu1 %v2081_v27 }
  0x43   :  { %1988 = vmatprep.mubr.bf16.mxu0 %v2066_v28  ;;  %2020 = vmatprep.mubr.bf16.mxu1 %v2082_v29 }
  0x4a   :  { %1989 = vmatmul.mubr.bf16.gmra.mrb[20].mxu0 %v2067_v30  ;;  %2021 = vmatmul.mubr.bf16.gmra.mrb[20].mxu1 %v2083_v31 }
  0x4b   :  { %1992 = vmatprep.mubr.bf16.mxu0 %v2068_v32  ;;  %2024 = vmatprep.mubr.bf16.mxu1 %v2084_v33 }
  0x52   :  { %1993 = vmatmul.mubr.bf16.gmra.mrb[24].mxu0 %v2069_v34  ;;  %2025 = vmatmul.mubr.bf16.gmra.mrb[24].mxu1 %v2085_v35 }
  0x53   :  { %1996 = vmatprep.mubr.bf16.mxu0 %v2070_v36  ;;  %2028 = vmatprep.mubr.bf16.mxu1 %v2086_v37 }
  0x5a   :  { %1997 = vmatmul.mubr.bf16.gmra.mrb[28].mxu0 %v2071_v38  ;;  %2029 = vmatmul.mubr.bf16.gmra.mrb[28].mxu1 %v2087_v39 }
  0xf5   :  { %v2230_v40 = vpop.f32.mrb[0].mxu0  ;;  %v2232_v41 = vpop.f32.mrb[0].mxu1 }
  0xf6   :  { %v2234_v42 = vpop.f32.mrb[1].mxu0  ;;  %v2236_v43 = vpop.f32.mrb[1].mxu1  ;;  %v628_v51 = vsel %vm624_vm0, %v2230_v40, 0.0 }
  0xf7   :  { %v2238_v44 = vpop.f32.mrb[2].mxu0  ;;  %v2240_v45 = vpop.f32.mrb[2].mxu1  ;;  %v625_v48 = vsel %vm624_vm0, %v2234_v42, 0.0 }
  0xf8   :  { %v2242_v46 = vpop.f32.mrb[3].mxu0  ;;  %v2244_v47 = vpop.f32.mrb[3].mxu1  ;;  %v630_v53 = vsel %vm624_vm0, %v2238_v44, 0.0 }
  0xf9   :  { %v626_v49 = vsel %vm624_vm0, %v2242_v46, 0.0 }
  0xfa   :  { %v627_v50 = vadd.f32 %v626_v49, %v625_v48 }
  0xfc   :  { %v629_v52 = vadd.f32 %v628_v51, %v627_v50 }
  0xfd   :  { %v2254_v54 = vpop.f32.mrb[4].mxu0  ;;  %v2256_v55 = vpop.f32.mrb[4].mxu1 }
  0xfe   :  { %v2258_v56 = vpop.f32.mrb[5].mxu0  ;;  %v631_v57 = vadd.f32 %v630_v53, %v629_v52  ;;  %v2260_v58 = vpop.f32.mrb[5].mxu1  ;;  %v636_v3 = vsel %vm624_vm0, %v2254_v54, 0.0 }
  0xff   :  { %v632_v59 = vsel %vm624_vm0, %v2258_v56, 0.0  ;;  %v2264_v60 = vpop.f32.mrb[6].mxu0  ;;  %v2266_v61 = vpop.f32.mrb[6].mxu1 }
 0x100   :  { %v633_v62 = vadd.f32 %v632_v59, %v631_v57  ;;  %v2268_v63 = vpop.f32.mrb[7].mxu0  ;;  %v2270_v0 = vpop.f32.mrb[7].mxu1  ;;  %v638_v5 = vsel %vm624_vm0, %v2264_v60, 0.0 }
 0x101   :  { %v634_v1 = vsel %vm624_vm0, %v2268_v63, 0.0 }
 0x102   :  { %v635_v2 = vadd.f32 %v634_v1, %v633_v62 }
 0x104   :  { %v637_v4 = vadd.f32 %v636_v3, %v635_v2 }
 0x105   :  { %v2278_v6 = vpop.f32.mrb[8].mxu0  ;;  %v2280_v7 = vpop.f32.mrb[8].mxu1 }
 0x106   :  { %v2282_v8 = vpop.f32.mrb[9].mxu0  ;;  %v639_v9 = vadd.f32 %v638_v5, %v637_v4  ;;  %v2284_v10 = vpop.f32.mrb[9].mxu1  ;;  %v644_v19 = vsel %vm624_vm0, %v2278_v6, 0.0 }
 0x107   :  { %v640_v11 = vsel %vm624_vm0, %v2282_v8, 0.0  ;;  %v2288_v12 = vpop.f32.mrb[10].mxu0  ;;  %v2290_v13 = vpop.f32.mrb[10].mxu1 }
 0x108   :  { %v641_v14 = vadd.f32 %v640_v11, %v639_v9  ;;  %v2292_v15 = vpop.f32.mrb[11].mxu0  ;;  %v2294_v16 = vpop.f32.mrb[11].mxu1  ;;  %v646_v21 = vsel %vm624_vm0, %v2288_v12, 0.0 }
 0x109   :  { %v642_v17 = vsel %vm624_vm0, %v2292_v15, 0.0 }
 0x10a   :  { %v643_v18 = vadd.f32 %v642_v17, %v641_v14 }
 0x10c   :  { %v645_v20 = vadd.f32 %v644_v19, %v643_v18 }
 0x10d   :  { %v2302_v22 = vpop.f32.mrb[12].mxu0  ;;  %v2304_v23 = vpop.f32.mrb[12].mxu1 }
 0x10e   :  { %v2306_v24 = vpop.f32.mrb[13].mxu0  ;;  %v647_v25 = vadd.f32 %v646_v21, %v645_v20  ;;  %v2308_v26 = vpop.f32.mrb[13].mxu1  ;;  %v652_v35 = vsel %vm624_vm0, %v2302_v22, 0.0 }
 0x10f   :  { %v648_v27 = vsel %vm624_vm0, %v2306_v24, 0.0  ;;  %v2312_v28 = vpop.f32.mrb[14].mxu0  ;;  %v2314_v29 = vpop.f32.mrb[14].mxu1 }
 0x110   :  { %v649_v30 = vadd.f32 %v648_v27, %v647_v25  ;;  %v2316_v31 = vpop.f32.mrb[15].mxu0  ;;  %v2318_v32 = vpop.f32.mrb[15].mxu1  ;;  %v654_v37 = vsel %vm624_vm0, %v2312_v28, 0.0 }
 0x111   :  { %v650_v33 = vsel %vm624_vm0, %v2316_v31, 0.0 }
 0x112   :  { %v651_v34 = vadd.f32 %v650_v33, %v649_v30 }
 0x114   :  { %v653_v36 = vadd.f32 %v652_v35, %v651_v34 }
 0x115   :  { %v2326_v38 = vpop.f32.mrb[16].mxu0  ;;  %v2328_v39 = vpop.f32.mrb[16].mxu1 }
 0x116   :  { %4596 = vst [vmem:[#allocation2_spill] sm:$0xff] %v2326_v38  ;;  %v2330_v48 = vpop.f32.mrb[17].mxu0  ;;  %v655_v49 = vadd.f32 %v654_v37, %v653_v36  ;;  %v2332_v50 = vpop.f32.mrb[17].mxu1  ;;  %v660_v3 = vsel %vm624_vm0, %v2326_v38, 0.0 }
 0x117   :  { %v656_v51 = vsel %vm624_vm0, %v2330_v48, 0.0  ;;  %v2336_v52 = vpop.f32.mrb[18].mxu0  ;;  %v2338_v53 = vpop.f32.mrb[18].mxu1 }
 0x118   :  { %4597 = vst [vmem:[#allocation3_spill] sm:$0xff] %v2336_v52  ;;  %v657_v57 = vadd.f32 %v656_v51, %v655_v49  ;;  %v2340_v59 = vpop.f32.mrb[19].mxu0  ;;  %v2342_v62 = vpop.f32.mrb[19].mxu1  ;;  %v662_v5 = vsel %vm624_vm0, %v2336_v52, 0.0 }
 0x119   :  { %v658_v1 = vsel %vm624_vm0, %v2340_v59, 0.0 }
 0x11a   :  { %v659_v2 = vadd.f32 %v658_v1, %v657_v57 }
 0x11c   :  { %v661_v4 = vadd.f32 %v660_v3, %v659_v2 }
 0x11d   :  { %v2350_v9 = vpop.f32.mrb[20].mxu0  ;;  %v2352_v11 = vpop.f32.mrb[20].mxu1 }
 0x11e   :  { %4598 = vst [vmem:[#allocation4_spill] sm:$0xff] %v2350_v9  ;;  %v2354_v14 = vpop.f32.mrb[21].mxu0  ;;  %v663_v17 = vadd.f32 %v662_v5, %v661_v4  ;;  %v2356_v18 = vpop.f32.mrb[21].mxu1  ;;  %v668_v35 = vsel %vm624_vm0, %v2350_v9, 0.0 }
 0x11f   :  { %4599 = vst [vmem:[#allocation5_spill] sm:$0xff] %v2354_v14  ;;  %v664_v19 = vsel %vm624_vm0, %v2354_v14, 0.0  ;;  %v2360_v20 = vpop.f32.mrb[22].mxu0  ;;  %v2362_v21 = vpop.f32.mrb[22].mxu1  ;;  %v688_v14 = vsel %vm624_vm0, %v2236_v43, 0.0 }
 0x120   :  { %4600 = vst [vmem:[#allocation6_spill] sm:$0xff] %v2360_v20  ;;  %v665_v25 = vadd.f32 %v664_v19, %v663_v17  ;;  %v2364_v27 = vpop.f32.mrb[23].mxu0  ;;  %v2366_v30 = vpop.f32.mrb[23].mxu1  ;;  %v670_v37 = vsel %vm624_vm0, %v2360_v20, 0.0 }
 0x121   :  { %4601 = vst [vmem:[#allocation7_spill] sm:$0xff] %v2364_v27  ;;  %v666_v33 = vsel %vm624_vm0, %v2364_v27, 0.0 }
 0x122   :  { %v667_v34 = vadd.f32 %v666_v33, %v665_v25 }
 0x124   :  { %v669_v36 = vadd.f32 %v668_v35, %v667_v34 }
 0x125   :  { %v2374_v49 = vpop.f32.mrb[24].mxu0  ;;  %v2376_v51 = vpop.f32.mrb[24].mxu1 }
 0x126   :  { %4602 = vst [vmem:[#allocation8_spill] sm:$0xff] %v2374_v49  ;;  %4603 = vst [vmem:[#allocation9_spill] sm:$0xff] %v2376_v51  ;;  %v2378_v57 = vpop.f32.mrb[25].mxu0  ;;  %v671_v1 = vadd.f32 %v670_v37, %v669_v36  ;;  %v2380_v2 = vpop.f32.mrb[25].mxu1  ;;  %v676_v35 = vsel %vm624_vm0, %v2374_v49, 0.0 }
 0x127   :  { %4604 = vst [vmem:[#allocation10_spill] sm:$0xff] %v2378_v57  ;;  %v672_v3 = vsel %vm624_vm0, %v2378_v57, 0.0  ;;  %v2384_v4 = vpop.f32.mrb[26].mxu0  ;;  %v2386_v5 = vpop.f32.mrb[26].mxu1 }
 0x128   :  { %4605 = vst [vmem:[#allocation11_spill] sm:$0xff] %v2384_v4  ;;  %4606 = vst [vmem:[#allocation12_spill] sm:$0xff] %v2386_v5  ;;  %v673_v17 = vadd.f32 %v672_v3, %v671_v1  ;;  %v2388_v19 = vpop.f32.mrb[27].mxu0  ;;  %v2390_v25 = vpop.f32.mrb[27].mxu1  ;;  %v678_v37 = vsel %vm624_vm0, %v2384_v4, 0.0 }
 0x129   :  { %4607 = vst [vmem:[#allocation13_spill] sm:$0xff] %v2388_v19  ;;  %4608 = vst [vmem:[#allocation14_spill] sm:$0xff] %v2390_v25  ;;  %v674_v33 = vsel %vm624_vm0, %v2388_v19, 0.0 }
 0x12a   :  { %v675_v34 = vadd.f32 %v674_v33, %v673_v17 }
 0x12c   :  { %v677_v36 = vadd.f32 %v676_v35, %v675_v34 }
 0x12d   :  { %v2398_v57 = vpop.f32.mrb[28].mxu0  ;;  %v2400_v20 = vpop.f32.mrb[28].mxu1 }
 0x12e   :  { %v2402_v1 = vpop.f32.mrb[29].mxu0  ;;  %v679_v3 = vadd.f32 %v678_v37, %v677_v36  ;;  %v2404_v9 = vpop.f32.mrb[29].mxu1  ;;  %v684_v36 = vsel %vm624_vm0, %v2398_v57, 0.0 }
 0x12f   :  { %4609 = vst [vmem:[#allocation15_spill] sm:$0xff] %v2402_v1  ;;  %4610 = vst [vmem:[#allocation16_spill] sm:$0xff] %v2404_v9  ;;  %v680_v19 = vsel %vm624_vm0, %v2402_v1, 0.0  ;;  %v2408_v17 = vpop.f32.mrb[30].mxu0  ;;  %v2410_v33 = vpop.f32.mrb[30].mxu1 }
 0x130   :  { %4611 = vst [vmem:[#allocation17_spill] sm:$0xff] %v2408_v17  ;;  %v681_v34 = vadd.f32 %v680_v19, %v679_v3  ;;  %v2412_v35 = vpop.f32.mrb[31].mxu0  ;;  %v2414_v4 = vpop.f32.mrb[31].mxu1  ;;  %v686_v1 = vsel %vm624_vm0, %v2408_v17, 0.0  ;;  %v690_v3 = vsel %vm624_vm0, %v2244_v47, 0.0 }
 0x131   :  { %4612 = vst [vmem:[#allocation18_spill] sm:$0xff] %v2412_v35  ;;  %v682_v49 = vsel %vm624_vm0, %v2412_v35, 0.0  ;;  %v692_v35 = vsel %vm624_vm0, %v2232_v41, 0.0 }
 0x132   :  { %v683_v27 = vadd.f32 %v682_v49, %v681_v34  ;;  %v694_v34 = vsel %vm624_vm0, %v2240_v45, 0.0 }
 0x134   :  { %v685_v37 = vadd.f32 %v684_v36, %v683_v27  ;;  %v696_v27 = vsel %vm624_vm0, %v2260_v58, 0.0 }
 0x136   :  { %v687_v52 = vadd.f32 %v686_v1, %v685_v37  ;;  %v698_v1 = vsel %vm624_vm0, %v2270_v0, 0.0 }
 0x138   :  { %v689_v19 = vadd.f32 %v688_v14, %v687_v52  ;;  %v700_v14 = vsel %vm624_vm0, %v2256_v55, 0.0 }
 0x13a   :  { %v691_v38 = vadd.f32 %v690_v3, %v689_v19  ;;  %v702_v19 = vsel %vm624_vm0, %v2266_v61, 0.0 }
 0x13c   :  { %v693_v49 = vadd.f32 %v692_v35, %v691_v38  ;;  %v704_v38 = vsel %vm624_vm0, %v2284_v10, 0.0 }
 0x13e   :  { %v695_v36 = vadd.f32 %v694_v34, %v693_v49  ;;  %v706_v49 = vsel %vm624_vm0, %v2294_v16, 0.0 }
 0x140   :  { %v697_v17 = vadd.f32 %v696_v27, %v695_v36  ;;  %v708_v27 = vsel %vm624_vm0, %v2280_v7, 0.0  ;;  %v710_v36 = vsel %vm624_vm0, %v2290_v13, 0.0 }
 0x142   :  { %v699_v52 = vadd.f32 %v698_v1, %v697_v17  ;;  %v712_v1 = vsel %vm624_vm0, %v2308_v26, 0.0 }
 0x144   :  { %v701_v37 = vadd.f32 %v700_v14, %v699_v52 }
 0x146   :  { %v703_v35 = vadd.f32 %v702_v19, %v701_v37  ;;  %v714_v37 = vsel %vm624_vm0, %v2318_v32, 0.0 }
 0x148   :  { %v705_v3 = vadd.f32 %v704_v38, %v703_v35  ;;  %v716_v38 = vsel %vm624_vm0, %v2304_v23, 0.0 }
 0x14a   :  { %v707_v34 = vadd.f32 %v706_v49, %v705_v3  ;;  %v718_v3 = vsel %vm624_vm0, %v2314_v29, 0.0  ;;  %v720_v49 = vsel %vm624_vm0, %v2332_v50, 0.0 }
 0x14c   :  { %v709_v17 = vadd.f32 %v708_v27, %v707_v34 }
 0x14e   :  { %v711_v52 = vadd.f32 %v710_v36, %v709_v17  ;;  %v722_v17 = vsel %vm624_vm0, %v2342_v62, 0.0 }
 0x150   :  { %v713_v14 = vadd.f32 %v712_v1, %v711_v52  ;;  %v724_v1 = vsel %vm624_vm0, %v2328_v39, 0.0 }
 0x152   :  { %v715_v19 = vadd.f32 %v714_v37, %v713_v14  ;;  %v726_v14 = vsel %vm624_vm0, %v2338_v53, 0.0  ;;  %v728_v37 = vsel %vm624_vm0, %v2356_v18, 0.0 }
 0x154   :  { %v717_v35 = vadd.f32 %v716_v38, %v715_v19 }
 0x156   :  { %v719_v34 = vadd.f32 %v718_v3, %v717_v35  ;;  %v730_v35 = vsel %vm624_vm0, %v2366_v30, 0.0 }
 0x158   :  { %v721_v27 = vadd.f32 %v720_v49, %v719_v34  ;;  %v732_v49 = vsel %vm624_vm0, %v2352_v11, 0.0 }
 0x15a   :  { %v723_v36 = vadd.f32 %v722_v17, %v721_v27  ;;  %v734_v27 = vsel %vm624_vm0, %v2362_v21, 0.0  ;;  %v736_v17 = vsel %vm624_vm0, %v2380_v2, 0.0 }
 0x15c   :  { %v725_v52 = vadd.f32 %v724_v1, %v723_v36 }
 0x15e   :  { %v727_v19 = vadd.f32 %v726_v14, %v725_v52  ;;  %v738_v52 = vsel %vm624_vm0, %v2390_v25, 0.0 }
 0x160   :  { %v729_v38 = vadd.f32 %v728_v37, %v727_v19  ;;  %v740_v37 = vsel %vm624_vm0, %v2376_v51, 0.0 }
 0x162   :  { %v731_v3 = vadd.f32 %v730_v35, %v729_v38  ;;  %v742_v38 = vsel %vm624_vm0, %v2386_v5, 0.0  ;;  %v744_v35 = vsel %vm624_vm0, %v2404_v9, 0.0 }
 0x164   :  { %v733_v34 = vadd.f32 %v732_v49, %v731_v3 }
 0x166   :  { %v735_v36 = vadd.f32 %v734_v27, %v733_v34  ;;  %v746_v34 = vsel %vm624_vm0, %v2414_v4, 0.0 }
 0x168   :  { %v737_v1 = vadd.f32 %v736_v17, %v735_v36  ;;  %v748_v17 = vsel %vm624_vm0, %v2400_v20, 0.0 }
 0x16a   :  { %v739_v14 = vadd.f32 %v738_v52, %v737_v1  ;;  %v750_v1 = vsel %vm624_vm0, %v2410_v33, 0.0 }
 0x16c   :  { %v741_v19 = vadd.f32 %v740_v37, %v739_v14 }
 0x16e   :  { %v743_v3 = vadd.f32 %v742_v38, %v741_v19 }
 0x170   :  { %v745_v49 = vadd.f32 %v744_v35, %v743_v3 }
 0x172   :  { %v747_v27 = vadd.f32 %v746_v34, %v745_v49  ;;  %v4621_v34 = vld [vmem:[#allocation7_spill] sm:$0xff] }
 0x174   :  { %v749_v36 = vadd.f32 %v748_v17, %v747_v27  ;;  %v4622_v27 = vld [vmem:[#allocation4_spill] sm:$0xff]  ;;  %v4624_v17 = vld [vmem:[#allocation6_spill] sm:$0xff] }
 0x176   :  { %v751_v52 = vadd.f32 %v750_v1, %v749_v36  ;;  %v4626_v1 = vld [vmem:[#allocation10_spill] sm:$0xff] }
 0x178   :  { %v752_v14 = vrot.slane %v751_v52, 4 }
 0x17a   :  { %v753_v37 = vadd.f32 %v752_v14, %v751_v52  ;;  %v4627_v14 = vld [vmem:[#allocation13_spill] sm:$0xff] }
 0x17c   :  { %v754_v5 = vrot.slane %v753_v37, 2 }
 0x17e   :  { %v755_v51 = vadd.f32 %v754_v5, %v753_v37  ;;  %v4618_v5 = vld [vmem:[#allocation3_spill] sm:$0xff] }
 0x180   :  { %v756_v25 = vrot.slane %v755_v51, 1 }
 0x182   :  { %v757_v9 = vadd.f32 %v756_v25, %v755_v51  ;;  %v4617_v51 = vld [vmem:[#allocation2_spill] sm:$0xff]  ;;  %v4619_v25 = vld [vmem:[#allocation5_spill] sm:$0xff] }
 0x184   :  { %v2486_v19 = vmul.f32 0.001953125, %v757_v9 }
 0x186   :  { %v2490_v38 = vsub.f32 %v2234_v42, %v2486_v19  ;;  %v2494_v35 = vsub.f32 %v2242_v46, %v2486_v19  ;;  %v2498_v3 = vsub.f32 %v2230_v40, %v2486_v19  ;;  %v2502_v49 = vsub.f32 %v2238_v44, %v2486_v19 }
 0x187   :  { %v2506_v9 = vsub.f32 %v2258_v56, %v2486_v19  ;;  %v2510_v42 = vsub.f32 %v2268_v63, %v2486_v19  ;;  %v2514_v46 = vsub.f32 %v2254_v54, %v2486_v19  ;;  %v2518_v40 = vsub.f32 %v2264_v60, %v2486_v19 }
 0x188   :  { %4613 = vst [vmem:[#allocation19_spill] sm:$0xff] %v2490_v38  ;;  %4614 = vst [vmem:[#allocation20_spill] sm:$0xff] %v2494_v35  ;;  %v2522_v44 = vsub.f32 %v2282_v8, %v2486_v19  ;;  %v2526_v56 = vsub.f32 %v2292_v15, %v2486_v19  ;;  %v2530_v63 = vsub.f32 %v2278_v6, %v2486_v19 }
 0x189   :  { %4615 = vst [vmem:[#allocation21_spill] sm:$0xff] %v2498_v3  ;;  %4616 = vst [vmem:[#allocation22_spill] sm:$0xff] %v2502_v49  ;;  %v2534_v54 = vsub.f32 %v2288_v12, %v2486_v19  ;;  %v2538_v60 = vsub.f32 %v2306_v24, %v2486_v19  ;;  %v2542_v8 = vsub.f32 %v2316_v31, %v2486_v19 }
 0x18a   :  { %v2546_v15 = vsub.f32 %v2302_v22, %v2486_v19  ;;  %v2550_v6 = vsub.f32 %v2312_v28, %v2486_v19  ;;  %v2554_v12 = vsub.f32 %v2330_v48, %v2486_v19  ;;  %v2558_v24 = vsub.f32 %v2340_v59, %v2486_v19 }
 0x18b   :  { %v2562_v31 = vsub.f32 %v4617_v51, %v2486_v19  ;;  %v2566_v22 = vsub.f32 %v4618_v5, %v2486_v19  ;;  %v2570_v28 = vsub.f32 %v4619_v25, %v2486_v19  ;;  %v2574_v48 = vsub.f32 %v4621_v34, %v2486_v19  ;;  %v4629_v51 = vld [vmem:[#allocation8_spill] sm:$0xff]  ;;  %v4630_v25 = vld [vmem:[#allocation11_spill] sm:$0xff] }
 0x18c   :  { %v2578_v59 = vsub.f32 %v4622_v27, %v2486_v19  ;;  %v2582_v36 = vsub.f32 %v4624_v17, %v2486_v19  ;;  %v2586_v52 = vsub.f32 %v4626_v1, %v2486_v19  ;;  %v2590_v37 = vsub.f32 %v4627_v14, %v2486_v19  ;;  %v4631_v27 = vld [vmem:[#allocation15_spill] sm:$0xff] }
 0x18d   :  { %4620 = vst [vmem:[#allocation2_spill] sm:$0xff] %v2570_v28  ;;  %v2594_v5 = vsub.f32 %v4629_v51, %v2486_v19  ;;  %v2598_v34 = vsub.f32 %v4630_v25, %v2486_v19  ;;  %v2602_v17 = vsub.f32 %v4631_v27, %v2486_v19  ;;  %v2610_v14 = vsub.f32 %v2398_v57, %v2486_v19 }
 0x18e   :  { %4623 = vst [vmem:[#allocation3_spill] sm:$0xff] %v2578_v59  ;;  %4625 = vst [vmem:[#allocation5_spill] sm:$0xff] %v2582_v36  ;;  %v4632_v36 = vld [vmem:[#allocation18_spill] sm:$0xff]  ;;  %v2618_v25 = vsub.f32 %v2236_v43, %v2486_v19  ;;  %v2622_v27 = vsub.f32 %v2244_v47, %v2486_v19  ;;  %v2630_v57 = vsub.f32 %v2240_v45, %v2486_v19 }
 0x18f   :  { %4628 = vst [vmem:[#allocation7_spill] sm:$0xff] %v2590_v37  ;;  %v2606_v1 = vsub.f32 %v4632_v36, %v2486_v19  ;;  %v4633_v37 = vld [vmem:[#allocation17_spill] sm:$0xff]  ;;  %v2626_v36 = vsub.f32 %v2232_v41, %v2486_v19  ;;  %v2638_v43 = vsub.f32 %v2270_v0, %v2486_v19  ;;  %v2642_v47 = vsub.f32 %v2256_v55, %v2486_v19 }
 0x190   :  { %v2614_v51 = vsub.f32 %v4633_v37, %v2486_v19  ;;  %v2634_v37 = vsub.f32 %v2260_v58, %v2486_v19  ;;  %v2646_v41 = vsub.f32 %v2266_v61, %v2486_v19  ;;  %v2650_v45 = vsub.f32 %v2284_v10, %v2486_v19 }
 0x191   :  { %v2654_v58 = vsub.f32 %v2294_v16, %v2486_v19  ;;  %v2658_v0 = vsub.f32 %v2280_v7, %v2486_v19  ;;  %v2662_v55 = vsub.f32 %v2290_v13, %v2486_v19  ;;  %v2666_v61 = vsub.f32 %v2308_v26, %v2486_v19 }
 0x192   :  { %v2670_v10 = vsub.f32 %v2318_v32, %v2486_v19  ;;  %v2674_v16 = vsub.f32 %v2304_v23, %v2486_v19  ;;  %v2678_v7 = vsub.f32 %v2314_v29, %v2486_v19  ;;  %v2682_v13 = vsub.f32 %v2332_v50, %v2486_v19 }
 0x193   :  { %4634 = vst [vmem:[#allocation4_spill] sm:$0xff] %v2654_v58  ;;  %4635 = vst [vmem:[#allocation6_spill] sm:$0xff] %v2658_v0  ;;  %v2686_v26 = vsub.f32 %v2342_v62, %v2486_v19  ;;  %v2690_v32 = vsub.f32 %v2328_v39, %v2486_v19  ;;  %v2694_v23 = vsub.f32 %v2338_v53, %v2486_v19 }
 0x194   :  { %4636 = vst [vmem:[#allocation10_spill] sm:$0xff] %v2662_v55  ;;  %4637 = vst [vmem:[#allocation13_spill] sm:$0xff] %v2666_v61  ;;  %v2698_v29 = vsub.f32 %v2356_v18, %v2486_v19  ;;  %v2702_v50 = vsub.f32 %v2366_v30, %v2486_v19  ;;  %v2706_v62 = vsub.f32 %v2352_v11, %v2486_v19 }
 0x195   :  { %4638 = vst [vmem:[#allocation8_spill] sm:$0xff] %v2670_v10  ;;  %4639 = vst [vmem:[#allocation11_spill] sm:$0xff] %v2674_v16  ;;  %v2710_v39 = vsub.f32 %v2362_v21, %v2486_v19  ;;  %v2714_v53 = vsub.f32 %v2380_v2, %v2486_v19  ;;  %v2734_v2 = vsub.f32 %v2414_v4, %v2486_v19 }
 0x196   :  { %4640 = vst [vmem:[#allocation15_spill] sm:$0xff] %v2678_v7  ;;  %4641 = vst [vmem:[#allocation18_spill] sm:$0xff] %v2682_v13  ;;  %v826_v4 = vmul.f32 %v2502_v49, %v2502_v49  ;;  %v829_v49 = vmul.f32 %v2514_v46, %v2514_v46 }
 0x197   :  { %4642 = vst [vmem:[#allocation17_spill] sm:$0xff] %v2686_v26  ;;  %4643 = vst [vmem:[#allocation23_spill] sm:$0xff] %v2690_v32 }
 0x198   :  { %4644 = vst [vmem:[#allocation24_spill] sm:$0xff] %v2694_v23  ;;  %4645 = vst [vmem:[#allocation25_spill] sm:$0xff] %v2698_v29  ;;  %v4648_v23 = vld [vmem:[#allocation14_spill] sm:$0xff]  ;;  %v4649_v29 = vld [vmem:[#allocation9_spill] sm:$0xff] }
 0x199   :  { %4646 = vst [vmem:[#allocation26_spill] sm:$0xff] %v2702_v50  ;;  %4647 = vst [vmem:[#allocation27_spill] sm:$0xff] %v2706_v62  ;;  %v2718_v18 = vsub.f32 %v4648_v23, %v2486_v19  ;;  %v2722_v30 = vsub.f32 %v4649_v29, %v2486_v19  ;;  %v4650_v50 = vld [vmem:[#allocation12_spill] sm:$0xff]  ;;  %v2738_v23 = vsub.f32 %v2400_v20, %v2486_v19 }
 0x19a   :  { %v2726_v11 = vsub.f32 %v4650_v50, %v2486_v19  ;;  %v4652_v62 = vld [vmem:[#allocation16_spill] sm:$0xff]  ;;  %4654 = vst [vmem:[#allocation12_spill] sm:$0xff] %v2734_v2  ;;  %v2742_v29 = vsub.f32 %v2410_v33, %v2486_v19  ;;  %v823_v50 = vmul.f32 %v2490_v38, %v2490_v38  ;;  %v827_v33 = vmul.f32 %v2506_v9, %v2506_v9 }
 0x19b   :  { %v2730_v21 = vsub.f32 %v4652_v62, %v2486_v19  ;;  %4655 = vst [vmem:[#allocation16_spill] sm:$0xff] %v2738_v23  ;;  %v825_v62 = vmul.f32 %v2498_v3, %v2498_v3 }
 0x19c   :  { %4651 = vst [vmem:[#allocation14_spill] sm:$0xff] %v2726_v11  ;;  %4656 = vst [vmem:[#allocation28_spill] sm:$0xff] %v2742_v29  ;;  %v824_v11 = vmul.f32 %v2494_v35, %v2494_v35  ;;  %v887_v2 = vsel %vm624_vm0, %v823_v50, 0.0  ;;  %v828_v35 = vmul.f32 %v2510_v42, %v2510_v42  ;;  %v892_v29 = vsel %vm624_vm0, %v826_v4, 0.0 }
 0x19d   :  { %4653 = vst [vmem:[#allocation9_spill] sm:$0xff] %v2730_v21  ;;  %v890_v19 = vsel %vm624_vm0, %v825_v62, 0.0  ;;  %v894_v50 = vsel %vm624_vm0, %v827_v33, 0.0  ;;  %v898_v62 = vsel %vm624_vm0, %v829_v49, 0.0  ;;  %v835_v49 = vmul.f32 %v2538_v60, %v2538_v60 }
 0x19e   :  { %v888_v20 = vsel %vm624_vm0, %v824_v11, 0.0  ;;  %v830_v11 = vmul.f32 %v2518_v40, %v2518_v40 }
 0x19f   :  { %v889_v23 = vadd.f32 %v888_v20, %v887_v2  ;;  %v896_v2 = vsel %vm624_vm0, %v828_v35, 0.0  ;;  %v834_v35 = vmul.f32 %v2534_v54, %v2534_v54 }
 0x1a1   :  { %v891_v38 = vadd.f32 %v890_v19, %v889_v23  ;;  %v831_v23 = vmul.f32 %v2522_v44, %v2522_v44 }
 0x1a3   :  { %v893_v3 = vadd.f32 %v892_v29, %v891_v38  ;;  %v832_v38 = vmul.f32 %v2526_v56, %v2526_v56  ;;  %v900_v29 = vsel %vm624_vm0, %v830_v11, 0.0  ;;  %v902_v33 = vsel %vm624_vm0, %v831_v23, 0.0 }
 0x1a4   :  { %v836_v11 = vmul.f32 %v2542_v8, %v2542_v8  ;;  %v837_v23 = vmul.f32 %v2546_v15, %v2546_v15 }
 0x1a5   :  { %v895_v21 = vadd.f32 %v894_v50, %v893_v3  ;;  %v833_v3 = vmul.f32 %v2530_v63, %v2530_v63 }
 0x1a7   :  { %v897_v20 = vadd.f32 %v896_v2, %v895_v21  ;;  %v904_v21 = vsel %vm624_vm0, %v832_v38, 0.0  ;;  %v838_v38 = vmul.f32 %v2550_v6, %v2550_v6 }
 0x1a9   :  { %v899_v19 = vadd.f32 %v898_v62, %v897_v20  ;;  %v906_v20 = vsel %vm624_vm0, %v833_v3, 0.0  ;;  %v839_v3 = vmul.f32 %v2554_v12, %v2554_v12 }
 0x1ab   :  { %v901_v4 = vadd.f32 %v900_v29, %v899_v19  ;;  %v908_v19 = vsel %vm624_vm0, %v834_v35, 0.0  ;;  %v840_v35 = vmul.f32 %v2558_v24, %v2558_v24 }
 0x1ad   :  { %v903_v50 = vadd.f32 %v902_v33, %v901_v4  ;;  %v910_v4 = vsel %vm624_vm0, %v835_v49, 0.0  ;;  %v841_v49 = vmul.f32 %v2562_v31, %v2562_v31 }
 0x1af   :  { %v905_v2 = vadd.f32 %v904_v21, %v903_v50  ;;  %v912_v50 = vsel %vm624_vm0, %v836_v11, 0.0  ;;  %v842_v11 = vmul.f32 %v2566_v22, %v2566_v22 }
 0x1b1   :  { %v907_v62 = vadd.f32 %v906_v20, %v905_v2  ;;  %v914_v2 = vsel %vm624_vm0, %v837_v23, 0.0  ;;  %v843_v23 = vmul.f32 %v2570_v28, %v2570_v28 }
 0x1b3   :  { %v909_v29 = vadd.f32 %v908_v19, %v907_v62  ;;  %v916_v62 = vsel %vm624_vm0, %v838_v38, 0.0  ;;  %v844_v38 = vmul.f32 %v2574_v48, %v2574_v48 }
 0x1b5   :  { %v911_v33 = vadd.f32 %v910_v4, %v909_v29  ;;  %v918_v29 = vsel %vm624_vm0, %v839_v3, 0.0  ;;  %v845_v3 = vmul.f32 %v2578_v59, %v2578_v59 }
 0x1b7   :  { %v913_v21 = vadd.f32 %v912_v50, %v911_v33  ;;  %v920_v33 = vsel %vm624_vm0, %v840_v35, 0.0  ;;  %v4657_v35 = vld [vmem:[#allocation5_spill] sm:$0xff] }
 0x1b9   :  { %v915_v20 = vadd.f32 %v914_v2, %v913_v21  ;;  %v922_v21 = vsel %vm624_vm0, %v841_v49, 0.0  ;;  %v847_v49 = vmul.f32 %v2586_v52, %v2586_v52 }
 0x1bb   :  { %v917_v19 = vadd.f32 %v916_v62, %v915_v20  ;;  %v924_v20 = vsel %vm624_vm0, %v842_v11, 0.0  ;;  %v4658_v11 = vld [vmem:[#allocation7_spill] sm:$0xff] }
 0x1bd   :  { %v919_v4 = vadd.f32 %v918_v29, %v917_v19  ;;  %v926_v19 = vsel %vm624_vm0, %v843_v23, 0.0  ;;  %v849_v23 = vmul.f32 %v2594_v5, %v2594_v5 }
 0x1bf   :  { %v921_v50 = vadd.f32 %v920_v33, %v919_v4  ;;  %v846_v4 = vmul.f32 %v4657_v35, %v4657_v35  ;;  %v928_v33 = vsel %vm624_vm0, %v844_v38, 0.0  ;;  %v850_v38 = vmul.f32 %v2598_v34, %v2598_v34 }
 0x1c1   :  { %v923_v2 = vadd.f32 %v922_v21, %v921_v50  ;;  %v930_v50 = vsel %vm624_vm0, %v845_v3, 0.0  ;;  %v938_v3 = vsel %vm624_vm0, %v849_v23, 0.0  ;;  %v855_v23 = vmul.f32 %v2618_v25, %v2618_v25 }
 0x1c3   :  { %v925_v62 = vadd.f32 %v924_v20, %v923_v2  ;;  %v848_v2 = vmul.f32 %v4658_v11, %v4658_v11  ;;  %v932_v20 = vsel %vm624_vm0, %v846_v4, 0.0  ;;  %v852_v4 = vmul.f32 %v2606_v1, %v2606_v1 }
 0x1c5   :  { %v927_v29 = vadd.f32 %v926_v19, %v925_v62  ;;  %v934_v62 = vsel %vm624_vm0, %v847_v49, 0.0 }
 0x1c7   :  { %v929_v28 = vadd.f32 %v928_v33, %v927_v29  ;;  %v936_v29 = vsel %vm624_vm0, %v848_v2, 0.0  ;;  %v854_v2 = vmul.f32 %v2614_v51, %v2614_v51 }
 0x1c9   :  { %v931_v21 = vadd.f32 %v930_v50, %v929_v28  ;;  %v851_v28 = vmul.f32 %v2602_v17, %v2602_v17 }
 0x1cb   :  { %v933_v59 = vadd.f32 %v932_v20, %v931_v21  ;;  %v940_v21 = vsel %vm624_vm0, %v850_v38, 0.0  ;;  %v942_v49 = vsel %vm624_vm0, %v851_v28, 0.0  ;;  %v856_v38 = vmul.f32 %v2622_v27, %v2622_v27 }
 0x1cc   :  { %v857_v28 = vmul.f32 %v2626_v36, %v2626_v36 }
 0x1cd   :  { %v935_v19 = vadd.f32 %v934_v62, %v933_v59  ;;  %v853_v59 = vmul.f32 %v2610_v14, %v2610_v14 }
 0x1cf   :  { %v937_v33 = vadd.f32 %v936_v29, %v935_v19  ;;  %v944_v19 = vsel %vm624_vm0, %v852_v4, 0.0  ;;  %v858_v4 = vmul.f32 %v2630_v57, %v2630_v57 }
 0x1d1   :  { %v939_v50 = vadd.f32 %v938_v3, %v937_v33  ;;  %v946_v33 = vsel %vm624_vm0, %v853_v59, 0.0  ;;  %v859_v59 = vmul.f32 %v2634_v37, %v2634_v37 }
 0x1d3   :  { %v941_v20 = vadd.f32 %v940_v21, %v939_v50  ;;  %v948_v50 = vsel %vm624_vm0, %v854_v2, 0.0  ;;  %v860_v2 = vmul.f32 %v2638_v43, %v2638_v43 }
 0x1d5   :  { %v943_v62 = vadd.f32 %v942_v49, %v941_v20  ;;  %v950_v20 = vsel %vm624_vm0, %v855_v23, 0.0  ;;  %v861_v23 = vmul.f32 %v2642_v47, %v2642_v47 }
 0x1d7   :  { %v945_v29 = vadd.f32 %v944_v19, %v943_v62  ;;  %v952_v62 = vsel %vm624_vm0, %v856_v38, 0.0  ;;  %v862_v38 = vmul.f32 %v2646_v41, %v2646_v41 }
 0x1d9   :  { %v947_v3 = vadd.f32 %v946_v33, %v945_v29  ;;  %v954_v29 = vsel %vm624_vm0, %v857_v28, 0.0  ;;  %v863_v28 = vmul.f32 %v2650_v45, %v2650_v45 }
 0x1db   :  { %v949_v21 = vadd.f32 %v948_v50, %v947_v3  ;;  %v956_v3 = vsel %vm624_vm0, %v858_v4, 0.0  ;;  %v864_v4 = vmul.f32 %v2654_v58, %v2654_v58 }
 0x1dd   :  { %v951_v49 = vadd.f32 %v950_v20, %v949_v21  ;;  %v958_v21 = vsel %vm624_vm0, %v859_v59, 0.0  ;;  %v865_v59 = vmul.f32 %v2658_v0, %v2658_v0 }
 0x1df   :  { %v953_v19 = vadd.f32 %v952_v62, %v951_v49  ;;  %v960_v49 = vsel %vm624_vm0, %v860_v2, 0.0  ;;  %v866_v2 = vmul.f32 %v2662_v55, %v2662_v55 }
 0x1e1   :  { %v955_v33 = vadd.f32 %v954_v29, %v953_v19  ;;  %v962_v19 = vsel %vm624_vm0, %v861_v23, 0.0  ;;  %v867_v23 = vmul.f32 %v2666_v61, %v2666_v61 }
 0x1e3   :  { %v957_v50 = vadd.f32 %v956_v3, %v955_v33  ;;  %v964_v33 = vsel %vm624_vm0, %v862_v38, 0.0  ;;  %v868_v38 = vmul.f32 %v2670_v10, %v2670_v10 }
 0x1e5   :  { %v959_v20 = vadd.f32 %v958_v21, %v957_v50  ;;  %v966_v50 = vsel %vm624_vm0, %v863_v28, 0.0  ;;  %v869_v28 = vmul.f32 %v2674_v16, %v2674_v16 }
 0x1e7   :  { %v961_v62 = vadd.f32 %v960_v49, %v959_v20  ;;  %v968_v20 = vsel %vm624_vm0, %v864_v4, 0.0  ;;  %v870_v4 = vmul.f32 %v2678_v7, %v2678_v7 }
 0x1e9   :  { %v963_v29 = vadd.f32 %v962_v19, %v961_v62  ;;  %v970_v62 = vsel %vm624_vm0, %v865_v59, 0.0  ;;  %v871_v59 = vmul.f32 %v2682_v13, %v2682_v13 }
 0x1eb   :  { %v965_v3 = vadd.f32 %v964_v33, %v963_v29  ;;  %v972_v29 = vsel %vm624_vm0, %v866_v2, 0.0  ;;  %v872_v2 = vmul.f32 %v2686_v26, %v2686_v26 }
 0x1ed   :  { %v967_v21 = vadd.f32 %v966_v50, %v965_v3  ;;  %v974_v3 = vsel %vm624_vm0, %v867_v23, 0.0  ;;  %v873_v23 = vmul.f32 %v2690_v32, %v2690_v32 }
 0x1ef   :  { %v969_v49 = vadd.f32 %v968_v20, %v967_v21  ;;  %v976_v21 = vsel %vm624_vm0, %v868_v38, 0.0  ;;  %v4659_v38 = vld [vmem:[#allocation24_spill] sm:$0xff] }
 0x1f1   :  { %v971_v19 = vadd.f32 %v970_v62, %v969_v49  ;;  %v978_v49 = vsel %vm624_vm0, %v869_v28, 0.0  ;;  %v4660_v28 = vld [vmem:[#allocation25_spill] sm:$0xff] }
 0x1f3   :  { %v973_v33 = vadd.f32 %v972_v29, %v971_v19  ;;  %v980_v19 = vsel %vm624_vm0, %v870_v4, 0.0  ;;  %v4661_v4 = vld [vmem:[#allocation26_spill] sm:$0xff] }
 0x1f5   :  { %v975_v50 = vadd.f32 %v974_v3, %v973_v33  ;;  %v982_v33 = vsel %vm624_vm0, %v871_v59, 0.0  ;;  %v4662_v59 = vld [vmem:[#allocation27_spill] sm:$0xff] }
 0x1f7   :  { %v977_v20 = vadd.f32 %v976_v21, %v975_v50  ;;  %v874_v50 = vmul.f32 %v4659_v38, %v4659_v38  ;;  %v984_v21 = vsel %vm624_vm0, %v872_v2, 0.0  ;;  %v878_v2 = vmul.f32 %v2710_v39, %v2710_v39 }
 0x1f9   :  { %v979_v62 = vadd.f32 %v978_v49, %v977_v20  ;;  %v875_v20 = vmul.f32 %v4660_v28, %v4660_v28  ;;  %v986_v49 = vsel %vm624_vm0, %v873_v23, 0.0 }
 0x1fb   :  { %v981_v29 = vadd.f32 %v980_v19, %v979_v62  ;;  %v876_v62 = vmul.f32 %v4661_v4, %v4661_v4  ;;  %v988_v19 = vsel %vm624_vm0, %v874_v50, 0.0  ;;  %v996_v50 = vsel %vm624_vm0, %v878_v2, 0.0  ;;  %v4665_v2 = vld [vmem:[#allocation12_spill] sm:$0xff] }
 0x1fd   :  { %v983_v3 = vadd.f32 %v982_v33, %v981_v29  ;;  %v877_v29 = vmul.f32 %v4662_v59, %v4662_v59  ;;  %v990_v33 = vsel %vm624_vm0, %v875_v20, 0.0 }
 0x1ff   :  { %v985_v13 = vadd.f32 %v984_v21, %v983_v3  ;;  %v992_v3 = vsel %vm624_vm0, %v876_v62, 0.0  ;;  %v994_v23 = vsel %vm624_vm0, %v877_v29, 0.0  ;;  %v4663_v62 = vld [vmem:[#allocation14_spill] sm:$0xff]  ;;  %v4664_v29 = vld [vmem:[#allocation9_spill] sm:$0xff] }
 0x201   :  { %v987_v26 = vadd.f32 %v986_v49, %v985_v13  ;;  %v879_v13 = vmul.f32 %v2714_v53, %v2714_v53 }
 0x203   :  { %v989_v32 = vadd.f32 %v988_v19, %v987_v26  ;;  %v880_v26 = vmul.f32 %v2718_v18, %v2718_v18  ;;  %v998_v20 = vsel %vm624_vm0, %v879_v13, 0.0  ;;  %v4666_v13 = vld [vmem:[#allocation16_spill] sm:$0xff] }
 0x205   :  { %v991_v38 = vadd.f32 %v990_v33, %v989_v32  ;;  %v881_v32 = vmul.f32 %v2722_v30, %v2722_v30 }
 0x207   :  { %v993_v21 = vadd.f32 %v992_v3, %v991_v38  ;;  %v882_v38 = vmul.f32 %v4663_v62, %v4663_v62  ;;  %v1000_v3 = vsel %vm624_vm0, %v880_v26, 0.0  ;;  %v4667_v26 = vld [vmem:[#allocation28_spill] sm:$0xff] }
 0x209   :  { %v995_v49 = vadd.f32 %v994_v23, %v993_v21  ;;  %v883_v21 = vmul.f32 %v4664_v29, %v4664_v29  ;;  %v1002_v23 = vsel %vm624_vm0, %v881_v32, 0.0 }
 0x20b   :  { %v997_v19 = vadd.f32 %v996_v50, %v995_v49  ;;  %v884_v49 = vmul.f32 %v4665_v2, %v4665_v2  ;;  %v1004_v50 = vsel %vm624_vm0, %v882_v38, 0.0 }
 0x20d   :  { %v999_v33 = vadd.f32 %v998_v20, %v997_v19  ;;  %v885_v19 = vmul.f32 %v4666_v13, %v4666_v13  ;;  %v1006_v20 = vsel %vm624_vm0, %v883_v21, 0.0 }
 0x20f   :  { %v1001_v4 = vadd.f32 %v1000_v3, %v999_v33  ;;  %v886_v33 = vmul.f32 %v4667_v26, %v4667_v26  ;;  %v1008_v3 = vsel %vm624_vm0, %v884_v49, 0.0  ;;  %v4678_v49 = vld [vmem:[#allocation20_spill] sm:$0xff] }
 0x211   :  { %v1003_v28 = vadd.f32 %v1002_v23, %v1001_v4  ;;  %v1010_v4 = vsel %vm624_vm0, %v885_v19, 0.0  ;;  %v1012_v23 = vsel %vm624_vm0, %v886_v33, 0.0 }
 0x213   :  { %v1005_v7 = vadd.f32 %v1004_v50, %v1003_v28 }
 0x215   :  { %v1007_v16 = vadd.f32 %v1006_v20, %v1005_v7 }
 0x217   :  { %v1009_v10 = vadd.f32 %v1008_v3, %v1007_v16  ;;  %v4680_v3 = vld [vmem:[#allocation22_spill] sm:$0xff] }
 0x219   :  { %v1011_v32 = vadd.f32 %v1010_v4, %v1009_v10 }
 0x21b   :  { %v1013_v61 = vadd.f32 %v1012_v23, %v1011_v32 }
 0x21d   :  { %v1014_v38 = vrot.slane %v1013_v61, 4 }
 0x21f   :  { %v1015_v28 = vadd.f32 %v1014_v38, %v1013_v61 }
 0x221   :  { %v1016_v50 = vrot.slane %v1015_v28, 2 }
 0x223   :  { %v1017_v55 = vadd.f32 %v1016_v50, %v1015_v28  ;;  %v4681_v50 = vld [vmem:[#allocation2_spill] sm:$0xff] }
 0x225   :  { %v1018_v0 = vrot.slane %v1017_v55, 1 }
 0x227   :  { %v1019_v58 = vadd.f32 %v1018_v0, %v1017_v55 }
 0x229   :  { %v1020_v21 = vmul.f32 0.001953125, %v1019_v58 }
 0x22b   :  { %v1021_v7 = vadd.f32 1e-05, %v1020_v21  ;;  %v4682_v21 = vld [vmem:[#allocation3_spill] sm:$0xff] }
 0x22d   :  { %2088 = vrsqrt.f32 %v1021_v7 }
 0x237   :  { %v2936_v20 = vpop.eup %2088 }
 0x238   :  { %v2940_v16 = vmul.f32 %v2936_v20, %v4662_v59  ;;  %v2944_v10 = vmul.f32 %v2936_v20, %v2710_v39  ;;  %v2948_v61 = vmul.f32 %v2936_v20, %v2714_v53  ;;  %v2952_v0 = vmul.f32 %v2936_v20, %v2718_v18  ;;  %v4677_v59 = vld [vmem:[#allocation19_spill] sm:$0xff] }
 0x239   :  { %v2956_v58 = vmul.f32 %v2936_v20, %v2722_v30  ;;  %v2960_v55 = vmul.f32 %v2936_v20, %v4663_v62  ;;  %v2964_v39 = vmul.f32 %v2936_v20, %v4664_v29  ;;  %v2968_v53 = vmul.f32 %v2936_v20, %v4665_v2  ;;  %v4679_v29 = vld [vmem:[#allocation21_spill] sm:$0xff] }
 0x23a   :  { %4668 = vst [vmem:[#allocation5_spill] sm:$0xff] %v2944_v10  ;;  %4669 = vst [vmem:[#allocation7_spill] sm:$0xff] %v2948_v61  ;;  %v2972_v18 = vmul.f32 %v2936_v20, %v4666_v13  ;;  %v2976_v30 = vmul.f32 %v2936_v20, %v4667_v26  ;;  %v1023_v62 = vmul.f32 %v2936_v20, %v4677_v59  ;;  %v4694_v61 = vld [vmem:[#allocation25_spill] sm:$0xff]  ;;  %v4695_v10 = vld [vmem:[#allocation26_spill] sm:$0xff] }
 0x23b   :  { %4670 = vst [vmem:[#allocation27_spill] sm:$0xff] %v2952_v0  ;;  %4671 = vst [vmem:[#allocation14_spill] sm:$0xff] %v2956_v58  ;;  %v1024_v19 = vmul.f32 %v2936_v20, %v4678_v49  ;;  %v1025_v33 = vmul.f32 %v2936_v20, %v4679_v29  ;;  %v1026_v2 = vmul.f32 %v2936_v20, %v4680_v3  ;;  %v4683_v49 = vld [vmem:[#allocation4_spill] sm:$0xff]  ;;  %v4684_v29 = vld [vmem:[#allocation6_spill] sm:$0xff] }
 0x23c   :  { %4672 = vst [vmem:[#allocation9_spill] sm:$0xff] %v2960_v55  ;;  %4673 = vst [vmem:[#allocation12_spill] sm:$0xff] %v2964_v39  ;;  %v1027_v13 = vmul.f32 %v2936_v20, %v2506_v9  ;;  %v1028_v4 = vmul.f32 %v2936_v20, %v2510_v42  ;;  %v1029_v26 = vmul.f32 %v2936_v20, %v2514_v46  ;;  %v4685_v3 = vld [vmem:[#allocation10_spill] sm:$0xff]  ;;  %v4692_v39 = vld [vmem:[#allocation23_spill] sm:$0xff] }
 0x23d   :  { %4674 = vst [vmem:[#allocation16_spill] sm:$0xff] %v2968_v53  ;;  %4675 = vst [vmem:[#allocation28_spill] sm:$0xff] %v2972_v18  ;;  %v1030_v32 = vmul.f32 %v2936_v20, %v2518_v40  ;;  %v1031_v23 = vmul.f32 %v2936_v20, %v2522_v44  ;;  %v1032_v38 = vmul.f32 %v2936_v20, %v2526_v56  ;;  %v4690_v18 = vld [vmem:[#allocation18_spill] sm:$0xff]  ;;  %v4691_v53 = vld [vmem:[#allocation17_spill] sm:$0xff] }
 0x23e   :  { %4676 = vst [vmem:[#allocation29_spill] sm:$0xff] %v2976_v30  ;;  %v1033_v28 = vmul.f32 %v2936_v20, %v2530_v63  ;;  %v1034_v9 = vmul.f32 %v2936_v20, %v2534_v54  ;;  %v1035_v42 = vmul.f32 %v2936_v20, %v2538_v60  ;;  %v1036_v46 = vmul.f32 %v2936_v20, %v2542_v8  ;;  %v4689_v30 = vld [vmem:[#allocation15_spill] sm:$0xff]  ;;  %v4693_v58 = vld [vmem:[#allocation24_spill] sm:$0xff] }
 0x23f   :  { %v1037_v40 = vmul.f32 %v2936_v20, %v2546_v15  ;;  %v1038_v44 = vmul.f32 %v2936_v20, %v2550_v6  ;;  %v1039_v56 = vmul.f32 %v2936_v20, %v2554_v12  ;;  %v1040_v63 = vmul.f32 %v2936_v20, %v2558_v24 }
 0x240   :  { %v1041_v54 = vmul.f32 %v2936_v20, %v2562_v31  ;;  %v1042_v60 = vmul.f32 %v2936_v20, %v2566_v22  ;;  %v1043_v8 = vmul.f32 %v2936_v20, %v4681_v50  ;;  %v1044_v15 = vmul.f32 %v2936_v20, %v2574_v48  ;;  %v4686_v50 = vld [vmem:[#allocation13_spill] sm:$0xff] }
 0x241   :  { %v1045_v6 = vmul.f32 %v2936_v20, %v4682_v21  ;;  %v1046_v12 = vmul.f32 %v2936_v20, %v4657_v35  ;;  %v1047_v24 = vmul.f32 %v2936_v20, %v2586_v52  ;;  %v1048_v31 = vmul.f32 %v2936_v20, %v4658_v11  ;;  %v4688_v21 = vld [vmem:[#allocation11_spill] sm:$0xff] }
 0x242   :  { %v1049_v22 = vmul.f32 %v2936_v20, %v2594_v5  ;;  %v1050_v7 = vmul.f32 %v2936_v20, %v2598_v34  ;;  %v1051_v48 = vmul.f32 %v2936_v20, %v2602_v17  ;;  %v1052_v59 = vmul.f32 %v2936_v20, %v2606_v1 }
 0x243   :  { %v1053_v35 = vmul.f32 %v2936_v20, %v2610_v14  ;;  %v1054_v52 = vmul.f32 %v2936_v20, %v2614_v51  ;;  %v1055_v11 = vmul.f32 %v2936_v20, %v2618_v25  ;;  %v1056_v5 = vmul.f32 %v2936_v20, %v2622_v27 }
 0x244   :  { %v1057_v34 = vmul.f32 %v2936_v20, %v2626_v36  ;;  %v1058_v17 = vmul.f32 %v2936_v20, %v2630_v57  ;;  %v1059_v1 = vmul.f32 %v2936_v20, %v2634_v37  ;;  %v1060_v14 = vmul.f32 %v2936_v20, %v2638_v43 }
 0x245   :  { %v1061_v51 = vmul.f32 %v2936_v20, %v2642_v47  ;;  %v1062_v25 = vmul.f32 %v2936_v20, %v2646_v41  ;;  %v1063_v27 = vmul.f32 %v2936_v20, %v2650_v45  ;;  %v1064_v36 = vmul.f32 %v2936_v20, %v4683_v49  ;;  %v3071_v47 = vld [vmem:[%s4517_s2] ss:$0 sm:$0xff]  ;;  %v4687_v41 = vld [vmem:[#allocation8_spill] sm:$0xff] }
 0x246   :  { %v1065_v57 = vmul.f32 %v2936_v20, %v4684_v29  ;;  %v1066_v37 = vmul.f32 %v2936_v20, %v4685_v3  ;;  %v1067_v43 = vmul.f32 %v2936_v20, %v4686_v50  ;;  %v1068_v45 = vmul.f32 %v2936_v20, %v4687_v41 }
 0x247   :  { %v1069_v49 = vmul.f32 %v2936_v20, %v4688_v21  ;;  %v1070_v29 = vmul.f32 %v2936_v20, %v4689_v30  ;;  %v1071_v3 = vmul.f32 %v2936_v20, %v4690_v18  ;;  %v1072_v50 = vmul.f32 %v2936_v20, %v4691_v53 }
 0x248   :  { %v1073_v55 = vmul.f32 %v2936_v20, %v4692_v39  ;;  %v1074_v0 = vmul.f32 %v2936_v20, %v4693_v58  ;;  %v1075_v41 = vmul.f32 %v2936_v20, %v4694_v61  ;;  %v1076_v21 = vmul.f32 %v2936_v20, %v4695_v10 }
 0x249   :  { %v3092_v30 = vmul.f32 %v3071_v47, %v1023_v62  ;;  %v3095_v18 = vmul.f32 %v3071_v47, %v1024_v19  ;;  %v3098_v53 = vmul.f32 %v3071_v47, %v1025_v33  ;;  %v3101_v39 = vmul.f32 %v3071_v47, %v1026_v2 }
 0x24a   :  { %v3104_v58 = vmul.f32 %v3071_v47, %v1027_v13  ;;  %v3107_v61 = vmul.f32 %v3071_v47, %v1028_v4  ;;  %v3110_v20 = vmul.f32 %v3071_v47, %v1029_v26  ;;  %v3113_v10 = vmul.f32 %v3071_v47, %v1030_v32 }
 0x24b   :  { %v3116_v62 = vmul.f32 %v3071_v47, %v1031_v23  ;;  %v3119_v19 = vmul.f32 %v3071_v47, %v1032_v38  ;;  %v3122_v33 = vmul.f32 %v3071_v47, %v1033_v28  ;;  %v3125_v2 = vmul.f32 %v3071_v47, %v1034_v9 }
 0x24c   :  { %v3128_v13 = vmul.f32 %v3071_v47, %v1035_v42  ;;  %v3131_v4 = vmul.f32 %v3071_v47, %v1036_v46  ;;  %v3134_v26 = vmul.f32 %v3071_v47, %v1037_v40  ;;  %v3137_v32 = vmul.f32 %v3071_v47, %v1038_v44 }
 0x24d   :  { %v3140_v23 = vmul.f32 %v3071_v47, %v1039_v56  ;;  %v3143_v38 = vmul.f32 %v3071_v47, %v1040_v63  ;;  %v3146_v28 = vmul.f32 %v3071_v47, %v1041_v54  ;;  %v3149_v9 = vmul.f32 %v3071_v47, %v1042_v60 }
 0x24e   :  { %v3152_v42 = vmul.f32 %v3071_v47, %v1043_v8  ;;  %v3155_v46 = vmul.f32 %v3071_v47, %v1044_v15  ;;  %v3158_v40 = vmul.f32 %v3071_v47, %v1045_v6  ;;  %v3161_v44 = vmul.f32 %v3071_v47, %v1046_v12 }
 0x24f   :  { %v3164_v56 = vmul.f32 %v3071_v47, %v1047_v24  ;;  %v3167_v63 = vmul.f32 %v3071_v47, %v1048_v31  ;;  %v3170_v54 = vmul.f32 %v3071_v47, %v1049_v22  ;;  %v3173_v60 = vmul.f32 %v3071_v47, %v1050_v7 }
 0x250   :  { %v3176_v8 = vmul.f32 %v3071_v47, %v1051_v48  ;;  %v3179_v15 = vmul.f32 %v3071_v47, %v1052_v59  ;;  %v3182_v6 = vmul.f32 %v3071_v47, %v1053_v35  ;;  %v3185_v12 = vmul.f32 %v3071_v47, %v1054_v52 }
 0x251   :  { %v3188_v24 = vmul.f32 %v3071_v47, %v1055_v11  ;;  %v3191_v31 = vmul.f32 %v3071_v47, %v1056_v5  ;;  %v3194_v22 = vmul.f32 %v3071_v47, %v1057_v34  ;;  %v3197_v7 = vmul.f32 %v3071_v47, %v1058_v17 }
 0x252   :  { %v3200_v48 = vmul.f32 %v3071_v47, %v1059_v1  ;;  %v3203_v59 = vmul.f32 %v3071_v47, %v1060_v14  ;;  %v3206_v35 = vmul.f32 %v3071_v47, %v1061_v51  ;;  %v3209_v52 = vmul.f32 %v3071_v47, %v1062_v25 }
 0x253   :  { %v3212_v11 = vmul.f32 %v3071_v47, %v1063_v27  ;;  %v3215_v5 = vmul.f32 %v3071_v47, %v1064_v36  ;;  %v3218_v34 = vmul.f32 %v3071_v47, %v1065_v57  ;;  %v3221_v17 = vmul.f32 %v3071_v47, %v1066_v37 }
 0x254   :  { %v3224_v1 = vmul.f32 %v3071_v47, %v1067_v43  ;;  %v3227_v14 = vmul.f32 %v3071_v47, %v1068_v45  ;;  %v3230_v51 = vmul.f32 %v3071_v47, %v1069_v49  ;;  %v3233_v25 = vmul.f32 %v3071_v47, %v1070_v29  ;;  %v3260_v29 = vld [vmem:[%s4517_s2 + $0x1] ss:$0 sm:$0xff] }
 0x255   :  { %v3236_v27 = vmul.f32 %v3071_v47, %v1071_v3  ;;  %v3239_v36 = vmul.f32 %v3071_v47, %v1072_v50  ;;  %v3242_v57 = vmul.f32 %v3071_v47, %v1073_v55  ;;  %v3245_v37 = vmul.f32 %v3071_v47, %v1074_v0  ;;  %v4700_v55 = vld [vmem:[#allocation5_spill] sm:$0xff]  ;;  %v4702_v0 = vld [vmem:[#allocation7_spill] sm:$0xff] }
 0x256   :  { %v3248_v43 = vmul.f32 %v3071_v47, %v1075_v41  ;;  %v3251_v45 = vmul.f32 %v3071_v47, %v1076_v21  ;;  %v3255_v49 = vmul.f32 %v3071_v47, %v2940_v16  ;;  %v3264_v3 = vmul.f32 %v3071_v47, %v4700_v55  ;;  %v4704_v41 = vld [vmem:[#allocation27_spill] sm:$0xff] }
 0x257   :  { %4696 = vst [vmem:[#allocation19_spill] sm:$0xff] %v3245_v37  ;;  %v3268_v50 = vmul.f32 %v3071_v47, %v4702_v0  ;;  %v3272_v21 = vmul.f32 %v3071_v47, %v4704_v41  ;;  %v4708_v37 = vld [vmem:[#allocation12_spill] sm:$0xff] }
 0x258   :  { %4697 = vst [vmem:[#allocation20_spill] sm:$0xff] %v3248_v43  ;;  %4698 = vst [vmem:[#allocation21_spill] sm:$0xff] %v3251_v45  ;;  %v4706_v45 = vld [vmem:[#allocation14_spill] sm:$0xff]  ;;  %v3284_v55 = vmul.f32 %v3071_v47, %v4708_v37  ;;  %v3304_v37 = vadd.f32 %v3260_v29, %v3095_v18  ;;  %v3324_v18 = vadd.f32 %v3260_v29, %v3110_v20 }
 0x259   :  { %4699 = vst [vmem:[#allocation22_spill] sm:$0xff] %v3255_v49  ;;  %4701 = vst [vmem:[#allocation2_spill] sm:$0xff] %v3264_v3  ;;  %v3276_v16 = vmul.f32 %v3071_v47, %v4706_v45  ;;  %v4707_v49 = vld [vmem:[#allocation9_spill] sm:$0xff]  ;;  %v4709_v3 = vld [vmem:[#allocation16_spill] sm:$0xff]  ;;  %v3344_v20 = vadd.f32 %v3260_v29, %v3125_v2  ;;  %v3364_v2 = vadd.f32 %v3260_v29, %v3140_v23 }
 0x25a   :  { %4703 = vst [vmem:[#allocation3_spill] sm:$0xff] %v3268_v50  ;;  %4705 = vst [vmem:[#allocation4_spill] sm:$0xff] %v3272_v21  ;;  %v3280_v43 = vmul.f32 %v3071_v47, %v4707_v49  ;;  %v3288_v0 = vmul.f32 %v3071_v47, %v4709_v3  ;;  %v4710_v50 = vld [vmem:[#allocation28_spill] sm:$0xff]  ;;  %v4711_v21 = vld [vmem:[#allocation29_spill] sm:$0xff]  ;;  %v3300_v49 = vadd.f32 %v3260_v29, %v3092_v30  ;;  %vm1226_vm2 = vcmp.ge.f32.partialorder %v3304_v37, 0.0 }
 0x25b   :  { %v3292_v41 = vmul.f32 %v3071_v47, %v4710_v50  ;;  %v3296_v45 = vmul.f32 %v3071_v47, %v4711_v21  ;;  %v3308_v3 = vadd.f32 %v3260_v29, %v3098_v53  ;;  %v3312_v50 = vadd.f32 %v3260_v29, %v3101_v39 }
 0x25c   :  { %v3316_v47 = vadd.f32 %v3260_v29, %v3104_v58  ;;  %v3320_v30 = vadd.f32 %v3260_v29, %v3107_v61  ;;  %v3328_v53 = vadd.f32 %v3260_v29, %v3113_v10  ;;  %v3332_v39 = vadd.f32 %v3260_v29, %v3116_v62 }
 0x25d   :  { %v3336_v58 = vadd.f32 %v3260_v29, %v3119_v19  ;;  %v3340_v61 = vadd.f32 %v3260_v29, %v3122_v33  ;;  %v3348_v10 = vadd.f32 %v3260_v29, %v3128_v13  ;;  %v3352_v62 = vadd.f32 %v3260_v29, %v3131_v4 }
 0x25e   :  { %v3356_v19 = vadd.f32 %v3260_v29, %v3134_v26  ;;  %v3360_v33 = vadd.f32 %v3260_v29, %v3137_v32  ;;  %v3368_v13 = vadd.f32 %v3260_v29, %v3143_v38  ;;  %v3372_v4 = vadd.f32 %v3260_v29, %v3146_v28  ;;  %v4718_v21 = vld [vmem:[#allocation19_spill] sm:$0xff] }
 0x25f   :  { %v3376_v26 = vadd.f32 %v3260_v29, %v3149_v9  ;;  %v3380_v32 = vadd.f32 %v3260_v29, %v3152_v42  ;;  %v3384_v23 = vadd.f32 %v3260_v29, %v3155_v46  ;;  %v3388_v38 = vadd.f32 %v3260_v29, %v3158_v40 }
 0x260   :  { %v3392_v28 = vadd.f32 %v3260_v29, %v3161_v44  ;;  %v3396_v9 = vadd.f32 %v3260_v29, %v3164_v56  ;;  %v3400_v42 = vadd.f32 %v3260_v29, %v3167_v63  ;;  %v3404_v46 = vadd.f32 %v3260_v29, %v3170_v54 }
 0x261   :  { %v3408_v40 = vadd.f32 %v3260_v29, %v3173_v60  ;;  %v3412_v44 = vadd.f32 %v3260_v29, %v3176_v8  ;;  %v3416_v56 = vadd.f32 %v3260_v29, %v3179_v15  ;;  %v3420_v63 = vadd.f32 %v3260_v29, %v3182_v6 }
 0x262   :  { %v3424_v54 = vadd.f32 %v3260_v29, %v3185_v12  ;;  %v3428_v60 = vadd.f32 %v3260_v29, %v3188_v24  ;;  %v3432_v8 = vadd.f32 %v3260_v29, %v3191_v31  ;;  %v3436_v15 = vadd.f32 %v3260_v29, %v3194_v22 }
 0x263   :  { %v3440_v6 = vadd.f32 %v3260_v29, %v3197_v7  ;;  %v3444_v12 = vadd.f32 %v3260_v29, %v3200_v48  ;;  %v3448_v24 = vadd.f32 %v3260_v29, %v3203_v59  ;;  %v3452_v31 = vadd.f32 %v3260_v29, %v3206_v35 }
 0x264   :  { %v3456_v22 = vadd.f32 %v3260_v29, %v3209_v52  ;;  %v3460_v7 = vadd.f32 %v3260_v29, %v3212_v11  ;;  %v3464_v48 = vadd.f32 %v3260_v29, %v3215_v5  ;;  %v3468_v59 = vadd.f32 %v3260_v29, %v3218_v34 }
 0x265   :  { %v3472_v35 = vadd.f32 %v3260_v29, %v3221_v17  ;;  %v3476_v52 = vadd.f32 %v3260_v29, %v3224_v1  ;;  %v3480_v11 = vadd.f32 %v3260_v29, %v3227_v14  ;;  %v3484_v5 = vadd.f32 %v3260_v29, %v3230_v51 }
 0x266   :  { %4712 = vst [vmem:[#allocation6_spill] sm:$0xff] %v3464_v48  ;;  %v3488_v34 = vadd.f32 %v3260_v29, %v3233_v25  ;;  %v3492_v17 = vadd.f32 %v3260_v29, %v3236_v27  ;;  %v3496_v1 = vadd.f32 %v3260_v29, %v3239_v36  ;;  %v3500_v14 = vadd.f32 %v3260_v29, %v3242_v57 }
 0x267   :  { %4713 = vst [vmem:[#allocation10_spill] sm:$0xff] %v3484_v5  ;;  %v3504_v51 = vadd.f32 %v3260_v29, %v4718_v21  ;;  %v4720_v5 = vld [vmem:[#allocation20_spill] sm:$0xff]  ;;  %vm1225_vm1 = vcmp.ge.f32.partialorder %v3300_v49, 0.0  ;;  %vm1227_vm3 = vcmp.ge.f32.partialorder %v3308_v3, 0.0  ;;  %vm1228_vm4 = vcmp.ge.f32.partialorder %v3312_v50, 0.0 }
 0x268   :  { %4714 = vst [vmem:[#allocation13_spill] sm:$0xff] %v3488_v34  ;;  %4715 = vst [vmem:[#allocation8_spill] sm:$0xff] %v3492_v17  ;;  %v3508_v25 = vadd.f32 %v3260_v29, %v4720_v5  ;;  %v4722_v34 = vld [vmem:[#allocation21_spill] sm:$0xff]  ;;  %v4724_v17 = vld [vmem:[#allocation22_spill] sm:$0xff]  ;;  %vm1229_vm5 = vcmp.ge.f32.partialorder %v3316_v47, 0.0  ;;  %vm1230_vm6 = vcmp.ge.f32.partialorder %v3320_v30, 0.0 }
 0x269   :  { %4716 = vst [vmem:[#allocation11_spill] sm:$0xff] %v3496_v1  ;;  %4717 = vst [vmem:[#allocation15_spill] sm:$0xff] %v3500_v14  ;;  %v3512_v27 = vadd.f32 %v3260_v29, %v4722_v34  ;;  %v3516_v36 = vadd.f32 %v3260_v29, %v4724_v17  ;;  %v4726_v1 = vld [vmem:[#allocation2_spill] sm:$0xff]  ;;  %v4728_v14 = vld [vmem:[#allocation3_spill] sm:$0xff]  ;;  %v3532_v34 = vadd.f32 %v3260_v29, %v3276_v16  ;;  %vm1231_vm7 = vcmp.ge.f32.partialorder %v3324_v18, 0.0 }
 0x26a   :  { %4719 = vst [vmem:[#allocation18_spill] sm:$0xff] %v3504_v51  ;;  %4721 = vst [vmem:[#allocation17_spill] sm:$0xff] %v3508_v25  ;;  %v3520_v57 = vadd.f32 %v3260_v29, %v4726_v1  ;;  %v3524_v21 = vadd.f32 %v3260_v29, %v4728_v14  ;;  %v4730_v51 = vld [vmem:[#allocation4_spill] sm:$0xff]  ;;  %v3536_v17 = vadd.f32 %v3260_v29, %v3280_v43  ;;  %vm1232_vm8 = vcmp.ge.f32.partialorder %v3328_v53, 0.0 }
 0x26b   :  { %4723 = vst [vmem:[#allocation23_spill] sm:$0xff] %v3512_v27  ;;  %4725 = vst [vmem:[#allocation24_spill] sm:$0xff] %v3516_v36  ;;  %v3528_v5 = vadd.f32 %v3260_v29, %v4730_v51  ;;  %v3540_v1 = vadd.f32 %v3260_v29, %v3284_v55  ;;  %v3544_v14 = vadd.f32 %v3260_v29, %v3288_v0  ;;  %vm1233_vm9 = vcmp.ge.f32.partialorder %v3332_v39, 0.0 }
 0x26c   :  { %4727 = vst [vmem:[#allocation25_spill] sm:$0xff] %v3520_v57  ;;  %4729 = vst [vmem:[#allocation26_spill] sm:$0xff] %v3524_v21  ;;  %v3557_v43 = vadd.f32 %v3260_v29, %v3292_v41  ;;  %vm1234_vm10 = vcmp.ge.f32.partialorder %v3336_v58, 0.0  ;;  %v1289_v16 = vmul.f32 0.2, %v3300_v49  ;;  %v3565_v51 = vadd.f32 %v3260_v29, %v3296_v45 }
 0x26d   :  { %4731 = vst [vmem:[#allocation5_spill] sm:$0xff] %v3528_v5  ;;  %4732 = vst [vmem:[#allocation7_spill] sm:$0xff] %v3532_v34  ;;  %v1290_v55 = vmul.f32 0.2, %v3304_v37  ;;  %v1291_v0 = vmul.f32 0.2, %v3308_v3 }
 0x26e   :  { %4733 = vst [vmem:[#allocation27_spill] sm:$0xff] %v3536_v17  ;;  %4734 = vst [vmem:[#allocation14_spill] sm:$0xff] %v3540_v1  ;;  %vm1235_vm11 = vcmp.ge.f32.partialorder %v3340_v61, 0.0  ;;  %v1293_v1 = vmul.f32 0.2, %v3316_v47  ;;  %vm1236_vm12 = vcmp.ge.f32.partialorder %v3344_v20, 0.0  ;;  %v3578_v29 = vsel %vm1225_vm1, %v3300_v49, %v1289_v16 }
 0x26f   :  { %4735 = vst [vmem:[#allocation9_spill] sm:$0xff] %v3544_v14  ;;  %4736 = vst [vmem:[#allocation12_spill] sm:$0xff] %v3557_v43  ;;  %v1292_v14 = vmul.f32 0.2, %v3312_v50  ;;  %v1294_v41 = vmul.f32 0.2, %v3320_v30  ;;  %v3589_v21 = vsel %vm1226_vm2, %v3304_v37, %v1290_v55 }
 0x270   :  { %4737 = vst [vmem:[#allocation16_spill] sm:$0xff] %v3565_v51  ;;  %v1295_v43 = vmul.f32 0.2, %v3324_v18  ;;  %v1296_v17 = vmul.f32 0.2, %v3328_v53  ;;  %4738 = vst [vmem:[#allocation28_spill] sm:$0xff] %v3578_v29  ;;  %v3604_v29 = vsel %vm1227_vm3, %v3308_v3, %v1291_v0 }
 0x271   :  { %v1297_v34 = vmul.f32 0.2, %v3332_v39  ;;  %vm1237_vm13 = vcmp.ge.f32.partialorder %v3348_v10, 0.0  ;;  %v1298_v45 = vmul.f32 0.2, %v3336_v58  ;;  %4739 = vst [vmem:[#allocation29_spill] sm:$0xff] %v3589_v21  ;;  %v3619_v36 = vsel %vm1228_vm4, %v3312_v50, %v1292_v14 }
 0x272   :  { %v1299_v51 = vmul.f32 0.2, %v3340_v61  ;;  %v3584_v5 = vmul.f32 0.2, %v3344_v20  ;;  %vm1238_vm14 = vcmp.ge.f32.partialorder %v3352_v62, 0.0  ;;  %4740 = vst [vmem:[#allocation19_spill] sm:$0xff] %v3604_v29 }
 0x273   :  { %v3593_v57 = vmul.f32 0.2, %v3348_v10  ;;  %v3596_v49 = vmul.f32 0.2, %v3352_v62  ;;  %v3599_v16 = vmul.f32 0.2, %v3356_v19 }
 0x274   :  { %vm1239_vm15 = vcmp.ge.f32.partialorder %v3356_v19, 0.0  ;;  %v3608_v37 = vmul.f32 0.2, %v3360_v33  ;;  %v3611_v55 = vmul.f32 0.2, %v3364_v2  ;;  %4742 = vst [vmem:[#allocation21_spill] sm:$0xff] %v3619_v36 }
 0x275   :  { %v3614_v21 = vmul.f32 0.2, %v3368_v13  ;;  %vm1240_vm0 = vcmp.ge.f32.partialorder %v3360_v33, 0.0  ;;  %v3623_v3 = vmul.f32 0.2, %v3372_v4  ;;  %vm1241_vm1 = vcmp.ge.f32.partialorder %v3364_v2, 0.0 }
 0x276   :  { %v3626_v0 = vmul.f32 0.2, %v3376_v26  ;;  %v3629_v29 = vmul.f32 0.2, %v3380_v32  ;;  %v3638_v50 = vmul.f32 0.2, %v3384_v23 }
 0x277   :  { %4741 = vst [vmem:[#allocation20_spill] sm:$0xff] %v3614_v21  ;;  %v3634_v21 = vsel %vm1229_vm5, %v3316_v47, %v1293_v1  ;;  %v3641_v14 = vmul.f32 0.2, %v3388_v38  ;;  %v3644_v36 = vmul.f32 0.2, %v3392_v28  ;;  %vm1242_vm2 = vcmp.ge.f32.partialorder %v3368_v13, 0.0 }
 0x278   :  { %4743 = vst [vmem:[#allocation22_spill] sm:$0xff] %v3629_v29  ;;  %4744 = vst [vmem:[#allocation2_spill] sm:$0xff] %v3634_v21  ;;  %v3649_v29 = vsel %vm1230_vm6, %v3320_v30, %v1294_v41  ;;  %v3653_v47 = vmul.f32 0.2, %v3396_v9  ;;  %v3656_v1 = vmul.f32 0.2, %v3400_v42 }
 0x279   :  { %4745 = vst [vmem:[#allocation3_spill] sm:$0xff] %v3644_v36  ;;  %4746 = vst [vmem:[#allocation4_spill] sm:$0xff] %v3649_v29  ;;  %v3659_v21 = vmul.f32 0.2, %v3404_v46  ;;  %v3664_v36 = vsel %vm1231_vm7, %v3324_v18, %v1295_v43  ;;  %vm1243_vm3 = vcmp.ge.f32.partialorder %v3372_v4, 0.0  ;;  %vm1244_vm4 = vcmp.ge.f32.partialorder %v3376_v26, 0.0 }
 0x27a   :  { %4748 = vst [vmem:[#allocation31_spill] sm:$0xff] %v3664_v36  ;;  %v3668_v30 = vmul.f32 0.2, %v3408_v40  ;;  %v3671_v41 = vmul.f32 0.2, %v3412_v44  ;;  %vm1247_vm7 = vcmp.ge.f32.partialorder %v3388_v38, 0.0 }
 0x27b   :  { %4747 = vst [vmem:[#allocation30_spill] sm:$0xff] %v3659_v21  ;;  %v3674_v29 = vmul.f32 0.2, %v3416_v56  ;;  %v3679_v21 = vsel %vm1232_vm8, %v3328_v53, %v1296_v17  ;;  %v3685_v18 = vmul.f32 0.2, %v3420_v63  ;;  %v3696_v53 = vsel %vm1233_vm9, %v3332_v39, %v1297_v34 }
 0x27c   :  { %4749 = vst [vmem:[#allocation32_spill] sm:$0xff] %v3679_v21  ;;  %v3688_v43 = vmul.f32 0.2, %v3424_v54  ;;  %v3691_v36 = vmul.f32 0.2, %v3428_v60  ;;  %4751 = vst [vmem:[#allocation34_spill] sm:$0xff] %v3696_v53  ;;  %v3714_v39 = vsel %vm1234_vm10, %v3336_v58, %v1298_v45  ;;  %v3732_v58 = vsel %vm1235_vm11, %v3340_v61, %v1299_v51 }
 0x27d   :  { %v3703_v17 = vmul.f32 0.2, %v3432_v8  ;;  %v3706_v21 = vmul.f32 0.2, %v3436_v15  ;;  %4753 = vst [vmem:[#allocation36_spill] sm:$0xff] %v3714_v39  ;;  %vm1251_vm9 = vcmp.ge.f32.partialorder %v3404_v46, 0.0  ;;  %v3751_v61 = vsel %vm1236_vm12, %v3344_v20, %v3584_v5 }
 0x27e   :  { %4750 = vst [vmem:[#allocation33_spill] sm:$0xff] %v3691_v36  ;;  %v3709_v36 = vmul.f32 0.2, %v3440_v6  ;;  %v3721_v34 = vmul.f32 0.2, %v3444_v12  ;;  %4755 = vst [vmem:[#allocation38_spill] sm:$0xff] %v3732_v58  ;;  %v3770_v20 = vsel %vm1237_vm13, %v3348_v10, %v3593_v57  ;;  %v3789_v10 = vsel %vm1238_vm14, %v3352_v62, %v3596_v49 }
 0x27f   :  { %v3724_v53 = vmul.f32 0.2, %v3448_v24  ;;  %vm1255_vm10 = vcmp.ge.f32.partialorder %v3420_v63, 0.0  ;;  %v3739_v45 = vmul.f32 0.2, %v3456_v22  ;;  %4757 = vst [vmem:[#allocation40_spill] sm:$0xff] %v3751_v61  ;;  %v3808_v62 = vsel %vm1239_vm15, %v3356_v19, %v3599_v16 }
 0x280   :  { %4752 = vst [vmem:[#allocation35_spill] sm:$0xff] %v3709_v36  ;;  %v3727_v36 = vmul.f32 0.2, %v3452_v31  ;;  %v3742_v39 = vmul.f32 0.2, %v3460_v7  ;;  %vm1259_vm11 = vcmp.ge.f32.partialorder %v3436_v15, 0.0  ;;  %v3827_v19 = vsel %vm1240_vm0, %v3360_v33, %v3608_v37 }
 0x281   :  { %v3758_v51 = vmul.f32 0.2, %v3468_v59  ;;  %v3761_v58 = vmul.f32 0.2, %v3472_v35  ;;  %4761 = vst [vmem:[#allocation44_spill] sm:$0xff] %v3770_v20  ;;  %vm1263_vm12 = vcmp.ge.f32.partialorder %v3452_v31, 0.0  ;;  %v3840_v33 = vsel %vm1241_vm1, %v3364_v2, %v3611_v55 }
 0x282   :  { %4754 = vst [vmem:[#allocation37_spill] sm:$0xff] %v3727_v36  ;;  %v3745_v36 = vmul.f32 0.2, %v3464_v48  ;;  %v3777_v5 = vmul.f32 0.2, %v3480_v11  ;;  %v4763_v61 = vld [vmem:[#allocation10_spill] sm:$0xff] }
 0x283   :  { %4758 = vst [vmem:[#allocation41_spill] sm:$0xff] %v3758_v51  ;;  %4759 = vst [vmem:[#allocation42_spill] sm:$0xff] %v3761_v58  ;;  %v3780_v58 = vmul.f32 0.2, %v4763_v61  ;;  %vm1267_vm13 = vcmp.ge.f32.partialorder %v3468_v59, 0.0  ;;  %v4768_v57 = vld [vmem:[#allocation8_spill] sm:$0xff] }
 0x284   :  { %4756 = vst [vmem:[#allocation39_spill] sm:$0xff] %v3745_v36  ;;  %v3764_v36 = vmul.f32 0.2, %v3476_v52  ;;  %4762 = vst [vmem:[#allocation45_spill] sm:$0xff] %v3777_v5  ;;  %v3796_v20 = vmul.f32 0.2, %v4768_v57 }
 0x285   :  { %4764 = vst [vmem:[#allocation10_spill] sm:$0xff] %v3780_v58  ;;  %4767 = vst [vmem:[#allocation46_spill] sm:$0xff] %v3789_v10  ;;  %v4769_v58 = vld [vmem:[#allocation11_spill] sm:$0xff]  ;;  %vm1271_vm14 = vcmp.ge.f32.partialorder %v4763_v61, 0.0  ;;  %v4774_v49 = vld [vmem:[#allocation18_spill] sm:$0xff]  ;;  %vm4793_vm8 = vcmp.ge.f32.partialorder %v3380_v32, 0.0 }
 0x286   :  { %4760 = vst [vmem:[#allocation43_spill] sm:$0xff] %v3764_v36  ;;  %v4765_v36 = vld [vmem:[#allocation13_spill] sm:$0xff]  ;;  %v3799_v5 = vmul.f32 0.2, %v4769_v58  ;;  %4773 = vst [vmem:[#allocation49_spill] sm:$0xff] %v3808_v62  ;;  %v4779_v16 = vld [vmem:[#allocation24_spill] sm:$0xff] }
 0x287   :  { %v3783_v51 = vmul.f32 0.2, %v4765_v36  ;;  %v3815_v10 = vmul.f32 0.2, %v4774_v49  ;;  %4778 = vst [vmem:[#allocation53_spill] sm:$0xff] %v3827_v19  ;;  %v4781_v58 = vld [vmem:[#allocation26_spill] sm:$0xff] }
 0x288   :  { %4770 = vst [vmem:[#allocation47_spill] sm:$0xff] %v3799_v5  ;;  %v3818_v5 = vmul.f32 0.2, %v3508_v25  ;;  %v1343_v62 = vmul.f32 0.2, %v4779_v16  ;;  %4782 = vst [vmem:[#allocation54_spill] sm:$0xff] %v3840_v33 }
 0x289   :  { %4766 = vst [vmem:[#allocation13_spill] sm:$0xff] %v3783_v51  ;;  %v4771_v51 = vld [vmem:[#allocation15_spill] sm:$0xff]  ;;  %4775 = vst [vmem:[#allocation50_spill] sm:$0xff] %v3815_v10  ;;  %vm1279_vm0 = vcmp.ge.f32.partialorder %v4779_v16, 0.0  ;;  %v4783_v37 = vld [vmem:[#allocation5_spill] sm:$0xff] }
 0x28a   :  { %v3802_v48 = vmul.f32 0.2, %v4771_v51  ;;  %4776 = vst [vmem:[#allocation51_spill] sm:$0xff] %v3818_v5  ;;  %vm1275_vm15 = vcmp.ge.f32.partialorder %v4771_v51, 0.0  ;;  %v4780_v5 = vld [vmem:[#allocation25_spill] sm:$0xff]  ;;  %v4785_v49 = vld [vmem:[#allocation27_spill] sm:$0xff] }
 0x28b   :  { %v1344_v10 = vmul.f32 0.2, %v4780_v5  ;;  %v1346_v19 = vmul.f32 0.2, %v4783_v37  ;;  %v1348_v51 = vmul.f32 0.2, %v4785_v49 }
 0x28c   :  { %4772 = vst [vmem:[#allocation48_spill] sm:$0xff] %v3802_v48  ;;  %v3821_v48 = vmul.f32 0.2, %v3512_v27  ;;  %v4784_v27 = vld [vmem:[#allocation7_spill] sm:$0xff]  ;;  %v4786_v57 = vld [vmem:[#allocation20_spill] sm:$0xff]  ;;  %v4788_v55 = vld [vmem:[#allocation14_spill] sm:$0xff] }
 0x28d   :  { %v1347_v25 = vmul.f32 0.2, %v4784_v27  ;;  %v3853_v2 = vsel %vm1242_vm2, %v3368_v13, %v4786_v57  ;;  %vm1283_vm1 = vcmp.ge.f32.partialorder %v4784_v27, 0.0  ;;  %vm1285_vm5 = vcmp.ge.f32.partialorder %v4788_v55, 0.0  ;;  %v4789_v33 = vld [vmem:[#allocation9_spill] sm:$0xff]  ;;  %v4790_v5 = vld [vmem:[#allocation12_spill] sm:$0xff] }
 0x28e   :  { %4777 = vst [vmem:[#allocation52_spill] sm:$0xff] %v3821_v48  ;;  %v1345_v48 = vmul.f32 0.2, %v4781_v58  ;;  %4787 = vst [vmem:[#allocation7_spill] sm:$0xff] %v3853_v2  ;;  %v1349_v37 = vmul.f32 0.2, %v4788_v55  ;;  %v3866_v13 = vsel %vm1243_vm3, %v3372_v4, %v3623_v3  ;;  %v3875_v55 = vsel %vm1244_vm4, %v3376_v26, %v3626_v0 }
 0x28f   :  { %v1350_v58 = vmul.f32 0.2, %v4789_v33  ;;  %v1351_v16 = vmul.f32 0.2, %v4790_v5  ;;  %vm1287_vm2 = vcmp.ge.f32.partialorder %v4790_v5, 0.0  ;;  %v4791_v57 = vld [vmem:[#allocation16_spill] sm:$0xff]  ;;  %v3893_v3 = vsel %vm1247_vm7, %v3388_v38, %v3641_v14 }
 0x290   :  { %vm1288_vm6 = vcmp.ge.f32.partialorder %v4791_v57, 0.0  ;;  %v1352_v2 = vmul.f32 0.2, %v4791_v57  ;;  %v4792_v33 = vld [vmem:[#allocation22_spill] sm:$0xff]  ;;  %vm4794_vm3 = vcmp.ge.f32.partialorder %v3384_v23, 0.0  ;;  %v4795_v26 = vld [vmem:[#allocation3_spill] sm:$0xff] }
 0x291   :  { %v3881_v49 = vsel %vm4793_vm8, %v3380_v32, %v4792_v33  ;;  %v3887_v4 = vsel %vm4794_vm3, %v3384_v23, %v3638_v50  ;;  %vm4796_vm4 = vcmp.ge.f32.partialorder %v3392_v28, 0.0  ;;  %vm4797_vm8 = vcmp.ge.f32.partialorder %v3396_v9, 0.0  ;;  %v4799_v38 = vld [vmem:[#allocation30_spill] sm:$0xff] }
 0x292   :  { %v3899_v0 = vsel %vm4796_vm4, %v3392_v28, %v4795_v26  ;;  %v3905_v32 = vsel %vm4797_vm8, %v3396_v9, %v3653_v47  ;;  %vm4798_vm3 = vcmp.ge.f32.partialorder %v3400_v42, 0.0  ;;  %v3917_v50 = vsel %vm1251_vm9, %v3404_v46, %v4799_v38  ;;  %v4815_v47 = vld [vmem:[#allocation6_spill] sm:$0xff]  ;;  %v4833_v26 = vld [vmem:[#allocation15_spill] sm:$0xff] }
 0x293   :  { %v3911_v23 = vsel %vm4798_vm3, %v3400_v42, %v3656_v1  ;;  %vm4800_vm7 = vcmp.ge.f32.partialorder %v3408_v40, 0.0  ;;  %vm4801_vm4 = vcmp.ge.f32.partialorder %v3412_v44, 0.0  ;;  %vm4802_vm8 = vcmp.ge.f32.partialorder %v3416_v56, 0.0 }
 0x294   :  { %v3923_v28 = vsel %vm4800_vm7, %v3408_v40, %v3668_v30  ;;  %v3929_v9 = vsel %vm4801_vm4, %v3412_v44, %v3671_v41  ;;  %v3935_v42 = vsel %vm4802_vm8, %v3416_v56, %v3674_v29  ;;  %vm1673_vm9 = vcmask 125952   ;;  %v4804_v44 = vld [vmem:[#allocation33_spill] sm:$0xff] }
 0x295   :  { %v3941_v46 = vsel %vm1255_vm10, %v3420_v63, %v3685_v18  ;;  %vm4803_vm3 = vcmp.ge.f32.partialorder %v3424_v54, 0.0  ;;  %vm4805_vm7 = vcmp.ge.f32.partialorder %v3428_v60, 0.0  ;;  %vm4806_vm4 = vcmp.ge.f32.partialorder %v3432_v8, 0.0 }
 0x296   :  { %v3947_v40 = vsel %vm4803_vm3, %v3424_v54, %v3688_v43  ;;  %v3953_v14 = vsel %vm4805_vm7, %v3428_v60, %v4804_v44  ;;  %v3959_v56 = vsel %vm4806_vm4, %v3432_v8, %v3703_v17  ;;  %v3965_v63 = vsel %vm1259_vm11, %v3436_v15, %v3706_v21  ;;  %v4807_v54 = vld [vmem:[#allocation35_spill] sm:$0xff]  ;;  %v4811_v15 = vld [vmem:[#allocation37_spill] sm:$0xff]  ;;  %v4835_v44 = vld [vmem:[#allocation18_spill] sm:$0xff] }
 0x297   :  { %vm4808_vm10 = vcmp.ge.f32.partialorder %v3440_v6, 0.0  ;;  %vm4809_vm8 = vcmp.ge.f32.partialorder %v3444_v12, 0.0  ;;  %vm4810_vm3 = vcmp.ge.f32.partialorder %v3448_v24, 0.0  ;;  %v3989_v21 = vsel %vm1263_vm12, %v3452_v31, %v4811_v15  ;;  %v4817_v31 = vld [vmem:[#allocation41_spill] sm:$0xff] }
 0x298   :  { %v3971_v29 = vsel %vm4808_vm10, %v3440_v6, %v4807_v54  ;;  %v3977_v60 = vsel %vm4809_vm8, %v3444_v12, %v3721_v34  ;;  %v3983_v8 = vsel %vm4810_vm3, %v3448_v24, %v3724_v53  ;;  %vm4812_vm11 = vcmp.ge.f32.partialorder %v3456_v22, 0.0  ;;  %v4814_v24 = vld [vmem:[#allocation39_spill] sm:$0xff]  ;;  %v4822_v43 = vld [vmem:[#allocation45_spill] sm:$0xff] }
 0x299   :  { %v3995_v6 = vsel %vm4812_vm11, %v3456_v22, %v3739_v45  ;;  %vm4813_vm7 = vcmp.ge.f32.partialorder %v3460_v7, 0.0  ;;  %vm4816_vm4 = vcmp.ge.f32.partialorder %v4815_v47, 0.0  ;;  %v4013_v30 = vsel %vm1267_vm13, %v3468_v59, %v4817_v31  ;;  %v4818_v22 = vld [vmem:[#allocation42_spill] sm:$0xff]  ;;  %v4830_v45 = vld [vmem:[#allocation11_spill] sm:$0xff]  ;;  %v4838_v15 = vld [vmem:[#allocation17_spill] sm:$0xff] }
 0x29a   :  { %v4001_v12 = vsel %vm4813_vm7, %v3460_v7, %v3742_v39  ;;  %v4007_v1 = vsel %vm4816_vm4, %v4815_v47, %v4814_v24  ;;  %vm4819_vm12 = vcmp.ge.f32.partialorder %v3472_v35, 0.0  ;;  %v4820_v7 = vld [vmem:[#allocation43_spill] sm:$0xff]  ;;  %vm4821_vm10 = vcmp.ge.f32.partialorder %v3476_v52, 0.0  ;;  %v4824_v59 = vld [vmem:[#allocation10_spill] sm:$0xff]  ;;  %v4840_v47 = vld [vmem:[#allocation52_spill] sm:$0xff] }
 0x29b   :  { %v4019_v41 = vsel %vm4819_vm12, %v3472_v35, %v4818_v22  ;;  %v4025_v18 = vsel %vm4821_vm10, %v3476_v52, %v4820_v7  ;;  %vm4823_vm8 = vcmp.ge.f32.partialorder %v3480_v11, 0.0  ;;  %v4037_v17 = vsel %vm1271_vm14, %v4763_v61, %v4824_v59  ;;  %v4825_v35 = vld [vmem:[#allocation13_spill] sm:$0xff]  ;;  %v4827_v52 = vld [vmem:[#allocation8_spill] sm:$0xff]  ;;  %v4841_v31 = vld [vmem:[#allocation23_spill] sm:$0xff] }
 0x29c   :  { %v4031_v53 = vsel %vm4823_vm8, %v3480_v11, %v4822_v43  ;;  %vm4826_vm13 = vcmp.ge.f32.partialorder %v4765_v36, 0.0  ;;  %vm4828_vm3 = vcmp.ge.f32.partialorder %v4827_v52, 0.0  ;;  %v4829_v11 = vld [vmem:[#allocation47_spill] sm:$0xff]  ;;  %vm4831_vm11 = vcmp.ge.f32.partialorder %v4830_v45, 0.0  ;;  %v4832_v61 = vld [vmem:[#allocation48_spill] sm:$0xff]  ;;  %v4844_v59 = vld [vmem:[#allocation25_spill] sm:$0xff] }
 0x29d   :  { %v4043_v39 = vsel %vm4826_vm13, %v4765_v36, %v4825_v35  ;;  %v4049_v34 = vsel %vm4828_vm3, %v4827_v52, %v3796_v20  ;;  %v4055_v33 = vsel %vm4831_vm11, %v4830_v45, %v4829_v11  ;;  %v4061_v38 = vsel %vm1275_vm15, %v4833_v26, %v4832_v61  ;;  %v4834_v36 = vld [vmem:[#allocation50_spill] sm:$0xff]  ;;  %v4837_v20 = vld [vmem:[#allocation51_spill] sm:$0xff]  ;;  %v4843_v7 = vld [vmem:[#allocation24_spill] sm:$0xff] }
 0x29e   :  { %vm4836_vm14 = vcmp.ge.f32.partialorder %v4835_v44, 0.0  ;;  %vm4839_vm7 = vcmp.ge.f32.partialorder %v4838_v15, 0.0  ;;  %vm4842_vm4 = vcmp.ge.f32.partialorder %v4841_v31, 0.0  ;;  %v4084_v43 = vsel %vm1279_vm0, %v4843_v7, %v1343_v62  ;;  %v4846_v52 = vld [vmem:[#allocation26_spill] sm:$0xff]  ;;  %v4848_v45 = vld [vmem:[#allocation5_spill] sm:$0xff]  ;;  %v4850_v26 = vld [vmem:[#allocation27_spill] sm:$0xff] }
 0x29f   :  { %v4067_v54 = vsel %vm4836_vm14, %v4835_v44, %v4834_v36  ;;  %v4073_v24 = vsel %vm4839_vm7, %v4838_v15, %v4837_v20  ;;  %v4079_v22 = vsel %vm4842_vm4, %v4841_v31, %v4840_v47  ;;  %vm4845_vm15 = vcmp.ge.f32.partialorder %v4844_v59, 0.0  ;;  %v4852_v36 = vld [vmem:[#allocation14_spill] sm:$0xff]  ;;  %v4853_v44 = vld [vmem:[#allocation9_spill] sm:$0xff]  ;;  %v4857_v47 = vld [vmem:[#allocation19_spill] sm:$0xff] }
 0x2a0   :  { %v4089_v35 = vsel %vm4845_vm15, %v4844_v59, %v1344_v10  ;;  %vm4847_vm12 = vcmp.ge.f32.partialorder %v4846_v52, 0.0  ;;  %vm4849_vm10 = vcmp.ge.f32.partialorder %v4848_v45, 0.0  ;;  %v4104_v62 = vsel %vm1283_vm1, %v4784_v27, %v1347_v25  ;;  %v4858_v31 = vld [vmem:[#allocation21_spill] sm:$0xff]  ;;  %v4859_v59 = vld [vmem:[#allocation2_spill] sm:$0xff] }
 0x2a1   :  { %v4094_v11 = vsel %vm4847_vm12, %v4846_v52, %v1345_v48  ;;  %v4099_v61 = vsel %vm4849_vm10, %v4848_v45, %v1346_v19  ;;  %vm4851_vm0 = vcmp.ge.f32.partialorder %v4850_v26, 0.0  ;;  %v4114_v48 = vsel %vm1285_vm5, %v4852_v36, %v1349_v37  ;;  %v4856_v37 = vld [vmem:[#allocation29_spill] sm:$0xff]  ;;  %v4862_v45 = vld [vmem:[#allocation32_spill] sm:$0xff]  ;;  %v4863_v36 = vld [vmem:[#allocation34_spill] sm:$0xff] }
 0x2a2   :  { %v4109_v10 = vsel %vm4851_vm0, %v4850_v26, %v1348_v51  ;;  %vm4854_vm8 = vcmp.ge.f32.partialorder %v4853_v44, 0.0  ;;  %v4124_v25 = vsel %vm1287_vm2, %v4790_v5, %v1351_v16  ;;  %v4129_v27 = vsel %vm1288_vm6, %v4791_v57, %v1352_v2  ;;  %v4855_v51 = vld [vmem:[#allocation28_spill] sm:$0xff]  ;;  %v4861_v2 = vld [vmem:[#allocation31_spill] sm:$0xff] }
 0x2a3   :  { %v4119_v19 = vsel %vm4854_vm8, %v4853_v44, %v1350_v58  ;;  %v1848_v20 = vpack.c.bf16 %v4855_v51, %v4855_v51  ;;  %v1849_v15 = vpack.c.bf16 %v4856_v37, %v4856_v37  ;;  %v1850_v58 = vpack.c.bf16 %v4857_v47, %v4857_v47  ;;  %v4860_v16 = vld [vmem:[#allocation4_spill] sm:$0xff]  ;;  %v4865_v47 = vld [vmem:[#allocation38_spill] sm:$0xff] }
 0x2a4   :  { %v1851_v7 = vpack.c.bf16 %v4858_v31, %v4858_v31  ;;  %v1852_v5 = vpack.c.bf16 %v4859_v59, %v4859_v59  ;;  %v1853_v52 = vpack.c.bf16 %v4860_v16, %v4860_v16  ;;  %v1854_v57 = vpack.c.bf16 %v4861_v2, %v4861_v2  ;;  %v4864_v51 = vld [vmem:[#allocation36_spill] sm:$0xff] }
 0x2a5   :  { %v1855_v26 = vpack.c.bf16 %v4862_v45, %v4862_v45  ;;  %v1856_v44 = vpack.c.bf16 %v4863_v36, %v4863_v36  ;;  %v1857_v37 = vpack.c.bf16 %v4864_v51, %v4864_v51  ;;  %1674 = vst.msk [vmem:[%s4518_s3] sm:$0xf] %vm1673_vm9, %v1848_v20  ;;  %1675 = vst.msk [vmem:[%s4518_s3 + $0x4] sm:$0xf] %vm1673_vm9, %v1849_v15  ;;  %v4866_v59 = vld [vmem:[#allocation40_spill] sm:$0xff]  ;;  %v4868_v36 = vld [vmem:[#allocation46_spill] sm:$0xff] }
 0x2a6   :  { %v1858_v31 = vpack.c.bf16 %v4865_v47, %v4865_v47  ;;  %v1859_v16 = vpack.c.bf16 %v4866_v59, %v4866_v59  ;;  %v4867_v2 = vld [vmem:[#allocation44_spill] sm:$0xff]  ;;  %v1861_v51 = vpack.c.bf16 %v4868_v36, %v4868_v36  ;;  %1676 = vst.msk [vmem:[%s4518_s3 + $0x8] sm:$0xf] %vm1673_vm9, %v1850_v58  ;;  %1677 = vst.msk [vmem:[%s4518_s3 + $0xc] sm:$0xf] %vm1673_vm9, %v1851_v7  ;;  %v4869_v20 = vld [vmem:[#allocation49_spill] sm:$0xff] }
 0x2a7   :  { %v1860_v45 = vpack.c.bf16 %v4867_v2, %v4867_v2  ;;  %1678 = vst.msk [vmem:[%s4518_s3 + $0x10] sm:$0xf] %vm1673_vm9, %v1852_v5  ;;  %1679 = vst.msk [vmem:[%s4518_s3 + $0x14] sm:$0xf] %vm1673_vm9, %v1853_v52  ;;  %v1862_v15 = vpack.c.bf16 %v4869_v20, %v4869_v20  ;;  %v4870_v47 = vld [vmem:[#allocation53_spill] sm:$0xff]  ;;  %v4871_v59 = vld [vmem:[#allocation54_spill] sm:$0xff]  ;;  %v1866_v5 = vpack.c.bf16 %v3866_v13, %v3866_v13 }
 0x2a8   :  { %v1863_v58 = vpack.c.bf16 %v4870_v47, %v4870_v47  ;;  %v1864_v2 = vpack.c.bf16 %v4871_v59, %v4871_v59  ;;  %v4872_v7 = vld [vmem:[#allocation7_spill] sm:$0xff]  ;;  %1680 = vst.msk [vmem:[%s4518_s3 + $0x18] sm:$0xf] %vm1673_vm9, %v1854_v57  ;;  %1681 = vst.msk [vmem:[%s4518_s3 + $0x1c] sm:$0xf] %vm1673_vm9, %v1855_v26  ;;  %v1867_v52 = vpack.c.bf16 %v3875_v55, %v3875_v55 }
 0x2a9   :  { %v1865_v36 = vpack.c.bf16 %v4872_v7, %v4872_v7  ;;  %1682 = vst.msk [vmem:[%s4518_s3 + $0x20] sm:$0xf] %vm1673_vm9, %v1856_v44  ;;  %1683 = vst.msk [vmem:[%s4518_s3 + $0x24] sm:$0xf] %vm1673_vm9, %v1857_v37  ;;  %v1868_v57 = vpack.c.bf16 %v3881_v49, %v3881_v49  ;;  %v1869_v26 = vpack.c.bf16 %v3887_v4, %v3887_v4 }
 0x2aa   :  { %1684 = vst.msk [vmem:[%s4518_s3 + $0x28] sm:$0xf] %vm1673_vm9, %v1858_v31  ;;  %1685 = vst.msk [vmem:[%s4518_s3 + $0x2c] sm:$0xf] %vm1673_vm9, %v1859_v16  ;;  %v1870_v49 = vpack.c.bf16 %v3893_v3, %v3893_v3  ;;  %v1871_v55 = vpack.c.bf16 %v3899_v0, %v3899_v0  ;;  %v1872_v13 = vpack.c.bf16 %v3905_v32, %v3905_v32 }
 0x2ab   :  { %1686 = vst.msk [vmem:[%s4518_s3 + $0x30] sm:$0xf] %vm1673_vm9, %v1860_v45  ;;  %1687 = vst.msk [vmem:[%s4518_s3 + $0x34] sm:$0xf] %vm1673_vm9, %v1861_v51  ;;  %v1873_v4 = vpack.c.bf16 %v3911_v23, %v3911_v23  ;;  %v1874_v3 = vpack.c.bf16 %v3917_v50, %v3917_v50  ;;  %v1875_v0 = vpack.c.bf16 %v3923_v28, %v3923_v28 }
 0x2ac   :  { %1688 = vst.msk [vmem:[%s4518_s3 + $0x38] sm:$0xf] %vm1673_vm9, %v1862_v15  ;;  %1689 = vst.msk [vmem:[%s4518_s3 + $0x3c] sm:$0xf] %vm1673_vm9, %v1863_v58  ;;  %v1876_v32 = vpack.c.bf16 %v3929_v9, %v3929_v9  ;;  %v1877_v23 = vpack.c.bf16 %v3935_v42, %v3935_v42  ;;  %v1878_v50 = vpack.c.bf16 %v3941_v46, %v3941_v46 }
 0x2ad   :  { %1690 = vst.msk [vmem:[%s4518_s3 + $0x40] sm:$0xf] %vm1673_vm9, %v1864_v2  ;;  %1691 = vst.msk [vmem:[%s4518_s3 + $0x44] sm:$0xf] %vm1673_vm9, %v1865_v36  ;;  %v1879_v28 = vpack.c.bf16 %v3947_v40, %v3947_v40  ;;  %v1880_v9 = vpack.c.bf16 %v3953_v14, %v3953_v14  ;;  %v1881_v42 = vpack.c.bf16 %v3959_v56, %v3959_v56 }
 0x2ae   :  { %1692 = vst.msk [vmem:[%s4518_s3 + $0x48] sm:$0xf] %vm1673_vm9, %v1866_v5  ;;  %1693 = vst.msk [vmem:[%s4518_s3 + $0x4c] sm:$0xf] %vm1673_vm9, %v1867_v52  ;;  %v1882_v46 = vpack.c.bf16 %v3965_v63, %v3965_v63  ;;  %v1883_v40 = vpack.c.bf16 %v3971_v29, %v3971_v29  ;;  %v1884_v14 = vpack.c.bf16 %v3977_v60, %v3977_v60 }
 0x2af   :  { %1694 = vst.msk [vmem:[%s4518_s3 + $0x50] sm:$0xf] %vm1673_vm9, %v1868_v57  ;;  %1695 = vst.msk [vmem:[%s4518_s3 + $0x54] sm:$0xf] %vm1673_vm9, %v1869_v26  ;;  %v1885_v56 = vpack.c.bf16 %v3983_v8, %v3983_v8  ;;  %v1886_v63 = vpack.c.bf16 %v3989_v21, %v3989_v21  ;;  %v1887_v29 = vpack.c.bf16 %v3995_v6, %v3995_v6 }
 0x2b0   :  { %1696 = vst.msk [vmem:[%s4518_s3 + $0x58] sm:$0xf] %vm1673_vm9, %v1870_v49  ;;  %1697 = vst.msk [vmem:[%s4518_s3 + $0x5c] sm:$0xf] %vm1673_vm9, %v1871_v55  ;;  %v1888_v60 = vpack.c.bf16 %v4001_v12, %v4001_v12  ;;  %v1889_v8 = vpack.c.bf16 %v4007_v1, %v4007_v1  ;;  %v1890_v21 = vpack.c.bf16 %v4013_v30, %v4013_v30 }
 0x2b1   :  { %1698 = vst.msk [vmem:[%s4518_s3 + $0x60] sm:$0xf] %vm1673_vm9, %v1872_v13  ;;  %1699 = vst.msk [vmem:[%s4518_s3 + $0x64] sm:$0xf] %vm1673_vm9, %v1873_v4  ;;  %v1891_v6 = vpack.c.bf16 %v4019_v41, %v4019_v41  ;;  %v1892_v12 = vpack.c.bf16 %v4025_v18, %v4025_v18  ;;  %v1893_v1 = vpack.c.bf16 %v4031_v53, %v4031_v53 }
 0x2b2   :  { %1700 = vst.msk [vmem:[%s4518_s3 + $0x68] sm:$0xf] %vm1673_vm9, %v1874_v3  ;;  %1701 = vst.msk [vmem:[%s4518_s3 + $0x6c] sm:$0xf] %vm1673_vm9, %v1875_v0  ;;  %v1894_v30 = vpack.c.bf16 %v4037_v17, %v4037_v17  ;;  %v1895_v41 = vpack.c.bf16 %v4043_v39, %v4043_v39  ;;  %v1896_v18 = vpack.c.bf16 %v4049_v34, %v4049_v34 }
 0x2b3   :  { %1702 = vst.msk [vmem:[%s4518_s3 + $0x70] sm:$0xf] %vm1673_vm9, %v1876_v32  ;;  %1703 = vst.msk [vmem:[%s4518_s3 + $0x74] sm:$0xf] %vm1673_vm9, %v1877_v23  ;;  %v1897_v53 = vpack.c.bf16 %v4055_v33, %v4055_v33  ;;  %v1898_v17 = vpack.c.bf16 %v4061_v38, %v4061_v38  ;;  %v1899_v39 = vpack.c.bf16 %v4067_v54, %v4067_v54 }
 0x2b4   :  { %1704 = vst.msk [vmem:[%s4518_s3 + $0x78] sm:$0xf] %vm1673_vm9, %v1878_v50  ;;  %1705 = vst.msk [vmem:[%s4518_s3 + $0x7c] sm:$0xf] %vm1673_vm9, %v1879_v28  ;;  %v1900_v34 = vpack.c.bf16 %v4073_v24, %v4073_v24  ;;  %v1901_v33 = vpack.c.bf16 %v4079_v22, %v4079_v22  ;;  %v1902_v38 = vpack.c.bf16 %v4084_v43, %v4084_v43 }
 0x2b5   :  { %1706 = vst.msk [vmem:[%s4518_s3 + $0x80] sm:$0xf] %vm1673_vm9, %v1880_v9  ;;  %1707 = vst.msk [vmem:[%s4518_s3 + $0x84] sm:$0xf] %vm1673_vm9, %v1881_v42  ;;  %v1903_v54 = vpack.c.bf16 %v4089_v35, %v4089_v35  ;;  %v1904_v24 = vpack.c.bf16 %v4094_v11, %v4094_v11  ;;  %v1905_v22 = vpack.c.bf16 %v4099_v61, %v4099_v61 }
 0x2b6   :  { %1708 = vst.msk [vmem:[%s4518_s3 + $0x88] sm:$0xf] %vm1673_vm9, %v1882_v46  ;;  %1709 = vst.msk [vmem:[%s4518_s3 + $0x8c] sm:$0xf] %vm1673_vm9, %v1883_v40  ;;  %v1906_v43 = vpack.c.bf16 %v4104_v62, %v4104_v62  ;;  %v1907_v35 = vpack.c.bf16 %v4109_v10, %v4109_v10  ;;  %v1908_v11 = vpack.c.bf16 %v4114_v48, %v4114_v48 }
 0x2b7   :  { %1710 = vst.msk [vmem:[%s4518_s3 + $0x90] sm:$0xf] %vm1673_vm9, %v1884_v14  ;;  %1711 = vst.msk [vmem:[%s4518_s3 + $0x94] sm:$0xf] %vm1673_vm9, %v1885_v56  ;;  %v1909_v61 = vpack.c.bf16 %v4119_v19, %v4119_v19  ;;  %v1910_v62 = vpack.c.bf16 %v4124_v25, %v4124_v25  ;;  %v1911_v10 = vpack.c.bf16 %v4129_v27, %v4129_v27 }
 0x2b8   :  { %1712 = vst.msk [vmem:[%s4518_s3 + $0x98] sm:$0xf] %vm1673_vm9, %v1886_v63  ;;  %1713 = vst.msk [vmem:[%s4518_s3 + $0x9c] sm:$0xf] %vm1673_vm9, %v1887_v29 }
 0x2b9   :  { %1714 = vst.msk [vmem:[%s4518_s3 + $0xa0] sm:$0xf] %vm1673_vm9, %v1888_v60  ;;  %1715 = vst.msk [vmem:[%s4518_s3 + $0xa4] sm:$0xf] %vm1673_vm9, %v1889_v8 }
 0x2ba   :  { %1716 = vst.msk [vmem:[%s4518_s3 + $0xa8] sm:$0xf] %vm1673_vm9, %v1890_v21  ;;  %1717 = vst.msk [vmem:[%s4518_s3 + $0xac] sm:$0xf] %vm1673_vm9, %v1891_v6 }
 0x2bb   :  { %1718 = vst.msk [vmem:[%s4518_s3 + $0xb0] sm:$0xf] %vm1673_vm9, %v1892_v12  ;;  %1719 = vst.msk [vmem:[%s4518_s3 + $0xb4] sm:$0xf] %vm1673_vm9, %v1893_v1 }
 0x2bc   :  { %1720 = vst.msk [vmem:[%s4518_s3 + $0xb8] sm:$0xf] %vm1673_vm9, %v1894_v30  ;;  %1721 = vst.msk [vmem:[%s4518_s3 + $0xbc] sm:$0xf] %vm1673_vm9, %v1895_v41 }
 0x2bd   :  { %1722 = vst.msk [vmem:[%s4518_s3 + $0xc0] sm:$0xf] %vm1673_vm9, %v1896_v18  ;;  %1723 = vst.msk [vmem:[%s4518_s3 + $0xc4] sm:$0xf] %vm1673_vm9, %v1897_v53 }
 0x2be   :  { %1724 = vst.msk [vmem:[%s4518_s3 + $0xc8] sm:$0xf] %vm1673_vm9, %v1898_v17  ;;  %1725 = vst.msk [vmem:[%s4518_s3 + $0xcc] sm:$0xf] %vm1673_vm9, %v1899_v39 }
 0x2bf   :  { %1726 = vst.msk [vmem:[%s4518_s3 + $0xd0] sm:$0xf] %vm1673_vm9, %v1900_v34  ;;  %1727 = vst.msk [vmem:[%s4518_s3 + $0xd4] sm:$0xf] %vm1673_vm9, %v1901_v33 }
 0x2c0   :  { %1728 = vst.msk [vmem:[%s4518_s3 + $0xd8] sm:$0xf] %vm1673_vm9, %v1902_v38  ;;  %1729 = vst.msk [vmem:[%s4518_s3 + $0xdc] sm:$0xf] %vm1673_vm9, %v1903_v54 }
 0x2c1   :  { %1730 = vst.msk [vmem:[%s4518_s3 + $0xe0] sm:$0xf] %vm1673_vm9, %v1904_v24  ;;  %1731 = vst.msk [vmem:[%s4518_s3 + $0xe4] sm:$0xf] %vm1673_vm9, %v1905_v22 }
 0x2c2   :  { %1732 = vst.msk [vmem:[%s4518_s3 + $0xe8] sm:$0xf] %vm1673_vm9, %v1906_v43  ;;  %1733 = vst.msk [vmem:[%s4518_s3 + $0xec] sm:$0xf] %vm1673_vm9, %v1907_v35 }
 0x2c3   :  { %1734 = vst.msk [vmem:[%s4518_s3 + $0xf0] sm:$0xf] %vm1673_vm9, %v1908_v11  ;;  %1735 = vst.msk [vmem:[%s4518_s3 + $0xf4] sm:$0xf] %vm1673_vm9, %v1909_v61 }
 0x2c4   :  { %1736 = vst.msk [vmem:[%s4518_s3 + $0xf8] sm:$0xf] %vm1673_vm9, %v1910_v62  ;;  %1737 = vst.msk [vmem:[%s4518_s3 + $0xfc] sm:$0xf] %vm1673_vm9, %v1911_v10 }

// kernel: _lambda_.7
= control target key start
LH: loop header
LB: loop body
LE: loop exit
PB: predicated region body
PF: predicated region fallthrough
CT: control target
= control target key end

     0   :  { %vm336_vm0 = vcmask 261120   ;;  %s1172_s1 = inlined_call_operand.vmem [shape: bf16[256,32], index: 1, kind: input, shape index: {}]   ;;  %s1173_s0 = inlined_call_operand.vmem [shape: bf16[128,256], index: 0, kind: input, shape index: {}]   ;;  %s1174_s2 = inlined_call_operand.vmem [shape: f32[2,32], index: 2, kind: input, shape index: {}]   ;;  %s1175_s3 = inlined_call_operand.vmem [shape: bf16[128,32], index: 3, kind: output, shape index: {}]  }
   0x1   :  { %v784_v0 = vld [vmem:[%s1172_s1 + $0x40] sm:$0xff]   ;;  %v786_v2 = vld [vmem:[%s1172_s1 + $0x48] sm:$0xff]   ;;  %v788_v4 = vld [vmem:[%s1172_s1 + $0x50] sm:$0xff]  }
   0x2   :  { %v785_v1 = vld [vmem:[%s1172_s1] sm:$0xff]   ;;  %704 = vmatprep.subr.bf16.mxu0 %v784_v0  ;;  %768 = vmatprep.subr.bf16.mxu1 %v784_v0  ;;  %v787_v3 = vld [vmem:[%s1172_s1 + $0x8] sm:$0xff]   ;;  %v789_v5 = vld [vmem:[%s1172_s1 + $0x10] sm:$0xff]  }
   0x3   :  { %705 = vmatpush3.bf16.msra.mxu0 %v785_v1  ;;  %776 = vmatpush3.bf16.msra.mxu1 %v785_v1  ;;  %v790_v6 = vld [vmem:[%s1172_s1 + $0x58] sm:$0xff]   ;;  %v792_v8 = vld [vmem:[%s1172_s1 + $0x60] sm:$0xff]   ;;  %v794_v10 = vld [vmem:[%s1172_s1 + $0x68] sm:$0xff]  }
   0x4   :  { %706 = vmatprep.subr.bf16.mxu0 %v786_v2  ;;  %769 = vmatprep.subr.bf16.mxu1 %v786_v2  ;;  %v791_v7 = vld [vmem:[%s1172_s1 + $0x18] sm:$0xff]   ;;  %v793_v9 = vld [vmem:[%s1172_s1 + $0x20] sm:$0xff]   ;;  %v795_v12 = vld [vmem:[%s1172_s1 + $0x28] sm:$0xff]  }
   0x5   :  { %v802_v11 = vld [vmem:[%s1173_s0 + $0x4] ss:$8 sps:$4 sm:$0xff]   ;;  %v796_v14 = vld [vmem:[%s1172_s1 + $0x70] sm:$0xff]   ;;  %v798_v16 = vld [vmem:[%s1172_s1 + $0x78] sm:$0xff]  }
   0x6   :  { %v808_v13 = vld [vmem:[%s1173_s0 + $0x44] ss:$8 sps:$4 sm:$0xff]   ;;  %271 = vmatprep.mubr.bf16.mxu0 %v802_v11  ;;  %v797_v15 = vld [vmem:[%s1172_s1 + $0x30] sm:$0xff]   ;;  %v799_v17 = vld [vmem:[%s1172_s1 + $0x38] sm:$0xff]  }
   0x7   :  { %707 = vmatpush3.bf16.msra.mxu0 %v787_v3  ;;  %777 = vmatpush3.bf16.msra.mxu1 %v787_v3  ;;  %v800_v18 = vld [vmem:[%s1173_s0] ss:$8 sps:$4 sm:$0xff]   ;;  %v803_v20 = vld [vmem:[%s1173_s0 + $0x14] ss:$8 sps:$4 sm:$0xff]   ;;  %v805_v22 = vld [vmem:[%s1173_s0 + $0x10] ss:$8 sps:$4 sm:$0xff]  }
   0x8   :  { %708 = vmatprep.subr.bf16.mxu0 %v788_v4  ;;  %770 = vmatprep.subr.bf16.mxu1 %v788_v4  ;;  %v806_v19 = vld [vmem:[%s1173_s0 + $0x40] ss:$8 sps:$4 sm:$0xff]   ;;  %v812_v21 = vld [vmem:[%s1173_s0 + $0x54] ss:$8 sps:$4 sm:$0xff]   ;;  %v814_v23 = vld [vmem:[%s1173_s0 + $0x50] ss:$8 sps:$4 sm:$0xff]  }
   0x9   :  { %303 = vmatprep.mubr.bf16.mxu1 %v808_v13  ;;  %v809_v24 = vld [vmem:[%s1173_s0 + $0x24] ss:$8 sps:$4 sm:$0xff]   ;;  %v811_v26 = vld [vmem:[%s1173_s0 + $0x20] ss:$8 sps:$4 sm:$0xff]   ;;  %v815_v28 = vld [vmem:[%s1173_s0 + $0x34] ss:$8 sps:$4 sm:$0xff]  }
   0xa   :  { %v818_v25 = vld [vmem:[%s1173_s0 + $0x64] ss:$8 sps:$4 sm:$0xff]   ;;  %v820_v27 = vld [vmem:[%s1173_s0 + $0x60] ss:$8 sps:$4 sm:$0xff]   ;;  %v821_v29 = vld [vmem:[%s1173_s0 + $0x74] ss:$8 sps:$4 sm:$0xff]  }
   0xb   :  { %709 = vmatpush3.bf16.msra.mxu0 %v789_v5  ;;  %778 = vmatpush3.bf16.msra.mxu1 %v789_v5  ;;  %v817_v30 = vld [vmem:[%s1173_s0 + $0x30] ss:$8 sps:$4 sm:$0xff]  }
   0xc   :  { %710 = vmatprep.subr.bf16.mxu0 %v790_v6  ;;  %771 = vmatprep.subr.bf16.mxu1 %v790_v6  ;;  %v823_v31 = vld [vmem:[%s1173_s0 + $0x70] ss:$8 sps:$4 sm:$0xff]  }
   0xf   :  { %711 = vmatpush3.bf16.msra.mxu0 %v791_v7  ;;  %779 = vmatpush3.bf16.msra.mxu1 %v791_v7 }
  0x10   :  { %712 = vmatprep.subr.bf16.mxu0 %v792_v8  ;;  %772 = vmatprep.subr.bf16.mxu1 %v792_v8 }
  0x13   :  { %713 = vmatpush3.bf16.msra.mxu0 %v793_v9  ;;  %780 = vmatpush3.bf16.msra.mxu1 %v793_v9 }
  0x14   :  { %714 = vmatprep.subr.bf16.mxu0 %v794_v10  ;;  %773 = vmatprep.subr.bf16.mxu1 %v794_v10 }
  0x17   :  { %715 = vmatpush3.bf16.msra.mxu0 %v795_v12  ;;  %781 = vmatpush3.bf16.msra.mxu1 %v795_v12 }
  0x18   :  { %716 = vmatprep.subr.bf16.mxu0 %v796_v14  ;;  %774 = vmatprep.subr.bf16.mxu1 %v796_v14 }
  0x1b   :  { %717 = vmatpush3.bf16.msra.mxu0 %v797_v15  ;;  %782 = vmatpush3.bf16.msra.mxu1 %v797_v15 }
  0x1c   :  { %718 = vmatprep.subr.bf16.mxu0 %v798_v16  ;;  %775 = vmatprep.subr.bf16.mxu1 %v798_v16 }
  0x1f   :  { %719 = vmatpush3.bf16.msra.mxu0 %v799_v17  ;;  %783 = vmatpush3.bf16.msra.mxu1 %v799_v17 }
  0x22   :  { %272 = vmatmul.mubr.bf16.vlgmr.msra.gmra.mrb[0].mxu0 %v800_v18  ;;  %304 = vmatmul.mubr.bf16.vlgmr.msra.gmra.mrb[0].mxu1 %v806_v19 }
  0x23   :  { %279 = vmatprep.mubr.bf16.mxu0 %v803_v20  ;;  %311 = vmatprep.mubr.bf16.mxu1 %v812_v21 }
  0x2a   :  { %280 = vmatmul.mubr.bf16.gmra.mrb[4].mxu0 %v805_v22  ;;  %312 = vmatmul.mubr.bf16.gmra.mrb[4].mxu1 %v814_v23 }
  0x2b   :  { %287 = vmatprep.mubr.bf16.mxu0 %v809_v24  ;;  %319 = vmatprep.mubr.bf16.mxu1 %v818_v25 }
  0x32   :  { %288 = vmatmul.mubr.bf16.gmra.mrb[8].mxu0 %v811_v26  ;;  %320 = vmatmul.mubr.bf16.gmra.mrb[8].mxu1 %v820_v27 }
  0x33   :  { %295 = vmatprep.mubr.bf16.mxu0 %v815_v28  ;;  %327 = vmatprep.mubr.bf16.mxu1 %v821_v29 }
  0x3a   :  { %296 = vmatmul.mubr.bf16.gmra.mrb[12].mxu0 %v817_v30  ;;  %328 = vmatmul.mubr.bf16.gmra.mrb[12].mxu1 %v823_v31 }
  0xf5   :  { %v720_v32 = vpop.f32.mrb[0].mxu0  ;;  %v744_v33 = vpop.f32.mrb[0].mxu1 }
  0xf6   :  { %v721_v34 = vpop.f32.mrb[1].mxu0  ;;  %v745_v35 = vpop.f32.mrb[1].mxu1 }
  0xf7   :  { %v942_v36 = vadd.f32 %v721_v34, %v720_v32  ;;  %v723_v37 = vpop.f32.mrb[2].mxu0  ;;  %v944_v38 = vadd.f32 %v745_v35, %v744_v33  ;;  %v747_v39 = vpop.f32.mrb[2].mxu1 }
  0xf8   :  { %v724_v40 = vpop.f32.mrb[3].mxu0  ;;  %v748_v41 = vpop.f32.mrb[3].mxu1 }
  0xf9   :  { %v946_v42 = vadd.f32 %v724_v40, %v723_v37  ;;  %v948_v43 = vadd.f32 %v748_v41, %v747_v39  ;;  %v337_v44 = vsel %vm336_vm0, %v942_v36, 0.0  ;;  %v352_v31 = vsel %vm336_vm0, %v944_v38, 0.0 }
  0xfb   :  { %v338_v45 = vsel %vm336_vm0, %v946_v42, 0.0  ;;  %v354_v33 = vsel %vm336_vm0, %v948_v43, 0.0 }
  0xfc   :  { %v339_v46 = vadd.f32 %v338_v45, %v337_v44 }
  0xfd   :  { %v726_v47 = vpop.f32.mrb[4].mxu0  ;;  %v750_v48 = vpop.f32.mrb[4].mxu1 }
  0xfe   :  { %v727_v49 = vpop.f32.mrb[5].mxu0  ;;  %v751_v50 = vpop.f32.mrb[5].mxu1 }
  0xff   :  { %v954_v51 = vadd.f32 %v727_v49, %v726_v47  ;;  %v729_v52 = vpop.f32.mrb[6].mxu0  ;;  %v956_v53 = vadd.f32 %v751_v50, %v750_v48  ;;  %v753_v54 = vpop.f32.mrb[6].mxu1 }
 0x100   :  { %v730_v55 = vpop.f32.mrb[7].mxu0  ;;  %v754_v56 = vpop.f32.mrb[7].mxu1 }
 0x101   :  { %v340_v57 = vsel %vm336_vm0, %v954_v51, 0.0  ;;  %v960_v58 = vadd.f32 %v730_v55, %v729_v52  ;;  %v962_v59 = vadd.f32 %v754_v56, %v753_v54  ;;  %v356_v35 = vsel %vm336_vm0, %v956_v53, 0.0 }
 0x102   :  { %v341_v60 = vadd.f32 %v340_v57, %v339_v46 }
 0x103   :  { %v342_v61 = vsel %vm336_vm0, %v960_v58, 0.0  ;;  %v358_v39 = vsel %vm336_vm0, %v962_v59, 0.0 }
 0x104   :  { %v343_v62 = vadd.f32 %v342_v61, %v341_v60 }
 0x105   :  { %v732_v63 = vpop.f32.mrb[8].mxu0  ;;  %v756_v0 = vpop.f32.mrb[8].mxu1 }
 0x106   :  { %v733_v1 = vpop.f32.mrb[9].mxu0  ;;  %v757_v2 = vpop.f32.mrb[9].mxu1 }
 0x107   :  { %v734_v3 = vadd.f32 %v733_v1, %v732_v63  ;;  %v735_v4 = vpop.f32.mrb[10].mxu0  ;;  %v758_v5 = vadd.f32 %v757_v2, %v756_v0  ;;  %v759_v6 = vpop.f32.mrb[10].mxu1 }
 0x108   :  { %v736_v7 = vpop.f32.mrb[11].mxu0  ;;  %v760_v8 = vpop.f32.mrb[11].mxu1 }
 0x109   :  { %v344_v9 = vsel %vm336_vm0, %v734_v3, 0.0  ;;  %v737_v10 = vadd.f32 %v736_v7, %v735_v4  ;;  %v761_v11 = vadd.f32 %v760_v8, %v759_v6  ;;  %v360_v41 = vsel %vm336_vm0, %v758_v5, 0.0 }
 0x10a   :  { %v345_v12 = vadd.f32 %v344_v9, %v343_v62 }
 0x10b   :  { %v346_v13 = vsel %vm336_vm0, %v737_v10, 0.0  ;;  %v362_v45 = vsel %vm336_vm0, %v761_v11, 0.0 }
 0x10c   :  { %v347_v14 = vadd.f32 %v346_v13, %v345_v12 }
 0x10d   :  { %v738_v15 = vpop.f32.mrb[12].mxu0  ;;  %v762_v16 = vpop.f32.mrb[12].mxu1 }
 0x10e   :  { %v739_v17 = vpop.f32.mrb[13].mxu0  ;;  %v763_v18 = vpop.f32.mrb[13].mxu1 }
 0x10f   :  { %v740_v19 = vadd.f32 %v739_v17, %v738_v15  ;;  %v741_v20 = vpop.f32.mrb[14].mxu0  ;;  %v764_v21 = vadd.f32 %v763_v18, %v762_v16  ;;  %v765_v22 = vpop.f32.mrb[14].mxu1 }
 0x110   :  { %v742_v23 = vpop.f32.mrb[15].mxu0  ;;  %v766_v24 = vpop.f32.mrb[15].mxu1 }
 0x111   :  { %v348_v25 = vsel %vm336_vm0, %v740_v19, 0.0  ;;  %v743_v26 = vadd.f32 %v742_v23, %v741_v20  ;;  %v767_v27 = vadd.f32 %v766_v24, %v765_v22  ;;  %v364_v46 = vsel %vm336_vm0, %v764_v21, 0.0 }
 0x112   :  { %v349_v28 = vadd.f32 %v348_v25, %v347_v14 }
 0x113   :  { %v350_v29 = vsel %vm336_vm0, %v743_v26, 0.0  ;;  %v366_v49 = vsel %vm336_vm0, %v767_v27, 0.0 }
 0x114   :  { %v351_v30 = vadd.f32 %v350_v29, %v349_v28 }
 0x116   :  { %v353_v32 = vadd.f32 %v352_v31, %v351_v30 }
 0x118   :  { %v355_v34 = vadd.f32 %v354_v33, %v353_v32 }
 0x11a   :  { %v357_v37 = vadd.f32 %v356_v35, %v355_v34 }
 0x11c   :  { %v359_v40 = vadd.f32 %v358_v39, %v357_v37 }
 0x11e   :  { %v361_v44 = vadd.f32 %v360_v41, %v359_v40 }
 0x120   :  { %v363_v47 = vadd.f32 %v362_v45, %v361_v44 }
 0x122   :  { %v365_v48 = vadd.f32 %v364_v46, %v363_v47 }
 0x124   :  { %v367_v50 = vadd.f32 %v366_v49, %v365_v48 }
 0x126   :  { %v368_v52 = vrot.slane %v367_v50, 4 }
 0x128   :  { %v369_v54 = vadd.f32 %v368_v52, %v367_v50 }
 0x12a   :  { %v370_v55 = vrot.slane %v369_v54, 2 }
 0x12c   :  { %v371_v56 = vadd.f32 %v370_v55, %v369_v54 }
 0x12e   :  { %v372_v57 = vrot.slane %v371_v56, 1 }
 0x130   :  { %v373_v60 = vadd.f32 %v372_v57, %v371_v56 }
 0x132   :  { %v374_v61 = vmul.f32 0.0078125, %v373_v60 }
 0x134   :  { %v983_v62 = vsub.f32 %v942_v36, %v374_v61  ;;  %v986_v63 = vsub.f32 %v946_v42, %v374_v61  ;;  %v989_v0 = vsub.f32 %v954_v51, %v374_v61  ;;  %v992_v1 = vsub.f32 %v960_v58, %v374_v61 }
 0x135   :  { %v994_v2 = vsub.f32 %v734_v3, %v374_v61  ;;  %v996_v4 = vsub.f32 %v737_v10, %v374_v61  ;;  %v998_v6 = vsub.f32 %v740_v19, %v374_v61  ;;  %v1000_v7 = vsub.f32 %v743_v26, %v374_v61 }
 0x136   :  { %v1003_v36 = vsub.f32 %v944_v38, %v374_v61  ;;  %v1006_v42 = vsub.f32 %v948_v43, %v374_v61  ;;  %v1009_v51 = vsub.f32 %v956_v53, %v374_v61  ;;  %v1012_v58 = vsub.f32 %v962_v59, %v374_v61 }
 0x137   :  { %v1014_v3 = vsub.f32 %v758_v5, %v374_v61  ;;  %v1016_v8 = vsub.f32 %v761_v11, %v374_v61  ;;  %v1018_v9 = vsub.f32 %v764_v21, %v374_v61  ;;  %v1020_v10 = vsub.f32 %v767_v27, %v374_v61 }
 0x138   :  { %v391_v38 = vmul.f32 %v983_v62, %v983_v62  ;;  %v392_v43 = vmul.f32 %v986_v63, %v986_v63  ;;  %v393_v53 = vmul.f32 %v989_v0, %v989_v0  ;;  %v394_v59 = vmul.f32 %v992_v1, %v992_v1 }
 0x139   :  { %v395_v13 = vmul.f32 %v994_v2, %v994_v2  ;;  %v396_v16 = vmul.f32 %v996_v4, %v996_v4  ;;  %v397_v19 = vmul.f32 %v998_v6, %v998_v6  ;;  %v398_v22 = vmul.f32 %v1000_v7, %v1000_v7 }
 0x13a   :  { %v407_v5 = vsel %vm336_vm0, %v391_v38, 0.0  ;;  %v408_v11 = vsel %vm336_vm0, %v392_v43, 0.0  ;;  %v410_v14 = vsel %vm336_vm0, %v393_v53, 0.0  ;;  %v412_v17 = vsel %vm336_vm0, %v394_v59, 0.0 }
 0x13b   :  { %v409_v12 = vadd.f32 %v408_v11, %v407_v5  ;;  %v414_v20 = vsel %vm336_vm0, %v395_v13, 0.0  ;;  %v416_v23 = vsel %vm336_vm0, %v396_v16, 0.0  ;;  %v399_v25 = vmul.f32 %v1003_v36, %v1003_v36 }
 0x13c   :  { %v418_v26 = vsel %vm336_vm0, %v397_v19, 0.0  ;;  %v400_v28 = vmul.f32 %v1006_v42, %v1006_v42  ;;  %v420_v29 = vsel %vm336_vm0, %v398_v22, 0.0  ;;  %v401_v31 = vmul.f32 %v1009_v51, %v1009_v51  ;;  %v670_v22 = vld [vmem:[%s1174_s2] ss:$0 sm:$0xff] }
 0x13d   :  { %v411_v15 = vadd.f32 %v410_v14, %v409_v12  ;;  %v422_v32 = vsel %vm336_vm0, %v399_v25, 0.0  ;;  %v402_v34 = vmul.f32 %v1012_v58, %v1012_v58  ;;  %v403_v39 = vmul.f32 %v1014_v3, %v1014_v3 }
 0x13e   :  { %v424_v35 = vsel %vm336_vm0, %v400_v28, 0.0  ;;  %v426_v40 = vsel %vm336_vm0, %v401_v31, 0.0  ;;  %v404_v44 = vmul.f32 %v1016_v8, %v1016_v8  ;;  %v405_v47 = vmul.f32 %v1018_v9, %v1018_v9 }
 0x13f   :  { %v413_v18 = vadd.f32 %v412_v17, %v411_v15  ;;  %v428_v45 = vsel %vm336_vm0, %v402_v34, 0.0  ;;  %v430_v48 = vsel %vm336_vm0, %v403_v39, 0.0  ;;  %v406_v50 = vmul.f32 %v1020_v10, %v1020_v10 }
 0x140   :  { %v432_v52 = vsel %vm336_vm0, %v404_v44, 0.0  ;;  %v434_v55 = vsel %vm336_vm0, %v405_v47, 0.0 }
 0x141   :  { %v415_v21 = vadd.f32 %v414_v20, %v413_v18  ;;  %v436_v57 = vsel %vm336_vm0, %v406_v50, 0.0 }
 0x143   :  { %v417_v24 = vadd.f32 %v416_v23, %v415_v21 }
 0x145   :  { %v419_v27 = vadd.f32 %v418_v26, %v417_v24 }
 0x147   :  { %v421_v30 = vadd.f32 %v420_v29, %v419_v27 }
 0x149   :  { %v423_v33 = vadd.f32 %v422_v32, %v421_v30 }
 0x14b   :  { %v425_v37 = vadd.f32 %v424_v35, %v423_v33 }
 0x14d   :  { %v427_v41 = vadd.f32 %v426_v40, %v425_v37 }
 0x14f   :  { %v429_v46 = vadd.f32 %v428_v45, %v427_v41 }
 0x151   :  { %v431_v49 = vadd.f32 %v430_v48, %v429_v46 }
 0x153   :  { %v433_v54 = vadd.f32 %v432_v52, %v431_v49 }
 0x155   :  { %v435_v56 = vadd.f32 %v434_v55, %v433_v54 }
 0x157   :  { %v437_v60 = vadd.f32 %v436_v57, %v435_v56 }
 0x159   :  { %v438_v61 = vrot.slane %v437_v60, 4 }
 0x15b   :  { %v439_v38 = vadd.f32 %v438_v61, %v437_v60 }
 0x15d   :  { %v440_v43 = vrot.slane %v439_v38, 2 }
 0x15f   :  { %v441_v53 = vadd.f32 %v440_v43, %v439_v38 }
 0x161   :  { %v442_v59 = vrot.slane %v441_v53, 1 }
 0x163   :  { %v443_v5 = vadd.f32 %v442_v59, %v441_v53 }
 0x165   :  { %v444_v11 = vmul.f32 0.0078125, %v443_v5 }
 0x167   :  { %v445_v12 = vadd.f32 1e-05, %v444_v11 }
 0x169   :  { %824 = vrsqrt.f32 %v445_v12 }
 0x173   :  { %v825_v13 = vpop.eup %824 }
 0x174   :  { %v447_v14 = vmul.f32 %v825_v13, %v983_v62  ;;  %v448_v15 = vmul.f32 %v825_v13, %v986_v63  ;;  %v449_v16 = vmul.f32 %v825_v13, %v989_v0  ;;  %v450_v17 = vmul.f32 %v825_v13, %v992_v1 }
 0x175   :  { %v451_v18 = vmul.f32 %v825_v13, %v994_v2  ;;  %v452_v19 = vmul.f32 %v825_v13, %v996_v4  ;;  %v453_v20 = vmul.f32 %v825_v13, %v998_v6  ;;  %v454_v21 = vmul.f32 %v825_v13, %v1000_v7 }
 0x176   :  { %v455_v62 = vmul.f32 %v825_v13, %v1003_v36  ;;  %v456_v63 = vmul.f32 %v825_v13, %v1006_v42  ;;  %v457_v0 = vmul.f32 %v825_v13, %v1009_v51  ;;  %v458_v1 = vmul.f32 %v825_v13, %v1012_v58  ;;  %v671_v51 = vld [vmem:[%s1174_s2 + $0x1] ss:$0 sm:$0xff] }
 0x177   :  { %v459_v2 = vmul.f32 %v825_v13, %v1014_v3  ;;  %v460_v4 = vmul.f32 %v825_v13, %v1016_v8  ;;  %v461_v6 = vmul.f32 %v825_v13, %v1018_v9  ;;  %v462_v7 = vmul.f32 %v825_v13, %v1020_v10 }
 0x178   :  { %v468_v23 = vmul.f32 %v670_v22, %v447_v14  ;;  %v469_v24 = vmul.f32 %v670_v22, %v448_v15  ;;  %v470_v25 = vmul.f32 %v670_v22, %v449_v16  ;;  %v471_v26 = vmul.f32 %v670_v22, %v450_v17 }
 0x179   :  { %v472_v27 = vmul.f32 %v670_v22, %v451_v18  ;;  %v473_v36 = vmul.f32 %v670_v22, %v452_v19  ;;  %v474_v28 = vmul.f32 %v670_v22, %v453_v20  ;;  %v475_v42 = vmul.f32 %v670_v22, %v454_v21 }
 0x17a   :  { %v476_v58 = vmul.f32 %v670_v22, %v455_v62  ;;  %v477_v3 = vmul.f32 %v670_v22, %v456_v63  ;;  %v478_v29 = vmul.f32 %v670_v22, %v457_v0  ;;  %v479_v8 = vmul.f32 %v670_v22, %v458_v1 }
 0x17b   :  { %v480_v30 = vmul.f32 %v670_v22, %v459_v2  ;;  %v481_v9 = vmul.f32 %v670_v22, %v460_v4  ;;  %v482_v31 = vmul.f32 %v670_v22, %v461_v6  ;;  %v483_v10 = vmul.f32 %v670_v22, %v462_v7 }
 0x17c   :  { %v489_v32 = vadd.f32 %v671_v51, %v468_v23  ;;  %v490_v33 = vadd.f32 %v671_v51, %v469_v24  ;;  %v491_v34 = vadd.f32 %v671_v51, %v470_v25  ;;  %v492_v35 = vadd.f32 %v671_v51, %v471_v26 }
 0x17d   :  { %v493_v37 = vadd.f32 %v671_v51, %v472_v27  ;;  %v494_v39 = vadd.f32 %v671_v51, %v473_v36  ;;  %v495_v40 = vadd.f32 %v671_v51, %v474_v28  ;;  %v496_v41 = vadd.f32 %v671_v51, %v475_v42 }
 0x17e   :  { %v497_v44 = vadd.f32 %v671_v51, %v476_v58  ;;  %v498_v45 = vadd.f32 %v671_v51, %v477_v3  ;;  %v499_v46 = vadd.f32 %v671_v51, %v478_v29  ;;  %v500_v47 = vadd.f32 %v671_v51, %v479_v8 }
 0x17f   :  { %v501_v48 = vadd.f32 %v671_v51, %v480_v30  ;;  %v502_v49 = vadd.f32 %v671_v51, %v481_v9  ;;  %v503_v50 = vadd.f32 %v671_v51, %v482_v31  ;;  %v504_v52 = vadd.f32 %v671_v51, %v483_v10 }
 0x180   :  { %vm506_vm2 = vcmp.ge.f32.partialorder %v490_v33, 0.0  ;;  %vm507_vm3 = vcmp.ge.f32.partialorder %v491_v34, 0.0  ;;  %vm508_vm4 = vcmp.ge.f32.partialorder %v492_v35, 0.0  ;;  %vm509_vm5 = vcmp.ge.f32.partialorder %v493_v37, 0.0 }
 0x181   :  { %vm510_vm6 = vcmp.ge.f32.partialorder %v494_v39, 0.0  ;;  %vm512_vm8 = vcmp.ge.f32.partialorder %v496_v41, 0.0  ;;  %vm513_vm9 = vcmp.ge.f32.partialorder %v497_v44, 0.0  ;;  %vm514_vm10 = vcmp.ge.f32.partialorder %v498_v45, 0.0 }
 0x182   :  { %vm515_vm11 = vcmp.ge.f32.partialorder %v499_v46, 0.0  ;;  %vm516_vm12 = vcmp.ge.f32.partialorder %v500_v47, 0.0  ;;  %vm517_vm13 = vcmp.ge.f32.partialorder %v501_v48, 0.0  ;;  %vm518_vm14 = vcmp.ge.f32.partialorder %v502_v49, 0.0 }
 0x183   :  { %vm519_vm15 = vcmp.ge.f32.partialorder %v503_v50, 0.0  ;;  %vm520_vm0 = vcmp.ge.f32.partialorder %v504_v52, 0.0  ;;  %v521_v54 = vmul.f32 0.2, %v489_v32  ;;  %v522_v55 = vmul.f32 0.2, %v490_v33 }
 0x184   :  { %v523_v56 = vmul.f32 0.2, %v491_v34  ;;  %v524_v57 = vmul.f32 0.2, %v492_v35  ;;  %v525_v60 = vmul.f32 0.2, %v493_v37 }
 0x185   :  { %v526_v61 = vmul.f32 0.2, %v494_v39  ;;  %v527_v38 = vmul.f32 0.2, %v495_v40  ;;  %v528_v43 = vmul.f32 0.2, %v496_v41  ;;  %v538_v13 = vsel %vm506_vm2, %v490_v33, %v522_v55 }
 0x186   :  { %v529_v53 = vmul.f32 0.2, %v497_v44  ;;  %vm1176_vm7 = vcmp.ge.f32.partialorder %v489_v32, 0.0  ;;  %v530_v5 = vmul.f32 0.2, %v498_v45  ;;  %v539_v17 = vsel %vm507_vm3, %v491_v34, %v523_v56 }
 0x187   :  { %v537_v59 = vsel %vm1176_vm7, %v489_v32, %v521_v54  ;;  %v531_v11 = vmul.f32 0.2, %v499_v46  ;;  %v532_v12 = vmul.f32 0.2, %v500_v47  ;;  %v533_v14 = vmul.f32 0.2, %v501_v48 }
 0x188   :  { %v534_v15 = vmul.f32 0.2, %v502_v49  ;;  %v535_v16 = vmul.f32 0.2, %v503_v50  ;;  %v536_v18 = vmul.f32 0.2, %v504_v52  ;;  %v540_v19 = vsel %vm508_vm4, %v492_v35, %v524_v57 }
 0x189   :  { %v541_v20 = vsel %vm509_vm5, %v493_v37, %v525_v60  ;;  %v542_v21 = vsel %vm510_vm6, %v494_v39, %v526_v61  ;;  %vm1177_vm1 = vcmp.ge.f32.partialorder %v495_v40, 0.0  ;;  %v544_v62 = vsel %vm512_vm8, %v496_v41, %v528_v43 }
 0x18a   :  { %v543_v22 = vsel %vm1177_vm1, %v495_v40, %v527_v38  ;;  %v545_v63 = vsel %vm513_vm9, %v497_v44, %v529_v53  ;;  %v546_v0 = vsel %vm514_vm10, %v498_v45, %v530_v5  ;;  %v547_v1 = vsel %vm515_vm11, %v499_v46, %v531_v11 }
 0x18b   :  { %v548_v2 = vsel %vm516_vm12, %v500_v47, %v532_v12  ;;  %v549_v4 = vsel %vm517_vm13, %v501_v48, %v533_v14  ;;  %v550_v6 = vsel %vm518_vm14, %v502_v49, %v534_v15  ;;  %v551_v7 = vsel %vm519_vm15, %v503_v50, %v535_v16 }
 0x18c   :  { %v552_v23 = vsel %vm520_vm0, %v504_v52, %v536_v18  ;;  %v688_v24 = vpack.c.bf16 %v537_v59, %v537_v59  ;;  %v689_v25 = vpack.c.bf16 %v538_v13, %v538_v13  ;;  %v690_v26 = vpack.c.bf16 %v539_v17, %v539_v17 }
 0x18d   :  { %v691_v27 = vpack.c.bf16 %v540_v19, %v540_v19  ;;  %v692_v36 = vpack.c.bf16 %v541_v20, %v541_v20  ;;  %v693_v28 = vpack.c.bf16 %v542_v21, %v542_v21  ;;  %v694_v42 = vpack.c.bf16 %v543_v22, %v543_v22 }
 0x18e   :  { %v695_v51 = vpack.c.bf16 %v544_v62, %v544_v62  ;;  %v696_v58 = vpack.c.bf16 %v545_v63, %v545_v63  ;;  %v697_v3 = vpack.c.bf16 %v546_v0, %v546_v0  ;;  %vm1178_vm1 = vcmask 257024  }
 0x18f   :  { %618 = vst.msk [vmem:[%s1175_s3] sm:$0xf] %vm1178_vm1, %v688_v24  ;;  %vm1179_vm2 = vmmov %vm1178_vm1  ;;  %v698_v29 = vpack.c.bf16 %v547_v1, %v547_v1  ;;  %v699_v8 = vpack.c.bf16 %v548_v2, %v548_v2  ;;  %v700_v30 = vpack.c.bf16 %v549_v4, %v549_v4  ;;  %v701_v9 = vpack.c.bf16 %v550_v6, %v550_v6 }
 0x190   :  { %619 = vst.msk [vmem:[%s1175_s3 + $0x4] sm:$0xf] %vm1179_vm2, %v689_v25  ;;  %vm1180_vm3 = vmmov %vm1178_vm1  ;;  %v702_v31 = vpack.c.bf16 %v551_v7, %v551_v7  ;;  %v703_v10 = vpack.c.bf16 %v552_v23, %v552_v23 }
 0x191   :  { %620 = vst.msk [vmem:[%s1175_s3 + $0x8] sm:$0xf] %vm1180_vm3, %v690_v26  ;;  %vm1181_vm4 = vmmov %vm1178_vm1 }
 0x192   :  { %621 = vst.msk [vmem:[%s1175_s3 + $0xc] sm:$0xf] %vm1181_vm4, %v691_v27  ;;  %vm1182_vm5 = vmmov %vm1178_vm1 }
 0x193   :  { %622 = vst.msk [vmem:[%s1175_s3 + $0x10] sm:$0xf] %vm1182_vm5, %v692_v36  ;;  %vm1183_vm6 = vmmov %vm1178_vm1 }
 0x194   :  { %623 = vst.msk [vmem:[%s1175_s3 + $0x14] sm:$0xf] %vm1183_vm6, %v693_v28  ;;  %vm1184_vm7 = vmmov %vm1178_vm1 }
 0x195   :  { %624 = vst.msk [vmem:[%s1175_s3 + $0x18] sm:$0xf] %vm1184_vm7, %v694_v42  ;;  %vm1185_vm8 = vmmov %vm1178_vm1 }
 0x196   :  { %625 = vst.msk [vmem:[%s1175_s3 + $0x1c] sm:$0xf] %vm1185_vm8, %v695_v51  ;;  %vm1186_vm9 = vmmov %vm1178_vm1 }
 0x197   :  { %626 = vst.msk [vmem:[%s1175_s3 + $0x20] sm:$0xf] %vm1186_vm9, %v696_v58  ;;  %vm1187_vm10 = vmmov %vm1178_vm1 }
 0x198   :  { %627 = vst.msk [vmem:[%s1175_s3 + $0x24] sm:$0xf] %vm1187_vm10, %v697_v3  ;;  %vm1188_vm11 = vmmov %vm1178_vm1 }
 0x199   :  { %628 = vst.msk [vmem:[%s1175_s3 + $0x28] sm:$0xf] %vm1188_vm11, %v698_v29  ;;  %vm1189_vm12 = vmmov %vm1178_vm1 }
 0x19a   :  { %629 = vst.msk [vmem:[%s1175_s3 + $0x2c] sm:$0xf] %vm1189_vm12, %v699_v8  ;;  %vm1190_vm13 = vmmov %vm1178_vm1 }
 0x19b   :  { %630 = vst.msk [vmem:[%s1175_s3 + $0x30] sm:$0xf] %vm1190_vm13, %v700_v30  ;;  %vm1191_vm14 = vmmov %vm1178_vm1 }
 0x19c   :  { %631 = vst.msk [vmem:[%s1175_s3 + $0x34] sm:$0xf] %vm1191_vm14, %v701_v9  ;;  %vm1192_vm15 = vmmov %vm1178_vm1 }
 0x19d   :  { %632 = vst.msk [vmem:[%s1175_s3 + $0x38] sm:$0xf] %vm1192_vm15, %v702_v31  ;;  %vm1193_vm0 = vmmov %vm1178_vm1 }
 0x19e   :  { %633 = vst.msk [vmem:[%s1175_s3 + $0x3c] sm:$0xf] %vm1193_vm0, %v703_v10 }

// kernel: _lambda_.8
= control target key start
LH: loop header
LB: loop body
LE: loop exit
PB: predicated region body
PF: predicated region fallthrough
CT: control target
= control target key end

     0   :  { %vm417_vm0 = vcmask 523264   ;;  %vm506_vm5 = vcmask 519168   ;;  %s833_s1 = inlined_call_operand.vmem [shape: bf16[512,64], index: 1, kind: input, shape index: {}]   ;;  %s834_s0 = inlined_call_operand.vmem [shape: bf16[32,512], index: 0, kind: input, shape index: {}]   ;;  %s835_s2 = inlined_call_operand.vmem [shape: f32[2,64], index: 2, kind: input, shape index: {}]   ;;  %s836_s3 = inlined_call_operand.vmem [shape: bf16[32,64], index: 3, kind: output, shape index: {}]  }
   0x1   :  { %v621_v0 = vld [vmem:[%s833_s1 + $0x40] sm:$0xff]   ;;  %v625_v4 = vld [vmem:[%s833_s1 + $0x48] sm:$0xff]   ;;  %v629_v8 = vld [vmem:[%s833_s1 + $0x50] sm:$0xff]  }
   0x2   :  { %v622_v1 = vld [vmem:[%s833_s1 + $0xc0] sm:$0xff]   ;;  %565 = vmatprep.subr.bf16.mxu0 %v621_v0  ;;  %v626_v5 = vld [vmem:[%s833_s1 + $0xc8] sm:$0xff]   ;;  %v630_v9 = vld [vmem:[%s833_s1 + $0xd0] sm:$0xff]  }
   0x3   :  { %v623_v2 = vld [vmem:[%s833_s1] sm:$0xff]   ;;  %593 = vmatprep.subr.bf16.mxu1 %v622_v1  ;;  %v627_v6 = vld [vmem:[%s833_s1 + $0x8] sm:$0xff]   ;;  %v631_v10 = vld [vmem:[%s833_s1 + $0x10] sm:$0xff]  }
   0x4   :  { %v624_v3 = vld [vmem:[%s833_s1 + $0x80] sm:$0xff]   ;;  %566 = vmatpush3.bf16.msra.mxu0 %v623_v2  ;;  %v628_v7 = vld [vmem:[%s833_s1 + $0x88] sm:$0xff]   ;;  %v632_v11 = vld [vmem:[%s833_s1 + $0x90] sm:$0xff]  }
   0x5   :  { %594 = vmatpush3.bf16.msra.mxu1 %v624_v3  ;;  %567 = vmatprep.subr.bf16.mxu0 %v625_v4  ;;  %v633_v12 = vld [vmem:[%s833_s1 + $0x58] sm:$0xff]   ;;  %v637_v16 = vld [vmem:[%s833_s1 + $0x60] sm:$0xff]   ;;  %v641_v20 = vld [vmem:[%s833_s1 + $0x68] sm:$0xff]  }
   0x6   :  { %595 = vmatprep.subr.bf16.mxu1 %v626_v5  ;;  %v634_v13 = vld [vmem:[%s833_s1 + $0xd8] sm:$0xff]   ;;  %v638_v17 = vld [vmem:[%s833_s1 + $0xe0] sm:$0xff]   ;;  %v642_v21 = vld [vmem:[%s833_s1 + $0xe8] sm:$0xff]  }
   0x7   :  { %v635_v14 = vld [vmem:[%s833_s1 + $0x18] sm:$0xff]   ;;  %v639_v18 = vld [vmem:[%s833_s1 + $0x20] sm:$0xff]   ;;  %v643_v22 = vld [vmem:[%s833_s1 + $0x28] sm:$0xff]  }
   0x8   :  { %568 = vmatpush3.bf16.msra.mxu0 %v627_v6  ;;  %v636_v15 = vld [vmem:[%s833_s1 + $0x98] sm:$0xff]   ;;  %v640_v19 = vld [vmem:[%s833_s1 + $0xa0] sm:$0xff]   ;;  %v644_v23 = vld [vmem:[%s833_s1 + $0xa8] sm:$0xff]  }
   0x9   :  { %596 = vmatpush3.bf16.msra.mxu1 %v628_v7  ;;  %569 = vmatprep.subr.bf16.mxu0 %v629_v8  ;;  %v645_v24 = vld [vmem:[%s833_s1 + $0x70] sm:$0xff]   ;;  %v649_v28 = vld [vmem:[%s833_s1 + $0x78] sm:$0xff]  }
   0xa   :  { %597 = vmatprep.subr.bf16.mxu1 %v630_v9  ;;  %v646_v25 = vld [vmem:[%s833_s1 + $0xf0] sm:$0xff]   ;;  %v650_v29 = vld [vmem:[%s833_s1 + $0xf8] sm:$0xff]  }
   0xb   :  { %v647_v26 = vld [vmem:[%s833_s1 + $0x30] sm:$0xff]   ;;  %v651_v30 = vld [vmem:[%s833_s1 + $0x38] sm:$0xff]  }
   0xc   :  { %570 = vmatpush3.bf16.msra.mxu0 %v631_v10  ;;  %v648_v27 = vld [vmem:[%s833_s1 + $0xb0] sm:$0xff]   ;;  %v652_v31 = vld [vmem:[%s833_s1 + $0xb8] sm:$0xff]  }
   0xd   :  { %598 = vmatpush3.bf16.msra.mxu1 %v632_v11  ;;  %571 = vmatprep.subr.bf16.mxu0 %v633_v12  ;;  %v653_v32 = vld [vmem:[%s834_s0] ss:$16 sps:$4 sm:$0xff]   ;;  %v655_v33 = vld [vmem:[%s834_s0 + $0x4] ss:$16 sps:$4 sm:$0xff]   ;;  %v656_v34 = vld [vmem:[%s834_s0 + $0x8] ss:$16 sps:$4 sm:$0xff]  }
   0xe   :  { %599 = vmatprep.subr.bf16.mxu1 %v634_v13  ;;  %v658_v35 = vld [vmem:[%s834_s0 + $0xc] ss:$16 sps:$4 sm:$0xff]   ;;  %351 = vmatprep.mubr.bf16.mxu0 %v655_v33  ;;  %v659_v36 = vld [vmem:[%s834_s0 + $0x24] ss:$16 sps:$4 sm:$0xff]   ;;  %v663_v38 = vld [vmem:[%s834_s0 + $0x20] ss:$16 sps:$4 sm:$0xff]  }
   0xf   :  { %400 = vmatprep.mubr.bf16.mxu1 %v658_v35  ;;  %v661_v37 = vld [vmem:[%s834_s0 + $0x2c] ss:$16 sps:$4 sm:$0xff]   ;;  %v664_v39 = vld [vmem:[%s834_s0 + $0x28] ss:$16 sps:$4 sm:$0xff]  }
  0x10   :  { %572 = vmatpush3.bf16.msra.mxu0 %v635_v14 }
  0x11   :  { %600 = vmatpush3.bf16.msra.mxu1 %v636_v15  ;;  %573 = vmatprep.subr.bf16.mxu0 %v637_v16 }
  0x12   :  { %601 = vmatprep.subr.bf16.mxu1 %v638_v17 }
  0x14   :  { %574 = vmatpush3.bf16.msra.mxu0 %v639_v18 }
  0x15   :  { %602 = vmatpush3.bf16.msra.mxu1 %v640_v19  ;;  %575 = vmatprep.subr.bf16.mxu0 %v641_v20 }
  0x16   :  { %603 = vmatprep.subr.bf16.mxu1 %v642_v21 }
  0x18   :  { %576 = vmatpush3.bf16.msra.mxu0 %v643_v22 }
  0x19   :  { %604 = vmatpush3.bf16.msra.mxu1 %v644_v23  ;;  %577 = vmatprep.subr.bf16.mxu0 %v645_v24 }
  0x1a   :  { %605 = vmatprep.subr.bf16.mxu1 %v646_v25 }
  0x1c   :  { %578 = vmatpush3.bf16.msra.mxu0 %v647_v26 }
  0x1d   :  { %606 = vmatpush3.bf16.msra.mxu1 %v648_v27  ;;  %579 = vmatprep.subr.bf16.mxu0 %v649_v28 }
  0x1e   :  { %607 = vmatprep.subr.bf16.mxu1 %v650_v29 }
  0x20   :  { %580 = vmatpush3.bf16.msra.mxu0 %v651_v30 }
  0x21   :  { %608 = vmatpush3.bf16.msra.mxu1 %v652_v31 }
  0x23   :  { %352 = vmatmul.mubr.bf16.vlgmr.msra.gmra.mrb[0].mxu0 %v653_v32 }
  0x24   :  { %401 = vmatmul.mubr.bf16.vlgmr.msra.gmra.mrb[0].mxu1 %v656_v34  ;;  %359 = vmatprep.mubr.bf16.mxu0 %v659_v36 }
  0x25   :  { %408 = vmatprep.mubr.bf16.mxu1 %v661_v37 }
  0x2b   :  { %360 = vmatmul.mubr.bf16.gmra.mrb[4].mxu0 %v663_v38 }
  0x2c   :  { %409 = vmatmul.mubr.bf16.gmra.mrb[4].mxu1 %v664_v39 }
  0xf6   :  { %v581_v40 = vpop.f32.mrb[0].mxu0 }
  0xf7   :  { %v609_v41 = vpop.f32.mrb[0].mxu1  ;;  %v582_v42 = vpop.f32.mrb[1].mxu0 }
  0xf8   :  { %v583_v43 = vadd.f32 %v582_v42, %v581_v40  ;;  %v610_v44 = vpop.f32.mrb[1].mxu1  ;;  %v584_v45 = vpop.f32.mrb[2].mxu0  ;;  %v555_v42 = vld [vmem:[%s835_s2] ss:$0 sm:$0xff] }
  0xf9   :  { %v611_v46 = vadd.f32 %v610_v44, %v609_v41  ;;  %v612_v47 = vpop.f32.mrb[2].mxu1  ;;  %v585_v48 = vpop.f32.mrb[3].mxu0 }
  0xfa   :  { %v586_v49 = vadd.f32 %v585_v48, %v584_v45  ;;  %v613_v50 = vpop.f32.mrb[3].mxu1 }
  0xfb   :  { %v403_v51 = vadd.f32 %v611_v46, %v583_v43  ;;  %v614_v52 = vadd.f32 %v613_v50, %v612_v47  ;;  %v556_v47 = vld [vmem:[%s835_s2 + $0x1] ss:$0 sm:$0xff] }
  0xfd   :  { %v406_v53 = vadd.f32 %v614_v52, %v586_v49  ;;  %v418_v55 = vsel %vm417_vm0, %v403_v51, 0.0 }
  0xfe   :  { %v587_v54 = vpop.f32.mrb[4].mxu0 }
  0xff   :  { %v419_v56 = vsel %vm417_vm0, %v406_v53, 0.0  ;;  %v615_v57 = vpop.f32.mrb[4].mxu1  ;;  %v588_v58 = vpop.f32.mrb[5].mxu0 }
 0x100   :  { %v420_v59 = vadd.f32 %v419_v56, %v418_v55  ;;  %v589_v60 = vadd.f32 %v588_v58, %v587_v54  ;;  %v616_v61 = vpop.f32.mrb[5].mxu1  ;;  %v590_v62 = vpop.f32.mrb[6].mxu0 }
 0x101   :  { %v617_v63 = vadd.f32 %v616_v61, %v615_v57  ;;  %v618_v0 = vpop.f32.mrb[6].mxu1  ;;  %v591_v1 = vpop.f32.mrb[7].mxu0 }
 0x102   :  { %v592_v2 = vadd.f32 %v591_v1, %v590_v62  ;;  %v619_v3 = vpop.f32.mrb[7].mxu1 }
 0x103   :  { %v411_v4 = vadd.f32 %v617_v63, %v589_v60  ;;  %v620_v5 = vadd.f32 %v619_v3, %v618_v0 }
 0x105   :  { %v421_v6 = vsel %vm417_vm0, %v411_v4, 0.0  ;;  %v414_v7 = vadd.f32 %v620_v5, %v592_v2 }
 0x106   :  { %v422_v8 = vadd.f32 %v421_v6, %v420_v59 }
 0x107   :  { %v423_v9 = vsel %vm417_vm0, %v414_v7, 0.0 }
 0x108   :  { %v424_v10 = vadd.f32 %v423_v9, %v422_v8 }
 0x10a   :  { %v425_v11 = vrot.slane %v424_v10, 4 }
 0x10c   :  { %v426_v12 = vadd.f32 %v425_v11, %v424_v10 }
 0x10e   :  { %v427_v13 = vrot.slane %v426_v12, 2 }
 0x110   :  { %v428_v14 = vadd.f32 %v427_v13, %v426_v12 }
 0x112   :  { %v429_v15 = vrot.slane %v428_v14, 1 }
 0x114   :  { %v430_v16 = vadd.f32 %v429_v15, %v428_v14 }
 0x116   :  { %v431_v17 = vmul.f32 0.03125, %v430_v16 }
 0x118   :  { %v432_v18 = vsub.f32 %v403_v51, %v431_v17  ;;  %v433_v19 = vsub.f32 %v406_v53, %v431_v17  ;;  %v434_v20 = vsub.f32 %v411_v4, %v431_v17  ;;  %v435_v21 = vsub.f32 %v414_v7, %v431_v17 }
 0x11a   :  { %v436_v22 = vmul.f32 %v432_v18, %v432_v18  ;;  %v437_v23 = vmul.f32 %v433_v19, %v433_v19  ;;  %v438_v24 = vmul.f32 %v434_v20, %v434_v20  ;;  %v439_v25 = vmul.f32 %v435_v21, %v435_v21 }
 0x11c   :  { %v440_v26 = vsel %vm417_vm0, %v436_v22, 0.0  ;;  %v441_v27 = vsel %vm417_vm0, %v437_v23, 0.0  ;;  %v443_v29 = vsel %vm417_vm0, %v438_v24, 0.0  ;;  %v445_v31 = vsel %vm417_vm0, %v439_v25, 0.0 }
 0x11d   :  { %v442_v28 = vadd.f32 %v441_v27, %v440_v26 }
 0x11f   :  { %v444_v30 = vadd.f32 %v443_v29, %v442_v28 }
 0x121   :  { %v446_v32 = vadd.f32 %v445_v31, %v444_v30 }
 0x123   :  { %v447_v33 = vrot.slane %v446_v32, 4 }
 0x125   :  { %v448_v34 = vadd.f32 %v447_v33, %v446_v32 }
 0x127   :  { %v449_v35 = vrot.slane %v448_v34, 2 }
 0x129   :  { %v450_v36 = vadd.f32 %v449_v35, %v448_v34 }
 0x12b   :  { %v451_v37 = vrot.slane %v450_v36, 1 }
 0x12d   :  { %v452_v38 = vadd.f32 %v451_v37, %v450_v36 }
 0x12f   :  { %v453_v39 = vmul.f32 0.03125, %v452_v38 }
 0x131   :  { %v454_v40 = vadd.f32 1e-05, %v453_v39 }
 0x133   :  { %665 = vrsqrt.f32 %v454_v40 }
 0x13d   :  { %v666_v41 = vpop.eup %665 }
 0x13e   :  { %v456_v43 = vmul.f32 %v666_v41, %v432_v18  ;;  %v457_v44 = vmul.f32 %v666_v41, %v433_v19  ;;  %v458_v45 = vmul.f32 %v666_v41, %v434_v20  ;;  %v459_v46 = vmul.f32 %v666_v41, %v435_v21 }
 0x140   :  { %v465_v48 = vmul.f32 %v555_v42, %v456_v43  ;;  %v466_v49 = vmul.f32 %v555_v42, %v457_v44  ;;  %v467_v50 = vmul.f32 %v555_v42, %v458_v45  ;;  %v468_v51 = vmul.f32 %v555_v42, %v459_v46 }
 0x142   :  { %v474_v52 = vadd.f32 %v556_v47, %v465_v48  ;;  %v475_v53 = vadd.f32 %v556_v47, %v466_v49  ;;  %v476_v54 = vadd.f32 %v556_v47, %v467_v50  ;;  %v477_v55 = vadd.f32 %v556_v47, %v468_v51 }
 0x144   :  { %vm478_vm1 = vcmp.ge.f32.partialorder %v474_v52, 0.0  ;;  %vm479_vm2 = vcmp.ge.f32.partialorder %v475_v53, 0.0  ;;  %vm480_vm3 = vcmp.ge.f32.partialorder %v476_v54, 0.0  ;;  %vm481_vm4 = vcmp.ge.f32.partialorder %v477_v55, 0.0 }
 0x145   :  { %v482_v56 = vmul.f32 0.2, %v474_v52  ;;  %v483_v57 = vmul.f32 0.2, %v475_v53  ;;  %v484_v58 = vmul.f32 0.2, %v476_v54 }
 0x146   :  { %v485_v59 = vmul.f32 0.2, %v477_v55 }
 0x147   :  { %v486_v60 = vsel %vm478_vm1, %v474_v52, %v482_v56  ;;  %v487_v61 = vsel %vm479_vm2, %v475_v53, %v483_v57  ;;  %v488_v62 = vsel %vm480_vm3, %v476_v54, %v484_v58 }
 0x148   :  { %v489_v63 = vsel %vm481_vm4, %v477_v55, %v485_v59  ;;  %v561_v0 = vpack.c.bf16 %v486_v60, %v486_v60  ;;  %v562_v1 = vpack.c.bf16 %v487_v61, %v487_v61  ;;  %v563_v2 = vpack.c.bf16 %v488_v62, %v488_v62 }
 0x149   :  { %v564_v3 = vpack.c.bf16 %v489_v63, %v489_v63 }
 0x14a   :  { %507 = vst.msk [vmem:[%s836_s3] sm:$0xf] %vm506_vm5, %v561_v0  ;;  %508 = vst.msk [vmem:[%s836_s3 + $0x4] sm:$0xf] %vm506_vm5, %v562_v1 }
 0x14b   :  { %509 = vst.msk [vmem:[%s836_s3 + $0x8] sm:$0xf] %vm506_vm5, %v563_v2  ;;  %510 = vst.msk [vmem:[%s836_s3 + $0xc] sm:$0xf] %vm506_vm5, %v564_v3 }

// kernel: _lambda_.9
= control target key start
LH: loop header
LB: loop body
LE: loop exit
PB: predicated region body
PF: predicated region fallthrough
CT: control target
= control target key end

     0   :  { %v1235_v22 = vmov 1966171168   ;;  %v160_v24 = vlaneseq  ;;  %vm1237_vm0 = vmmov 0   ;;  %vm790_vm1 = vcmask 523264   ;;  %s1520_s1 = inlined_call_operand.vmem [shape: bf16[1024,64], index: 1, kind: input, shape index: {}]   ;;  %s1521_s0 = inlined_call_operand.vmem [shape: bf16[2,1024], index: 0, kind: input, shape index: {}]   ;;  %s1522_s2 = inlined_call_operand.vmem [shape: bf16[64,64], index: 2, kind: input, shape index: {}]   ;;  %s1523_s4 = inlined_call_operand.vmem [shape: f32[4,64], index: 4, kind: input, shape index: {}]   ;;  %s1524_s3 = inlined_call_operand.vmem [shape: bf16[64,64], index: 3, kind: input, shape index: {}]   ;;  %s1525_s5 = inlined_call_operand.vmem [shape: f32[2,64], index: 5, kind: output, shape index: {}]  }
   0x1   :  { %v1160_v0 = vld [vmem:[%s1520_s1 + $0x40] sm:$0xff]   ;;  %v1164_v4 = vld [vmem:[%s1520_s1 + $0x48] sm:$0xff]   ;;  %v1168_v8 = vld [vmem:[%s1520_s1 + $0x50] sm:$0xff]   ;;  %v158_v23 = vunpack.c.l.s4 %v1235_v22  ;;  %vm834_vm2 = vcmask 517120  }
   0x2   :  { %v1161_v1 = vld [vmem:[%s1520_s1 + $0xc0] sm:$0xff]   ;;  %1035 = vmatprep.subr.bf16.mxu0 %v1160_v0  ;;  %v1165_v5 = vld [vmem:[%s1520_s1 + $0xc8] sm:$0xff]   ;;  %v1169_v9 = vld [vmem:[%s1520_s1 + $0xd0] sm:$0xff]   ;;  %v161_v30 = vshrl.u32 %v160_v24, 7 }
   0x3   :  { %v1162_v2 = vld [vmem:[%s1520_s1] sm:$0xff]   ;;  %1057 = vmatprep.subr.bf16.mxu1 %v1161_v1  ;;  %v1166_v6 = vld [vmem:[%s1520_s1 + $0x8] sm:$0xff]   ;;  %v1170_v10 = vld [vmem:[%s1520_s1 + $0x10] sm:$0xff]   ;;  %v159_v29 = vunpack.c.0.s8 %v158_v23 }
   0x4   :  { %v1163_v3 = vld [vmem:[%s1520_s1 + $0x80] sm:$0xff]   ;;  %1036 = vmatpush3.bf16.msra.mxu0 %v1162_v2  ;;  %v1167_v7 = vld [vmem:[%s1520_s1 + $0x88] sm:$0xff]   ;;  %v1171_v11 = vld [vmem:[%s1520_s1 + $0x90] sm:$0xff]  }
   0x5   :  { %1058 = vmatpush3.bf16.msra.mxu1 %v1163_v3  ;;  %1037 = vmatprep.subr.bf16.mxu0 %v1164_v4  ;;  %v1172_v12 = vld [vmem:[%s1520_s1 + $0x58] sm:$0xff]   ;;  %v1176_v16 = vld [vmem:[%s1520_s1 + $0x60] sm:$0xff]   ;;  %v1180_v20 = vld [vmem:[%s1520_s1 + $0x68] sm:$0xff]   ;;  %v1358_v35 = vsub.s32 %v159_v29, %v161_v30 }
   0x6   :  { %1059 = vmatprep.subr.bf16.mxu1 %v1165_v5  ;;  %v1173_v13 = vld [vmem:[%s1520_s1 + $0xd8] sm:$0xff]   ;;  %v1177_v17 = vld [vmem:[%s1520_s1 + $0xe0] sm:$0xff]   ;;  %v1181_v21 = vld [vmem:[%s1520_s1 + $0xe8] sm:$0xff]  }
   0x7   :  { %v1174_v14 = vld [vmem:[%s1520_s1 + $0x18] sm:$0xff]   ;;  %v1178_v18 = vld [vmem:[%s1520_s1 + $0x20] sm:$0xff]   ;;  %v1182_v25 = vld [vmem:[%s1520_s1 + $0x28] sm:$0xff]  }
   0x8   :  { %1038 = vmatpush3.bf16.msra.mxu0 %v1166_v6  ;;  %v1175_v15 = vld [vmem:[%s1520_s1 + $0x98] sm:$0xff]   ;;  %v1179_v19 = vld [vmem:[%s1520_s1 + $0xa0] sm:$0xff]   ;;  %v1183_v26 = vld [vmem:[%s1520_s1 + $0xa8] sm:$0xff]  }
   0x9   :  { %1060 = vmatpush3.bf16.msra.mxu1 %v1167_v7  ;;  %1039 = vmatprep.subr.bf16.mxu0 %v1168_v8  ;;  %v1184_v27 = vld [vmem:[%s1520_s1 + $0x70] sm:$0xff]   ;;  %v1188_v33 = vld [vmem:[%s1520_s1 + $0x78] sm:$0xff]   ;;  %v21_v38 = vld [vmem:[%s1521_s0] sm:$0xff] }
   0xa   :  { %1061 = vmatprep.subr.bf16.mxu1 %v1169_v9  ;;  %v1185_v28 = vld [vmem:[%s1520_s1 + $0xf0] sm:$0xff]   ;;  %v1189_v34 = vld [vmem:[%s1520_s1 + $0xf8] sm:$0xff]   ;;  %v156_v39 = vcombine.high %v21_v38, %v21_v38  ;;  %v163_v40 = vrot.slane %v21_v38, %v1358_v35  ;;  %v1193_v41 = vld [vmem:[%s1520_s1 + $0x140] sm:$0xff]  }
   0xb   :  { %v1186_v31 = vld [vmem:[%s1520_s1 + $0x30] sm:$0xff]   ;;  %v1190_v36 = vld [vmem:[%s1520_s1 + $0x38] sm:$0xff]   ;;  %v1194_v42 = vld [vmem:[%s1520_s1 + $0x1c0] sm:$0xff]  }
   0xc   :  { %1040 = vmatpush3.bf16.msra.mxu0 %v1170_v10  ;;  %v1187_v32 = vld [vmem:[%s1520_s1 + $0xb0] sm:$0xff]   ;;  %v1191_v37 = vld [vmem:[%s1520_s1 + $0xb8] sm:$0xff]   ;;  %v171_v43 = vcombine.high %v163_v40, %v163_v40  ;;  %v179_v44 = vrot.slane %v163_v40, %v1358_v35  ;;  %v1378_v45 = vrot.slane %v156_v39, %v1358_v35  ;;  %v1195_v47 = vld [vmem:[%s1520_s1 + $0x100] sm:$0xff]  }
   0xd   :  { %1062 = vmatpush3.bf16.msra.mxu1 %v1171_v11  ;;  %1041 = vmatprep.subr.bf16.mxu0 %v1172_v12  ;;  %v1197_v50 = vld [vmem:[%s1520_s1 + $0x148] sm:$0xff]   ;;  %v1196_v52 = vld [vmem:[%s1520_s1 + $0x180] sm:$0xff]   ;;  %v1201_v57 = vld [vmem:[%s1520_s1 + $0x150] sm:$0xff]  }
   0xe   :  { %1063 = vmatprep.subr.bf16.mxu1 %v1173_v13  ;;  %v193_v46 = vrot.slane %v171_v43, %v1358_v35  ;;  %v172_v48 = vcombine.high %v1378_v45, %v1378_v45  ;;  %v201_v49 = vcombine.high %v179_v44, %v179_v44  ;;  %v1198_v54 = vld [vmem:[%s1520_s1 + $0x1c8] sm:$0xff]   ;;  %v1202_v59 = vld [vmem:[%s1520_s1 + $0x1d0] sm:$0xff]   ;;  %v1205_v61 = vld [vmem:[%s1520_s1 + $0x158] sm:$0xff]  }
   0xf   :  { %v1199_v55 = vld [vmem:[%s1520_s1 + $0x108] sm:$0xff]   ;;  %v1203_v60 = vld [vmem:[%s1520_s1 + $0x110] sm:$0xff]   ;;  %v1206_v63 = vld [vmem:[%s1520_s1 + $0x1d8] sm:$0xff]  }
  0x10   :  { %1042 = vmatpush3.bf16.msra.mxu0 %v1174_v14  ;;  %629 = vmatprep.mubr.bf16.mxu0 %v193_v46  ;;  %v203_v51 = vcombine.high %v193_v46, %v193_v46  ;;  %v200_v53 = vrot.slane %v172_v48, %v1358_v35  ;;  %v1200_v58 = vld [vmem:[%s1520_s1 + $0x188] sm:$0xff]   ;;  %v1204_v62 = vld [vmem:[%s1520_s1 + $0x190] sm:$0xff]   ;;  %v1207_v0 = vld [vmem:[%s1520_s1 + $0x118] sm:$0xff]  }
  0x11   :  { %1064 = vmatpush3.bf16.msra.mxu1 %v1175_v15  ;;  %1043 = vmatprep.subr.bf16.mxu0 %v1176_v16  ;;  %v1209_v1 = vld [vmem:[%s1520_s1 + $0x160] sm:$0xff]   ;;  %v1208_v2 = vld [vmem:[%s1520_s1 + $0x198] sm:$0xff]   ;;  %v1213_v5 = vld [vmem:[%s1520_s1 + $0x168] sm:$0xff]  }
  0x12   :  { %1065 = vmatprep.subr.bf16.mxu1 %v1177_v17  ;;  %669 = vmatprep.mubr.bf16.mxu1 %v203_v51  ;;  %v204_v56 = vcombine.high %v200_v53, %v200_v53  ;;  %v1210_v3 = vld [vmem:[%s1520_s1 + $0x1e0] sm:$0xff]   ;;  %v1214_v7 = vld [vmem:[%s1520_s1 + $0x1e8] sm:$0xff]   ;;  %v1217_v9 = vld [vmem:[%s1520_s1 + $0x170] sm:$0xff]   ;;  %v186_v17 = vrot.slane %v1378_v45, %v1358_v35 }
  0x13   :  { %v1211_v4 = vld [vmem:[%s1520_s1 + $0x120] sm:$0xff]   ;;  %v1215_v8 = vld [vmem:[%s1520_s1 + $0x128] sm:$0xff]   ;;  %v1218_v11 = vld [vmem:[%s1520_s1 + $0x1f0] sm:$0xff]  }
  0x14   :  { %1044 = vmatpush3.bf16.msra.mxu0 %v1178_v18  ;;  %v1212_v6 = vld [vmem:[%s1520_s1 + $0x1a0] sm:$0xff]   ;;  %v1216_v10 = vld [vmem:[%s1520_s1 + $0x1a8] sm:$0xff]   ;;  %v1219_v12 = vld [vmem:[%s1520_s1 + $0x130] sm:$0xff]  }
  0x15   :  { %1066 = vmatpush3.bf16.msra.mxu1 %v1179_v19  ;;  %1045 = vmatprep.subr.bf16.mxu0 %v1180_v20  ;;  %v1221_v13 = vld [vmem:[%s1520_s1 + $0x178] sm:$0xff]   ;;  %v1220_v14 = vld [vmem:[%s1520_s1 + $0x1b0] sm:$0xff]   ;;  %v202_v19 = vcombine.high %v186_v17, %v186_v17  ;;  %v1236_v20 = vmov 0.0   ;;  %v1226_v22 = vld [vmem:[%s1522_s2 + $0x8] sm:$0xff]  }
  0x16   :  { %1067 = vmatprep.subr.bf16.mxu1 %v1181_v21  ;;  %v1222_v15 = vld [vmem:[%s1520_s1 + $0x1f8] sm:$0xff]   ;;  %v1225_v21 = vld [vmem:[%s1522_s2] sm:$0xff]   ;;  %v1227_v23 = vld [vmem:[%s1522_s2 + $0x10] sm:$0xff]  }
  0x17   :  { %v1223_v16 = vld [vmem:[%s1520_s1 + $0x138] sm:$0xff]   ;;  %v1229_v51 = vld [vmem:[%s1524_s3] sm:$0xff]  }
  0x18   :  { %1046 = vmatpush3.bf16.msra.mxu0 %v1182_v25  ;;  %v1224_v18 = vld [vmem:[%s1520_s1 + $0x1b8] sm:$0xff]  }
  0x19   :  { %1068 = vmatpush3.bf16.msra.mxu1 %v1183_v26  ;;  %1047 = vmatprep.subr.bf16.mxu0 %v1184_v27  ;;  %v1228_v24 = vld [vmem:[%s1522_s2 + $0x18] sm:$0xff]   ;;  %v957_v26 = vld [vmem:[%s1523_s4] ss:$0 sm:$0xff] }
  0x1a   :  { %1069 = vmatprep.subr.bf16.mxu1 %v1185_v28 }
  0x1c   :  { %1048 = vmatpush3.bf16.msra.mxu0 %v1186_v31 }
  0x1d   :  { %1070 = vmatpush3.bf16.msra.mxu1 %v1187_v32  ;;  %1049 = vmatprep.subr.bf16.mxu0 %v1188_v33 }
  0x1e   :  { %1071 = vmatprep.subr.bf16.mxu1 %v1189_v34 }
  0x20   :  { %1050 = vmatpush3.bf16.msra.mxu0 %v1190_v36 }
  0x21   :  { %1072 = vmatpush3.bf16.msra.mxu1 %v1191_v37  ;;  %1079 = vmatprep.subr.bf16.mxu0 %v1193_v41 }
  0x22   :  { %1101 = vmatprep.subr.bf16.mxu1 %v1194_v42 }
  0x23   :  { %630 = vmatmul.mubr.bf16.vlgmr.msra.gmra.mrb[0].mxu0 %v179_v44 }
  0x24   :  { %1080 = vmatpush3.bf16.msra.mxu0 %v1195_v47  ;;  %670 = vmatmul.mubr.bf16.vlgmr.msra.gmra.mrb[0].mxu1 %v201_v49 }
  0x25   :  { %1081 = vmatprep.subr.bf16.mxu0 %v1197_v50  ;;  %1102 = vmatpush3.bf16.msra.mxu1 %v1196_v52  ;;  %v1230_v52 = vld [vmem:[%s1524_s3 + $0x8] sm:$0xff]  }
  0x26   :  { %709 = vmatprep.mubr.bf16.mxu0 %v200_v53  ;;  %1103 = vmatprep.subr.bf16.mxu1 %v1198_v54  ;;  %v1231_v53 = vld [vmem:[%s1524_s3 + $0x10] sm:$0xff]   ;;  %v1232_v54 = vld [vmem:[%s1524_s3 + $0x18] sm:$0xff]  }
  0x27   :  { %749 = vmatprep.mubr.bf16.mxu1 %v204_v56 }
  0x28   :  { %1082 = vmatpush3.bf16.msra.mxu0 %v1199_v55 }
  0x29   :  { %1083 = vmatprep.subr.bf16.mxu0 %v1201_v57  ;;  %1104 = vmatpush3.bf16.msra.mxu1 %v1200_v58 }
  0x2a   :  { %1105 = vmatprep.subr.bf16.mxu1 %v1202_v59 }
  0x2c   :  { %1084 = vmatpush3.bf16.msra.mxu0 %v1203_v60 }
  0x2d   :  { %1085 = vmatprep.subr.bf16.mxu0 %v1205_v61  ;;  %1106 = vmatpush3.bf16.msra.mxu1 %v1204_v62 }
  0x2e   :  { %1107 = vmatprep.subr.bf16.mxu1 %v1206_v63 }
  0x30   :  { %1086 = vmatpush3.bf16.msra.mxu0 %v1207_v0 }
  0x31   :  { %1087 = vmatprep.subr.bf16.mxu0 %v1209_v1  ;;  %1108 = vmatpush3.bf16.msra.mxu1 %v1208_v2 }
  0x32   :  { %1109 = vmatprep.subr.bf16.mxu1 %v1210_v3 }
  0x34   :  { %1088 = vmatpush3.bf16.msra.mxu0 %v1211_v4 }
  0x35   :  { %1089 = vmatprep.subr.bf16.mxu0 %v1213_v5  ;;  %1110 = vmatpush3.bf16.msra.mxu1 %v1212_v6 }
  0x36   :  { %1111 = vmatprep.subr.bf16.mxu1 %v1214_v7 }
  0x38   :  { %1090 = vmatpush3.bf16.msra.mxu0 %v1215_v8 }
  0x39   :  { %1091 = vmatprep.subr.bf16.mxu0 %v1217_v9  ;;  %1112 = vmatpush3.bf16.msra.mxu1 %v1216_v10 }
  0x3a   :  { %1113 = vmatprep.subr.bf16.mxu1 %v1218_v11 }
  0x3c   :  { %1092 = vmatpush3.bf16.msra.mxu0 %v1219_v12 }
  0x3d   :  { %1093 = vmatprep.subr.bf16.mxu0 %v1221_v13  ;;  %1114 = vmatpush3.bf16.msra.mxu1 %v1220_v14 }
  0x3e   :  { %1115 = vmatprep.subr.bf16.mxu1 %v1222_v15  ;;  %v1027_v15 = vld [vmem:[%s1523_s4 + $0x1] ss:$0 sm:$0xff] }
  0x40   :  { %1094 = vmatpush3.bf16.msra.mxu0 %v1223_v16 }
  0x41   :  { %1116 = vmatpush3.bf16.msra.mxu1 %v1224_v18  ;;  %1133 = vmatprep.subr.bf16.mxu0 %v1236_v20 }
  0x42   :  { %1145 = vmatprep.subr.bf16.mxu1 %v1236_v20 }
  0x43   :  { %710 = vmatmul.mubr.bf16.vlgmr.msra.gmra.mrb[4].mxu0 %v186_v17  ;;  %v1028_v17 = vld [vmem:[%s1523_s4 + $0x2] ss:$0 sm:$0xff] }
  0x44   :  { %750 = vmatmul.mubr.bf16.vlgmr.msra.gmra.mrb[4].mxu1 %v202_v19  ;;  %1134 = vmatpush3.bf16.msra.mxu0 %v1225_v21 }
  0x45   :  { %1135 = vmatprep.subr.bf16.mxu0 %v1236_v20  ;;  %1141 = vmatprep.mubr.msk.bf16.mxu0 %vm1237_vm0, %v1236_v20 }
  0x46   :  { %1153 = vmatprep.mubr.msk.bf16.mxu1 %vm1237_vm0, %v1236_v20  ;;  %1146 = vmatpush3.bf16.msra.mxu1 %v1229_v51 }
  0x47   :  { %1147 = vmatprep.subr.bf16.mxu1 %v1236_v20 }
  0x48   :  { %1136 = vmatpush3.bf16.msra.mxu0 %v1226_v22 }
  0x49   :  { %1137 = vmatprep.subr.bf16.mxu0 %v1236_v20 }
  0x4a   :  { %1148 = vmatpush3.bf16.msra.mxu1 %v1230_v52 }
  0x4b   :  { %1149 = vmatprep.subr.bf16.mxu1 %v1236_v20 }
  0x4c   :  { %1138 = vmatpush3.bf16.msra.mxu0 %v1227_v23  ;;  %v1029_v23 = vld [vmem:[%s1523_s4 + $0x3] ss:$0 sm:$0xff] }
  0x4d   :  { %1139 = vmatprep.subr.bf16.mxu0 %v1236_v20 }
  0x4e   :  { %1150 = vmatpush3.bf16.msra.mxu1 %v1231_v53 }
  0x4f   :  { %1151 = vmatprep.subr.bf16.mxu1 %v1236_v20 }
  0x50   :  { %1140 = vmatpush3.bf16.msra.mxu0 %v1228_v24 }
  0x52   :  { %1152 = vmatpush3.bf16.msra.mxu1 %v1232_v54 }
  0xf6   :  { %v1051_v25 = vpop.f32.mrb[0].mxu0 }
  0xf7   :  { %v1052_v27 = vpop.f32.mrb[1].mxu0  ;;  %v1073_v28 = vpop.f32.mrb[0].mxu1 }
  0xf8   :  { %v1053_v29 = vadd.f32 %v1052_v27, %v1051_v25  ;;  %v1054_v30 = vpop.f32.mrb[2].mxu0  ;;  %v1074_v31 = vpop.f32.mrb[1].mxu1 }
  0xf9   :  { %v1055_v32 = vpop.f32.mrb[3].mxu0  ;;  %v1075_v34 = vadd.f32 %v1074_v31, %v1073_v28  ;;  %v1076_v35 = vpop.f32.mrb[2].mxu1 }
  0xfa   :  { %v632_v33 = vadd.f32 %v1053_v29, %v957_v26  ;;  %v1077_v36 = vpop.f32.mrb[3].mxu1 }
  0xfc   :  { %v672_v37 = vadd.f32 %v1075_v34, %v632_v33 }
 0x116   :  { %v1095_v38 = vpop.f32.mrb[4].mxu0 }
 0x117   :  { %v1096_v39 = vpop.f32.mrb[5].mxu0  ;;  %v1117_v40 = vpop.f32.mrb[4].mxu1 }
 0x118   :  { %v1097_v41 = vadd.f32 %v1096_v39, %v1095_v38  ;;  %v1098_v42 = vpop.f32.mrb[6].mxu0  ;;  %v1118_v43 = vpop.f32.mrb[5].mxu1 }
 0x119   :  { %v1099_v44 = vpop.f32.mrb[7].mxu0  ;;  %v1119_v46 = vadd.f32 %v1118_v43, %v1117_v40  ;;  %v1120_v47 = vpop.f32.mrb[6].mxu1 }
 0x11a   :  { %v712_v45 = vadd.f32 %v1097_v41, %v672_v37  ;;  %v1121_v48 = vpop.f32.mrb[7].mxu1 }
 0x11c   :  { %v752_v49 = vadd.f32 %v1119_v46, %v712_v45 }
 0x11e   :  { %v757_v50 = vpack.c.bf16 %v752_v49, %v752_v49 }
 0x120   :  { %1142 = vmatmul.mubr.msk.bf16.vlgmr.msra.gmra.mrb[8].mxu0 %vm790_vm1, %v757_v50 }
 0x1f3   :  { %v828_v55 = vpop.f32.mrb[8].mxu0 }
 0x1f4   :  { %v835_v56 = vsel %vm834_vm2, %v828_v55, 0.0  ;;  %v1143_v57 = vpop.f32.mrb[9].mxu0 }
 0x1f5   :  { %v836_v58 = vrot.slane %v835_v56, 4  ;;  %v831_v59 = vpop.f32.mrb[10].mxu0 }
 0x1f6   :  { %v1144_v60 = vpop.f32.mrb[11].mxu0 }
 0x1f7   :  { %v837_v61 = vadd.f32 %v836_v58, %v835_v56 }
 0x1f9   :  { %v838_v62 = vrot.slane %v837_v61, 2 }
 0x1fb   :  { %v839_v63 = vadd.f32 %v838_v62, %v837_v61 }
 0x1fd   :  { %v840_v0 = vrot.slane %v839_v63, 1 }
 0x1ff   :  { %v841_v1 = vadd.f32 %v840_v0, %v839_v63 }
 0x201   :  { %v842_v2 = vmul.f32 0.5, %v841_v1 }
 0x203   :  { %v843_v3 = vsub.f32 %v828_v55, %v842_v2 }
 0x205   :  { %v844_v4 = vmul.f32 %v843_v3, %v843_v3 }
 0x207   :  { %v845_v5 = vsel %vm834_vm2, %v844_v4, 0.0 }
 0x208   :  { %v846_v6 = vrot.slane %v845_v5, 4 }
 0x20a   :  { %v847_v7 = vadd.f32 %v846_v6, %v845_v5 }
 0x20c   :  { %v848_v8 = vrot.slane %v847_v7, 2 }
 0x20e   :  { %v849_v9 = vadd.f32 %v848_v8, %v847_v7 }
 0x210   :  { %v850_v10 = vrot.slane %v849_v9, 1 }
 0x212   :  { %v851_v11 = vadd.f32 %v850_v10, %v849_v9 }
 0x214   :  { %v852_v12 = vmul.f32 0.5, %v851_v11 }
 0x216   :  { %v853_v13 = vadd.f32 1e-05, %v852_v12 }
 0x218   :  { %1233 = vrsqrt.f32 %v853_v13 }
 0x222   :  { %v1234_v14 = vpop.eup %1233 }
 0x223   :  { %v855_v16 = vmul.f32 %v1234_v14, %v843_v3 }
 0x225   :  { %v861_v18 = vmul.f32 %v1027_v15, %v855_v16 }
 0x227   :  { %v867_v19 = vadd.f32 %v1028_v17, %v861_v18 }
 0x229   :  { %vm868_vm3 = vcmp.ge.f32.partialorder %v867_v19, 0.0  ;;  %v869_v20 = vmul.f32 0.01, %v867_v19 }
 0x22b   :  { %v870_v21 = vsel %vm868_vm3, %v867_v19, %v869_v20 }
 0x22c   :  { %v871_v22 = vpack.c.bf16 %v870_v21, %v870_v21 }
 0x22e   :  { %1154 = vmatmul.mubr.msk.bf16.vlgmr.msra.gmra.mrb[8].mxu1 %vm790_vm1, %v871_v22 }
 0x301   :  { %v946_v24 = vpop.f32.mrb[8].mxu1 }
 0x302   :  { %v947_v25 = vadd.f32 %v1029_v23, %v946_v24  ;;  %v1155_v26 = vpop.f32.mrb[9].mxu1 }
 0x303   :  { %v949_v27 = vpop.f32.mrb[10].mxu1 }
 0x304   :  { %952 = vst.msk [vmem:[%s1525_s5] sm:$0x3] %vm834_vm2, %v947_v25  ;;  %v1156_v28 = vpop.f32.mrb[11].mxu1 }

</bundles_post_ra>
